<compile_context>
chip_gen: v5e
topology: v5e:2x2
jax: 0.10.0
libtpu: 0.0.40
codegen_flags: <defaults>
</compile_context>

<pallas_src>
import math
import numpy as np
import jax
import jax.numpy as jnp
from jax.experimental import pallas as pl
from jax.experimental.pallas import tpu as pltpu


_VMEM = pl.BlockSpec(memory_space=pltpu.MemorySpace.VMEM)
_VMEM_LIMIT = 32 * 1024 * 1024   # comfortably inside v5e/v6e (128 MiB) and v7x (64 MiB)


# ----------------- kernel 1: conv1+conv2+conv3 + both avg-pools ----------------

def _conv_pool_kernel(x_ref, w2_ref, b2_ref, w3_ref, b3_ref, pt_ref,
                      xseq_ref, pool_ref, h2_ref):
    # x_ref   : (1, D, W, H, Cin)   one batch element, layout (D, W, H, Cin)
    # w2_ref  : (3, 3, Cin, C)      conv2 weights with conv1 folded in
    # b2_ref  : (1, C)              conv2 bias with conv1 folded in
    # w3_ref  : (3, 3, C, C)        conv3 weights
    # b3_ref  : (1, C)
    # pt_ref  : (D3, W, OT, H3)     [P1 | P2] pooling matrix, pre-permuted
    # xseq_ref: (1, D3, W, H3, C)   conv3 output (re-flattened to (L, C) in JAX)
    # pool_ref: (1, OT, C)          downsample1 ++ downsample2 outputs
    # h2_ref  : (D2, W, H2, C)      VMEM scratch holding the conv2 output
    _, D, W, H, Cin = x_ref.shape
    C = w3_ref.shape[3]
    D2, H2 = D - 2, H - 2
    D3, H3 = D - 4, H - 4
    OT = pool_ref.shape[1]

    # conv2 (with conv1 folded in).  The contraction depth is only Cin (=1), so
    # the taps are VPU broadcast multiply-adds instead of wasted K=1 MXU passes.
    acc2 = jnp.zeros((D2, W, H2, C), jnp.float32)
    for kd in range(3):
        for kh in range(3):
            for ci in range(Cin):
                win = x_ref[0, kd:kd + D2, :, kh:kh + H2, ci:ci + 1]   # (D2,W,H2,1)
                acc2 = acc2 + win * w2_ref[kd, kh, ci:ci + 1, :]        # * (1, C)
    h2_ref[...] = acc2 + b2_ref[...]

    # conv3 + both adaptive avg-pools, one (d, w) column at a time: every tap is
    # a clean 2-D (H3, C) @ (C, C) accumulating MXU dot; intermediates stay in
    # VMEM (no im2col, no HBM round-trips, no in-kernel relayouting reshapes).
    pooled = jnp.zeros((OT, C), jnp.float32)
    for d in range(D3):
        for w in range(W):
            acc3 = jnp.zeros((H3, C), jnp.float32)
            for kd in range(3):
                for kh in range(3):
                    acc3 = acc3 + jnp.dot(
                        h2_ref[d + kd, w, kh:kh + H3, :], w3_ref[kd, kh],
                        preferred_element_type=jnp.float32)
            col = acc3 + b3_ref[...]                                    # (H3, C)
            xseq_ref[0, d, w, :, :] = col
            pooled = pooled + jnp.dot(pt_ref[d, w, :, :], col,
                                      preferred_element_type=jnp.float32)
    pool_ref[0, :, :] = pooled


# --------------- kernel 2: three LSTMs + time-mean + MLP head ------------------

def _make_lstm_head_kernel(t2, t3):
    """Fused lstm1/lstm2/lstm3 (with mean over time) + (x+y+z)/3 -> Linear -> Sigmoid."""

    def kernel(xs_ref, ps_ref, wih_ref, whh_ref, b_ref, wm_ref, bm_ref,
               out_ref, xp_ref):
        # xs_ref : (T1, Np, C)    conv3 sequence, time-major, batch padded to 8k
        # ps_ref : (T2+T3, Np, C) pooled sequences, time-major
        # wih_ref: (3, 4, C, H)   per-LSTM, per-gate input weights (order i,f,g,o)
        # whh_ref: (3, 4, H, H)   per-LSTM, per-gate hidden weights
        # b_ref  : (3, 4, 1, H)   combined b_ih + b_hh, per gate
        # wm_ref : (H, 1)  bm_ref: (1, 1)   final Linear(32, 1)
        # out_ref: (Np, 1)
        # xp_ref : (4, Tmax, Np, H) scratch for the hoisted input projections
        t1, n_pad, c_in = xs_ref.shape
        h_dim = whh_ref.shape[3]

        def run_lstm(l_idx, seq_ref, t0, t_len):
            # Hoisted input projection: one (T*Np, C) @ (C, H) matmul per gate,
            # computed once, off the serial recurrence critical path.
            x2d = seq_ref[t0:t0 + t_len, :, :].reshape(t_len * n_pad, c_in)
            for k in range(4):
                xp_ref[k, 0:t_len, :, :] = (
                    jnp.dot(x2d, wih_ref[l_idx, k],
                            preferred_element_type=jnp.float32)
                    + b_ref[l_idx, k]
                ).reshape(t_len, n_pad, h_dim)

            whh = [whh_ref[l_idx, k] for k in range(4)]   # (H, H) each: i, f, g, o

            def step(t, carry):
                h, c, acc = carry

                def gate(k):
                    xk = xp_ref[k, pl.ds(t, 1), :, :].reshape(n_pad, h_dim)
                    return xk + jnp.dot(h, whh[k],
                                        preferred_element_type=jnp.float32)

                i = jax.nn.sigmoid(gate(0))
                f = jax.nn.sigmoid(gate(1))
                g = jnp.tanh(gate(2))
                o = jax.nn.sigmoid(gate(3))
                c_new = f * c + i * g
                h_new = o * jnp.tanh(c_new)
                return h_new, c_new, acc + h_new

            z = jnp.zeros((n_pad, h_dim), jnp.float32)
            _, _, acc = jax.lax.fori_loop(0, t_len, step, (z, z, z))
            return acc * (1.0 / t_len)       # mean over time == _transfer_mean

        mx = run_lstm(0, xs_ref, 0, t1)
        my = run_lstm(1, ps_ref, 0, t2)
        mz = run_lstm(2, ps_ref, t2, t3)

        m = (mx + my + mz) * (1.0 / 3.0)
        out_ref[...] = jax.nn.sigmoid(
            jnp.dot(m, wm_ref[...], preferred_element_type=jnp.float32)
            + bm_ref[...])

    return kernel


# ------------------------------- glue helpers ----------------------------------

def adaptive_pool_matrix(length, out_size):
    """P (length, out) s.t. pooling over the last dim == x @ P (AdaptiveAvgPool1d)."""
    p = np.zeros((length, out_size), dtype=np.float32)
    for i in range(out_size):
        start = (i * length) // out_size
        end = math.ceil((i + 1) * length / out_size)
        p[start:end, i] = 1.0 / (end - start)
    return p


def init_params(seed=42, in_channels=1, out_channels=32):
    keys = jax.random.split(jax.random.PRNGKey(seed), 24)
    ki = iter(range(24))

    def u(k, shape, fan):
        bound = 1.0 / math.sqrt(fan)
        return jax.random.uniform(k, shape, jnp.float32, -bound, bound)

    C = out_channels
    p = {}
    p["w1"] = u(keys[next(ki)], (C, in_channels, 1, 1, 1), in_channels)
    p["b1"] = u(keys[next(ki)], (C,), in_channels)
    p["w2"] = u(keys[next(ki)], (C, C, 3, 3, 1), C * 9)
    p["b2"] = u(keys[next(ki)], (C,), C * 9)
    p["w3"] = u(keys[next(ki)], (C, C, 3, 3, 1), C * 9)
    p["b3"] = u(keys[next(ki)], (C,), C * 9)
    for name in ("lstm1", "lstm2", "lstm3"):
        p[name] = {
            "w_ih": u(keys[next(ki)], (4 * C, C), C),
            "w_hh": u(keys[next(ki)], (4 * C, C), C),
            "b_ih": u(keys[next(ki)], (4 * C,), C),
            "b_hh": u(keys[next(ki)], (4 * C,), C),
        }
    p["wm"] = u(keys[next(ki)], (1, C), C)
    p["bm"] = u(keys[next(ki)], (1,), C)
    return p


# ---------------------------------- forward ------------------------------------

def sfl_net_forward(params, x_ncdhw, init_numlayers=50):
    """x_ncdhw: (N, Cin, D, H, W) float32 -> (N,) float32 (SFL_Net.forward)."""
    C = params["b1"].shape[0]
    N, Cin, D, H, W = x_ncdhw.shape
    D3, H3 = D - 4, H - 4
    L = D3 * H3 * W
    out1, out2 = init_numlayers // 2, init_numlayers // 4
    OT = out1 + out2

    # kernel-friendly layout (N, D, W, H, Cin); essentially free for Cin == 1.
    x = jnp.transpose(x_ncdhw, (0, 2, 4, 3, 1))

    # Fold conv1 (1x1x1, no nonlinearity in between) into conv2 at trace time.
    w1m = params["w1"].reshape(C, Cin)                              # (C, Cin)
    w2k = params["w2"][..., 0]                                      # (C, C, 3, 3)
    w2eff = jnp.einsum("ocdh,ci->dhio", w2k, w1m)                   # (3, 3, Cin, C)
    b2eff = params["b2"] + jnp.einsum("ocdh,c->o", w2k, params["b1"])
    w3m = jnp.transpose(params["w3"][..., 0], (2, 3, 1, 0))         # (3, 3, C, C)

    # Both AdaptiveAvgPool1d's as one matrix, pre-permuted to (D3, W, OT, H3)
    # so pooling inside the kernel is clean 2-D dots with no activation transposes.
    p_np = np.concatenate([adaptive_pool_matrix(L, out1),
                           adaptive_pool_matrix(L, out2)], axis=1)  # (L, OT)
    pt4 = jnp.asarray(p_np.reshape(D3, H3, W, OT).transpose(0, 2, 3, 1))

    xs5, pooled = pl.pallas_call(
        _conv_pool_kernel,
        grid=(N,),
        out_shape=(jax.ShapeDtypeStruct((N, D3, W, H3, C), jnp.float32),
                   jax.ShapeDtypeStruct((N, OT, C), jnp.float32)),
        in_specs=[
            pl.BlockSpec((1, D, W, H, Cin), lambda n: (n, 0, 0, 0, 0)),
            pl.BlockSpec((3, 3, Cin, C), lambda n: (0, 0, 0, 0)),
            pl.BlockSpec((1, C), lambda n: (0, 0)),
            pl.BlockSpec((3, 3, C, C), lambda n: (0, 0, 0, 0)),
            pl.BlockSpec((1, C), lambda n: (0, 0)),
            pl.BlockSpec((D3, W, OT, H3), lambda n: (0, 0, 0, 0)),
        ],
        out_specs=(
            pl.BlockSpec((1, D3, W, H3, C), lambda n: (n, 0, 0, 0, 0)),
            pl.BlockSpec((1, OT, C), lambda n: (n, 0, 0)),
        ),
        scratch_shapes=[pltpu.VMEM((D - 2, W, H - 2, C), jnp.float32)],
        compiler_params=pltpu.CompilerParams(
            dimension_semantics=("parallel",),       # megacore / v7x: 2 TCs
            vmem_limit_bytes=_VMEM_LIMIT),
    )(x, w2eff, b2eff.reshape(1, C), w3m, params["b3"].reshape(1, C), pt4)

    # Time-major sequences for the fused LSTM kernel; pad batch to a multiple of
    # 8 (sublane tile) so the in-kernel reshapes are layout-preserving.
    n_pad = ((N + 7) // 8) * 8
    xs_t = jnp.transpose(xs5, (1, 3, 2, 0, 4)).reshape(L, N, C)      # (L, N, C)
    ps_t = jnp.transpose(pooled, (1, 0, 2))                          # (OT, N, C)
    if n_pad != N:
        pad = ((0, 0), (0, n_pad - N), (0, 0))
        xs_t = jnp.pad(xs_t, pad)
        ps_t = jnp.pad(ps_t, pad)

    # Pack the three LSTMs gate-major (PyTorch gate order i, f, g, o).
    # hidden == input == C for this module.
    def pack(lp):
        wih = jnp.transpose(lp["w_ih"].reshape(4, C, C), (0, 2, 1))   # (4, C, H)
        whh = jnp.transpose(lp["w_hh"].reshape(4, C, C), (0, 2, 1))   # (4, H, H)
        b = (lp["b_ih"] + lp["b_hh"]).reshape(4, 1, C)
        return wih, whh, b

    packed = [pack(params[k]) for k in ("lstm1", "lstm2", "lstm3")]
    wih_all = jnp.stack([p[0] for p in packed])                       # (3, 4, C, H)
    whh_all = jnp.stack([p[1] for p in packed])                       # (3, 4, H, H)
    b_all = jnp.stack([p[2] for p in packed])                         # (3, 4, 1, H)

    t_max = max(L, out1, out2)
    out = pl.pallas_call(
        _make_lstm_head_kernel(out1, out2),
        out_shape=jax.ShapeDtypeStruct((n_pad, 1), jnp.float32),
        in_specs=[_VMEM] * 7,
        out_specs=_VMEM,
        scratch_shapes=[pltpu.VMEM((4, t_max, n_pad, C), jnp.float32)],
        compiler_params=pltpu.CompilerParams(vmem_limit_bytes=_VMEM_LIMIT),
    )(xs_t, ps_t, wih_all, whh_all, b_all,
      params["wm"].T, params["bm"].reshape(1, 1))

    return out[:N, 0]


# ------------------------------------ main --------------------------------------

if __name__ == "__main__":
    # Small shapes consistent with the module: NCDHW input, 1 input channel.
    N, Cin, D, H, W = 2, 1, 8, 8, 2
    x = jax.random.normal(jax.random.PRNGKey(0), (N, Cin, D, H, W), jnp.float32)
    params = init_params(seed=42, in_channels=Cin, out_channels=32)

    fwd = jax.jit(lambda p, v: sfl_net_forward(p, v, init_numlayers=50))
    out = jax.block_until_ready(fwd(params, x))

    assert out.shape == (N,)
    assert bool(jnp.all(jnp.isfinite(out)))
    assert bool(jnp.all((out > 0.0) & (out < 1.0)))   # sigmoid output range
    print("KERNEL_OK")
</pallas_src>

<mosaic_0001>
module attributes {stable_mosaic.version = 11 : i64} {
  func.func @_conv_pool_kernel(%arg0: i32, %arg1: memref<1x8x2x8x1xf32, #tpu.memory_space<vmem>>, %arg2: memref<3x3x1x32xf32, #tpu.memory_space<vmem>>, %arg3: memref<1x32xf32, #tpu.memory_space<vmem>>, %arg4: memref<3x3x32x32xf32, #tpu.memory_space<vmem>>, %arg5: memref<1x32xf32, #tpu.memory_space<vmem>>, %arg6: memref<4x2x37x4xf32, #tpu.memory_space<vmem>>, %arg7: memref<1x4x2x4x32xf32, #tpu.memory_space<vmem>>, %arg8: memref<1x37x32xf32, #tpu.memory_space<vmem>>, %arg9: memref<6x2x6x32xf32, #tpu.memory_space<vmem>>) attributes {dimension_semantics = [#tpu.dimension_semantics<parallel>], iteration_bounds = array<i64: 2>, scalar_prefetch = 0 : i64, scratch_operands = 1 : i64, tpu.core_type = #tpu.core_type<tc>, window_params = [{transform_indices = @transform_0, window_bounds = array<i64: 1, 8, 2, 8, 1>}, {pipeline_mode = #tpu.pipeline_mode<synchronous>, transform_indices = @transform_1, window_bounds = array<i64: 3, 3, 1, 32>}, {pipeline_mode = #tpu.pipeline_mode<synchronous>, transform_indices = @transform_2, window_bounds = array<i64: 1, 32>}, {pipeline_mode = #tpu.pipeline_mode<synchronous>, transform_indices = @transform_3, window_bounds = array<i64: 3, 3, 32, 32>}, {pipeline_mode = #tpu.pipeline_mode<synchronous>, transform_indices = @transform_4, window_bounds = array<i64: 1, 32>}, {pipeline_mode = #tpu.pipeline_mode<synchronous>, transform_indices = @transform_5, window_bounds = array<i64: 4, 2, 37, 4>}, {transform_indices = @transform_6, window_bounds = array<i64: 1, 4, 2, 4, 32>}, {transform_indices = @transform_7, window_bounds = array<i64: 1, 37, 32>}]} {
    %cst = arith.constant 0.000000e+00 : f32
    %0 = vector.broadcast %cst : f32 to vector<6x2x6x32xf32>
    %c0 = arith.constant 0 : index
    %c0_0 = arith.constant 0 : index
    %c0_1 = arith.constant 0 : index
    %c0_2 = arith.constant 0 : index
    %c0_3 = arith.constant 0 : index
    %1 = vector.load %arg1[%c0, %c0_0, %c0_1, %c0_2, %c0_3] : memref<1x8x2x8x1xf32, #tpu.memory_space<vmem>>, vector<1x6x2x6x1xf32>
    %2 = vector.shape_cast %1 : vector<1x6x2x6x1xf32> to vector<6x2x6x1xf32>
    %c0_4 = arith.constant 0 : index
    %c0_5 = arith.constant 0 : index
    %c0_6 = arith.constant 0 : index
    %c0_7 = arith.constant 0 : index
    %3 = vector.load %arg2[%c0_4, %c0_5, %c0_6, %c0_7] : memref<3x3x1x32xf32, #tpu.memory_space<vmem>>, vector<1x1x1x32xf32>
    %4 = vector.shape_cast %3 : vector<1x1x1x32xf32> to vector<1x32xf32>
    %5 = vector.shape_cast %4 : vector<1x32xf32> to vector<1x1x1x32xf32>
    %6 = vector.broadcast %2 : vector<6x2x6x1xf32> to vector<6x2x6x32xf32>
    %7 = vector.broadcast %5 : vector<1x1x1x32xf32> to vector<6x2x6x32xf32>
    %8 = arith.mulf %6, %7 : vector<6x2x6x32xf32>
    %9 = arith.addf %0, %8 : vector<6x2x6x32xf32>
    %c0_8 = arith.constant 0 : index
    %c0_9 = arith.constant 0 : index
    %c0_10 = arith.constant 0 : index
    %c1 = arith.constant 1 : index
    %c0_11 = arith.constant 0 : index
    %10 = vector.load %arg1[%c0_8, %c0_9, %c0_10, %c1, %c0_11] : memref<1x8x2x8x1xf32, #tpu.memory_space<vmem>>, vector<1x6x2x6x1xf32>
    %11 = vector.shape_cast %10 : vector<1x6x2x6x1xf32> to vector<6x2x6x1xf32>
    %c0_12 = arith.constant 0 : index
    %c1_13 = arith.constant 1 : index
    %c0_14 = arith.constant 0 : index
    %c0_15 = arith.constant 0 : index
    %12 = vector.load %arg2[%c0_12, %c1_13, %c0_14, %c0_15] : memref<3x3x1x32xf32, #tpu.memory_space<vmem>>, vector<1x1x1x32xf32>
    %13 = vector.shape_cast %12 : vector<1x1x1x32xf32> to vector<1x32xf32>
    %14 = vector.shape_cast %13 : vector<1x32xf32> to vector<1x1x1x32xf32>
    %15 = vector.broadcast %11 : vector<6x2x6x1xf32> to vector<6x2x6x32xf32>
    %16 = vector.broadcast %14 : vector<1x1x1x32xf32> to vector<6x2x6x32xf32>
    %17 = arith.mulf %15, %16 : vector<6x2x6x32xf32>
    %18 = arith.addf %9, %17 : vector<6x2x6x32xf32>
    %c0_16 = arith.constant 0 : index
    %c0_17 = arith.constant 0 : index
    %c0_18 = arith.constant 0 : index
    %c2 = arith.constant 2 : index
    %c0_19 = arith.constant 0 : index
    %19 = vector.load %arg1[%c0_16, %c0_17, %c0_18, %c2, %c0_19] : memref<1x8x2x8x1xf32, #tpu.memory_space<vmem>>, vector<1x6x2x6x1xf32>
    %20 = vector.shape_cast %19 : vector<1x6x2x6x1xf32> to vector<6x2x6x1xf32>
    %c0_20 = arith.constant 0 : index
    %c2_21 = arith.constant 2 : index
    %c0_22 = arith.constant 0 : index
    %c0_23 = arith.constant 0 : index
    %21 = vector.load %arg2[%c0_20, %c2_21, %c0_22, %c0_23] : memref<3x3x1x32xf32, #tpu.memory_space<vmem>>, vector<1x1x1x32xf32>
    %22 = vector.shape_cast %21 : vector<1x1x1x32xf32> to vector<1x32xf32>
    %23 = vector.shape_cast %22 : vector<1x32xf32> to vector<1x1x1x32xf32>
    %24 = vector.broadcast %20 : vector<6x2x6x1xf32> to vector<6x2x6x32xf32>
    %25 = vector.broadcast %23 : vector<1x1x1x32xf32> to vector<6x2x6x32xf32>
    %26 = arith.mulf %24, %25 : vector<6x2x6x32xf32>
    %27 = arith.addf %18, %26 : vector<6x2x6x32xf32>
    %c0_24 = arith.constant 0 : index
    %c1_25 = arith.constant 1 : index
    %c0_26 = arith.constant 0 : index
    %c0_27 = arith.constant 0 : index
    %c0_28 = arith.constant 0 : index
    %28 = vector.load %arg1[%c0_24, %c1_25, %c0_26, %c0_27, %c0_28] : memref<1x8x2x8x1xf32, #tpu.memory_space<vmem>>, vector<1x6x2x6x1xf32>
    %29 = vector.shape_cast %28 : vector<1x6x2x6x1xf32> to vector<6x2x6x1xf32>
    %c1_29 = arith.constant 1 : index
    %c0_30 = arith.constant 0 : index
    %c0_31 = arith.constant 0 : index
    %c0_32 = arith.constant 0 : index
    %30 = vector.load %arg2[%c1_29, %c0_30, %c0_31, %c0_32] : memref<3x3x1x32xf32, #tpu.memory_space<vmem>>, vector<1x1x1x32xf32>
    %31 = vector.shape_cast %30 : vector<1x1x1x32xf32> to vector<1x32xf32>
    %32 = vector.shape_cast %31 : vector<1x32xf32> to vector<1x1x1x32xf32>
    %33 = vector.broadcast %29 : vector<6x2x6x1xf32> to vector<6x2x6x32xf32>
    %34 = vector.broadcast %32 : vector<1x1x1x32xf32> to vector<6x2x6x32xf32>
    %35 = arith.mulf %33, %34 : vector<6x2x6x32xf32>
    %36 = arith.addf %27, %35 : vector<6x2x6x32xf32>
    %c0_33 = arith.constant 0 : index
    %c1_34 = arith.constant 1 : index
    %c0_35 = arith.constant 0 : index
    %c1_36 = arith.constant 1 : index
    %c0_37 = arith.constant 0 : index
    %37 = vector.load %arg1[%c0_33, %c1_34, %c0_35, %c1_36, %c0_37] : memref<1x8x2x8x1xf32, #tpu.memory_space<vmem>>, vector<1x6x2x6x1xf32>
    %38 = vector.shape_cast %37 : vector<1x6x2x6x1xf32> to vector<6x2x6x1xf32>
    %c1_38 = arith.constant 1 : index
    %c1_39 = arith.constant 1 : index
    %c0_40 = arith.constant 0 : index
    %c0_41 = arith.constant 0 : index
    %39 = vector.load %arg2[%c1_38, %c1_39, %c0_40, %c0_41] : memref<3x3x1x32xf32, #tpu.memory_space<vmem>>, vector<1x1x1x32xf32>
    %40 = vector.shape_cast %39 : vector<1x1x1x32xf32> to vector<1x32xf32>
    %41 = vector.shape_cast %40 : vector<1x32xf32> to vector<1x1x1x32xf32>
    %42 = vector.broadcast %38 : vector<6x2x6x1xf32> to vector<6x2x6x32xf32>
    %43 = vector.broadcast %41 : vector<1x1x1x32xf32> to vector<6x2x6x32xf32>
    %44 = arith.mulf %42, %43 : vector<6x2x6x32xf32>
    %45 = arith.addf %36, %44 : vector<6x2x6x32xf32>
    %c0_42 = arith.constant 0 : index
    %c1_43 = arith.constant 1 : index
    %c0_44 = arith.constant 0 : index
    %c2_45 = arith.constant 2 : index
    %c0_46 = arith.constant 0 : index
    %46 = vector.load %arg1[%c0_42, %c1_43, %c0_44, %c2_45, %c0_46] : memref<1x8x2x8x1xf32, #tpu.memory_space<vmem>>, vector<1x6x2x6x1xf32>
    %47 = vector.shape_cast %46 : vector<1x6x2x6x1xf32> to vector<6x2x6x1xf32>
    %c1_47 = arith.constant 1 : index
    %c2_48 = arith.constant 2 : index
    %c0_49 = arith.constant 0 : index
    %c0_50 = arith.constant 0 : index
    %48 = vector.load %arg2[%c1_47, %c2_48, %c0_49, %c0_50] : memref<3x3x1x32xf32, #tpu.memory_space<vmem>>, vector<1x1x1x32xf32>
    %49 = vector.shape_cast %48 : vector<1x1x1x32xf32> to vector<1x32xf32>
    %50 = vector.shape_cast %49 : vector<1x32xf32> to vector<1x1x1x32xf32>
    %51 = vector.broadcast %47 : vector<6x2x6x1xf32> to vector<6x2x6x32xf32>
    %52 = vector.broadcast %50 : vector<1x1x1x32xf32> to vector<6x2x6x32xf32>
    %53 = arith.mulf %51, %52 : vector<6x2x6x32xf32>
    %54 = arith.addf %45, %53 : vector<6x2x6x32xf32>
    %c0_51 = arith.constant 0 : index
    %c2_52 = arith.constant 2 : index
    %c0_53 = arith.constant 0 : index
    %c0_54 = arith.constant 0 : index
    %c0_55 = arith.constant 0 : index
    %55 = vector.load %arg1[%c0_51, %c2_52, %c0_53, %c0_54, %c0_55] : memref<1x8x2x8x1xf32, #tpu.memory_space<vmem>>, vector<1x6x2x6x1xf32>
    %56 = vector.shape_cast %55 : vector<1x6x2x6x1xf32> to vector<6x2x6x1xf32>
    %c2_56 = arith.constant 2 : index
    %c0_57 = arith.constant 0 : index
    %c0_58 = arith.constant 0 : index
    %c0_59 = arith.constant 0 : index
    %57 = vector.load %arg2[%c2_56, %c0_57, %c0_58, %c0_59] : memref<3x3x1x32xf32, #tpu.memory_space<vmem>>, vector<1x1x1x32xf32>
    %58 = vector.shape_cast %57 : vector<1x1x1x32xf32> to vector<1x32xf32>
    %59 = vector.shape_cast %58 : vector<1x32xf32> to vector<1x1x1x32xf32>
    %60 = vector.broadcast %56 : vector<6x2x6x1xf32> to vector<6x2x6x32xf32>
    %61 = vector.broadcast %59 : vector<1x1x1x32xf32> to vector<6x2x6x32xf32>
    %62 = arith.mulf %60, %61 : vector<6x2x6x32xf32>
    %63 = arith.addf %54, %62 : vector<6x2x6x32xf32>
    %c0_60 = arith.constant 0 : index
    %c2_61 = arith.constant 2 : index
    %c0_62 = arith.constant 0 : index
    %c1_63 = arith.constant 1 : index
    %c0_64 = arith.constant 0 : index
    %64 = vector.load %arg1[%c0_60, %c2_61, %c0_62, %c1_63, %c0_64] : memref<1x8x2x8x1xf32, #tpu.memory_space<vmem>>, vector<1x6x2x6x1xf32>
    %65 = vector.shape_cast %64 : vector<1x6x2x6x1xf32> to vector<6x2x6x1xf32>
    %c2_65 = arith.constant 2 : index
    %c1_66 = arith.constant 1 : index
    %c0_67 = arith.constant 0 : index
    %c0_68 = arith.constant 0 : index
    %66 = vector.load %arg2[%c2_65, %c1_66, %c0_67, %c0_68] : memref<3x3x1x32xf32, #tpu.memory_space<vmem>>, vector<1x1x1x32xf32>
    %67 = vector.shape_cast %66 : vector<1x1x1x32xf32> to vector<1x32xf32>
    %68 = vector.shape_cast %67 : vector<1x32xf32> to vector<1x1x1x32xf32>
    %69 = vector.broadcast %65 : vector<6x2x6x1xf32> to vector<6x2x6x32xf32>
    %70 = vector.broadcast %68 : vector<1x1x1x32xf32> to vector<6x2x6x32xf32>
    %71 = arith.mulf %69, %70 : vector<6x2x6x32xf32>
    %72 = arith.addf %63, %71 : vector<6x2x6x32xf32>
    %c0_69 = arith.constant 0 : index
    %c2_70 = arith.constant 2 : index
    %c0_71 = arith.constant 0 : index
    %c2_72 = arith.constant 2 : index
    %c0_73 = arith.constant 0 : index
    %73 = vector.load %arg1[%c0_69, %c2_70, %c0_71, %c2_72, %c0_73] : memref<1x8x2x8x1xf32, #tpu.memory_space<vmem>>, vector<1x6x2x6x1xf32>
    %74 = vector.shape_cast %73 : vector<1x6x2x6x1xf32> to vector<6x2x6x1xf32>
    %c2_74 = arith.constant 2 : index
    %c2_75 = arith.constant 2 : index
    %c0_76 = arith.constant 0 : index
    %c0_77 = arith.constant 0 : index
    %75 = vector.load %arg2[%c2_74, %c2_75, %c0_76, %c0_77] : memref<3x3x1x32xf32, #tpu.memory_space<vmem>>, vector<1x1x1x32xf32>
    %76 = vector.shape_cast %75 : vector<1x1x1x32xf32> to vector<1x32xf32>
    %77 = vector.shape_cast %76 : vector<1x32xf32> to vector<1x1x1x32xf32>
    %78 = vector.broadcast %74 : vector<6x2x6x1xf32> to vector<6x2x6x32xf32>
    %79 = vector.broadcast %77 : vector<1x1x1x32xf32> to vector<6x2x6x32xf32>
    %80 = arith.mulf %78, %79 : vector<6x2x6x32xf32>
    %81 = arith.addf %72, %80 : vector<6x2x6x32xf32>
    %c0_78 = arith.constant 0 : index
    %c0_79 = arith.constant 0 : index
    %82 = vector.load %arg3[%c0_78, %c0_79] : memref<1x32xf32, #tpu.memory_space<vmem>>, vector<1x32xf32>
    %83 = vector.shape_cast %82 : vector<1x32xf32> to vector<1x1x1x32xf32>
    %84 = vector.broadcast %83 : vector<1x1x1x32xf32> to vector<6x2x6x32xf32>
    %85 = arith.addf %81, %84 : vector<6x2x6x32xf32>
    %c0_80 = arith.constant 0 : index
    %c0_81 = arith.constant 0 : index
    %c0_82 = arith.constant 0 : index
    %c0_83 = arith.constant 0 : index
    %86 = vector.load %arg9[%c0_80, %c0_81, %c0_82, %c0_83] : memref<6x2x6x32xf32, #tpu.memory_space<vmem>>, vector<6x2x6x32xf32>
    tpu.vector_store %arg9[%c0_80, %c0_81, %c0_82, %c0_83], %85 {strides = array<i32>} : memref<6x2x6x32xf32, #tpu.memory_space<vmem>>, vector<6x2x6x32xf32>,
    %cst_84 = arith.constant 0.000000e+00 : f32
    %87 = vector.broadcast %cst_84 : f32 to vector<37x32xf32>
    %cst_85 = arith.constant 0.000000e+00 : f32
    %88 = vector.broadcast %cst_85 : f32 to vector<4x32xf32>
    %c0_86 = arith.constant 0 : index
    %c0_87 = arith.constant 0 : index
    %c0_88 = arith.constant 0 : index
    %c0_89 = arith.constant 0 : index
    %89 = vector.load %arg9[%c0_86, %c0_87, %c0_88, %c0_89] : memref<6x2x6x32xf32, #tpu.memory_space<vmem>>, vector<1x1x4x32xf32>
    %90 = vector.shape_cast %89 : vector<1x1x4x32xf32> to vector<4x32xf32>
    %c0_90 = arith.constant 0 : index
    %c0_91 = arith.constant 0 : index
    %c0_92 = arith.constant 0 : index
    %c0_93 = arith.constant 0 : index
    %91 = vector.load %arg4[%c0_90, %c0_91, %c0_92, %c0_93] : memref<3x3x32x32xf32, #tpu.memory_space<vmem>>, vector<1x1x32x32xf32>
    %92 = vector.shape_cast %91 : vector<1x1x32x32xf32> to vector<32x32xf32>
    %cst_94 = arith.constant dense<0.000000e+00> : vector<4x32xf32>
    %93 = tpu.matmul %90, %92, %cst_94 {dimension_numbers = #tpu.dot_dimension_numbers<[1], [0], [0], [1], [0, 0, 1, 1], [], []>} : vector<4x32xf32>, vector<32x32xf32>, vector<4x32xf32> -> vector<4x32xf32>
    %94 = arith.addf %88, %93 : vector<4x32xf32>
    %c0_95 = arith.constant 0 : index
    %c0_96 = arith.constant 0 : index
    %c1_97 = arith.constant 1 : index
    %c0_98 = arith.constant 0 : index
    %95 = vector.load %arg9[%c0_95, %c0_96, %c1_97, %c0_98] : memref<6x2x6x32xf32, #tpu.memory_space<vmem>>, vector<1x1x4x32xf32>
    %96 = vector.shape_cast %95 : vector<1x1x4x32xf32> to vector<4x32xf32>
    %c0_99 = arith.constant 0 : index
    %c1_100 = arith.constant 1 : index
    %c0_101 = arith.constant 0 : index
    %c0_102 = arith.constant 0 : index
    %97 = vector.load %arg4[%c0_99, %c1_100, %c0_101, %c0_102] : memref<3x3x32x32xf32, #tpu.memory_space<vmem>>, vector<1x1x32x32xf32>
    %98 = vector.shape_cast %97 : vector<1x1x32x32xf32> to vector<32x32xf32>
    %cst_103 = arith.constant dense<0.000000e+00> : vector<4x32xf32>
    %99 = tpu.matmul %96, %98, %cst_103 {dimension_numbers = #tpu.dot_dimension_numbers<[1], [0], [0], [1], [0, 0, 1, 1], [], []>} : vector<4x32xf32>, vector<32x32xf32>, vector<4x32xf32> -> vector<4x32xf32>
    %100 = arith.addf %94, %99 : vector<4x32xf32>
    %c0_104 = arith.constant 0 : index
    %c0_105 = arith.constant 0 : index
    %c2_106 = arith.constant 2 : index
    %c0_107 = arith.constant 0 : index
    %101 = vector.load %arg9[%c0_104, %c0_105, %c2_106, %c0_107] : memref<6x2x6x32xf32, #tpu.memory_space<vmem>>, vector<1x1x4x32xf32>
    %102 = vector.shape_cast %101 : vector<1x1x4x32xf32> to vector<4x32xf32>
    %c0_108 = arith.constant 0 : index
    %c2_109 = arith.constant 2 : index
    %c0_110 = arith.constant 0 : index
    %c0_111 = arith.constant 0 : index
    %103 = vector.load %arg4[%c0_108, %c2_109, %c0_110, %c0_111] : memref<3x3x32x32xf32, #tpu.memory_space<vmem>>, vector<1x1x32x32xf32>
    %104 = vector.shape_cast %103 : vector<1x1x32x32xf32> to vector<32x32xf32>
    %cst_112 = arith.constant dense<0.000000e+00> : vector<4x32xf32>
    %105 = tpu.matmul %102, %104, %cst_112 {dimension_numbers = #tpu.dot_dimension_numbers<[1], [0], [0], [1], [0, 0, 1, 1], [], []>} : vector<4x32xf32>, vector<32x32xf32>, vector<4x32xf32> -> vector<4x32xf32>
    %106 = arith.addf %100, %105 : vector<4x32xf32>
    %c1_113 = arith.constant 1 : index
    %c0_114 = arith.constant 0 : index
    %c0_115 = arith.constant 0 : index
    %c0_116 = arith.constant 0 : index
    %107 = vector.load %arg9[%c1_113, %c0_114, %c0_115, %c0_116] : memref<6x2x6x32xf32, #tpu.memory_space<vmem>>, vector<1x1x4x32xf32>
    %108 = vector.shape_cast %107 : vector<1x1x4x32xf32> to vector<4x32xf32>
    %c1_117 = arith.constant 1 : index
    %c0_118 = arith.constant 0 : index
    %c0_119 = arith.constant 0 : index
    %c0_120 = arith.constant 0 : index
    %109 = vector.load %arg4[%c1_117, %c0_118, %c0_119, %c0_120] : memref<3x3x32x32xf32, #tpu.memory_space<vmem>>, vector<1x1x32x32xf32>
    %110 = vector.shape_cast %109 : vector<1x1x32x32xf32> to vector<32x32xf32>
    %cst_121 = arith.constant dense<0.000000e+00> : vector<4x32xf32>
    %111 = tpu.matmul %108, %110, %cst_121 {dimension_numbers = #tpu.dot_dimension_numbers<[1], [0], [0], [1], [0, 0, 1, 1], [], []>} : vector<4x32xf32>, vector<32x32xf32>, vector<4x32xf32> -> vector<4x32xf32>
    %112 = arith.addf %106, %111 : vector<4x32xf32>
    %c1_122 = arith.constant 1 : index
    %c0_123 = arith.constant 0 : index
    %c1_124 = arith.constant 1 : index
    %c0_125 = arith.constant 0 : index
    %113 = vector.load %arg9[%c1_122, %c0_123, %c1_124, %c0_125] : memref<6x2x6x32xf32, #tpu.memory_space<vmem>>, vector<1x1x4x32xf32>
    %114 = vector.shape_cast %113 : vector<1x1x4x32xf32> to vector<4x32xf32>
    %c1_126 = arith.constant 1 : index
    %c1_127 = arith.constant 1 : index
    %c0_128 = arith.constant 0 : index
    %c0_129 = arith.constant 0 : index
    %115 = vector.load %arg4[%c1_126, %c1_127, %c0_128, %c0_129] : memref<3x3x32x32xf32, #tpu.memory_space<vmem>>, vector<1x1x32x32xf32>
    %116 = vector.shape_cast %115 : vector<1x1x32x32xf32> to vector<32x32xf32>
    %cst_130 = arith.constant dense<0.000000e+00> : vector<4x32xf32>
    %117 = tpu.matmul %114, %116, %cst_130 {dimension_numbers = #tpu.dot_dimension_numbers<[1], [0], [0], [1], [0, 0, 1, 1], [], []>} : vector<4x32xf32>, vector<32x32xf32>, vector<4x32xf32> -> vector<4x32xf32>
    %118 = arith.addf %112, %117 : vector<4x32xf32>
    %c1_131 = arith.constant 1 : index
    %c0_132 = arith.constant 0 : index
    %c2_133 = arith.constant 2 : index
    %c0_134 = arith.constant 0 : index
    %119 = vector.load %arg9[%c1_131, %c0_132, %c2_133, %c0_134] : memref<6x2x6x32xf32, #tpu.memory_space<vmem>>, vector<1x1x4x32xf32>
    %120 = vector.shape_cast %119 : vector<1x1x4x32xf32> to vector<4x32xf32>
    %c1_135 = arith.constant 1 : index
    %c2_136 = arith.constant 2 : index
    %c0_137 = arith.constant 0 : index
    %c0_138 = arith.constant 0 : index
    %121 = vector.load %arg4[%c1_135, %c2_136, %c0_137, %c0_138] : memref<3x3x32x32xf32, #tpu.memory_space<vmem>>, vector<1x1x32x32xf32>
    %122 = vector.shape_cast %121 : vector<1x1x32x32xf32> to vector<32x32xf32>
    %cst_139 = arith.constant dense<0.000000e+00> : vector<4x32xf32>
    %123 = tpu.matmul %120, %122, %cst_139 {dimension_numbers = #tpu.dot_dimension_numbers<[1], [0], [0], [1], [0, 0, 1, 1], [], []>} : vector<4x32xf32>, vector<32x32xf32>, vector<4x32xf32> -> vector<4x32xf32>
    %124 = arith.addf %118, %123 : vector<4x32xf32>
    %c2_140 = arith.constant 2 : index
    %c0_141 = arith.constant 0 : index
    %c0_142 = arith.constant 0 : index
    %c0_143 = arith.constant 0 : index
    %125 = vector.load %arg9[%c2_140, %c0_141, %c0_142, %c0_143] : memref<6x2x6x32xf32, #tpu.memory_space<vmem>>, vector<1x1x4x32xf32>
    %126 = vector.shape_cast %125 : vector<1x1x4x32xf32> to vector<4x32xf32>
    %c2_144 = arith.constant 2 : index
    %c0_145 = arith.constant 0 : index
    %c0_146 = arith.constant 0 : index
    %c0_147 = arith.constant 0 : index
    %127 = vector.load %arg4[%c2_144, %c0_145, %c0_146, %c0_147] : memref<3x3x32x32xf32, #tpu.memory_space<vmem>>, vector<1x1x32x32xf32>
    %128 = vector.shape_cast %127 : vector<1x1x32x32xf32> to vector<32x32xf32>
    %cst_148 = arith.constant dense<0.000000e+00> : vector<4x32xf32>
    %129 = tpu.matmul %126, %128, %cst_148 {dimension_numbers = #tpu.dot_dimension_numbers<[1], [0], [0], [1], [0, 0, 1, 1], [], []>} : vector<4x32xf32>, vector<32x32xf32>, vector<4x32xf32> -> vector<4x32xf32>
    %130 = arith.addf %124, %129 : vector<4x32xf32>
    %c2_149 = arith.constant 2 : index
    %c0_150 = arith.constant 0 : index
    %c1_151 = arith.constant 1 : index
    %c0_152 = arith.constant 0 : index
    %131 = vector.load %arg9[%c2_149, %c0_150, %c1_151, %c0_152] : memref<6x2x6x32xf32, #tpu.memory_space<vmem>>, vector<1x1x4x32xf32>
    %132 = vector.shape_cast %131 : vector<1x1x4x32xf32> to vector<4x32xf32>
    %c2_153 = arith.constant 2 : index
    %c1_154 = arith.constant 1 : index
    %c0_155 = arith.constant 0 : index
    %c0_156 = arith.constant 0 : index
    %133 = vector.load %arg4[%c2_153, %c1_154, %c0_155, %c0_156] : memref<3x3x32x32xf32, #tpu.memory_space<vmem>>, vector<1x1x32x32xf32>
    %134 = vector.shape_cast %133 : vector<1x1x32x32xf32> to vector<32x32xf32>
    %cst_157 = arith.constant dense<0.000000e+00> : vector<4x32xf32>
    %135 = tpu.matmul %132, %134, %cst_157 {dimension_numbers = #tpu.dot_dimension_numbers<[1], [0], [0], [1], [0, 0, 1, 1], [], []>} : vector<4x32xf32>, vector<32x32xf32>, vector<4x32xf32> -> vector<4x32xf32>
    %136 = arith.addf %130, %135 : vector<4x32xf32>
    %c2_158 = arith.constant 2 : index
    %c0_159 = arith.constant 0 : index
    %c2_160 = arith.constant 2 : index
    %c0_161 = arith.constant 0 : index
    %137 = vector.load %arg9[%c2_158, %c0_159, %c2_160, %c0_161] : memref<6x2x6x32xf32, #tpu.memory_space<vmem>>, vector<1x1x4x32xf32>
    %138 = vector.shape_cast %137 : vector<1x1x4x32xf32> to vector<4x32xf32>
    %c2_162 = arith.constant 2 : index
    %c2_163 = arith.constant 2 : index
    %c0_164 = arith.constant 0 : index
    %c0_165 = arith.constant 0 : index
    %139 = vector.load %arg4[%c2_162, %c2_163, %c0_164, %c0_165] : memref<3x3x32x32xf32, #tpu.memory_space<vmem>>, vector<1x1x32x32xf32>
    %140 = vector.shape_cast %139 : vector<1x1x32x32xf32> to vector<32x32xf32>
    %cst_166 = arith.constant dense<0.000000e+00> : vector<4x32xf32>
    %141 = tpu.matmul %138, %140, %cst_166 {dimension_numbers = #tpu.dot_dimension_numbers<[1], [0], [0], [1], [0, 0, 1, 1], [], []>} : vector<4x32xf32>, vector<32x32xf32>, vector<4x32xf32> -> vector<4x32xf32>
    %142 = arith.addf %136, %141 : vector<4x32xf32>
    %c0_167 = arith.constant 0 : index
    %c0_168 = arith.constant 0 : index
    %143 = vector.load %arg5[%c0_167, %c0_168] : memref<1x32xf32, #tpu.memory_space<vmem>>, vector<1x32xf32>
    %144 = vector.broadcast %143 : vector<1x32xf32> to vector<4x32xf32>
    %145 = arith.addf %142, %144 : vector<4x32xf32>
    %c0_169 = arith.constant 0 : index
    %c0_170 = arith.constant 0 : index
    %c0_171 = arith.constant 0 : index
    %c0_172 = arith.constant 0 : index
    %c0_173 = arith.constant 0 : index
    %146 = vector.load %arg7[%c0_169, %c0_170, %c0_171, %c0_172, %c0_173] : memref<1x4x2x4x32xf32, #tpu.memory_space<vmem>>, vector<1x1x1x4x32xf32>
    %147 = vector.shape_cast %146 : vector<1x1x1x4x32xf32> to vector<4x32xf32>
    %148 = vector.shape_cast %145 : vector<4x32xf32> to vector<1x1x1x4x32xf32>
    tpu.vector_store %arg7[%c0_169, %c0_170, %c0_171, %c0_172, %c0_173], %148 {strides = array<i32>} : memref<1x4x2x4x32xf32, #tpu.memory_space<vmem>>, vector<1x1x1x4x32xf32>,
    %c0_174 = arith.constant 0 : index
    %c0_175 = arith.constant 0 : index
    %c0_176 = arith.constant 0 : index
    %c0_177 = arith.constant 0 : index
    %149 = vector.load %arg6[%c0_174, %c0_175, %c0_176, %c0_177] : memref<4x2x37x4xf32, #tpu.memory_space<vmem>>, vector<1x1x37x4xf32>
    %150 = vector.shape_cast %149 : vector<1x1x37x4xf32> to vector<37x4xf32>
    %cst_178 = arith.constant dense<0.000000e+00> : vector<37x32xf32>
    %151 = tpu.matmul %150, %145, %cst_178 {dimension_numbers = #tpu.dot_dimension_numbers<[1], [0], [0], [1], [0, 0, 1, 1], [], []>} : vector<37x4xf32>, vector<4x32xf32>, vector<37x32xf32> -> vector<37x32xf32>
    %152 = arith.addf %87, %151 : vector<37x32xf32>
    %cst_179 = arith.constant 0.000000e+00 : f32
    %153 = vector.broadcast %cst_179 : f32 to vector<4x32xf32>
    %c0_180 = arith.constant 0 : index
    %c1_181 = arith.constant 1 : index
    %c0_182 = arith.constant 0 : index
    %c0_183 = arith.constant 0 : index
    %154 = vector.load %arg9[%c0_180, %c1_181, %c0_182, %c0_183] : memref<6x2x6x32xf32, #tpu.memory_space<vmem>>, vector<1x1x4x32xf32>
    %155 = vector.shape_cast %154 : vector<1x1x4x32xf32> to vector<4x32xf32>
    %c0_184 = arith.constant 0 : index
    %c0_185 = arith.constant 0 : index
    %c0_186 = arith.constant 0 : index
    %c0_187 = arith.constant 0 : index
    %156 = vector.load %arg4[%c0_184, %c0_185, %c0_186, %c0_187] : memref<3x3x32x32xf32, #tpu.memory_space<vmem>>, vector<1x1x32x32xf32>
    %157 = vector.shape_cast %156 : vector<1x1x32x32xf32> to vector<32x32xf32>
    %cst_188 = arith.constant dense<0.000000e+00> : vector<4x32xf32>
    %158 = tpu.matmul %155, %157, %cst_188 {dimension_numbers = #tpu.dot_dimension_numbers<[1], [0], [0], [1], [0, 0, 1, 1], [], []>} : vector<4x32xf32>, vector<32x32xf32>, vector<4x32xf32> -> vector<4x32xf32>
    %159 = arith.addf %153, %158 : vector<4x32xf32>
    %c0_189 = arith.constant 0 : index
    %c1_190 = arith.constant 1 : index
    %c1_191 = arith.constant 1 : index
    %c0_192 = arith.constant 0 : index
    %160 = vector.load %arg9[%c0_189, %c1_190, %c1_191, %c0_192] : memref<6x2x6x32xf32, #tpu.memory_space<vmem>>, vector<1x1x4x32xf32>
    %161 = vector.shape_cast %160 : vector<1x1x4x32xf32> to vector<4x32xf32>
    %c0_193 = arith.constant 0 : index
    %c1_194 = arith.constant 1 : index
    %c0_195 = arith.constant 0 : index
    %c0_196 = arith.constant 0 : index
    %162 = vector.load %arg4[%c0_193, %c1_194, %c0_195, %c0_196] : memref<3x3x32x32xf32, #tpu.memory_space<vmem>>, vector<1x1x32x32xf32>
    %163 = vector.shape_cast %162 : vector<1x1x32x32xf32> to vector<32x32xf32>
    %cst_197 = arith.constant dense<0.000000e+00> : vector<4x32xf32>
    %164 = tpu.matmul %161, %163, %cst_197 {dimension_numbers = #tpu.dot_dimension_numbers<[1], [0], [0], [1], [0, 0, 1, 1], [], []>} : vector<4x32xf32>, vector<32x32xf32>, vector<4x32xf32> -> vector<4x32xf32>
    %165 = arith.addf %159, %164 : vector<4x32xf32>
    %c0_198 = arith.constant 0 : index
    %c1_199 = arith.constant 1 : index
    %c2_200 = arith.constant 2 : index
    %c0_201 = arith.constant 0 : index
    %166 = vector.load %arg9[%c0_198, %c1_199, %c2_200, %c0_201] : memref<6x2x6x32xf32, #tpu.memory_space<vmem>>, vector<1x1x4x32xf32>
    %167 = vector.shape_cast %166 : vector<1x1x4x32xf32> to vector<4x32xf32>
    %c0_202 = arith.constant 0 : index
    %c2_203 = arith.constant 2 : index
    %c0_204 = arith.constant 0 : index
    %c0_205 = arith.constant 0 : index
    %168 = vector.load %arg4[%c0_202, %c2_203, %c0_204, %c0_205] : memref<3x3x32x32xf32, #tpu.memory_space<vmem>>, vector<1x1x32x32xf32>
    %169 = vector.shape_cast %168 : vector<1x1x32x32xf32> to vector<32x32xf32>
    %cst_206 = arith.constant dense<0.000000e+00> : vector<4x32xf32>
    %170 = tpu.matmul %167, %169, %cst_206 {dimension_numbers = #tpu.dot_dimension_numbers<[1], [0], [0], [1], [0, 0, 1, 1], [], []>} : vector<4x32xf32>, vector<32x32xf32>, vector<4x32xf32> -> vector<4x32xf32>
    %171 = arith.addf %165, %170 : vector<4x32xf32>
    %c1_207 = arith.constant 1 : index
    %c1_208 = arith.constant 1 : index
    %c0_209 = arith.constant 0 : index
    %c0_210 = arith.constant 0 : index
    %172 = vector.load %arg9[%c1_207, %c1_208, %c0_209, %c0_210] : memref<6x2x6x32xf32, #tpu.memory_space<vmem>>, vector<1x1x4x32xf32>
    %173 = vector.shape_cast %172 : vector<1x1x4x32xf32> to vector<4x32xf32>
    %c1_211 = arith.constant 1 : index
    %c0_212 = arith.constant 0 : index
    %c0_213 = arith.constant 0 : index
    %c0_214 = arith.constant 0 : index
    %174 = vector.load %arg4[%c1_211, %c0_212, %c0_213, %c0_214] : memref<3x3x32x32xf32, #tpu.memory_space<vmem>>, vector<1x1x32x32xf32>
    %175 = vector.shape_cast %174 : vector<1x1x32x32xf32> to vector<32x32xf32>
    %cst_215 = arith.constant dense<0.000000e+00> : vector<4x32xf32>
    %176 = tpu.matmul %173, %175, %cst_215 {dimension_numbers = #tpu.dot_dimension_numbers<[1], [0], [0], [1], [0, 0, 1, 1], [], []>} : vector<4x32xf32>, vector<32x32xf32>, vector<4x32xf32> -> vector<4x32xf32>
    %177 = arith.addf %171, %176 : vector<4x32xf32>
    %c1_216 = arith.constant 1 : index
    %c1_217 = arith.constant 1 : index
    %c1_218 = arith.constant 1 : index
    %c0_219 = arith.constant 0 : index
    %178 = vector.load %arg9[%c1_216, %c1_217, %c1_218, %c0_219] : memref<6x2x6x32xf32, #tpu.memory_space<vmem>>, vector<1x1x4x32xf32>
    %179 = vector.shape_cast %178 : vector<1x1x4x32xf32> to vector<4x32xf32>
    %c1_220 = arith.constant 1 : index
    %c1_221 = arith.constant 1 : index
    %c0_222 = arith.constant 0 : index
    %c0_223 = arith.constant 0 : index
    %180 = vector.load %arg4[%c1_220, %c1_221, %c0_222, %c0_223] : memref<3x3x32x32xf32, #tpu.memory_space<vmem>>, vector<1x1x32x32xf32>
    %181 = vector.shape_cast %180 : vector<1x1x32x32xf32> to vector<32x32xf32>
    %cst_224 = arith.constant dense<0.000000e+00> : vector<4x32xf32>
    %182 = tpu.matmul %179, %181, %cst_224 {dimension_numbers = #tpu.dot_dimension_numbers<[1], [0], [0], [1], [0, 0, 1, 1], [], []>} : vector<4x32xf32>, vector<32x32xf32>, vector<4x32xf32> -> vector<4x32xf32>
    %183 = arith.addf %177, %182 : vector<4x32xf32>
    %c1_225 = arith.constant 1 : index
    %c1_226 = arith.constant 1 : index
    %c2_227 = arith.constant 2 : index
    %c0_228 = arith.constant 0 : index
    %184 = vector.load %arg9[%c1_225, %c1_226, %c2_227, %c0_228] : memref<6x2x6x32xf32, #tpu.memory_space<vmem>>, vector<1x1x4x32xf32>
    %185 = vector.shape_cast %184 : vector<1x1x4x32xf32> to vector<4x32xf32>
    %c1_229 = arith.constant 1 : index
    %c2_230 = arith.constant 2 : index
    %c0_231 = arith.constant 0 : index
    %c0_232 = arith.constant 0 : index
    %186 = vector.load %arg4[%c1_229, %c2_230, %c0_231, %c0_232] : memref<3x3x32x32xf32, #tpu.memory_space<vmem>>, vector<1x1x32x32xf32>
    %187 = vector.shape_cast %186 : vector<1x1x32x32xf32> to vector<32x32xf32>
    %cst_233 = arith.constant dense<0.000000e+00> : vector<4x32xf32>
    %188 = tpu.matmul %185, %187, %cst_233 {dimension_numbers = #tpu.dot_dimension_numbers<[1], [0], [0], [1], [0, 0, 1, 1], [], []>} : vector<4x32xf32>, vector<32x32xf32>, vector<4x32xf32> -> vector<4x32xf32>
    %189 = arith.addf %183, %188 : vector<4x32xf32>
    %c2_234 = arith.constant 2 : index
    %c1_235 = arith.constant 1 : index
    %c0_236 = arith.constant 0 : index
    %c0_237 = arith.constant 0 : index
    %190 = vector.load %arg9[%c2_234, %c1_235, %c0_236, %c0_237] : memref<6x2x6x32xf32, #tpu.memory_space<vmem>>, vector<1x1x4x32xf32>
    %191 = vector.shape_cast %190 : vector<1x1x4x32xf32> to vector<4x32xf32>
    %c2_238 = arith.constant 2 : index
    %c0_239 = arith.constant 0 : index
    %c0_240 = arith.constant 0 : index
    %c0_241 = arith.constant 0 : index
    %192 = vector.load %arg4[%c2_238, %c0_239, %c0_240, %c0_241] : memref<3x3x32x32xf32, #tpu.memory_space<vmem>>, vector<1x1x32x32xf32>
    %193 = vector.shape_cast %192 : vector<1x1x32x32xf32> to vector<32x32xf32>
    %cst_242 = arith.constant dense<0.000000e+00> : vector<4x32xf32>
    %194 = tpu.matmul %191, %193, %cst_242 {dimension_numbers = #tpu.dot_dimension_numbers<[1], [0], [0], [1], [0, 0, 1, 1], [], []>} : vector<4x32xf32>, vector<32x32xf32>, vector<4x32xf32> -> vector<4x32xf32>
    %195 = arith.addf %189, %194 : vector<4x32xf32>
    %c2_243 = arith.constant 2 : index
    %c1_244 = arith.constant 1 : index
    %c1_245 = arith.constant 1 : index
    %c0_246 = arith.constant 0 : index
    %196 = vector.load %arg9[%c2_243, %c1_244, %c1_245, %c0_246] : memref<6x2x6x32xf32, #tpu.memory_space<vmem>>, vector<1x1x4x32xf32>
    %197 = vector.shape_cast %196 : vector<1x1x4x32xf32> to vector<4x32xf32>
    %c2_247 = arith.constant 2 : index
    %c1_248 = arith.constant 1 : index
    %c0_249 = arith.constant 0 : index
    %c0_250 = arith.constant 0 : index
    %198 = vector.load %arg4[%c2_247, %c1_248, %c0_249, %c0_250] : memref<3x3x32x32xf32, #tpu.memory_space<vmem>>, vector<1x1x32x32xf32>
    %199 = vector.shape_cast %198 : vector<1x1x32x32xf32> to vector<32x32xf32>
    %cst_251 = arith.constant dense<0.000000e+00> : vector<4x32xf32>
    %200 = tpu.matmul %197, %199, %cst_251 {dimension_numbers = #tpu.dot_dimension_numbers<[1], [0], [0], [1], [0, 0, 1, 1], [], []>} : vector<4x32xf32>, vector<32x32xf32>, vector<4x32xf32> -> vector<4x32xf32>
    %201 = arith.addf %195, %200 : vector<4x32xf32>
    %c2_252 = arith.constant 2 : index
    %c1_253 = arith.constant 1 : index
    %c2_254 = arith.constant 2 : index
    %c0_255 = arith.constant 0 : index
    %202 = vector.load %arg9[%c2_252, %c1_253, %c2_254, %c0_255] : memref<6x2x6x32xf32, #tpu.memory_space<vmem>>, vector<1x1x4x32xf32>
    %203 = vector.shape_cast %202 : vector<1x1x4x32xf32> to vector<4x32xf32>
    %c2_256 = arith.constant 2 : index
    %c2_257 = arith.constant 2 : index
    %c0_258 = arith.constant 0 : index
    %c0_259 = arith.constant 0 : index
    %204 = vector.load %arg4[%c2_256, %c2_257, %c0_258, %c0_259] : memref<3x3x32x32xf32, #tpu.memory_space<vmem>>, vector<1x1x32x32xf32>
    %205 = vector.shape_cast %204 : vector<1x1x32x32xf32> to vector<32x32xf32>
    %cst_260 = arith.constant dense<0.000000e+00> : vector<4x32xf32>
    %206 = tpu.matmul %203, %205, %cst_260 {dimension_numbers = #tpu.dot_dimension_numbers<[1], [0], [0], [1], [0, 0, 1, 1], [], []>} : vector<4x32xf32>, vector<32x32xf32>, vector<4x32xf32> -> vector<4x32xf32>
    %207 = arith.addf %201, %206 : vector<4x32xf32>
    %c0_261 = arith.constant 0 : index
    %c0_262 = arith.constant 0 : index
    %208 = vector.load %arg5[%c0_261, %c0_262] : memref<1x32xf32, #tpu.memory_space<vmem>>, vector<1x32xf32>
    %209 = vector.broadcast %208 : vector<1x32xf32> to vector<4x32xf32>
    %210 = arith.addf %207, %209 : vector<4x32xf32>
    %c0_263 = arith.constant 0 : index
    %c0_264 = arith.constant 0 : index
    %c1_265 = arith.constant 1 : index
    %c0_266 = arith.constant 0 : index
    %c0_267 = arith.constant 0 : index
    %211 = vector.load %arg7[%c0_263, %c0_264, %c1_265, %c0_266, %c0_267] : memref<1x4x2x4x32xf32, #tpu.memory_space<vmem>>, vector<1x1x1x4x32xf32>
    %212 = vector.shape_cast %211 : vector<1x1x1x4x32xf32> to vector<4x32xf32>
    %213 = vector.shape_cast %210 : vector<4x32xf32> to vector<1x1x1x4x32xf32>
    tpu.vector_store %arg7[%c0_263, %c0_264, %c1_265, %c0_266, %c0_267], %213 {strides = array<i32>} : memref<1x4x2x4x32xf32, #tpu.memory_space<vmem>>, vector<1x1x1x4x32xf32>,
    %c0_268 = arith.constant 0 : index
    %c1_269 = arith.constant 1 : index
    %c0_270 = arith.constant 0 : index
    %c0_271 = arith.constant 0 : index
    %214 = vector.load %arg6[%c0_268, %c1_269, %c0_270, %c0_271] : memref<4x2x37x4xf32, #tpu.memory_space<vmem>>, vector<1x1x37x4xf32>
    %215 = vector.shape_cast %214 : vector<1x1x37x4xf32> to vector<37x4xf32>
    %cst_272 = arith.constant dense<0.000000e+00> : vector<37x32xf32>
    %216 = tpu.matmul %215, %210, %cst_272 {dimension_numbers = #tpu.dot_dimension_numbers<[1], [0], [0], [1], [0, 0, 1, 1], [], []>} : vector<37x4xf32>, vector<4x32xf32>, vector<37x32xf32> -> vector<37x32xf32>
    %217 = arith.addf %152, %216 : vector<37x32xf32>
    %cst_273 = arith.constant 0.000000e+00 : f32
    %218 = vector.broadcast %cst_273 : f32 to vector<4x32xf32>
    %c1_274 = arith.constant 1 : index
    %c0_275 = arith.constant 0 : index
    %c0_276 = arith.constant 0 : index
    %c0_277 = arith.constant 0 : index
    %219 = vector.load %arg9[%c1_274, %c0_275, %c0_276, %c0_277] : memref<6x2x6x32xf32, #tpu.memory_space<vmem>>, vector<1x1x4x32xf32>
    %220 = vector.shape_cast %219 : vector<1x1x4x32xf32> to vector<4x32xf32>
    %c0_278 = arith.constant 0 : index
    %c0_279 = arith.constant 0 : index
    %c0_280 = arith.constant 0 : index
    %c0_281 = arith.constant 0 : index
    %221 = vector.load %arg4[%c0_278, %c0_279, %c0_280, %c0_281] : memref<3x3x32x32xf32, #tpu.memory_space<vmem>>, vector<1x1x32x32xf32>
    %222 = vector.shape_cast %221 : vector<1x1x32x32xf32> to vector<32x32xf32>
    %cst_282 = arith.constant dense<0.000000e+00> : vector<4x32xf32>
    %223 = tpu.matmul %220, %222, %cst_282 {dimension_numbers = #tpu.dot_dimension_numbers<[1], [0], [0], [1], [0, 0, 1, 1], [], []>} : vector<4x32xf32>, vector<32x32xf32>, vector<4x32xf32> -> vector<4x32xf32>
    %224 = arith.addf %218, %223 : vector<4x32xf32>
    %c1_283 = arith.constant 1 : index
    %c0_284 = arith.constant 0 : index
    %c1_285 = arith.constant 1 : index
    %c0_286 = arith.constant 0 : index
    %225 = vector.load %arg9[%c1_283, %c0_284, %c1_285, %c0_286] : memref<6x2x6x32xf32, #tpu.memory_space<vmem>>, vector<1x1x4x32xf32>
    %226 = vector.shape_cast %225 : vector<1x1x4x32xf32> to vector<4x32xf32>
    %c0_287 = arith.constant 0 : index
    %c1_288 = arith.constant 1 : index
    %c0_289 = arith.constant 0 : index
    %c0_290 = arith.constant 0 : index
    %227 = vector.load %arg4[%c0_287, %c1_288, %c0_289, %c0_290] : memref<3x3x32x32xf32, #tpu.memory_space<vmem>>, vector<1x1x32x32xf32>
    %228 = vector.shape_cast %227 : vector<1x1x32x32xf32> to vector<32x32xf32>
    %cst_291 = arith.constant dense<0.000000e+00> : vector<4x32xf32>
    %229 = tpu.matmul %226, %228, %cst_291 {dimension_numbers = #tpu.dot_dimension_numbers<[1], [0], [0], [1], [0, 0, 1, 1], [], []>} : vector<4x32xf32>, vector<32x32xf32>, vector<4x32xf32> -> vector<4x32xf32>
    %230 = arith.addf %224, %229 : vector<4x32xf32>
    %c1_292 = arith.constant 1 : index
    %c0_293 = arith.constant 0 : index
    %c2_294 = arith.constant 2 : index
    %c0_295 = arith.constant 0 : index
    %231 = vector.load %arg9[%c1_292, %c0_293, %c2_294, %c0_295] : memref<6x2x6x32xf32, #tpu.memory_space<vmem>>, vector<1x1x4x32xf32>
    %232 = vector.shape_cast %231 : vector<1x1x4x32xf32> to vector<4x32xf32>
    %c0_296 = arith.constant 0 : index
    %c2_297 = arith.constant 2 : index
    %c0_298 = arith.constant 0 : index
    %c0_299 = arith.constant 0 : index
    %233 = vector.load %arg4[%c0_296, %c2_297, %c0_298, %c0_299] : memref<3x3x32x32xf32, #tpu.memory_space<vmem>>, vector<1x1x32x32xf32>
    %234 = vector.shape_cast %233 : vector<1x1x32x32xf32> to vector<32x32xf32>
    %cst_300 = arith.constant dense<0.000000e+00> : vector<4x32xf32>
    %235 = tpu.matmul %232, %234, %cst_300 {dimension_numbers = #tpu.dot_dimension_numbers<[1], [0], [0], [1], [0, 0, 1, 1], [], []>} : vector<4x32xf32>, vector<32x32xf32>, vector<4x32xf32> -> vector<4x32xf32>
    %236 = arith.addf %230, %235 : vector<4x32xf32>
    %c2_301 = arith.constant 2 : index
    %c0_302 = arith.constant 0 : index
    %c0_303 = arith.constant 0 : index
    %c0_304 = arith.constant 0 : index
    %237 = vector.load %arg9[%c2_301, %c0_302, %c0_303, %c0_304] : memref<6x2x6x32xf32, #tpu.memory_space<vmem>>, vector<1x1x4x32xf32>
    %238 = vector.shape_cast %237 : vector<1x1x4x32xf32> to vector<4x32xf32>
    %c1_305 = arith.constant 1 : index
    %c0_306 = arith.constant 0 : index
    %c0_307 = arith.constant 0 : index
    %c0_308 = arith.constant 0 : index
    %239 = vector.load %arg4[%c1_305, %c0_306, %c0_307, %c0_308] : memref<3x3x32x32xf32, #tpu.memory_space<vmem>>, vector<1x1x32x32xf32>
    %240 = vector.shape_cast %239 : vector<1x1x32x32xf32> to vector<32x32xf32>
    %cst_309 = arith.constant dense<0.000000e+00> : vector<4x32xf32>
    %241 = tpu.matmul %238, %240, %cst_309 {dimension_numbers = #tpu.dot_dimension_numbers<[1], [0], [0], [1], [0, 0, 1, 1], [], []>} : vector<4x32xf32>, vector<32x32xf32>, vector<4x32xf32> -> vector<4x32xf32>
    %242 = arith.addf %236, %241 : vector<4x32xf32>
    %c2_310 = arith.constant 2 : index
    %c0_311 = arith.constant 0 : index
    %c1_312 = arith.constant 1 : index
    %c0_313 = arith.constant 0 : index
    %243 = vector.load %arg9[%c2_310, %c0_311, %c1_312, %c0_313] : memref<6x2x6x32xf32, #tpu.memory_space<vmem>>, vector<1x1x4x32xf32>
    %244 = vector.shape_cast %243 : vector<1x1x4x32xf32> to vector<4x32xf32>
    %c1_314 = arith.constant 1 : index
    %c1_315 = arith.constant 1 : index
    %c0_316 = arith.constant 0 : index
    %c0_317 = arith.constant 0 : index
    %245 = vector.load %arg4[%c1_314, %c1_315, %c0_316, %c0_317] : memref<3x3x32x32xf32, #tpu.memory_space<vmem>>, vector<1x1x32x32xf32>
    %246 = vector.shape_cast %245 : vector<1x1x32x32xf32> to vector<32x32xf32>
    %cst_318 = arith.constant dense<0.000000e+00> : vector<4x32xf32>
    %247 = tpu.matmul %244, %246, %cst_318 {dimension_numbers = #tpu.dot_dimension_numbers<[1], [0], [0], [1], [0, 0, 1, 1], [], []>} : vector<4x32xf32>, vector<32x32xf32>, vector<4x32xf32> -> vector<4x32xf32>
    %248 = arith.addf %242, %247 : vector<4x32xf32>
    %c2_319 = arith.constant 2 : index
    %c0_320 = arith.constant 0 : index
    %c2_321 = arith.constant 2 : index
    %c0_322 = arith.constant 0 : index
    %249 = vector.load %arg9[%c2_319, %c0_320, %c2_321, %c0_322] : memref<6x2x6x32xf32, #tpu.memory_space<vmem>>, vector<1x1x4x32xf32>
    %250 = vector.shape_cast %249 : vector<1x1x4x32xf32> to vector<4x32xf32>
    %c1_323 = arith.constant 1 : index
    %c2_324 = arith.constant 2 : index
    %c0_325 = arith.constant 0 : index
    %c0_326 = arith.constant 0 : index
    %251 = vector.load %arg4[%c1_323, %c2_324, %c0_325, %c0_326] : memref<3x3x32x32xf32, #tpu.memory_space<vmem>>, vector<1x1x32x32xf32>
    %252 = vector.shape_cast %251 : vector<1x1x32x32xf32> to vector<32x32xf32>
    %cst_327 = arith.constant dense<0.000000e+00> : vector<4x32xf32>
    %253 = tpu.matmul %250, %252, %cst_327 {dimension_numbers = #tpu.dot_dimension_numbers<[1], [0], [0], [1], [0, 0, 1, 1], [], []>} : vector<4x32xf32>, vector<32x32xf32>, vector<4x32xf32> -> vector<4x32xf32>
    %254 = arith.addf %248, %253 : vector<4x32xf32>
    %c3 = arith.constant 3 : index
    %c0_328 = arith.constant 0 : index
    %c0_329 = arith.constant 0 : index
    %c0_330 = arith.constant 0 : index
    %255 = vector.load %arg9[%c3, %c0_328, %c0_329, %c0_330] : memref<6x2x6x32xf32, #tpu.memory_space<vmem>>, vector<1x1x4x32xf32>
    %256 = vector.shape_cast %255 : vector<1x1x4x32xf32> to vector<4x32xf32>
    %c2_331 = arith.constant 2 : index
    %c0_332 = arith.constant 0 : index
    %c0_333 = arith.constant 0 : index
    %c0_334 = arith.constant 0 : index
    %257 = vector.load %arg4[%c2_331, %c0_332, %c0_333, %c0_334] : memref<3x3x32x32xf32, #tpu.memory_space<vmem>>, vector<1x1x32x32xf32>
    %258 = vector.shape_cast %257 : vector<1x1x32x32xf32> to vector<32x32xf32>
    %cst_335 = arith.constant dense<0.000000e+00> : vector<4x32xf32>
    %259 = tpu.matmul %256, %258, %cst_335 {dimension_numbers = #tpu.dot_dimension_numbers<[1], [0], [0], [1], [0, 0, 1, 1], [], []>} : vector<4x32xf32>, vector<32x32xf32>, vector<4x32xf32> -> vector<4x32xf32>
    %260 = arith.addf %254, %259 : vector<4x32xf32>
    %c3_336 = arith.constant 3 : index
    %c0_337 = arith.constant 0 : index
    %c1_338 = arith.constant 1 : index
    %c0_339 = arith.constant 0 : index
    %261 = vector.load %arg9[%c3_336, %c0_337, %c1_338, %c0_339] : memref<6x2x6x32xf32, #tpu.memory_space<vmem>>, vector<1x1x4x32xf32>
    %262 = vector.shape_cast %261 : vector<1x1x4x32xf32> to vector<4x32xf32>
    %c2_340 = arith.constant 2 : index
    %c1_341 = arith.constant 1 : index
    %c0_342 = arith.constant 0 : index
    %c0_343 = arith.constant 0 : index
    %263 = vector.load %arg4[%c2_340, %c1_341, %c0_342, %c0_343] : memref<3x3x32x32xf32, #tpu.memory_space<vmem>>, vector<1x1x32x32xf32>
    %264 = vector.shape_cast %263 : vector<1x1x32x32xf32> to vector<32x32xf32>
    %cst_344 = arith.constant dense<0.000000e+00> : vector<4x32xf32>
    %265 = tpu.matmul %262, %264, %cst_344 {dimension_numbers = #tpu.dot_dimension_numbers<[1], [0], [0], [1], [0, 0, 1, 1], [], []>} : vector<4x32xf32>, vector<32x32xf32>, vector<4x32xf32> -> vector<4x32xf32>
    %266 = arith.addf %260, %265 : vector<4x32xf32>
    %c3_345 = arith.constant 3 : index
    %c0_346 = arith.constant 0 : index
    %c2_347 = arith.constant 2 : index
    %c0_348 = arith.constant 0 : index
    %267 = vector.load %arg9[%c3_345, %c0_346, %c2_347, %c0_348] : memref<6x2x6x32xf32, #tpu.memory_space<vmem>>, vector<1x1x4x32xf32>
    %268 = vector.shape_cast %267 : vector<1x1x4x32xf32> to vector<4x32xf32>
    %c2_349 = arith.constant 2 : index
    %c2_350 = arith.constant 2 : index
    %c0_351 = arith.constant 0 : index
    %c0_352 = arith.constant 0 : index
    %269 = vector.load %arg4[%c2_349, %c2_350, %c0_351, %c0_352] : memref<3x3x32x32xf32, #tpu.memory_space<vmem>>, vector<1x1x32x32xf32>
    %270 = vector.shape_cast %269 : vector<1x1x32x32xf32> to vector<32x32xf32>
    %cst_353 = arith.constant dense<0.000000e+00> : vector<4x32xf32>
    %271 = tpu.matmul %268, %270, %cst_353 {dimension_numbers = #tpu.dot_dimension_numbers<[1], [0], [0], [1], [0, 0, 1, 1], [], []>} : vector<4x32xf32>, vector<32x32xf32>, vector<4x32xf32> -> vector<4x32xf32>
    %272 = arith.addf %266, %271 : vector<4x32xf32>
    %c0_354 = arith.constant 0 : index
    %c0_355 = arith.constant 0 : index
    %273 = vector.load %arg5[%c0_354, %c0_355] : memref<1x32xf32, #tpu.memory_space<vmem>>, vector<1x32xf32>
    %274 = vector.broadcast %273 : vector<1x32xf32> to vector<4x32xf32>
    %275 = arith.addf %272, %274 : vector<4x32xf32>
    %c0_356 = arith.constant 0 : index
    %c1_357 = arith.constant 1 : index
    %c0_358 = arith.constant 0 : index
    %c0_359 = arith.constant 0 : index
    %c0_360 = arith.constant 0 : index
    %276 = vector.load %arg7[%c0_356, %c1_357, %c0_358, %c0_359, %c0_360] : memref<1x4x2x4x32xf32, #tpu.memory_space<vmem>>, vector<1x1x1x4x32xf32>
    %277 = vector.shape_cast %276 : vector<1x1x1x4x32xf32> to vector<4x32xf32>
    %278 = vector.shape_cast %275 : vector<4x32xf32> to vector<1x1x1x4x32xf32>
    tpu.vector_store %arg7[%c0_356, %c1_357, %c0_358, %c0_359, %c0_360], %278 {strides = array<i32>} : memref<1x4x2x4x32xf32, #tpu.memory_space<vmem>>, vector<1x1x1x4x32xf32>,
    %c1_361 = arith.constant 1 : index
    %c0_362 = arith.constant 0 : index
    %c0_363 = arith.constant 0 : index
    %c0_364 = arith.constant 0 : index
    %279 = vector.load %arg6[%c1_361, %c0_362, %c0_363, %c0_364] : memref<4x2x37x4xf32, #tpu.memory_space<vmem>>, vector<1x1x37x4xf32>
    %280 = vector.shape_cast %279 : vector<1x1x37x4xf32> to vector<37x4xf32>
    %cst_365 = arith.constant dense<0.000000e+00> : vector<37x32xf32>
    %281 = tpu.matmul %280, %275, %cst_365 {dimension_numbers = #tpu.dot_dimension_numbers<[1], [0], [0], [1], [0, 0, 1, 1], [], []>} : vector<37x4xf32>, vector<4x32xf32>, vector<37x32xf32> -> vector<37x32xf32>
    %282 = arith.addf %217, %281 : vector<37x32xf32>
    %cst_366 = arith.constant 0.000000e+00 : f32
    %283 = vector.broadcast %cst_366 : f32 to vector<4x32xf32>
    %c1_367 = arith.constant 1 : index
    %c1_368 = arith.constant 1 : index
    %c0_369 = arith.constant 0 : index
    %c0_370 = arith.constant 0 : index
    %284 = vector.load %arg9[%c1_367, %c1_368, %c0_369, %c0_370] : memref<6x2x6x32xf32, #tpu.memory_space<vmem>>, vector<1x1x4x32xf32>
    %285 = vector.shape_cast %284 : vector<1x1x4x32xf32> to vector<4x32xf32>
    %c0_371 = arith.constant 0 : index
    %c0_372 = arith.constant 0 : index
    %c0_373 = arith.constant 0 : index
    %c0_374 = arith.constant 0 : index
    %286 = vector.load %arg4[%c0_371, %c0_372, %c0_373, %c0_374] : memref<3x3x32x32xf32, #tpu.memory_space<vmem>>, vector<1x1x32x32xf32>
    %287 = vector.shape_cast %286 : vector<1x1x32x32xf32> to vector<32x32xf32>
    %cst_375 = arith.constant dense<0.000000e+00> : vector<4x32xf32>
    %288 = tpu.matmul %285, %287, %cst_375 {dimension_numbers = #tpu.dot_dimension_numbers<[1], [0], [0], [1], [0, 0, 1, 1], [], []>} : vector<4x32xf32>, vector<32x32xf32>, vector<4x32xf32> -> vector<4x32xf32>
    %289 = arith.addf %283, %288 : vector<4x32xf32>
    %c1_376 = arith.constant 1 : index
    %c1_377 = arith.constant 1 : index
    %c1_378 = arith.constant 1 : index
    %c0_379 = arith.constant 0 : index
    %290 = vector.load %arg9[%c1_376, %c1_377, %c1_378, %c0_379] : memref<6x2x6x32xf32, #tpu.memory_space<vmem>>, vector<1x1x4x32xf32>
    %291 = vector.shape_cast %290 : vector<1x1x4x32xf32> to vector<4x32xf32>
    %c0_380 = arith.constant 0 : index
    %c1_381 = arith.constant 1 : index
    %c0_382 = arith.constant 0 : index
    %c0_383 = arith.constant 0 : index
    %292 = vector.load %arg4[%c0_380, %c1_381, %c0_382, %c0_383] : memref<3x3x32x32xf32, #tpu.memory_space<vmem>>, vector<1x1x32x32xf32>
    %293 = vector.shape_cast %292 : vector<1x1x32x32xf32> to vector<32x32xf32>
    %cst_384 = arith.constant dense<0.000000e+00> : vector<4x32xf32>
    %294 = tpu.matmul %291, %293, %cst_384 {dimension_numbers = #tpu.dot_dimension_numbers<[1], [0], [0], [1], [0, 0, 1, 1], [], []>} : vector<4x32xf32>, vector<32x32xf32>, vector<4x32xf32> -> vector<4x32xf32>
    %295 = arith.addf %289, %294 : vector<4x32xf32>
    %c1_385 = arith.constant 1 : index
    %c1_386 = arith.constant 1 : index
    %c2_387 = arith.constant 2 : index
    %c0_388 = arith.constant 0 : index
    %296 = vector.load %arg9[%c1_385, %c1_386, %c2_387, %c0_388] : memref<6x2x6x32xf32, #tpu.memory_space<vmem>>, vector<1x1x4x32xf32>
    %297 = vector.shape_cast %296 : vector<1x1x4x32xf32> to vector<4x32xf32>
    %c0_389 = arith.constant 0 : index
    %c2_390 = arith.constant 2 : index
    %c0_391 = arith.constant 0 : index
    %c0_392 = arith.constant 0 : index
    %298 = vector.load %arg4[%c0_389, %c2_390, %c0_391, %c0_392] : memref<3x3x32x32xf32, #tpu.memory_space<vmem>>, vector<1x1x32x32xf32>
    %299 = vector.shape_cast %298 : vector<1x1x32x32xf32> to vector<32x32xf32>
    %cst_393 = arith.constant dense<0.000000e+00> : vector<4x32xf32>
    %300 = tpu.matmul %297, %299, %cst_393 {dimension_numbers = #tpu.dot_dimension_numbers<[1], [0], [0], [1], [0, 0, 1, 1], [], []>} : vector<4x32xf32>, vector<32x32xf32>, vector<4x32xf32> -> vector<4x32xf32>
    %301 = arith.addf %295, %300 : vector<4x32xf32>
    %c2_394 = arith.constant 2 : index
    %c1_395 = arith.constant 1 : index
    %c0_396 = arith.constant 0 : index
    %c0_397 = arith.constant 0 : index
    %302 = vector.load %arg9[%c2_394, %c1_395, %c0_396, %c0_397] : memref<6x2x6x32xf32, #tpu.memory_space<vmem>>, vector<1x1x4x32xf32>
    %303 = vector.shape_cast %302 : vector<1x1x4x32xf32> to vector<4x32xf32>
    %c1_398 = arith.constant 1 : index
    %c0_399 = arith.constant 0 : index
    %c0_400 = arith.constant 0 : index
    %c0_401 = arith.constant 0 : index
    %304 = vector.load %arg4[%c1_398, %c0_399, %c0_400, %c0_401] : memref<3x3x32x32xf32, #tpu.memory_space<vmem>>, vector<1x1x32x32xf32>
    %305 = vector.shape_cast %304 : vector<1x1x32x32xf32> to vector<32x32xf32>
    %cst_402 = arith.constant dense<0.000000e+00> : vector<4x32xf32>
    %306 = tpu.matmul %303, %305, %cst_402 {dimension_numbers = #tpu.dot_dimension_numbers<[1], [0], [0], [1], [0, 0, 1, 1], [], []>} : vector<4x32xf32>, vector<32x32xf32>, vector<4x32xf32> -> vector<4x32xf32>
    %307 = arith.addf %301, %306 : vector<4x32xf32>
    %c2_403 = arith.constant 2 : index
    %c1_404 = arith.constant 1 : index
    %c1_405 = arith.constant 1 : index
    %c0_406 = arith.constant 0 : index
    %308 = vector.load %arg9[%c2_403, %c1_404, %c1_405, %c0_406] : memref<6x2x6x32xf32, #tpu.memory_space<vmem>>, vector<1x1x4x32xf32>
    %309 = vector.shape_cast %308 : vector<1x1x4x32xf32> to vector<4x32xf32>
    %c1_407 = arith.constant 1 : index
    %c1_408 = arith.constant 1 : index
    %c0_409 = arith.constant 0 : index
    %c0_410 = arith.constant 0 : index
    %310 = vector.load %arg4[%c1_407, %c1_408, %c0_409, %c0_410] : memref<3x3x32x32xf32, #tpu.memory_space<vmem>>, vector<1x1x32x32xf32>
    %311 = vector.shape_cast %310 : vector<1x1x32x32xf32> to vector<32x32xf32>
    %cst_411 = arith.constant dense<0.000000e+00> : vector<4x32xf32>
    %312 = tpu.matmul %309, %311, %cst_411 {dimension_numbers = #tpu.dot_dimension_numbers<[1], [0], [0], [1], [0, 0, 1, 1], [], []>} : vector<4x32xf32>, vector<32x32xf32>, vector<4x32xf32> -> vector<4x32xf32>
    %313 = arith.addf %307, %312 : vector<4x32xf32>
    %c2_412 = arith.constant 2 : index
    %c1_413 = arith.constant 1 : index
    %c2_414 = arith.constant 2 : index
    %c0_415 = arith.constant 0 : index
    %314 = vector.load %arg9[%c2_412, %c1_413, %c2_414, %c0_415] : memref<6x2x6x32xf32, #tpu.memory_space<vmem>>, vector<1x1x4x32xf32>
    %315 = vector.shape_cast %314 : vector<1x1x4x32xf32> to vector<4x32xf32>
    %c1_416 = arith.constant 1 : index
    %c2_417 = arith.constant 2 : index
    %c0_418 = arith.constant 0 : index
    %c0_419 = arith.constant 0 : index
    %316 = vector.load %arg4[%c1_416, %c2_417, %c0_418, %c0_419] : memref<3x3x32x32xf32, #tpu.memory_space<vmem>>, vector<1x1x32x32xf32>
    %317 = vector.shape_cast %316 : vector<1x1x32x32xf32> to vector<32x32xf32>
    %cst_420 = arith.constant dense<0.000000e+00> : vector<4x32xf32>
    %318 = tpu.matmul %315, %317, %cst_420 {dimension_numbers = #tpu.dot_dimension_numbers<[1], [0], [0], [1], [0, 0, 1, 1], [], []>} : vector<4x32xf32>, vector<32x32xf32>, vector<4x32xf32> -> vector<4x32xf32>
    %319 = arith.addf %313, %318 : vector<4x32xf32>
    %c3_421 = arith.constant 3 : index
    %c1_422 = arith.constant 1 : index
    %c0_423 = arith.constant 0 : index
    %c0_424 = arith.constant 0 : index
    %320 = vector.load %arg9[%c3_421, %c1_422, %c0_423, %c0_424] : memref<6x2x6x32xf32, #tpu.memory_space<vmem>>, vector<1x1x4x32xf32>
    %321 = vector.shape_cast %320 : vector<1x1x4x32xf32> to vector<4x32xf32>
    %c2_425 = arith.constant 2 : index
    %c0_426 = arith.constant 0 : index
    %c0_427 = arith.constant 0 : index
    %c0_428 = arith.constant 0 : index
    %322 = vector.load %arg4[%c2_425, %c0_426, %c0_427, %c0_428] : memref<3x3x32x32xf32, #tpu.memory_space<vmem>>, vector<1x1x32x32xf32>
    %323 = vector.shape_cast %322 : vector<1x1x32x32xf32> to vector<32x32xf32>
    %cst_429 = arith.constant dense<0.000000e+00> : vector<4x32xf32>
    %324 = tpu.matmul %321, %323, %cst_429 {dimension_numbers = #tpu.dot_dimension_numbers<[1], [0], [0], [1], [0, 0, 1, 1], [], []>} : vector<4x32xf32>, vector<32x32xf32>, vector<4x32xf32> -> vector<4x32xf32>
    %325 = arith.addf %319, %324 : vector<4x32xf32>
    %c3_430 = arith.constant 3 : index
    %c1_431 = arith.constant 1 : index
    %c1_432 = arith.constant 1 : index
    %c0_433 = arith.constant 0 : index
    %326 = vector.load %arg9[%c3_430, %c1_431, %c1_432, %c0_433] : memref<6x2x6x32xf32, #tpu.memory_space<vmem>>, vector<1x1x4x32xf32>
    %327 = vector.shape_cast %326 : vector<1x1x4x32xf32> to vector<4x32xf32>
    %c2_434 = arith.constant 2 : index
    %c1_435 = arith.constant 1 : index
    %c0_436 = arith.constant 0 : index
    %c0_437 = arith.constant 0 : index
    %328 = vector.load %arg4[%c2_434, %c1_435, %c0_436, %c0_437] : memref<3x3x32x32xf32, #tpu.memory_space<vmem>>, vector<1x1x32x32xf32>
    %329 = vector.shape_cast %328 : vector<1x1x32x32xf32> to vector<32x32xf32>
    %cst_438 = arith.constant dense<0.000000e+00> : vector<4x32xf32>
    %330 = tpu.matmul %327, %329, %cst_438 {dimension_numbers = #tpu.dot_dimension_numbers<[1], [0], [0], [1], [0, 0, 1, 1], [], []>} : vector<4x32xf32>, vector<32x32xf32>, vector<4x32xf32> -> vector<4x32xf32>
    %331 = arith.addf %325, %330 : vector<4x32xf32>
    %c3_439 = arith.constant 3 : index
    %c1_440 = arith.constant 1 : index
    %c2_441 = arith.constant 2 : index
    %c0_442 = arith.constant 0 : index
    %332 = vector.load %arg9[%c3_439, %c1_440, %c2_441, %c0_442] : memref<6x2x6x32xf32, #tpu.memory_space<vmem>>, vector<1x1x4x32xf32>
    %333 = vector.shape_cast %332 : vector<1x1x4x32xf32> to vector<4x32xf32>
    %c2_443 = arith.constant 2 : index
    %c2_444 = arith.constant 2 : index
    %c0_445 = arith.constant 0 : index
    %c0_446 = arith.constant 0 : index
    %334 = vector.load %arg4[%c2_443, %c2_444, %c0_445, %c0_446] : memref<3x3x32x32xf32, #tpu.memory_space<vmem>>, vector<1x1x32x32xf32>
    %335 = vector.shape_cast %334 : vector<1x1x32x32xf32> to vector<32x32xf32>
    %cst_447 = arith.constant dense<0.000000e+00> : vector<4x32xf32>
    %336 = tpu.matmul %333, %335, %cst_447 {dimension_numbers = #tpu.dot_dimension_numbers<[1], [0], [0], [1], [0, 0, 1, 1], [], []>} : vector<4x32xf32>, vector<32x32xf32>, vector<4x32xf32> -> vector<4x32xf32>
    %337 = arith.addf %331, %336 : vector<4x32xf32>
    %c0_448 = arith.constant 0 : index
    %c0_449 = arith.constant 0 : index
    %338 = vector.load %arg5[%c0_448, %c0_449] : memref<1x32xf32, #tpu.memory_space<vmem>>, vector<1x32xf32>
    %339 = vector.broadcast %338 : vector<1x32xf32> to vector<4x32xf32>
    %340 = arith.addf %337, %339 : vector<4x32xf32>
    %c0_450 = arith.constant 0 : index
    %c1_451 = arith.constant 1 : index
    %c1_452 = arith.constant 1 : index
    %c0_453 = arith.constant 0 : index
    %c0_454 = arith.constant 0 : index
    %341 = vector.load %arg7[%c0_450, %c1_451, %c1_452, %c0_453, %c0_454] : memref<1x4x2x4x32xf32, #tpu.memory_space<vmem>>, vector<1x1x1x4x32xf32>
    %342 = vector.shape_cast %341 : vector<1x1x1x4x32xf32> to vector<4x32xf32>
    %343 = vector.shape_cast %340 : vector<4x32xf32> to vector<1x1x1x4x32xf32>
    tpu.vector_store %arg7[%c0_450, %c1_451, %c1_452, %c0_453, %c0_454], %343 {strides = array<i32>} : memref<1x4x2x4x32xf32, #tpu.memory_space<vmem>>, vector<1x1x1x4x32xf32>,
    %c1_455 = arith.constant 1 : index
    %c1_456 = arith.constant 1 : index
    %c0_457 = arith.constant 0 : index
    %c0_458 = arith.constant 0 : index
    %344 = vector.load %arg6[%c1_455, %c1_456, %c0_457, %c0_458] : memref<4x2x37x4xf32, #tpu.memory_space<vmem>>, vector<1x1x37x4xf32>
    %345 = vector.shape_cast %344 : vector<1x1x37x4xf32> to vector<37x4xf32>
    %cst_459 = arith.constant dense<0.000000e+00> : vector<37x32xf32>
    %346 = tpu.matmul %345, %340, %cst_459 {dimension_numbers = #tpu.dot_dimension_numbers<[1], [0], [0], [1], [0, 0, 1, 1], [], []>} : vector<37x4xf32>, vector<4x32xf32>, vector<37x32xf32> -> vector<37x32xf32>
    %347 = arith.addf %282, %346 : vector<37x32xf32>
    %cst_460 = arith.constant 0.000000e+00 : f32
    %348 = vector.broadcast %cst_460 : f32 to vector<4x32xf32>
    %c2_461 = arith.constant 2 : index
    %c0_462 = arith.constant 0 : index
    %c0_463 = arith.constant 0 : index
    %c0_464 = arith.constant 0 : index
    %349 = vector.load %arg9[%c2_461, %c0_462, %c0_463, %c0_464] : memref<6x2x6x32xf32, #tpu.memory_space<vmem>>, vector<1x1x4x32xf32>
    %350 = vector.shape_cast %349 : vector<1x1x4x32xf32> to vector<4x32xf32>
    %c0_465 = arith.constant 0 : index
    %c0_466 = arith.constant 0 : index
    %c0_467 = arith.constant 0 : index
    %c0_468 = arith.constant 0 : index
    %351 = vector.load %arg4[%c0_465, %c0_466, %c0_467, %c0_468] : memref<3x3x32x32xf32, #tpu.memory_space<vmem>>, vector<1x1x32x32xf32>
    %352 = vector.shape_cast %351 : vector<1x1x32x32xf32> to vector<32x32xf32>
    %cst_469 = arith.constant dense<0.000000e+00> : vector<4x32xf32>
    %353 = tpu.matmul %350, %352, %cst_469 {dimension_numbers = #tpu.dot_dimension_numbers<[1], [0], [0], [1], [0, 0, 1, 1], [], []>} : vector<4x32xf32>, vector<32x32xf32>, vector<4x32xf32> -> vector<4x32xf32>
    %354 = arith.addf %348, %353 : vector<4x32xf32>
    %c2_470 = arith.constant 2 : index
    %c0_471 = arith.constant 0 : index
    %c1_472 = arith.constant 1 : index
    %c0_473 = arith.constant 0 : index
    %355 = vector.load %arg9[%c2_470, %c0_471, %c1_472, %c0_473] : memref<6x2x6x32xf32, #tpu.memory_space<vmem>>, vector<1x1x4x32xf32>
    %356 = vector.shape_cast %355 : vector<1x1x4x32xf32> to vector<4x32xf32>
    %c0_474 = arith.constant 0 : index
    %c1_475 = arith.constant 1 : index
    %c0_476 = arith.constant 0 : index
    %c0_477 = arith.constant 0 : index
    %357 = vector.load %arg4[%c0_474, %c1_475, %c0_476, %c0_477] : memref<3x3x32x32xf32, #tpu.memory_space<vmem>>, vector<1x1x32x32xf32>
    %358 = vector.shape_cast %357 : vector<1x1x32x32xf32> to vector<32x32xf32>
    %cst_478 = arith.constant dense<0.000000e+00> : vector<4x32xf32>
    %359 = tpu.matmul %356, %358, %cst_478 {dimension_numbers = #tpu.dot_dimension_numbers<[1], [0], [0], [1], [0, 0, 1, 1], [], []>} : vector<4x32xf32>, vector<32x32xf32>, vector<4x32xf32> -> vector<4x32xf32>
    %360 = arith.addf %354, %359 : vector<4x32xf32>
    %c2_479 = arith.constant 2 : index
    %c0_480 = arith.constant 0 : index
    %c2_481 = arith.constant 2 : index
    %c0_482 = arith.constant 0 : index
    %361 = vector.load %arg9[%c2_479, %c0_480, %c2_481, %c0_482] : memref<6x2x6x32xf32, #tpu.memory_space<vmem>>, vector<1x1x4x32xf32>
    %362 = vector.shape_cast %361 : vector<1x1x4x32xf32> to vector<4x32xf32>
    %c0_483 = arith.constant 0 : index
    %c2_484 = arith.constant 2 : index
    %c0_485 = arith.constant 0 : index
    %c0_486 = arith.constant 0 : index
    %363 = vector.load %arg4[%c0_483, %c2_484, %c0_485, %c0_486] : memref<3x3x32x32xf32, #tpu.memory_space<vmem>>, vector<1x1x32x32xf32>
    %364 = vector.shape_cast %363 : vector<1x1x32x32xf32> to vector<32x32xf32>
    %cst_487 = arith.constant dense<0.000000e+00> : vector<4x32xf32>
    %365 = tpu.matmul %362, %364, %cst_487 {dimension_numbers = #tpu.dot_dimension_numbers<[1], [0], [0], [1], [0, 0, 1, 1], [], []>} : vector<4x32xf32>, vector<32x32xf32>, vector<4x32xf32> -> vector<4x32xf32>
    %366 = arith.addf %360, %365 : vector<4x32xf32>
    %c3_488 = arith.constant 3 : index
    %c0_489 = arith.constant 0 : index
    %c0_490 = arith.constant 0 : index
    %c0_491 = arith.constant 0 : index
    %367 = vector.load %arg9[%c3_488, %c0_489, %c0_490, %c0_491] : memref<6x2x6x32xf32, #tpu.memory_space<vmem>>, vector<1x1x4x32xf32>
    %368 = vector.shape_cast %367 : vector<1x1x4x32xf32> to vector<4x32xf32>
    %c1_492 = arith.constant 1 : index
    %c0_493 = arith.constant 0 : index
    %c0_494 = arith.constant 0 : index
    %c0_495 = arith.constant 0 : index
    %369 = vector.load %arg4[%c1_492, %c0_493, %c0_494, %c0_495] : memref<3x3x32x32xf32, #tpu.memory_space<vmem>>, vector<1x1x32x32xf32>
    %370 = vector.shape_cast %369 : vector<1x1x32x32xf32> to vector<32x32xf32>
    %cst_496 = arith.constant dense<0.000000e+00> : vector<4x32xf32>
    %371 = tpu.matmul %368, %370, %cst_496 {dimension_numbers = #tpu.dot_dimension_numbers<[1], [0], [0], [1], [0, 0, 1, 1], [], []>} : vector<4x32xf32>, vector<32x32xf32>, vector<4x32xf32> -> vector<4x32xf32>
    %372 = arith.addf %366, %371 : vector<4x32xf32>
    %c3_497 = arith.constant 3 : index
    %c0_498 = arith.constant 0 : index
    %c1_499 = arith.constant 1 : index
    %c0_500 = arith.constant 0 : index
    %373 = vector.load %arg9[%c3_497, %c0_498, %c1_499, %c0_500] : memref<6x2x6x32xf32, #tpu.memory_space<vmem>>, vector<1x1x4x32xf32>
    %374 = vector.shape_cast %373 : vector<1x1x4x32xf32> to vector<4x32xf32>
    %c1_501 = arith.constant 1 : index
    %c1_502 = arith.constant 1 : index
    %c0_503 = arith.constant 0 : index
    %c0_504 = arith.constant 0 : index
    %375 = vector.load %arg4[%c1_501, %c1_502, %c0_503, %c0_504] : memref<3x3x32x32xf32, #tpu.memory_space<vmem>>, vector<1x1x32x32xf32>
    %376 = vector.shape_cast %375 : vector<1x1x32x32xf32> to vector<32x32xf32>
    %cst_505 = arith.constant dense<0.000000e+00> : vector<4x32xf32>
    %377 = tpu.matmul %374, %376, %cst_505 {dimension_numbers = #tpu.dot_dimension_numbers<[1], [0], [0], [1], [0, 0, 1, 1], [], []>} : vector<4x32xf32>, vector<32x32xf32>, vector<4x32xf32> -> vector<4x32xf32>
    %378 = arith.addf %372, %377 : vector<4x32xf32>
    %c3_506 = arith.constant 3 : index
    %c0_507 = arith.constant 0 : index
    %c2_508 = arith.constant 2 : index
    %c0_509 = arith.constant 0 : index
    %379 = vector.load %arg9[%c3_506, %c0_507, %c2_508, %c0_509] : memref<6x2x6x32xf32, #tpu.memory_space<vmem>>, vector<1x1x4x32xf32>
    %380 = vector.shape_cast %379 : vector<1x1x4x32xf32> to vector<4x32xf32>
    %c1_510 = arith.constant 1 : index
    %c2_511 = arith.constant 2 : index
    %c0_512 = arith.constant 0 : index
    %c0_513 = arith.constant 0 : index
    %381 = vector.load %arg4[%c1_510, %c2_511, %c0_512, %c0_513] : memref<3x3x32x32xf32, #tpu.memory_space<vmem>>, vector<1x1x32x32xf32>
    %382 = vector.shape_cast %381 : vector<1x1x32x32xf32> to vector<32x32xf32>
    %cst_514 = arith.constant dense<0.000000e+00> : vector<4x32xf32>
    %383 = tpu.matmul %380, %382, %cst_514 {dimension_numbers = #tpu.dot_dimension_numbers<[1], [0], [0], [1], [0, 0, 1, 1], [], []>} : vector<4x32xf32>, vector<32x32xf32>, vector<4x32xf32> -> vector<4x32xf32>
    %384 = arith.addf %378, %383 : vector<4x32xf32>
    %c4 = arith.constant 4 : index
    %c0_515 = arith.constant 0 : index
    %c0_516 = arith.constant 0 : index
    %c0_517 = arith.constant 0 : index
    %385 = vector.load %arg9[%c4, %c0_515, %c0_516, %c0_517] : memref<6x2x6x32xf32, #tpu.memory_space<vmem>>, vector<1x1x4x32xf32>
    %386 = vector.shape_cast %385 : vector<1x1x4x32xf32> to vector<4x32xf32>
    %c2_518 = arith.constant 2 : index
    %c0_519 = arith.constant 0 : index
    %c0_520 = arith.constant 0 : index
    %c0_521 = arith.constant 0 : index
    %387 = vector.load %arg4[%c2_518, %c0_519, %c0_520, %c0_521] : memref<3x3x32x32xf32, #tpu.memory_space<vmem>>, vector<1x1x32x32xf32>
    %388 = vector.shape_cast %387 : vector<1x1x32x32xf32> to vector<32x32xf32>
    %cst_522 = arith.constant dense<0.000000e+00> : vector<4x32xf32>
    %389 = tpu.matmul %386, %388, %cst_522 {dimension_numbers = #tpu.dot_dimension_numbers<[1], [0], [0], [1], [0, 0, 1, 1], [], []>} : vector<4x32xf32>, vector<32x32xf32>, vector<4x32xf32> -> vector<4x32xf32>
    %390 = arith.addf %384, %389 : vector<4x32xf32>
    %c4_523 = arith.constant 4 : index
    %c0_524 = arith.constant 0 : index
    %c1_525 = arith.constant 1 : index
    %c0_526 = arith.constant 0 : index
    %391 = vector.load %arg9[%c4_523, %c0_524, %c1_525, %c0_526] : memref<6x2x6x32xf32, #tpu.memory_space<vmem>>, vector<1x1x4x32xf32>
    %392 = vector.shape_cast %391 : vector<1x1x4x32xf32> to vector<4x32xf32>
    %c2_527 = arith.constant 2 : index
    %c1_528 = arith.constant 1 : index
    %c0_529 = arith.constant 0 : index
    %c0_530 = arith.constant 0 : index
    %393 = vector.load %arg4[%c2_527, %c1_528, %c0_529, %c0_530] : memref<3x3x32x32xf32, #tpu.memory_space<vmem>>, vector<1x1x32x32xf32>
    %394 = vector.shape_cast %393 : vector<1x1x32x32xf32> to vector<32x32xf32>
    %cst_531 = arith.constant dense<0.000000e+00> : vector<4x32xf32>
    %395 = tpu.matmul %392, %394, %cst_531 {dimension_numbers = #tpu.dot_dimension_numbers<[1], [0], [0], [1], [0, 0, 1, 1], [], []>} : vector<4x32xf32>, vector<32x32xf32>, vector<4x32xf32> -> vector<4x32xf32>
    %396 = arith.addf %390, %395 : vector<4x32xf32>
    %c4_532 = arith.constant 4 : index
    %c0_533 = arith.constant 0 : index
    %c2_534 = arith.constant 2 : index
    %c0_535 = arith.constant 0 : index
    %397 = vector.load %arg9[%c4_532, %c0_533, %c2_534, %c0_535] : memref<6x2x6x32xf32, #tpu.memory_space<vmem>>, vector<1x1x4x32xf32>
    %398 = vector.shape_cast %397 : vector<1x1x4x32xf32> to vector<4x32xf32>
    %c2_536 = arith.constant 2 : index
    %c2_537 = arith.constant 2 : index
    %c0_538 = arith.constant 0 : index
    %c0_539 = arith.constant 0 : index
    %399 = vector.load %arg4[%c2_536, %c2_537, %c0_538, %c0_539] : memref<3x3x32x32xf32, #tpu.memory_space<vmem>>, vector<1x1x32x32xf32>
    %400 = vector.shape_cast %399 : vector<1x1x32x32xf32> to vector<32x32xf32>
    %cst_540 = arith.constant dense<0.000000e+00> : vector<4x32xf32>
    %401 = tpu.matmul %398, %400, %cst_540 {dimension_numbers = #tpu.dot_dimension_numbers<[1], [0], [0], [1], [0, 0, 1, 1], [], []>} : vector<4x32xf32>, vector<32x32xf32>, vector<4x32xf32> -> vector<4x32xf32>
    %402 = arith.addf %396, %401 : vector<4x32xf32>
    %c0_541 = arith.constant 0 : index
    %c0_542 = arith.constant 0 : index
    %403 = vector.load %arg5[%c0_541, %c0_542] : memref<1x32xf32, #tpu.memory_space<vmem>>, vector<1x32xf32>
    %404 = vector.broadcast %403 : vector<1x32xf32> to vector<4x32xf32>
    %405 = arith.addf %402, %404 : vector<4x32xf32>
    %c0_543 = arith.constant 0 : index
    %c2_544 = arith.constant 2 : index
    %c0_545 = arith.constant 0 : index
    %c0_546 = arith.constant 0 : index
    %c0_547 = arith.constant 0 : index
    %406 = vector.load %arg7[%c0_543, %c2_544, %c0_545, %c0_546, %c0_547] : memref<1x4x2x4x32xf32, #tpu.memory_space<vmem>>, vector<1x1x1x4x32xf32>
    %407 = vector.shape_cast %406 : vector<1x1x1x4x32xf32> to vector<4x32xf32>
    %408 = vector.shape_cast %405 : vector<4x32xf32> to vector<1x1x1x4x32xf32>
    tpu.vector_store %arg7[%c0_543, %c2_544, %c0_545, %c0_546, %c0_547], %408 {strides = array<i32>} : memref<1x4x2x4x32xf32, #tpu.memory_space<vmem>>, vector<1x1x1x4x32xf32>,
    %c2_548 = arith.constant 2 : index
    %c0_549 = arith.constant 0 : index
    %c0_550 = arith.constant 0 : index
    %c0_551 = arith.constant 0 : index
    %409 = vector.load %arg6[%c2_548, %c0_549, %c0_550, %c0_551] : memref<4x2x37x4xf32, #tpu.memory_space<vmem>>, vector<1x1x37x4xf32>
    %410 = vector.shape_cast %409 : vector<1x1x37x4xf32> to vector<37x4xf32>
    %cst_552 = arith.constant dense<0.000000e+00> : vector<37x32xf32>
    %411 = tpu.matmul %410, %405, %cst_552 {dimension_numbers = #tpu.dot_dimension_numbers<[1], [0], [0], [1], [0, 0, 1, 1], [], []>} : vector<37x4xf32>, vector<4x32xf32>, vector<37x32xf32> -> vector<37x32xf32>
    %412 = arith.addf %347, %411 : vector<37x32xf32>
    %cst_553 = arith.constant 0.000000e+00 : f32
    %413 = vector.broadcast %cst_553 : f32 to vector<4x32xf32>
    %c2_554 = arith.constant 2 : index
    %c1_555 = arith.constant 1 : index
    %c0_556 = arith.constant 0 : index
    %c0_557 = arith.constant 0 : index
    %414 = vector.load %arg9[%c2_554, %c1_555, %c0_556, %c0_557] : memref<6x2x6x32xf32, #tpu.memory_space<vmem>>, vector<1x1x4x32xf32>
    %415 = vector.shape_cast %414 : vector<1x1x4x32xf32> to vector<4x32xf32>
    %c0_558 = arith.constant 0 : index
    %c0_559 = arith.constant 0 : index
    %c0_560 = arith.constant 0 : index
    %c0_561 = arith.constant 0 : index
    %416 = vector.load %arg4[%c0_558, %c0_559, %c0_560, %c0_561] : memref<3x3x32x32xf32, #tpu.memory_space<vmem>>, vector<1x1x32x32xf32>
    %417 = vector.shape_cast %416 : vector<1x1x32x32xf32> to vector<32x32xf32>
    %cst_562 = arith.constant dense<0.000000e+00> : vector<4x32xf32>
    %418 = tpu.matmul %415, %417, %cst_562 {dimension_numbers = #tpu.dot_dimension_numbers<[1], [0], [0], [1], [0, 0, 1, 1], [], []>} : vector<4x32xf32>, vector<32x32xf32>, vector<4x32xf32> -> vector<4x32xf32>
    %419 = arith.addf %413, %418 : vector<4x32xf32>
    %c2_563 = arith.constant 2 : index
    %c1_564 = arith.constant 1 : index
    %c1_565 = arith.constant 1 : index
    %c0_566 = arith.constant 0 : index
    %420 = vector.load %arg9[%c2_563, %c1_564, %c1_565, %c0_566] : memref<6x2x6x32xf32, #tpu.memory_space<vmem>>, vector<1x1x4x32xf32>
    %421 = vector.shape_cast %420 : vector<1x1x4x32xf32> to vector<4x32xf32>
    %c0_567 = arith.constant 0 : index
    %c1_568 = arith.constant 1 : index
    %c0_569 = arith.constant 0 : index
    %c0_570 = arith.constant 0 : index
    %422 = vector.load %arg4[%c0_567, %c1_568, %c0_569, %c0_570] : memref<3x3x32x32xf32, #tpu.memory_space<vmem>>, vector<1x1x32x32xf32>
    %423 = vector.shape_cast %422 : vector<1x1x32x32xf32> to vector<32x32xf32>
    %cst_571 = arith.constant dense<0.000000e+00> : vector<4x32xf32>
    %424 = tpu.matmul %421, %423, %cst_571 {dimension_numbers = #tpu.dot_dimension_numbers<[1], [0], [0], [1], [0, 0, 1, 1], [], []>} : vector<4x32xf32>, vector<32x32xf32>, vector<4x32xf32> -> vector<4x32xf32>
    %425 = arith.addf %419, %424 : vector<4x32xf32>
    %c2_572 = arith.constant 2 : index
    %c1_573 = arith.constant 1 : index
    %c2_574 = arith.constant 2 : index
    %c0_575 = arith.constant 0 : index
    %426 = vector.load %arg9[%c2_572, %c1_573, %c2_574, %c0_575] : memref<6x2x6x32xf32, #tpu.memory_space<vmem>>, vector<1x1x4x32xf32>
    %427 = vector.shape_cast %426 : vector<1x1x4x32xf32> to vector<4x32xf32>
    %c0_576 = arith.constant 0 : index
    %c2_577 = arith.constant 2 : index
    %c0_578 = arith.constant 0 : index
    %c0_579 = arith.constant 0 : index
    %428 = vector.load %arg4[%c0_576, %c2_577, %c0_578, %c0_579] : memref<3x3x32x32xf32, #tpu.memory_space<vmem>>, vector<1x1x32x32xf32>
    %429 = vector.shape_cast %428 : vector<1x1x32x32xf32> to vector<32x32xf32>
    %cst_580 = arith.constant dense<0.000000e+00> : vector<4x32xf32>
    %430 = tpu.matmul %427, %429, %cst_580 {dimension_numbers = #tpu.dot_dimension_numbers<[1], [0], [0], [1], [0, 0, 1, 1], [], []>} : vector<4x32xf32>, vector<32x32xf32>, vector<4x32xf32> -> vector<4x32xf32>
    %431 = arith.addf %425, %430 : vector<4x32xf32>
    %c3_581 = arith.constant 3 : index
    %c1_582 = arith.constant 1 : index
    %c0_583 = arith.constant 0 : index
    %c0_584 = arith.constant 0 : index
    %432 = vector.load %arg9[%c3_581, %c1_582, %c0_583, %c0_584] : memref<6x2x6x32xf32, #tpu.memory_space<vmem>>, vector<1x1x4x32xf32>
    %433 = vector.shape_cast %432 : vector<1x1x4x32xf32> to vector<4x32xf32>
    %c1_585 = arith.constant 1 : index
    %c0_586 = arith.constant 0 : index
    %c0_587 = arith.constant 0 : index
    %c0_588 = arith.constant 0 : index
    %434 = vector.load %arg4[%c1_585, %c0_586, %c0_587, %c0_588] : memref<3x3x32x32xf32, #tpu.memory_space<vmem>>, vector<1x1x32x32xf32>
    %435 = vector.shape_cast %434 : vector<1x1x32x32xf32> to vector<32x32xf32>
    %cst_589 = arith.constant dense<0.000000e+00> : vector<4x32xf32>
    %436 = tpu.matmul %433, %435, %cst_589 {dimension_numbers = #tpu.dot_dimension_numbers<[1], [0], [0], [1], [0, 0, 1, 1], [], []>} : vector<4x32xf32>, vector<32x32xf32>, vector<4x32xf32> -> vector<4x32xf32>
    %437 = arith.addf %431, %436 : vector<4x32xf32>
    %c3_590 = arith.constant 3 : index
    %c1_591 = arith.constant 1 : index
    %c1_592 = arith.constant 1 : index
    %c0_593 = arith.constant 0 : index
    %438 = vector.load %arg9[%c3_590, %c1_591, %c1_592, %c0_593] : memref<6x2x6x32xf32, #tpu.memory_space<vmem>>, vector<1x1x4x32xf32>
    %439 = vector.shape_cast %438 : vector<1x1x4x32xf32> to vector<4x32xf32>
    %c1_594 = arith.constant 1 : index
    %c1_595 = arith.constant 1 : index
    %c0_596 = arith.constant 0 : index
    %c0_597 = arith.constant 0 : index
    %440 = vector.load %arg4[%c1_594, %c1_595, %c0_596, %c0_597] : memref<3x3x32x32xf32, #tpu.memory_space<vmem>>, vector<1x1x32x32xf32>
    %441 = vector.shape_cast %440 : vector<1x1x32x32xf32> to vector<32x32xf32>
    %cst_598 = arith.constant dense<0.000000e+00> : vector<4x32xf32>
    %442 = tpu.matmul %439, %441, %cst_598 {dimension_numbers = #tpu.dot_dimension_numbers<[1], [0], [0], [1], [0, 0, 1, 1], [], []>} : vector<4x32xf32>, vector<32x32xf32>, vector<4x32xf32> -> vector<4x32xf32>
    %443 = arith.addf %437, %442 : vector<4x32xf32>
    %c3_599 = arith.constant 3 : index
    %c1_600 = arith.constant 1 : index
    %c2_601 = arith.constant 2 : index
    %c0_602 = arith.constant 0 : index
    %444 = vector.load %arg9[%c3_599, %c1_600, %c2_601, %c0_602] : memref<6x2x6x32xf32, #tpu.memory_space<vmem>>, vector<1x1x4x32xf32>
    %445 = vector.shape_cast %444 : vector<1x1x4x32xf32> to vector<4x32xf32>
    %c1_603 = arith.constant 1 : index
    %c2_604 = arith.constant 2 : index
    %c0_605 = arith.constant 0 : index
    %c0_606 = arith.constant 0 : index
    %446 = vector.load %arg4[%c1_603, %c2_604, %c0_605, %c0_606] : memref<3x3x32x32xf32, #tpu.memory_space<vmem>>, vector<1x1x32x32xf32>
    %447 = vector.shape_cast %446 : vector<1x1x32x32xf32> to vector<32x32xf32>
    %cst_607 = arith.constant dense<0.000000e+00> : vector<4x32xf32>
    %448 = tpu.matmul %445, %447, %cst_607 {dimension_numbers = #tpu.dot_dimension_numbers<[1], [0], [0], [1], [0, 0, 1, 1], [], []>} : vector<4x32xf32>, vector<32x32xf32>, vector<4x32xf32> -> vector<4x32xf32>
    %449 = arith.addf %443, %448 : vector<4x32xf32>
    %c4_608 = arith.constant 4 : index
    %c1_609 = arith.constant 1 : index
    %c0_610 = arith.constant 0 : index
    %c0_611 = arith.constant 0 : index
    %450 = vector.load %arg9[%c4_608, %c1_609, %c0_610, %c0_611] : memref<6x2x6x32xf32, #tpu.memory_space<vmem>>, vector<1x1x4x32xf32>
    %451 = vector.shape_cast %450 : vector<1x1x4x32xf32> to vector<4x32xf32>
    %c2_612 = arith.constant 2 : index
    %c0_613 = arith.constant 0 : index
    %c0_614 = arith.constant 0 : index
    %c0_615 = arith.constant 0 : index
    %452 = vector.load %arg4[%c2_612, %c0_613, %c0_614, %c0_615] : memref<3x3x32x32xf32, #tpu.memory_space<vmem>>, vector<1x1x32x32xf32>
    %453 = vector.shape_cast %452 : vector<1x1x32x32xf32> to vector<32x32xf32>
    %cst_616 = arith.constant dense<0.000000e+00> : vector<4x32xf32>
    %454 = tpu.matmul %451, %453, %cst_616 {dimension_numbers = #tpu.dot_dimension_numbers<[1], [0], [0], [1], [0, 0, 1, 1], [], []>} : vector<4x32xf32>, vector<32x32xf32>, vector<4x32xf32> -> vector<4x32xf32>
    %455 = arith.addf %449, %454 : vector<4x32xf32>
    %c4_617 = arith.constant 4 : index
    %c1_618 = arith.constant 1 : index
    %c1_619 = arith.constant 1 : index
    %c0_620 = arith.constant 0 : index
    %456 = vector.load %arg9[%c4_617, %c1_618, %c1_619, %c0_620] : memref<6x2x6x32xf32, #tpu.memory_space<vmem>>, vector<1x1x4x32xf32>
    %457 = vector.shape_cast %456 : vector<1x1x4x32xf32> to vector<4x32xf32>
    %c2_621 = arith.constant 2 : index
    %c1_622 = arith.constant 1 : index
    %c0_623 = arith.constant 0 : index
    %c0_624 = arith.constant 0 : index
    %458 = vector.load %arg4[%c2_621, %c1_622, %c0_623, %c0_624] : memref<3x3x32x32xf32, #tpu.memory_space<vmem>>, vector<1x1x32x32xf32>
    %459 = vector.shape_cast %458 : vector<1x1x32x32xf32> to vector<32x32xf32>
    %cst_625 = arith.constant dense<0.000000e+00> : vector<4x32xf32>
    %460 = tpu.matmul %457, %459, %cst_625 {dimension_numbers = #tpu.dot_dimension_numbers<[1], [0], [0], [1], [0, 0, 1, 1], [], []>} : vector<4x32xf32>, vector<32x32xf32>, vector<4x32xf32> -> vector<4x32xf32>
    %461 = arith.addf %455, %460 : vector<4x32xf32>
    %c4_626 = arith.constant 4 : index
    %c1_627 = arith.constant 1 : index
    %c2_628 = arith.constant 2 : index
    %c0_629 = arith.constant 0 : index
    %462 = vector.load %arg9[%c4_626, %c1_627, %c2_628, %c0_629] : memref<6x2x6x32xf32, #tpu.memory_space<vmem>>, vector<1x1x4x32xf32>
    %463 = vector.shape_cast %462 : vector<1x1x4x32xf32> to vector<4x32xf32>
    %c2_630 = arith.constant 2 : index
    %c2_631 = arith.constant 2 : index
    %c0_632 = arith.constant 0 : index
    %c0_633 = arith.constant 0 : index
    %464 = vector.load %arg4[%c2_630, %c2_631, %c0_632, %c0_633] : memref<3x3x32x32xf32, #tpu.memory_space<vmem>>, vector<1x1x32x32xf32>
    %465 = vector.shape_cast %464 : vector<1x1x32x32xf32> to vector<32x32xf32>
    %cst_634 = arith.constant dense<0.000000e+00> : vector<4x32xf32>
    %466 = tpu.matmul %463, %465, %cst_634 {dimension_numbers = #tpu.dot_dimension_numbers<[1], [0], [0], [1], [0, 0, 1, 1], [], []>} : vector<4x32xf32>, vector<32x32xf32>, vector<4x32xf32> -> vector<4x32xf32>
    %467 = arith.addf %461, %466 : vector<4x32xf32>
    %c0_635 = arith.constant 0 : index
    %c0_636 = arith.constant 0 : index
    %468 = vector.load %arg5[%c0_635, %c0_636] : memref<1x32xf32, #tpu.memory_space<vmem>>, vector<1x32xf32>
    %469 = vector.broadcast %468 : vector<1x32xf32> to vector<4x32xf32>
    %470 = arith.addf %467, %469 : vector<4x32xf32>
    %c0_637 = arith.constant 0 : index
    %c2_638 = arith.constant 2 : index
    %c1_639 = arith.constant 1 : index
    %c0_640 = arith.constant 0 : index
    %c0_641 = arith.constant 0 : index
    %471 = vector.load %arg7[%c0_637, %c2_638, %c1_639, %c0_640, %c0_641] : memref<1x4x2x4x32xf32, #tpu.memory_space<vmem>>, vector<1x1x1x4x32xf32>
    %472 = vector.shape_cast %471 : vector<1x1x1x4x32xf32> to vector<4x32xf32>
    %473 = vector.shape_cast %470 : vector<4x32xf32> to vector<1x1x1x4x32xf32>
    tpu.vector_store %arg7[%c0_637, %c2_638, %c1_639, %c0_640, %c0_641], %473 {strides = array<i32>} : memref<1x4x2x4x32xf32, #tpu.memory_space<vmem>>, vector<1x1x1x4x32xf32>,
    %c2_642 = arith.constant 2 : index
    %c1_643 = arith.constant 1 : index
    %c0_644 = arith.constant 0 : index
    %c0_645 = arith.constant 0 : index
    %474 = vector.load %arg6[%c2_642, %c1_643, %c0_644, %c0_645] : memref<4x2x37x4xf32, #tpu.memory_space<vmem>>, vector<1x1x37x4xf32>
    %475 = vector.shape_cast %474 : vector<1x1x37x4xf32> to vector<37x4xf32>
    %cst_646 = arith.constant dense<0.000000e+00> : vector<37x32xf32>
    %476 = tpu.matmul %475, %470, %cst_646 {dimension_numbers = #tpu.dot_dimension_numbers<[1], [0], [0], [1], [0, 0, 1, 1], [], []>} : vector<37x4xf32>, vector<4x32xf32>, vector<37x32xf32> -> vector<37x32xf32>
    %477 = arith.addf %412, %476 : vector<37x32xf32>
    %cst_647 = arith.constant 0.000000e+00 : f32
    %478 = vector.broadcast %cst_647 : f32 to vector<4x32xf32>
    %c3_648 = arith.constant 3 : index
    %c0_649 = arith.constant 0 : index
    %c0_650 = arith.constant 0 : index
    %c0_651 = arith.constant 0 : index
    %479 = vector.load %arg9[%c3_648, %c0_649, %c0_650, %c0_651] : memref<6x2x6x32xf32, #tpu.memory_space<vmem>>, vector<1x1x4x32xf32>
    %480 = vector.shape_cast %479 : vector<1x1x4x32xf32> to vector<4x32xf32>
    %c0_652 = arith.constant 0 : index
    %c0_653 = arith.constant 0 : index
    %c0_654 = arith.constant 0 : index
    %c0_655 = arith.constant 0 : index
    %481 = vector.load %arg4[%c0_652, %c0_653, %c0_654, %c0_655] : memref<3x3x32x32xf32, #tpu.memory_space<vmem>>, vector<1x1x32x32xf32>
    %482 = vector.shape_cast %481 : vector<1x1x32x32xf32> to vector<32x32xf32>
    %cst_656 = arith.constant dense<0.000000e+00> : vector<4x32xf32>
    %483 = tpu.matmul %480, %482, %cst_656 {dimension_numbers = #tpu.dot_dimension_numbers<[1], [0], [0], [1], [0, 0, 1, 1], [], []>} : vector<4x32xf32>, vector<32x32xf32>, vector<4x32xf32> -> vector<4x32xf32>
    %484 = arith.addf %478, %483 : vector<4x32xf32>
    %c3_657 = arith.constant 3 : index
    %c0_658 = arith.constant 0 : index
    %c1_659 = arith.constant 1 : index
    %c0_660 = arith.constant 0 : index
    %485 = vector.load %arg9[%c3_657, %c0_658, %c1_659, %c0_660] : memref<6x2x6x32xf32, #tpu.memory_space<vmem>>, vector<1x1x4x32xf32>
    %486 = vector.shape_cast %485 : vector<1x1x4x32xf32> to vector<4x32xf32>
    %c0_661 = arith.constant 0 : index
    %c1_662 = arith.constant 1 : index
    %c0_663 = arith.constant 0 : index
    %c0_664 = arith.constant 0 : index
    %487 = vector.load %arg4[%c0_661, %c1_662, %c0_663, %c0_664] : memref<3x3x32x32xf32, #tpu.memory_space<vmem>>, vector<1x1x32x32xf32>
    %488 = vector.shape_cast %487 : vector<1x1x32x32xf32> to vector<32x32xf32>
    %cst_665 = arith.constant dense<0.000000e+00> : vector<4x32xf32>
    %489 = tpu.matmul %486, %488, %cst_665 {dimension_numbers = #tpu.dot_dimension_numbers<[1], [0], [0], [1], [0, 0, 1, 1], [], []>} : vector<4x32xf32>, vector<32x32xf32>, vector<4x32xf32> -> vector<4x32xf32>
    %490 = arith.addf %484, %489 : vector<4x32xf32>
    %c3_666 = arith.constant 3 : index
    %c0_667 = arith.constant 0 : index
    %c2_668 = arith.constant 2 : index
    %c0_669 = arith.constant 0 : index
    %491 = vector.load %arg9[%c3_666, %c0_667, %c2_668, %c0_669] : memref<6x2x6x32xf32, #tpu.memory_space<vmem>>, vector<1x1x4x32xf32>
    %492 = vector.shape_cast %491 : vector<1x1x4x32xf32> to vector<4x32xf32>
    %c0_670 = arith.constant 0 : index
    %c2_671 = arith.constant 2 : index
    %c0_672 = arith.constant 0 : index
    %c0_673 = arith.constant 0 : index
    %493 = vector.load %arg4[%c0_670, %c2_671, %c0_672, %c0_673] : memref<3x3x32x32xf32, #tpu.memory_space<vmem>>, vector<1x1x32x32xf32>
    %494 = vector.shape_cast %493 : vector<1x1x32x32xf32> to vector<32x32xf32>
    %cst_674 = arith.constant dense<0.000000e+00> : vector<4x32xf32>
    %495 = tpu.matmul %492, %494, %cst_674 {dimension_numbers = #tpu.dot_dimension_numbers<[1], [0], [0], [1], [0, 0, 1, 1], [], []>} : vector<4x32xf32>, vector<32x32xf32>, vector<4x32xf32> -> vector<4x32xf32>
    %496 = arith.addf %490, %495 : vector<4x32xf32>
    %c4_675 = arith.constant 4 : index
    %c0_676 = arith.constant 0 : index
    %c0_677 = arith.constant 0 : index
    %c0_678 = arith.constant 0 : index
    %497 = vector.load %arg9[%c4_675, %c0_676, %c0_677, %c0_678] : memref<6x2x6x32xf32, #tpu.memory_space<vmem>>, vector<1x1x4x32xf32>
    %498 = vector.shape_cast %497 : vector<1x1x4x32xf32> to vector<4x32xf32>
    %c1_679 = arith.constant 1 : index
    %c0_680 = arith.constant 0 : index
    %c0_681 = arith.constant 0 : index
    %c0_682 = arith.constant 0 : index
    %499 = vector.load %arg4[%c1_679, %c0_680, %c0_681, %c0_682] : memref<3x3x32x32xf32, #tpu.memory_space<vmem>>, vector<1x1x32x32xf32>
    %500 = vector.shape_cast %499 : vector<1x1x32x32xf32> to vector<32x32xf32>
    %cst_683 = arith.constant dense<0.000000e+00> : vector<4x32xf32>
    %501 = tpu.matmul %498, %500, %cst_683 {dimension_numbers = #tpu.dot_dimension_numbers<[1], [0], [0], [1], [0, 0, 1, 1], [], []>} : vector<4x32xf32>, vector<32x32xf32>, vector<4x32xf32> -> vector<4x32xf32>
    %502 = arith.addf %496, %501 : vector<4x32xf32>
    %c4_684 = arith.constant 4 : index
    %c0_685 = arith.constant 0 : index
    %c1_686 = arith.constant 1 : index
    %c0_687 = arith.constant 0 : index
    %503 = vector.load %arg9[%c4_684, %c0_685, %c1_686, %c0_687] : memref<6x2x6x32xf32, #tpu.memory_space<vmem>>, vector<1x1x4x32xf32>
    %504 = vector.shape_cast %503 : vector<1x1x4x32xf32> to vector<4x32xf32>
    %c1_688 = arith.constant 1 : index
    %c1_689 = arith.constant 1 : index
    %c0_690 = arith.constant 0 : index
    %c0_691 = arith.constant 0 : index
    %505 = vector.load %arg4[%c1_688, %c1_689, %c0_690, %c0_691] : memref<3x3x32x32xf32, #tpu.memory_space<vmem>>, vector<1x1x32x32xf32>
    %506 = vector.shape_cast %505 : vector<1x1x32x32xf32> to vector<32x32xf32>
    %cst_692 = arith.constant dense<0.000000e+00> : vector<4x32xf32>
    %507 = tpu.matmul %504, %506, %cst_692 {dimension_numbers = #tpu.dot_dimension_numbers<[1], [0], [0], [1], [0, 0, 1, 1], [], []>} : vector<4x32xf32>, vector<32x32xf32>, vector<4x32xf32> -> vector<4x32xf32>
    %508 = arith.addf %502, %507 : vector<4x32xf32>
    %c4_693 = arith.constant 4 : index
    %c0_694 = arith.constant 0 : index
    %c2_695 = arith.constant 2 : index
    %c0_696 = arith.constant 0 : index
    %509 = vector.load %arg9[%c4_693, %c0_694, %c2_695, %c0_696] : memref<6x2x6x32xf32, #tpu.memory_space<vmem>>, vector<1x1x4x32xf32>
    %510 = vector.shape_cast %509 : vector<1x1x4x32xf32> to vector<4x32xf32>
    %c1_697 = arith.constant 1 : index
    %c2_698 = arith.constant 2 : index
    %c0_699 = arith.constant 0 : index
    %c0_700 = arith.constant 0 : index
    %511 = vector.load %arg4[%c1_697, %c2_698, %c0_699, %c0_700] : memref<3x3x32x32xf32, #tpu.memory_space<vmem>>, vector<1x1x32x32xf32>
    %512 = vector.shape_cast %511 : vector<1x1x32x32xf32> to vector<32x32xf32>
    %cst_701 = arith.constant dense<0.000000e+00> : vector<4x32xf32>
    %513 = tpu.matmul %510, %512, %cst_701 {dimension_numbers = #tpu.dot_dimension_numbers<[1], [0], [0], [1], [0, 0, 1, 1], [], []>} : vector<4x32xf32>, vector<32x32xf32>, vector<4x32xf32> -> vector<4x32xf32>
    %514 = arith.addf %508, %513 : vector<4x32xf32>
    %c5 = arith.constant 5 : index
    %c0_702 = arith.constant 0 : index
    %c0_703 = arith.constant 0 : index
    %c0_704 = arith.constant 0 : index
    %515 = vector.load %arg9[%c5, %c0_702, %c0_703, %c0_704] : memref<6x2x6x32xf32, #tpu.memory_space<vmem>>, vector<1x1x4x32xf32>
    %516 = vector.shape_cast %515 : vector<1x1x4x32xf32> to vector<4x32xf32>
    %c2_705 = arith.constant 2 : index
    %c0_706 = arith.constant 0 : index
    %c0_707 = arith.constant 0 : index
    %c0_708 = arith.constant 0 : index
    %517 = vector.load %arg4[%c2_705, %c0_706, %c0_707, %c0_708] : memref<3x3x32x32xf32, #tpu.memory_space<vmem>>, vector<1x1x32x32xf32>
    %518 = vector.shape_cast %517 : vector<1x1x32x32xf32> to vector<32x32xf32>
    %cst_709 = arith.constant dense<0.000000e+00> : vector<4x32xf32>
    %519 = tpu.matmul %516, %518, %cst_709 {dimension_numbers = #tpu.dot_dimension_numbers<[1], [0], [0], [1], [0, 0, 1, 1], [], []>} : vector<4x32xf32>, vector<32x32xf32>, vector<4x32xf32> -> vector<4x32xf32>
    %520 = arith.addf %514, %519 : vector<4x32xf32>
    %c5_710 = arith.constant 5 : index
    %c0_711 = arith.constant 0 : index
    %c1_712 = arith.constant 1 : index
    %c0_713 = arith.constant 0 : index
    %521 = vector.load %arg9[%c5_710, %c0_711, %c1_712, %c0_713] : memref<6x2x6x32xf32, #tpu.memory_space<vmem>>, vector<1x1x4x32xf32>
    %522 = vector.shape_cast %521 : vector<1x1x4x32xf32> to vector<4x32xf32>
    %c2_714 = arith.constant 2 : index
    %c1_715 = arith.constant 1 : index
    %c0_716 = arith.constant 0 : index
    %c0_717 = arith.constant 0 : index
    %523 = vector.load %arg4[%c2_714, %c1_715, %c0_716, %c0_717] : memref<3x3x32x32xf32, #tpu.memory_space<vmem>>, vector<1x1x32x32xf32>
    %524 = vector.shape_cast %523 : vector<1x1x32x32xf32> to vector<32x32xf32>
    %cst_718 = arith.constant dense<0.000000e+00> : vector<4x32xf32>
    %525 = tpu.matmul %522, %524, %cst_718 {dimension_numbers = #tpu.dot_dimension_numbers<[1], [0], [0], [1], [0, 0, 1, 1], [], []>} : vector<4x32xf32>, vector<32x32xf32>, vector<4x32xf32> -> vector<4x32xf32>
    %526 = arith.addf %520, %525 : vector<4x32xf32>
    %c5_719 = arith.constant 5 : index
    %c0_720 = arith.constant 0 : index
    %c2_721 = arith.constant 2 : index
    %c0_722 = arith.constant 0 : index
    %527 = vector.load %arg9[%c5_719, %c0_720, %c2_721, %c0_722] : memref<6x2x6x32xf32, #tpu.memory_space<vmem>>, vector<1x1x4x32xf32>
    %528 = vector.shape_cast %527 : vector<1x1x4x32xf32> to vector<4x32xf32>
    %c2_723 = arith.constant 2 : index
    %c2_724 = arith.constant 2 : index
    %c0_725 = arith.constant 0 : index
    %c0_726 = arith.constant 0 : index
    %529 = vector.load %arg4[%c2_723, %c2_724, %c0_725, %c0_726] : memref<3x3x32x32xf32, #tpu.memory_space<vmem>>, vector<1x1x32x32xf32>
    %530 = vector.shape_cast %529 : vector<1x1x32x32xf32> to vector<32x32xf32>
    %cst_727 = arith.constant dense<0.000000e+00> : vector<4x32xf32>
    %531 = tpu.matmul %528, %530, %cst_727 {dimension_numbers = #tpu.dot_dimension_numbers<[1], [0], [0], [1], [0, 0, 1, 1], [], []>} : vector<4x32xf32>, vector<32x32xf32>, vector<4x32xf32> -> vector<4x32xf32>
    %532 = arith.addf %526, %531 : vector<4x32xf32>
    %c0_728 = arith.constant 0 : index
    %c0_729 = arith.constant 0 : index
    %533 = vector.load %arg5[%c0_728, %c0_729] : memref<1x32xf32, #tpu.memory_space<vmem>>, vector<1x32xf32>
    %534 = vector.broadcast %533 : vector<1x32xf32> to vector<4x32xf32>
    %535 = arith.addf %532, %534 : vector<4x32xf32>
    %c0_730 = arith.constant 0 : index
    %c3_731 = arith.constant 3 : index
    %c0_732 = arith.constant 0 : index
    %c0_733 = arith.constant 0 : index
    %c0_734 = arith.constant 0 : index
    %536 = vector.load %arg7[%c0_730, %c3_731, %c0_732, %c0_733, %c0_734] : memref<1x4x2x4x32xf32, #tpu.memory_space<vmem>>, vector<1x1x1x4x32xf32>
    %537 = vector.shape_cast %536 : vector<1x1x1x4x32xf32> to vector<4x32xf32>
    %538 = vector.shape_cast %535 : vector<4x32xf32> to vector<1x1x1x4x32xf32>
    tpu.vector_store %arg7[%c0_730, %c3_731, %c0_732, %c0_733, %c0_734], %538 {strides = array<i32>} : memref<1x4x2x4x32xf32, #tpu.memory_space<vmem>>, vector<1x1x1x4x32xf32>,
    %c3_735 = arith.constant 3 : index
    %c0_736 = arith.constant 0 : index
    %c0_737 = arith.constant 0 : index
    %c0_738 = arith.constant 0 : index
    %539 = vector.load %arg6[%c3_735, %c0_736, %c0_737, %c0_738] : memref<4x2x37x4xf32, #tpu.memory_space<vmem>>, vector<1x1x37x4xf32>
    %540 = vector.shape_cast %539 : vector<1x1x37x4xf32> to vector<37x4xf32>
    %cst_739 = arith.constant dense<0.000000e+00> : vector<37x32xf32>
    %541 = tpu.matmul %540, %535, %cst_739 {dimension_numbers = #tpu.dot_dimension_numbers<[1], [0], [0], [1], [0, 0, 1, 1], [], []>} : vector<37x4xf32>, vector<4x32xf32>, vector<37x32xf32> -> vector<37x32xf32>
    %542 = arith.addf %477, %541 : vector<37x32xf32>
    %cst_740 = arith.constant 0.000000e+00 : f32
    %543 = vector.broadcast %cst_740 : f32 to vector<4x32xf32>
    %c3_741 = arith.constant 3 : index
    %c1_742 = arith.constant 1 : index
    %c0_743 = arith.constant 0 : index
    %c0_744 = arith.constant 0 : index
    %544 = vector.load %arg9[%c3_741, %c1_742, %c0_743, %c0_744] : memref<6x2x6x32xf32, #tpu.memory_space<vmem>>, vector<1x1x4x32xf32>
    %545 = vector.shape_cast %544 : vector<1x1x4x32xf32> to vector<4x32xf32>
    %c0_745 = arith.constant 0 : index
    %c0_746 = arith.constant 0 : index
    %c0_747 = arith.constant 0 : index
    %c0_748 = arith.constant 0 : index
    %546 = vector.load %arg4[%c0_745, %c0_746, %c0_747, %c0_748] : memref<3x3x32x32xf32, #tpu.memory_space<vmem>>, vector<1x1x32x32xf32>
    %547 = vector.shape_cast %546 : vector<1x1x32x32xf32> to vector<32x32xf32>
    %cst_749 = arith.constant dense<0.000000e+00> : vector<4x32xf32>
    %548 = tpu.matmul %545, %547, %cst_749 {dimension_numbers = #tpu.dot_dimension_numbers<[1], [0], [0], [1], [0, 0, 1, 1], [], []>} : vector<4x32xf32>, vector<32x32xf32>, vector<4x32xf32> -> vector<4x32xf32>
    %549 = arith.addf %543, %548 : vector<4x32xf32>
    %c3_750 = arith.constant 3 : index
    %c1_751 = arith.constant 1 : index
    %c1_752 = arith.constant 1 : index
    %c0_753 = arith.constant 0 : index
    %550 = vector.load %arg9[%c3_750, %c1_751, %c1_752, %c0_753] : memref<6x2x6x32xf32, #tpu.memory_space<vmem>>, vector<1x1x4x32xf32>
    %551 = vector.shape_cast %550 : vector<1x1x4x32xf32> to vector<4x32xf32>
    %c0_754 = arith.constant 0 : index
    %c1_755 = arith.constant 1 : index
    %c0_756 = arith.constant 0 : index
    %c0_757 = arith.constant 0 : index
    %552 = vector.load %arg4[%c0_754, %c1_755, %c0_756, %c0_757] : memref<3x3x32x32xf32, #tpu.memory_space<vmem>>, vector<1x1x32x32xf32>
    %553 = vector.shape_cast %552 : vector<1x1x32x32xf32> to vector<32x32xf32>
    %cst_758 = arith.constant dense<0.000000e+00> : vector<4x32xf32>
    %554 = tpu.matmul %551, %553, %cst_758 {dimension_numbers = #tpu.dot_dimension_numbers<[1], [0], [0], [1], [0, 0, 1, 1], [], []>} : vector<4x32xf32>, vector<32x32xf32>, vector<4x32xf32> -> vector<4x32xf32>
    %555 = arith.addf %549, %554 : vector<4x32xf32>
    %c3_759 = arith.constant 3 : index
    %c1_760 = arith.constant 1 : index
    %c2_761 = arith.constant 2 : index
    %c0_762 = arith.constant 0 : index
    %556 = vector.load %arg9[%c3_759, %c1_760, %c2_761, %c0_762] : memref<6x2x6x32xf32, #tpu.memory_space<vmem>>, vector<1x1x4x32xf32>
    %557 = vector.shape_cast %556 : vector<1x1x4x32xf32> to vector<4x32xf32>
    %c0_763 = arith.constant 0 : index
    %c2_764 = arith.constant 2 : index
    %c0_765 = arith.constant 0 : index
    %c0_766 = arith.constant 0 : index
    %558 = vector.load %arg4[%c0_763, %c2_764, %c0_765, %c0_766] : memref<3x3x32x32xf32, #tpu.memory_space<vmem>>, vector<1x1x32x32xf32>
    %559 = vector.shape_cast %558 : vector<1x1x32x32xf32> to vector<32x32xf32>
    %cst_767 = arith.constant dense<0.000000e+00> : vector<4x32xf32>
    %560 = tpu.matmul %557, %559, %cst_767 {dimension_numbers = #tpu.dot_dimension_numbers<[1], [0], [0], [1], [0, 0, 1, 1], [], []>} : vector<4x32xf32>, vector<32x32xf32>, vector<4x32xf32> -> vector<4x32xf32>
    %561 = arith.addf %555, %560 : vector<4x32xf32>
    %c4_768 = arith.constant 4 : index
    %c1_769 = arith.constant 1 : index
    %c0_770 = arith.constant 0 : index
    %c0_771 = arith.constant 0 : index
    %562 = vector.load %arg9[%c4_768, %c1_769, %c0_770, %c0_771] : memref<6x2x6x32xf32, #tpu.memory_space<vmem>>, vector<1x1x4x32xf32>
    %563 = vector.shape_cast %562 : vector<1x1x4x32xf32> to vector<4x32xf32>
    %c1_772 = arith.constant 1 : index
    %c0_773 = arith.constant 0 : index
    %c0_774 = arith.constant 0 : index
    %c0_775 = arith.constant 0 : index
    %564 = vector.load %arg4[%c1_772, %c0_773, %c0_774, %c0_775] : memref<3x3x32x32xf32, #tpu.memory_space<vmem>>, vector<1x1x32x32xf32>
    %565 = vector.shape_cast %564 : vector<1x1x32x32xf32> to vector<32x32xf32>
    %cst_776 = arith.constant dense<0.000000e+00> : vector<4x32xf32>
    %566 = tpu.matmul %563, %565, %cst_776 {dimension_numbers = #tpu.dot_dimension_numbers<[1], [0], [0], [1], [0, 0, 1, 1], [], []>} : vector<4x32xf32>, vector<32x32xf32>, vector<4x32xf32> -> vector<4x32xf32>
    %567 = arith.addf %561, %566 : vector<4x32xf32>
    %c4_777 = arith.constant 4 : index
    %c1_778 = arith.constant 1 : index
    %c1_779 = arith.constant 1 : index
    %c0_780 = arith.constant 0 : index
    %568 = vector.load %arg9[%c4_777, %c1_778, %c1_779, %c0_780] : memref<6x2x6x32xf32, #tpu.memory_space<vmem>>, vector<1x1x4x32xf32>
    %569 = vector.shape_cast %568 : vector<1x1x4x32xf32> to vector<4x32xf32>
    %c1_781 = arith.constant 1 : index
    %c1_782 = arith.constant 1 : index
    %c0_783 = arith.constant 0 : index
    %c0_784 = arith.constant 0 : index
    %570 = vector.load %arg4[%c1_781, %c1_782, %c0_783, %c0_784] : memref<3x3x32x32xf32, #tpu.memory_space<vmem>>, vector<1x1x32x32xf32>
    %571 = vector.shape_cast %570 : vector<1x1x32x32xf32> to vector<32x32xf32>
    %cst_785 = arith.constant dense<0.000000e+00> : vector<4x32xf32>
    %572 = tpu.matmul %569, %571, %cst_785 {dimension_numbers = #tpu.dot_dimension_numbers<[1], [0], [0], [1], [0, 0, 1, 1], [], []>} : vector<4x32xf32>, vector<32x32xf32>, vector<4x32xf32> -> vector<4x32xf32>
    %573 = arith.addf %567, %572 : vector<4x32xf32>
    %c4_786 = arith.constant 4 : index
    %c1_787 = arith.constant 1 : index
    %c2_788 = arith.constant 2 : index
    %c0_789 = arith.constant 0 : index
    %574 = vector.load %arg9[%c4_786, %c1_787, %c2_788, %c0_789] : memref<6x2x6x32xf32, #tpu.memory_space<vmem>>, vector<1x1x4x32xf32>
    %575 = vector.shape_cast %574 : vector<1x1x4x32xf32> to vector<4x32xf32>
    %c1_790 = arith.constant 1 : index
    %c2_791 = arith.constant 2 : index
    %c0_792 = arith.constant 0 : index
    %c0_793 = arith.constant 0 : index
    %576 = vector.load %arg4[%c1_790, %c2_791, %c0_792, %c0_793] : memref<3x3x32x32xf32, #tpu.memory_space<vmem>>, vector<1x1x32x32xf32>
    %577 = vector.shape_cast %576 : vector<1x1x32x32xf32> to vector<32x32xf32>
    %cst_794 = arith.constant dense<0.000000e+00> : vector<4x32xf32>
    %578 = tpu.matmul %575, %577, %cst_794 {dimension_numbers = #tpu.dot_dimension_numbers<[1], [0], [0], [1], [0, 0, 1, 1], [], []>} : vector<4x32xf32>, vector<32x32xf32>, vector<4x32xf32> -> vector<4x32xf32>
    %579 = arith.addf %573, %578 : vector<4x32xf32>
    %c5_795 = arith.constant 5 : index
    %c1_796 = arith.constant 1 : index
    %c0_797 = arith.constant 0 : index
    %c0_798 = arith.constant 0 : index
    %580 = vector.load %arg9[%c5_795, %c1_796, %c0_797, %c0_798] : memref<6x2x6x32xf32, #tpu.memory_space<vmem>>, vector<1x1x4x32xf32>
    %581 = vector.shape_cast %580 : vector<1x1x4x32xf32> to vector<4x32xf32>
    %c2_799 = arith.constant 2 : index
    %c0_800 = arith.constant 0 : index
    %c0_801 = arith.constant 0 : index
    %c0_802 = arith.constant 0 : index
    %582 = vector.load %arg4[%c2_799, %c0_800, %c0_801, %c0_802] : memref<3x3x32x32xf32, #tpu.memory_space<vmem>>, vector<1x1x32x32xf32>
    %583 = vector.shape_cast %582 : vector<1x1x32x32xf32> to vector<32x32xf32>
    %cst_803 = arith.constant dense<0.000000e+00> : vector<4x32xf32>
    %584 = tpu.matmul %581, %583, %cst_803 {dimension_numbers = #tpu.dot_dimension_numbers<[1], [0], [0], [1], [0, 0, 1, 1], [], []>} : vector<4x32xf32>, vector<32x32xf32>, vector<4x32xf32> -> vector<4x32xf32>
    %585 = arith.addf %579, %584 : vector<4x32xf32>
    %c5_804 = arith.constant 5 : index
    %c1_805 = arith.constant 1 : index
    %c1_806 = arith.constant 1 : index
    %c0_807 = arith.constant 0 : index
    %586 = vector.load %arg9[%c5_804, %c1_805, %c1_806, %c0_807] : memref<6x2x6x32xf32, #tpu.memory_space<vmem>>, vector<1x1x4x32xf32>
    %587 = vector.shape_cast %586 : vector<1x1x4x32xf32> to vector<4x32xf32>
    %c2_808 = arith.constant 2 : index
    %c1_809 = arith.constant 1 : index
    %c0_810 = arith.constant 0 : index
    %c0_811 = arith.constant 0 : index
    %588 = vector.load %arg4[%c2_808, %c1_809, %c0_810, %c0_811] : memref<3x3x32x32xf32, #tpu.memory_space<vmem>>, vector<1x1x32x32xf32>
    %589 = vector.shape_cast %588 : vector<1x1x32x32xf32> to vector<32x32xf32>
    %cst_812 = arith.constant dense<0.000000e+00> : vector<4x32xf32>
    %590 = tpu.matmul %587, %589, %cst_812 {dimension_numbers = #tpu.dot_dimension_numbers<[1], [0], [0], [1], [0, 0, 1, 1], [], []>} : vector<4x32xf32>, vector<32x32xf32>, vector<4x32xf32> -> vector<4x32xf32>
    %591 = arith.addf %585, %590 : vector<4x32xf32>
    %c5_813 = arith.constant 5 : index
    %c1_814 = arith.constant 1 : index
    %c2_815 = arith.constant 2 : index
    %c0_816 = arith.constant 0 : index
    %592 = vector.load %arg9[%c5_813, %c1_814, %c2_815, %c0_816] : memref<6x2x6x32xf32, #tpu.memory_space<vmem>>, vector<1x1x4x32xf32>
    %593 = vector.shape_cast %592 : vector<1x1x4x32xf32> to vector<4x32xf32>
    %c2_817 = arith.constant 2 : index
    %c2_818 = arith.constant 2 : index
    %c0_819 = arith.constant 0 : index
    %c0_820 = arith.constant 0 : index
    %594 = vector.load %arg4[%c2_817, %c2_818, %c0_819, %c0_820] : memref<3x3x32x32xf32, #tpu.memory_space<vmem>>, vector<1x1x32x32xf32>
    %595 = vector.shape_cast %594 : vector<1x1x32x32xf32> to vector<32x32xf32>
    %cst_821 = arith.constant dense<0.000000e+00> : vector<4x32xf32>
    %596 = tpu.matmul %593, %595, %cst_821 {dimension_numbers = #tpu.dot_dimension_numbers<[1], [0], [0], [1], [0, 0, 1, 1], [], []>} : vector<4x32xf32>, vector<32x32xf32>, vector<4x32xf32> -> vector<4x32xf32>
    %597 = arith.addf %591, %596 : vector<4x32xf32>
    %c0_822 = arith.constant 0 : index
    %c0_823 = arith.constant 0 : index
    %598 = vector.load %arg5[%c0_822, %c0_823] : memref<1x32xf32, #tpu.memory_space<vmem>>, vector<1x32xf32>
    %599 = vector.broadcast %598 : vector<1x32xf32> to vector<4x32xf32>
    %600 = arith.addf %597, %599 : vector<4x32xf32>
    %c0_824 = arith.constant 0 : index
    %c3_825 = arith.constant 3 : index
    %c1_826 = arith.constant 1 : index
    %c0_827 = arith.constant 0 : index
    %c0_828 = arith.constant 0 : index
    %601 = vector.load %arg7[%c0_824, %c3_825, %c1_826, %c0_827, %c0_828] : memref<1x4x2x4x32xf32, #tpu.memory_space<vmem>>, vector<1x1x1x4x32xf32>
    %602 = vector.shape_cast %601 : vector<1x1x1x4x32xf32> to vector<4x32xf32>
    %603 = vector.shape_cast %600 : vector<4x32xf32> to vector<1x1x1x4x32xf32>
    tpu.vector_store %arg7[%c0_824, %c3_825, %c1_826, %c0_827, %c0_828], %603 {strides = array<i32>} : memref<1x4x2x4x32xf32, #tpu.memory_space<vmem>>, vector<1x1x1x4x32xf32>,
    %c3_829 = arith.constant 3 : index
    %c1_830 = arith.constant 1 : index
    %c0_831 = arith.constant 0 : index
    %c0_832 = arith.constant 0 : index
    %604 = vector.load %arg6[%c3_829, %c1_830, %c0_831, %c0_832] : memref<4x2x37x4xf32, #tpu.memory_space<vmem>>, vector<1x1x37x4xf32>
    %605 = vector.shape_cast %604 : vector<1x1x37x4xf32> to vector<37x4xf32>
    %cst_833 = arith.constant dense<0.000000e+00> : vector<37x32xf32>
    %606 = tpu.matmul %605, %600, %cst_833 {dimension_numbers = #tpu.dot_dimension_numbers<[1], [0], [0], [1], [0, 0, 1, 1], [], []>} : vector<37x4xf32>, vector<4x32xf32>, vector<37x32xf32> -> vector<37x32xf32>
    %607 = arith.addf %542, %606 : vector<37x32xf32>
    %c0_834 = arith.constant 0 : index
    %c0_835 = arith.constant 0 : index
    %c0_836 = arith.constant 0 : index
    %608 = vector.load %arg8[%c0_834, %c0_835, %c0_836] : memref<1x37x32xf32, #tpu.memory_space<vmem>>, vector<1x37x32xf32>
    %609 = vector.shape_cast %608 : vector<1x37x32xf32> to vector<37x32xf32>
    %610 = vector.shape_cast %607 : vector<37x32xf32> to vector<1x37x32xf32>
    tpu.vector_store %arg8[%c0_834, %c0_835, %c0_836], %610 {strides = array<i32>} : memref<1x37x32xf32, #tpu.memory_space<vmem>>, vector<1x37x32xf32>,
    return
  }
  func.func @transform_0(%arg0: i32) -> (i32, i32, i32, i32, i32) {
    %c0_i32 = arith.constant 0 : i32
    %c0_i32_0 = arith.constant 0 : i32
    %c0_i32_1 = arith.constant 0 : i32
    %c0_i32_2 = arith.constant 0 : i32
    %c0_i32_3 = arith.constant 0 : i32
    return %arg0, %c0_i32, %c0_i32_0, %c0_i32_1, %c0_i32_2 : i32, i32, i32, i32, i32
  }
  func.func @transform_1(%arg0: i32) -> (i32, i32, i32, i32) {
    %c0_i32 = arith.constant 0 : i32
    %c0_i32_0 = arith.constant 0 : i32
    %c0_i32_1 = arith.constant 0 : i32
    %c0_i32_2 = arith.constant 0 : i32
    %c0_i32_3 = arith.constant 0 : i32
    return %c0_i32, %c0_i32_0, %c0_i32_1, %c0_i32_2 : i32, i32, i32, i32
  }
  func.func @transform_2(%arg0: i32) -> (i32, i32) {
    %c0_i32 = arith.constant 0 : i32
    %c0_i32_0 = arith.constant 0 : i32
    %c0_i32_1 = arith.constant 0 : i32
    return %c0_i32, %c0_i32_0 : i32, i32
  }
  func.func @transform_3(%arg0: i32) -> (i32, i32, i32, i32) {
    %c0_i32 = arith.constant 0 : i32
    %c0_i32_0 = arith.constant 0 : i32
    %c0_i32_1 = arith.constant 0 : i32
    %c0_i32_2 = arith.constant 0 : i32
    %c0_i32_3 = arith.constant 0 : i32
    return %c0_i32, %c0_i32_0, %c0_i32_1, %c0_i32_2 : i32, i32, i32, i32
  }
  func.func @transform_4(%arg0: i32) -> (i32, i32) {
    %c0_i32 = arith.constant 0 : i32
    %c0_i32_0 = arith.constant 0 : i32
    %c0_i32_1 = arith.constant 0 : i32
    return %c0_i32, %c0_i32_0 : i32, i32
  }
  func.func @transform_5(%arg0: i32) -> (i32, i32, i32, i32) {
    %c0_i32 = arith.constant 0 : i32
    %c0_i32_0 = arith.constant 0 : i32
    %c0_i32_1 = arith.constant 0 : i32
    %c0_i32_2 = arith.constant 0 : i32
    %c0_i32_3 = arith.constant 0 : i32
    return %c0_i32, %c0_i32_0, %c0_i32_1, %c0_i32_2 : i32, i32, i32, i32
  }
  func.func @transform_6(%arg0: i32) -> (i32, i32, i32, i32, i32) {
    %c0_i32 = arith.constant 0 : i32
    %c0_i32_0 = arith.constant 0 : i32
    %c0_i32_1 = arith.constant 0 : i32
    %c0_i32_2 = arith.constant 0 : i32
    %c0_i32_3 = arith.constant 0 : i32
    return %arg0, %c0_i32, %c0_i32_0, %c0_i32_1, %c0_i32_2 : i32, i32, i32, i32, i32
  }
  func.func @transform_7(%arg0: i32) -> (i32, i32, i32) {
    %c0_i32 = arith.constant 0 : i32
    %c0_i32_0 = arith.constant 0 : i32
    %c0_i32_1 = arith.constant 0 : i32
    return %arg0, %c0_i32, %c0_i32_0 : i32, i32, i32
  }
}

module attributes {stable_mosaic.version = 11 : i64} {
  func.func @kernel(%arg0: memref<32x8x32xf32, #tpu.memory_space<vmem>>, %arg1: memref<37x8x32xf32, #tpu.memory_space<vmem>>, %arg2: memref<3x4x32x32xf32, #tpu.memory_space<vmem>>, %arg3: memref<3x4x32x32xf32, #tpu.memory_space<vmem>>, %arg4: memref<3x4x1x32xf32, #tpu.memory_space<vmem>>, %arg5: memref<32x1xf32, #tpu.memory_space<vmem>>, %arg6: memref<1x1xf32, #tpu.memory_space<vmem>>, %arg7: memref<8x1xf32, #tpu.memory_space<vmem>>, %arg8: memref<4x32x8x32xf32, #tpu.memory_space<vmem>>) attributes {dimension_semantics = [], scalar_prefetch = 0 : i64, scratch_operands = 1 : i64, tpu.core_type = #tpu.core_type<tc>} {
    %c0 = arith.constant 0 : index
    %c0_0 = arith.constant 0 : index
    %c0_1 = arith.constant 0 : index
    %0 = vector.load %arg0[%c0, %c0_0, %c0_1] : memref<32x8x32xf32, #tpu.memory_space<vmem>>, vector<32x8x32xf32>
    %1 = vector.shape_cast %0 : vector<32x8x32xf32> to vector<256x32xf32>
    %c0_2 = arith.constant 0 : index
    %c0_3 = arith.constant 0 : index
    %c0_4 = arith.constant 0 : index
    %c0_5 = arith.constant 0 : index
    %2 = vector.load %arg2[%c0_2, %c0_3, %c0_4, %c0_5] : memref<3x4x32x32xf32, #tpu.memory_space<vmem>>, vector<1x1x32x32xf32>
    %3 = vector.shape_cast %2 : vector<1x1x32x32xf32> to vector<32x32xf32>
    %cst = arith.constant dense<0.000000e+00> : vector<256x32xf32>
    %4 = tpu.matmul %1, %3, %cst {dimension_numbers = #tpu.dot_dimension_numbers<[1], [0], [0], [1], [0, 0, 1, 1], [], []>} : vector<256x32xf32>, vector<32x32xf32>, vector<256x32xf32> -> vector<256x32xf32>
    %c0_6 = arith.constant 0 : index
    %c0_7 = arith.constant 0 : index
    %c0_8 = arith.constant 0 : index
    %c0_9 = arith.constant 0 : index
    %5 = vector.load %arg4[%c0_6, %c0_7, %c0_8, %c0_9] : memref<3x4x1x32xf32, #tpu.memory_space<vmem>>, vector<1x1x1x32xf32>
    %6 = vector.shape_cast %5 : vector<1x1x1x32xf32> to vector<1x32xf32>
    %7 = vector.broadcast %6 : vector<1x32xf32> to vector<256x32xf32>
    %8 = arith.addf %4, %7 : vector<256x32xf32>
    %9 = vector.shape_cast %8 : vector<256x32xf32> to vector<32x8x32xf32>
    %c0_10 = arith.constant 0 : index
    %c0_11 = arith.constant 0 : index
    %c0_12 = arith.constant 0 : index
    %c0_13 = arith.constant 0 : index
    %10 = vector.load %arg8[%c0_10, %c0_11, %c0_12, %c0_13] : memref<4x32x8x32xf32, #tpu.memory_space<vmem>>, vector<1x32x8x32xf32>
    %11 = vector.shape_cast %10 : vector<1x32x8x32xf32> to vector<32x8x32xf32>
    %12 = vector.shape_cast %9 : vector<32x8x32xf32> to vector<1x32x8x32xf32>
    tpu.vector_store %arg8[%c0_10, %c0_11, %c0_12, %c0_13], %12 {strides = array<i32>} : memref<4x32x8x32xf32, #tpu.memory_space<vmem>>, vector<1x32x8x32xf32>,
    %c0_14 = arith.constant 0 : index
    %c1 = arith.constant 1 : index
    %c0_15 = arith.constant 0 : index
    %c0_16 = arith.constant 0 : index
    %13 = vector.load %arg2[%c0_14, %c1, %c0_15, %c0_16] : memref<3x4x32x32xf32, #tpu.memory_space<vmem>>, vector<1x1x32x32xf32>
    %14 = vector.shape_cast %13 : vector<1x1x32x32xf32> to vector<32x32xf32>
    %cst_17 = arith.constant dense<0.000000e+00> : vector<256x32xf32>
    %15 = tpu.matmul %1, %14, %cst_17 {dimension_numbers = #tpu.dot_dimension_numbers<[1], [0], [0], [1], [0, 0, 1, 1], [], []>} : vector<256x32xf32>, vector<32x32xf32>, vector<256x32xf32> -> vector<256x32xf32>
    %c0_18 = arith.constant 0 : index
    %c1_19 = arith.constant 1 : index
    %c0_20 = arith.constant 0 : index
    %c0_21 = arith.constant 0 : index
    %16 = vector.load %arg4[%c0_18, %c1_19, %c0_20, %c0_21] : memref<3x4x1x32xf32, #tpu.memory_space<vmem>>, vector<1x1x1x32xf32>
    %17 = vector.shape_cast %16 : vector<1x1x1x32xf32> to vector<1x32xf32>
    %18 = vector.broadcast %17 : vector<1x32xf32> to vector<256x32xf32>
    %19 = arith.addf %15, %18 : vector<256x32xf32>
    %20 = vector.shape_cast %19 : vector<256x32xf32> to vector<32x8x32xf32>
    %c1_22 = arith.constant 1 : index
    %c0_23 = arith.constant 0 : index
    %c0_24 = arith.constant 0 : index
    %c0_25 = arith.constant 0 : index
    %21 = vector.load %arg8[%c1_22, %c0_23, %c0_24, %c0_25] : memref<4x32x8x32xf32, #tpu.memory_space<vmem>>, vector<1x32x8x32xf32>
    %22 = vector.shape_cast %21 : vector<1x32x8x32xf32> to vector<32x8x32xf32>
    %23 = vector.shape_cast %20 : vector<32x8x32xf32> to vector<1x32x8x32xf32>
    tpu.vector_store %arg8[%c1_22, %c0_23, %c0_24, %c0_25], %23 {strides = array<i32>} : memref<4x32x8x32xf32, #tpu.memory_space<vmem>>, vector<1x32x8x32xf32>,
    %c0_26 = arith.constant 0 : index
    %c2 = arith.constant 2 : index
    %c0_27 = arith.constant 0 : index
    %c0_28 = arith.constant 0 : index
    %24 = vector.load %arg2[%c0_26, %c2, %c0_27, %c0_28] : memref<3x4x32x32xf32, #tpu.memory_space<vmem>>, vector<1x1x32x32xf32>
    %25 = vector.shape_cast %24 : vector<1x1x32x32xf32> to vector<32x32xf32>
    %cst_29 = arith.constant dense<0.000000e+00> : vector<256x32xf32>
    %26 = tpu.matmul %1, %25, %cst_29 {dimension_numbers = #tpu.dot_dimension_numbers<[1], [0], [0], [1], [0, 0, 1, 1], [], []>} : vector<256x32xf32>, vector<32x32xf32>, vector<256x32xf32> -> vector<256x32xf32>
    %c0_30 = arith.constant 0 : index
    %c2_31 = arith.constant 2 : index
    %c0_32 = arith.constant 0 : index
    %c0_33 = arith.constant 0 : index
    %27 = vector.load %arg4[%c0_30, %c2_31, %c0_32, %c0_33] : memref<3x4x1x32xf32, #tpu.memory_space<vmem>>, vector<1x1x1x32xf32>
    %28 = vector.shape_cast %27 : vector<1x1x1x32xf32> to vector<1x32xf32>
    %29 = vector.broadcast %28 : vector<1x32xf32> to vector<256x32xf32>
    %30 = arith.addf %26, %29 : vector<256x32xf32>
    %31 = vector.shape_cast %30 : vector<256x32xf32> to vector<32x8x32xf32>
    %c2_34 = arith.constant 2 : index
    %c0_35 = arith.constant 0 : index
    %c0_36 = arith.constant 0 : index
    %c0_37 = arith.constant 0 : index
    %32 = vector.load %arg8[%c2_34, %c0_35, %c0_36, %c0_37] : memref<4x32x8x32xf32, #tpu.memory_space<vmem>>, vector<1x32x8x32xf32>
    %33 = vector.shape_cast %32 : vector<1x32x8x32xf32> to vector<32x8x32xf32>
    %34 = vector.shape_cast %31 : vector<32x8x32xf32> to vector<1x32x8x32xf32>
    tpu.vector_store %arg8[%c2_34, %c0_35, %c0_36, %c0_37], %34 {strides = array<i32>} : memref<4x32x8x32xf32, #tpu.memory_space<vmem>>, vector<1x32x8x32xf32>,
    %c0_38 = arith.constant 0 : index
    %c3 = arith.constant 3 : index
    %c0_39 = arith.constant 0 : index
    %c0_40 = arith.constant 0 : index
    %35 = vector.load %arg2[%c0_38, %c3, %c0_39, %c0_40] : memref<3x4x32x32xf32, #tpu.memory_space<vmem>>, vector<1x1x32x32xf32>
    %36 = vector.shape_cast %35 : vector<1x1x32x32xf32> to vector<32x32xf32>
    %cst_41 = arith.constant dense<0.000000e+00> : vector<256x32xf32>
    %37 = tpu.matmul %1, %36, %cst_41 {dimension_numbers = #tpu.dot_dimension_numbers<[1], [0], [0], [1], [0, 0, 1, 1], [], []>} : vector<256x32xf32>, vector<32x32xf32>, vector<256x32xf32> -> vector<256x32xf32>
    %c0_42 = arith.constant 0 : index
    %c3_43 = arith.constant 3 : index
    %c0_44 = arith.constant 0 : index
    %c0_45 = arith.constant 0 : index
    %38 = vector.load %arg4[%c0_42, %c3_43, %c0_44, %c0_45] : memref<3x4x1x32xf32, #tpu.memory_space<vmem>>, vector<1x1x1x32xf32>
    %39 = vector.shape_cast %38 : vector<1x1x1x32xf32> to vector<1x32xf32>
    %40 = vector.broadcast %39 : vector<1x32xf32> to vector<256x32xf32>
    %41 = arith.addf %37, %40 : vector<256x32xf32>
    %42 = vector.shape_cast %41 : vector<256x32xf32> to vector<32x8x32xf32>
    %c3_46 = arith.constant 3 : index
    %c0_47 = arith.constant 0 : index
    %c0_48 = arith.constant 0 : index
    %c0_49 = arith.constant 0 : index
    %43 = vector.load %arg8[%c3_46, %c0_47, %c0_48, %c0_49] : memref<4x32x8x32xf32, #tpu.memory_space<vmem>>, vector<1x32x8x32xf32>
    %44 = vector.shape_cast %43 : vector<1x32x8x32xf32> to vector<32x8x32xf32>
    %45 = vector.shape_cast %42 : vector<32x8x32xf32> to vector<1x32x8x32xf32>
    tpu.vector_store %arg8[%c3_46, %c0_47, %c0_48, %c0_49], %45 {strides = array<i32>} : memref<4x32x8x32xf32, #tpu.memory_space<vmem>>, vector<1x32x8x32xf32>,
    %c0_50 = arith.constant 0 : index
    %c0_51 = arith.constant 0 : index
    %c0_52 = arith.constant 0 : index
    %c0_53 = arith.constant 0 : index
    %46 = vector.load %arg3[%c0_50, %c0_51, %c0_52, %c0_53] : memref<3x4x32x32xf32, #tpu.memory_space<vmem>>, vector<1x1x32x32xf32>
    %47 = vector.shape_cast %46 : vector<1x1x32x32xf32> to vector<32x32xf32>
    %c0_54 = arith.constant 0 : index
    %c1_55 = arith.constant 1 : index
    %c0_56 = arith.constant 0 : index
    %c0_57 = arith.constant 0 : index
    %48 = vector.load %arg3[%c0_54, %c1_55, %c0_56, %c0_57] : memref<3x4x32x32xf32, #tpu.memory_space<vmem>>, vector<1x1x32x32xf32>
    %49 = vector.shape_cast %48 : vector<1x1x32x32xf32> to vector<32x32xf32>
    %c0_58 = arith.constant 0 : index
    %c2_59 = arith.constant 2 : index
    %c0_60 = arith.constant 0 : index
    %c0_61 = arith.constant 0 : index
    %50 = vector.load %arg3[%c0_58, %c2_59, %c0_60, %c0_61] : memref<3x4x32x32xf32, #tpu.memory_space<vmem>>, vector<1x1x32x32xf32>
    %51 = vector.shape_cast %50 : vector<1x1x32x32xf32> to vector<32x32xf32>
    %c0_62 = arith.constant 0 : index
    %c3_63 = arith.constant 3 : index
    %c0_64 = arith.constant 0 : index
    %c0_65 = arith.constant 0 : index
    %52 = vector.load %arg3[%c0_62, %c3_63, %c0_64, %c0_65] : memref<3x4x32x32xf32, #tpu.memory_space<vmem>>, vector<1x1x32x32xf32>
    %53 = vector.shape_cast %52 : vector<1x1x32x32xf32> to vector<32x32xf32>
    %cst_66 = arith.constant 0.000000e+00 : f32
    %54 = vector.broadcast %cst_66 : f32 to vector<8x32xf32>
    %c0_i32 = arith.constant 0 : i32
    %c32_i32 = arith.constant 32 : i32
    %55 = arith.addi %c0_i32, %c32_i32 : i32
    %c1_i32 = arith.constant 1 : i32
    %56:3 = scf.for %arg9 = %c0_i32 to %55 step %c1_i32 iter_args(%arg10 = %54, %arg11 = %54, %arg12 = %54) -> (vector<8x32xf32>, vector<8x32xf32>, vector<8x32xf32>)  : i32 {
      %c0_229 = arith.constant 0 : index
      %192 = arith.index_cast %arg9 : i32 to index
      %c0_230 = arith.constant 0 : index
      %c0_231 = arith.constant 0 : index
      %193 = vector.load %arg8[%c0_229, %192, %c0_230, %c0_231] : memref<4x32x8x32xf32, #tpu.memory_space<vmem>>, vector<1x1x8x32xf32>
      %194 = vector.shape_cast %193 : vector<1x1x8x32xf32> to vector<1x8x32xf32>
      %195 = vector.shape_cast %194 : vector<1x8x32xf32> to vector<8x32xf32>
      %cst_232 = arith.constant dense<0.000000e+00> : vector<8x32xf32>
      %196 = tpu.matmul %arg10, %47, %cst_232 {dimension_numbers = #tpu.dot_dimension_numbers<[1], [0], [0], [1], [0, 0, 1, 1], [], []>} : vector<8x32xf32>, vector<32x32xf32>, vector<8x32xf32> -> vector<8x32xf32>
      %197 = arith.addf %195, %196 : vector<8x32xf32>
      %198 = arith.negf %197 : vector<8x32xf32>
      %199 = math.exp %198 : vector<8x32xf32>
      %cst_233 = arith.constant 1.000000e+00 : f32
      %200 = vector.broadcast %cst_233 : f32 to vector<8x32xf32>
      %201 = arith.addf %200, %199 : vector<8x32xf32>
      %202 = arith.divf %200, %201 : vector<8x32xf32>
      %c1_234 = arith.constant 1 : index
      %203 = arith.index_cast %arg9 : i32 to index
      %c0_235 = arith.constant 0 : index
      %c0_236 = arith.constant 0 : index
      %204 = vector.load %arg8[%c1_234, %203, %c0_235, %c0_236] : memref<4x32x8x32xf32, #tpu.memory_space<vmem>>, vector<1x1x8x32xf32>
      %205 = vector.shape_cast %204 : vector<1x1x8x32xf32> to vector<1x8x32xf32>
      %206 = vector.shape_cast %205 : vector<1x8x32xf32> to vector<8x32xf32>
      %cst_237 = arith.constant dense<0.000000e+00> : vector<8x32xf32>
      %207 = tpu.matmul %arg10, %49, %cst_237 {dimension_numbers = #tpu.dot_dimension_numbers<[1], [0], [0], [1], [0, 0, 1, 1], [], []>} : vector<8x32xf32>, vector<32x32xf32>, vector<8x32xf32> -> vector<8x32xf32>
      %208 = arith.addf %206, %207 : vector<8x32xf32>
      %209 = arith.negf %208 : vector<8x32xf32>
      %210 = math.exp %209 : vector<8x32xf32>
      %cst_238 = arith.constant 1.000000e+00 : f32
      %211 = vector.broadcast %cst_238 : f32 to vector<8x32xf32>
      %212 = arith.addf %211, %210 : vector<8x32xf32>
      %213 = arith.divf %211, %212 : vector<8x32xf32>
      %c2_239 = arith.constant 2 : index
      %214 = arith.index_cast %arg9 : i32 to index
      %c0_240 = arith.constant 0 : index
      %c0_241 = arith.constant 0 : index
      %215 = vector.load %arg8[%c2_239, %214, %c0_240, %c0_241] : memref<4x32x8x32xf32, #tpu.memory_space<vmem>>, vector<1x1x8x32xf32>
      %216 = vector.shape_cast %215 : vector<1x1x8x32xf32> to vector<1x8x32xf32>
      %217 = vector.shape_cast %216 : vector<1x8x32xf32> to vector<8x32xf32>
      %cst_242 = arith.constant dense<0.000000e+00> : vector<8x32xf32>
      %218 = tpu.matmul %arg10, %51, %cst_242 {dimension_numbers = #tpu.dot_dimension_numbers<[1], [0], [0], [1], [0, 0, 1, 1], [], []>} : vector<8x32xf32>, vector<32x32xf32>, vector<8x32xf32> -> vector<8x32xf32>
      %219 = arith.addf %217, %218 : vector<8x32xf32>
      %220 = math.tanh %219 : vector<8x32xf32>
      %c3_243 = arith.constant 3 : index
      %221 = arith.index_cast %arg9 : i32 to index
      %c0_244 = arith.constant 0 : index
      %c0_245 = arith.constant 0 : index
      %222 = vector.load %arg8[%c3_243, %221, %c0_244, %c0_245] : memref<4x32x8x32xf32, #tpu.memory_space<vmem>>, vector<1x1x8x32xf32>
      %223 = vector.shape_cast %222 : vector<1x1x8x32xf32> to vector<1x8x32xf32>
      %224 = vector.shape_cast %223 : vector<1x8x32xf32> to vector<8x32xf32>
      %cst_246 = arith.constant dense<0.000000e+00> : vector<8x32xf32>
      %225 = tpu.matmul %arg10, %53, %cst_246 {dimension_numbers = #tpu.dot_dimension_numbers<[1], [0], [0], [1], [0, 0, 1, 1], [], []>} : vector<8x32xf32>, vector<32x32xf32>, vector<8x32xf32> -> vector<8x32xf32>
      %226 = arith.addf %224, %225 : vector<8x32xf32>
      %227 = arith.negf %226 : vector<8x32xf32>
      %228 = math.exp %227 : vector<8x32xf32>
      %cst_247 = arith.constant 1.000000e+00 : f32
      %229 = vector.broadcast %cst_247 : f32 to vector<8x32xf32>
      %230 = arith.addf %229, %228 : vector<8x32xf32>
      %231 = arith.divf %229, %230 : vector<8x32xf32>
      %232 = arith.mulf %213, %arg11 : vector<8x32xf32>
      %233 = arith.mulf %202, %220 : vector<8x32xf32>
      %234 = arith.addf %232, %233 : vector<8x32xf32>
      %235 = math.tanh %234 : vector<8x32xf32>
      %236 = arith.mulf %231, %235 : vector<8x32xf32>
      %237 = arith.addf %arg12, %236 : vector<8x32xf32>
      scf.yield %236, %234, %237 : vector<8x32xf32>, vector<8x32xf32>, vector<8x32xf32>
    }
    %c32_i32_67 = arith.constant 32 : i32
    %cst_68 = arith.constant 3.125000e-02 : f32
    %57 = vector.broadcast %cst_68 : f32 to vector<8x32xf32>
    %58 = arith.mulf %56#2, %57 : vector<8x32xf32>
    %c0_69 = arith.constant 0 : index
    %c0_70 = arith.constant 0 : index
    %c0_71 = arith.constant 0 : index
    %59 = vector.load %arg1[%c0_69, %c0_70, %c0_71] : memref<37x8x32xf32, #tpu.memory_space<vmem>>, vector<25x8x32xf32>
    %60 = vector.shape_cast %59 : vector<25x8x32xf32> to vector<200x32xf32>
    %c1_72 = arith.constant 1 : index
    %c0_73 = arith.constant 0 : index
    %c0_74 = arith.constant 0 : index
    %c0_75 = arith.constant 0 : index
    %61 = vector.load %arg2[%c1_72, %c0_73, %c0_74, %c0_75] : memref<3x4x32x32xf32, #tpu.memory_space<vmem>>, vector<1x1x32x32xf32>
    %62 = vector.shape_cast %61 : vector<1x1x32x32xf32> to vector<32x32xf32>
    %cst_76 = arith.constant dense<0.000000e+00> : vector<200x32xf32>
    %63 = tpu.matmul %60, %62, %cst_76 {dimension_numbers = #tpu.dot_dimension_numbers<[1], [0], [0], [1], [0, 0, 1, 1], [], []>} : vector<200x32xf32>, vector<32x32xf32>, vector<200x32xf32> -> vector<200x32xf32>
    %c1_77 = arith.constant 1 : index
    %c0_78 = arith.constant 0 : index
    %c0_79 = arith.constant 0 : index
    %c0_80 = arith.constant 0 : index
    %64 = vector.load %arg4[%c1_77, %c0_78, %c0_79, %c0_80] : memref<3x4x1x32xf32, #tpu.memory_space<vmem>>, vector<1x1x1x32xf32>
    %65 = vector.shape_cast %64 : vector<1x1x1x32xf32> to vector<1x32xf32>
    %66 = vector.broadcast %65 : vector<1x32xf32> to vector<200x32xf32>
    %67 = arith.addf %63, %66 : vector<200x32xf32>
    %68 = vector.shape_cast %67 : vector<200x32xf32> to vector<25x8x32xf32>
    %c0_81 = arith.constant 0 : index
    %c0_82 = arith.constant 0 : index
    %c0_83 = arith.constant 0 : index
    %c0_84 = arith.constant 0 : index
    %69 = vector.load %arg8[%c0_81, %c0_82, %c0_83, %c0_84] : memref<4x32x8x32xf32, #tpu.memory_space<vmem>>, vector<1x25x8x32xf32>
    %70 = vector.shape_cast %69 : vector<1x25x8x32xf32> to vector<25x8x32xf32>
    %71 = vector.shape_cast %68 : vector<25x8x32xf32> to vector<1x25x8x32xf32>
    tpu.vector_store %arg8[%c0_81, %c0_82, %c0_83, %c0_84], %71 {strides = array<i32>} : memref<4x32x8x32xf32, #tpu.memory_space<vmem>>, vector<1x25x8x32xf32>,
    %c1_85 = arith.constant 1 : index
    %c1_86 = arith.constant 1 : index
    %c0_87 = arith.constant 0 : index
    %c0_88 = arith.constant 0 : index
    %72 = vector.load %arg2[%c1_85, %c1_86, %c0_87, %c0_88] : memref<3x4x32x32xf32, #tpu.memory_space<vmem>>, vector<1x1x32x32xf32>
    %73 = vector.shape_cast %72 : vector<1x1x32x32xf32> to vector<32x32xf32>
    %cst_89 = arith.constant dense<0.000000e+00> : vector<200x32xf32>
    %74 = tpu.matmul %60, %73, %cst_89 {dimension_numbers = #tpu.dot_dimension_numbers<[1], [0], [0], [1], [0, 0, 1, 1], [], []>} : vector<200x32xf32>, vector<32x32xf32>, vector<200x32xf32> -> vector<200x32xf32>
    %c1_90 = arith.constant 1 : index
    %c1_91 = arith.constant 1 : index
    %c0_92 = arith.constant 0 : index
    %c0_93 = arith.constant 0 : index
    %75 = vector.load %arg4[%c1_90, %c1_91, %c0_92, %c0_93] : memref<3x4x1x32xf32, #tpu.memory_space<vmem>>, vector<1x1x1x32xf32>
    %76 = vector.shape_cast %75 : vector<1x1x1x32xf32> to vector<1x32xf32>
    %77 = vector.broadcast %76 : vector<1x32xf32> to vector<200x32xf32>
    %78 = arith.addf %74, %77 : vector<200x32xf32>
    %79 = vector.shape_cast %78 : vector<200x32xf32> to vector<25x8x32xf32>
    %c1_94 = arith.constant 1 : index
    %c0_95 = arith.constant 0 : index
    %c0_96 = arith.constant 0 : index
    %c0_97 = arith.constant 0 : index
    %80 = vector.load %arg8[%c1_94, %c0_95, %c0_96, %c0_97] : memref<4x32x8x32xf32, #tpu.memory_space<vmem>>, vector<1x25x8x32xf32>
    %81 = vector.shape_cast %80 : vector<1x25x8x32xf32> to vector<25x8x32xf32>
    %82 = vector.shape_cast %79 : vector<25x8x32xf32> to vector<1x25x8x32xf32>
    tpu.vector_store %arg8[%c1_94, %c0_95, %c0_96, %c0_97], %82 {strides = array<i32>} : memref<4x32x8x32xf32, #tpu.memory_space<vmem>>, vector<1x25x8x32xf32>,
    %c1_98 = arith.constant 1 : index
    %c2_99 = arith.constant 2 : index
    %c0_100 = arith.constant 0 : index
    %c0_101 = arith.constant 0 : index
    %83 = vector.load %arg2[%c1_98, %c2_99, %c0_100, %c0_101] : memref<3x4x32x32xf32, #tpu.memory_space<vmem>>, vector<1x1x32x32xf32>
    %84 = vector.shape_cast %83 : vector<1x1x32x32xf32> to vector<32x32xf32>
    %cst_102 = arith.constant dense<0.000000e+00> : vector<200x32xf32>
    %85 = tpu.matmul %60, %84, %cst_102 {dimension_numbers = #tpu.dot_dimension_numbers<[1], [0], [0], [1], [0, 0, 1, 1], [], []>} : vector<200x32xf32>, vector<32x32xf32>, vector<200x32xf32> -> vector<200x32xf32>
    %c1_103 = arith.constant 1 : index
    %c2_104 = arith.constant 2 : index
    %c0_105 = arith.constant 0 : index
    %c0_106 = arith.constant 0 : index
    %86 = vector.load %arg4[%c1_103, %c2_104, %c0_105, %c0_106] : memref<3x4x1x32xf32, #tpu.memory_space<vmem>>, vector<1x1x1x32xf32>
    %87 = vector.shape_cast %86 : vector<1x1x1x32xf32> to vector<1x32xf32>
    %88 = vector.broadcast %87 : vector<1x32xf32> to vector<200x32xf32>
    %89 = arith.addf %85, %88 : vector<200x32xf32>
    %90 = vector.shape_cast %89 : vector<200x32xf32> to vector<25x8x32xf32>
    %c2_107 = arith.constant 2 : index
    %c0_108 = arith.constant 0 : index
    %c0_109 = arith.constant 0 : index
    %c0_110 = arith.constant 0 : index
    %91 = vector.load %arg8[%c2_107, %c0_108, %c0_109, %c0_110] : memref<4x32x8x32xf32, #tpu.memory_space<vmem>>, vector<1x25x8x32xf32>
    %92 = vector.shape_cast %91 : vector<1x25x8x32xf32> to vector<25x8x32xf32>
    %93 = vector.shape_cast %90 : vector<25x8x32xf32> to vector<1x25x8x32xf32>
    tpu.vector_store %arg8[%c2_107, %c0_108, %c0_109, %c0_110], %93 {strides = array<i32>} : memref<4x32x8x32xf32, #tpu.memory_space<vmem>>, vector<1x25x8x32xf32>,
    %c1_111 = arith.constant 1 : index
    %c3_112 = arith.constant 3 : index
    %c0_113 = arith.constant 0 : index
    %c0_114 = arith.constant 0 : index
    %94 = vector.load %arg2[%c1_111, %c3_112, %c0_113, %c0_114] : memref<3x4x32x32xf32, #tpu.memory_space<vmem>>, vector<1x1x32x32xf32>
    %95 = vector.shape_cast %94 : vector<1x1x32x32xf32> to vector<32x32xf32>
    %cst_115 = arith.constant dense<0.000000e+00> : vector<200x32xf32>
    %96 = tpu.matmul %60, %95, %cst_115 {dimension_numbers = #tpu.dot_dimension_numbers<[1], [0], [0], [1], [0, 0, 1, 1], [], []>} : vector<200x32xf32>, vector<32x32xf32>, vector<200x32xf32> -> vector<200x32xf32>
    %c1_116 = arith.constant 1 : index
    %c3_117 = arith.constant 3 : index
    %c0_118 = arith.constant 0 : index
    %c0_119 = arith.constant 0 : index
    %97 = vector.load %arg4[%c1_116, %c3_117, %c0_118, %c0_119] : memref<3x4x1x32xf32, #tpu.memory_space<vmem>>, vector<1x1x1x32xf32>
    %98 = vector.shape_cast %97 : vector<1x1x1x32xf32> to vector<1x32xf32>
    %99 = vector.broadcast %98 : vector<1x32xf32> to vector<200x32xf32>
    %100 = arith.addf %96, %99 : vector<200x32xf32>
    %101 = vector.shape_cast %100 : vector<200x32xf32> to vector<25x8x32xf32>
    %c3_120 = arith.constant 3 : index
    %c0_121 = arith.constant 0 : index
    %c0_122 = arith.constant 0 : index
    %c0_123 = arith.constant 0 : index
    %102 = vector.load %arg8[%c3_120, %c0_121, %c0_122, %c0_123] : memref<4x32x8x32xf32, #tpu.memory_space<vmem>>, vector<1x25x8x32xf32>
    %103 = vector.shape_cast %102 : vector<1x25x8x32xf32> to vector<25x8x32xf32>
    %104 = vector.shape_cast %101 : vector<25x8x32xf32> to vector<1x25x8x32xf32>
    tpu.vector_store %arg8[%c3_120, %c0_121, %c0_122, %c0_123], %104 {strides = array<i32>} : memref<4x32x8x32xf32, #tpu.memory_space<vmem>>, vector<1x25x8x32xf32>,
    %c1_124 = arith.constant 1 : index
    %c0_125 = arith.constant 0 : index
    %c0_126 = arith.constant 0 : index
    %c0_127 = arith.constant 0 : index
    %105 = vector.load %arg3[%c1_124, %c0_125, %c0_126, %c0_127] : memref<3x4x32x32xf32, #tpu.memory_space<vmem>>, vector<1x1x32x32xf32>
    %106 = vector.shape_cast %105 : vector<1x1x32x32xf32> to vector<32x32xf32>
    %c1_128 = arith.constant 1 : index
    %c1_129 = arith.constant 1 : index
    %c0_130 = arith.constant 0 : index
    %c0_131 = arith.constant 0 : index
    %107 = vector.load %arg3[%c1_128, %c1_129, %c0_130, %c0_131] : memref<3x4x32x32xf32, #tpu.memory_space<vmem>>, vector<1x1x32x32xf32>
    %108 = vector.shape_cast %107 : vector<1x1x32x32xf32> to vector<32x32xf32>
    %c1_132 = arith.constant 1 : index
    %c2_133 = arith.constant 2 : index
    %c0_134 = arith.constant 0 : index
    %c0_135 = arith.constant 0 : index
    %109 = vector.load %arg3[%c1_132, %c2_133, %c0_134, %c0_135] : memref<3x4x32x32xf32, #tpu.memory_space<vmem>>, vector<1x1x32x32xf32>
    %110 = vector.shape_cast %109 : vector<1x1x32x32xf32> to vector<32x32xf32>
    %c1_136 = arith.constant 1 : index
    %c3_137 = arith.constant 3 : index
    %c0_138 = arith.constant 0 : index
    %c0_139 = arith.constant 0 : index
    %111 = vector.load %arg3[%c1_136, %c3_137, %c0_138, %c0_139] : memref<3x4x32x32xf32, #tpu.memory_space<vmem>>, vector<1x1x32x32xf32>
    %112 = vector.shape_cast %111 : vector<1x1x32x32xf32> to vector<32x32xf32>
    %cst_140 = arith.constant 0.000000e+00 : f32
    %113 = vector.broadcast %cst_140 : f32 to vector<8x32xf32>
    %c0_i32_141 = arith.constant 0 : i32
    %c25_i32 = arith.constant 25 : i32
    %114 = arith.addi %c0_i32_141, %c25_i32 : i32
    %c1_i32_142 = arith.constant 1 : i32
    %115:3 = scf.for %arg9 = %c0_i32_141 to %114 step %c1_i32_142 iter_args(%arg10 = %113, %arg11 = %113, %arg12 = %113) -> (vector<8x32xf32>, vector<8x32xf32>, vector<8x32xf32>)  : i32 {
      %c0_229 = arith.constant 0 : index
      %192 = arith.index_cast %arg9 : i32 to index
      %c0_230 = arith.constant 0 : index
      %c0_231 = arith.constant 0 : index
      %193 = vector.load %arg8[%c0_229, %192, %c0_230, %c0_231] : memref<4x32x8x32xf32, #tpu.memory_space<vmem>>, vector<1x1x8x32xf32>
      %194 = vector.shape_cast %193 : vector<1x1x8x32xf32> to vector<1x8x32xf32>
      %195 = vector.shape_cast %194 : vector<1x8x32xf32> to vector<8x32xf32>
      %cst_232 = arith.constant dense<0.000000e+00> : vector<8x32xf32>
      %196 = tpu.matmul %arg10, %106, %cst_232 {dimension_numbers = #tpu.dot_dimension_numbers<[1], [0], [0], [1], [0, 0, 1, 1], [], []>} : vector<8x32xf32>, vector<32x32xf32>, vector<8x32xf32> -> vector<8x32xf32>
      %197 = arith.addf %195, %196 : vector<8x32xf32>
      %198 = arith.negf %197 : vector<8x32xf32>
      %199 = math.exp %198 : vector<8x32xf32>
      %cst_233 = arith.constant 1.000000e+00 : f32
      %200 = vector.broadcast %cst_233 : f32 to vector<8x32xf32>
      %201 = arith.addf %200, %199 : vector<8x32xf32>
      %202 = arith.divf %200, %201 : vector<8x32xf32>
      %c1_234 = arith.constant 1 : index
      %203 = arith.index_cast %arg9 : i32 to index
      %c0_235 = arith.constant 0 : index
      %c0_236 = arith.constant 0 : index
      %204 = vector.load %arg8[%c1_234, %203, %c0_235, %c0_236] : memref<4x32x8x32xf32, #tpu.memory_space<vmem>>, vector<1x1x8x32xf32>
      %205 = vector.shape_cast %204 : vector<1x1x8x32xf32> to vector<1x8x32xf32>
      %206 = vector.shape_cast %205 : vector<1x8x32xf32> to vector<8x32xf32>
      %cst_237 = arith.constant dense<0.000000e+00> : vector<8x32xf32>
      %207 = tpu.matmul %arg10, %108, %cst_237 {dimension_numbers = #tpu.dot_dimension_numbers<[1], [0], [0], [1], [0, 0, 1, 1], [], []>} : vector<8x32xf32>, vector<32x32xf32>, vector<8x32xf32> -> vector<8x32xf32>
      %208 = arith.addf %206, %207 : vector<8x32xf32>
      %209 = arith.negf %208 : vector<8x32xf32>
      %210 = math.exp %209 : vector<8x32xf32>
      %cst_238 = arith.constant 1.000000e+00 : f32
      %211 = vector.broadcast %cst_238 : f32 to vector<8x32xf32>
      %212 = arith.addf %211, %210 : vector<8x32xf32>
      %213 = arith.divf %211, %212 : vector<8x32xf32>
      %c2_239 = arith.constant 2 : index
      %214 = arith.index_cast %arg9 : i32 to index
      %c0_240 = arith.constant 0 : index
      %c0_241 = arith.constant 0 : index
      %215 = vector.load %arg8[%c2_239, %214, %c0_240, %c0_241] : memref<4x32x8x32xf32, #tpu.memory_space<vmem>>, vector<1x1x8x32xf32>
      %216 = vector.shape_cast %215 : vector<1x1x8x32xf32> to vector<1x8x32xf32>
      %217 = vector.shape_cast %216 : vector<1x8x32xf32> to vector<8x32xf32>
      %cst_242 = arith.constant dense<0.000000e+00> : vector<8x32xf32>
      %218 = tpu.matmul %arg10, %110, %cst_242 {dimension_numbers = #tpu.dot_dimension_numbers<[1], [0], [0], [1], [0, 0, 1, 1], [], []>} : vector<8x32xf32>, vector<32x32xf32>, vector<8x32xf32> -> vector<8x32xf32>
      %219 = arith.addf %217, %218 : vector<8x32xf32>
      %220 = math.tanh %219 : vector<8x32xf32>
      %c3_243 = arith.constant 3 : index
      %221 = arith.index_cast %arg9 : i32 to index
      %c0_244 = arith.constant 0 : index
      %c0_245 = arith.constant 0 : index
      %222 = vector.load %arg8[%c3_243, %221, %c0_244, %c0_245] : memref<4x32x8x32xf32, #tpu.memory_space<vmem>>, vector<1x1x8x32xf32>
      %223 = vector.shape_cast %222 : vector<1x1x8x32xf32> to vector<1x8x32xf32>
      %224 = vector.shape_cast %223 : vector<1x8x32xf32> to vector<8x32xf32>
      %cst_246 = arith.constant dense<0.000000e+00> : vector<8x32xf32>
      %225 = tpu.matmul %arg10, %112, %cst_246 {dimension_numbers = #tpu.dot_dimension_numbers<[1], [0], [0], [1], [0, 0, 1, 1], [], []>} : vector<8x32xf32>, vector<32x32xf32>, vector<8x32xf32> -> vector<8x32xf32>
      %226 = arith.addf %224, %225 : vector<8x32xf32>
      %227 = arith.negf %226 : vector<8x32xf32>
      %228 = math.exp %227 : vector<8x32xf32>
      %cst_247 = arith.constant 1.000000e+00 : f32
      %229 = vector.broadcast %cst_247 : f32 to vector<8x32xf32>
      %230 = arith.addf %229, %228 : vector<8x32xf32>
      %231 = arith.divf %229, %230 : vector<8x32xf32>
      %232 = arith.mulf %213, %arg11 : vector<8x32xf32>
      %233 = arith.mulf %202, %220 : vector<8x32xf32>
      %234 = arith.addf %232, %233 : vector<8x32xf32>
      %235 = math.tanh %234 : vector<8x32xf32>
      %236 = arith.mulf %231, %235 : vector<8x32xf32>
      %237 = arith.addf %arg12, %236 : vector<8x32xf32>
      scf.yield %236, %234, %237 : vector<8x32xf32>, vector<8x32xf32>, vector<8x32xf32>
    }
    %c25_i32_143 = arith.constant 25 : i32
    %cst_144 = arith.constant 4.000000e-02 : f32
    %116 = vector.broadcast %cst_144 : f32 to vector<8x32xf32>
    %117 = arith.mulf %115#2, %116 : vector<8x32xf32>
    %c25 = arith.constant 25 : index
    %c0_145 = arith.constant 0 : index
    %c0_146 = arith.constant 0 : index
    %118 = vector.load %arg1[%c25, %c0_145, %c0_146] : memref<37x8x32xf32, #tpu.memory_space<vmem>>, vector<12x8x32xf32>
    %119 = vector.shape_cast %118 : vector<12x8x32xf32> to vector<96x32xf32>
    %c2_147 = arith.constant 2 : index
    %c0_148 = arith.constant 0 : index
    %c0_149 = arith.constant 0 : index
    %c0_150 = arith.constant 0 : index
    %120 = vector.load %arg2[%c2_147, %c0_148, %c0_149, %c0_150] : memref<3x4x32x32xf32, #tpu.memory_space<vmem>>, vector<1x1x32x32xf32>
    %121 = vector.shape_cast %120 : vector<1x1x32x32xf32> to vector<32x32xf32>
    %cst_151 = arith.constant dense<0.000000e+00> : vector<96x32xf32>
    %122 = tpu.matmul %119, %121, %cst_151 {dimension_numbers = #tpu.dot_dimension_numbers<[1], [0], [0], [1], [0, 0, 1, 1], [], []>} : vector<96x32xf32>, vector<32x32xf32>, vector<96x32xf32> -> vector<96x32xf32>
    %c2_152 = arith.constant 2 : index
    %c0_153 = arith.constant 0 : index
    %c0_154 = arith.constant 0 : index
    %c0_155 = arith.constant 0 : index
    %123 = vector.load %arg4[%c2_152, %c0_153, %c0_154, %c0_155] : memref<3x4x1x32xf32, #tpu.memory_space<vmem>>, vector<1x1x1x32xf32>
    %124 = vector.shape_cast %123 : vector<1x1x1x32xf32> to vector<1x32xf32>
    %125 = vector.broadcast %124 : vector<1x32xf32> to vector<96x32xf32>
    %126 = arith.addf %122, %125 : vector<96x32xf32>
    %127 = vector.shape_cast %126 : vector<96x32xf32> to vector<12x8x32xf32>
    %c0_156 = arith.constant 0 : index
    %c0_157 = arith.constant 0 : index
    %c0_158 = arith.constant 0 : index
    %c0_159 = arith.constant 0 : index
    %128 = vector.load %arg8[%c0_156, %c0_157, %c0_158, %c0_159] : memref<4x32x8x32xf32, #tpu.memory_space<vmem>>, vector<1x12x8x32xf32>
    %129 = vector.shape_cast %128 : vector<1x12x8x32xf32> to vector<12x8x32xf32>
    %130 = vector.shape_cast %127 : vector<12x8x32xf32> to vector<1x12x8x32xf32>
    tpu.vector_store %arg8[%c0_156, %c0_157, %c0_158, %c0_159], %130 {strides = array<i32>} : memref<4x32x8x32xf32, #tpu.memory_space<vmem>>, vector<1x12x8x32xf32>,
    %c2_160 = arith.constant 2 : index
    %c1_161 = arith.constant 1 : index
    %c0_162 = arith.constant 0 : index
    %c0_163 = arith.constant 0 : index
    %131 = vector.load %arg2[%c2_160, %c1_161, %c0_162, %c0_163] : memref<3x4x32x32xf32, #tpu.memory_space<vmem>>, vector<1x1x32x32xf32>
    %132 = vector.shape_cast %131 : vector<1x1x32x32xf32> to vector<32x32xf32>
    %cst_164 = arith.constant dense<0.000000e+00> : vector<96x32xf32>
    %133 = tpu.matmul %119, %132, %cst_164 {dimension_numbers = #tpu.dot_dimension_numbers<[1], [0], [0], [1], [0, 0, 1, 1], [], []>} : vector<96x32xf32>, vector<32x32xf32>, vector<96x32xf32> -> vector<96x32xf32>
    %c2_165 = arith.constant 2 : index
    %c1_166 = arith.constant 1 : index
    %c0_167 = arith.constant 0 : index
    %c0_168 = arith.constant 0 : index
    %134 = vector.load %arg4[%c2_165, %c1_166, %c0_167, %c0_168] : memref<3x4x1x32xf32, #tpu.memory_space<vmem>>, vector<1x1x1x32xf32>
    %135 = vector.shape_cast %134 : vector<1x1x1x32xf32> to vector<1x32xf32>
    %136 = vector.broadcast %135 : vector<1x32xf32> to vector<96x32xf32>
    %137 = arith.addf %133, %136 : vector<96x32xf32>
    %138 = vector.shape_cast %137 : vector<96x32xf32> to vector<12x8x32xf32>
    %c1_169 = arith.constant 1 : index
    %c0_170 = arith.constant 0 : index
    %c0_171 = arith.constant 0 : index
    %c0_172 = arith.constant 0 : index
    %139 = vector.load %arg8[%c1_169, %c0_170, %c0_171, %c0_172] : memref<4x32x8x32xf32, #tpu.memory_space<vmem>>, vector<1x12x8x32xf32>
    %140 = vector.shape_cast %139 : vector<1x12x8x32xf32> to vector<12x8x32xf32>
    %141 = vector.shape_cast %138 : vector<12x8x32xf32> to vector<1x12x8x32xf32>
    tpu.vector_store %arg8[%c1_169, %c0_170, %c0_171, %c0_172], %141 {strides = array<i32>} : memref<4x32x8x32xf32, #tpu.memory_space<vmem>>, vector<1x12x8x32xf32>,
    %c2_173 = arith.constant 2 : index
    %c2_174 = arith.constant 2 : index
    %c0_175 = arith.constant 0 : index
    %c0_176 = arith.constant 0 : index
    %142 = vector.load %arg2[%c2_173, %c2_174, %c0_175, %c0_176] : memref<3x4x32x32xf32, #tpu.memory_space<vmem>>, vector<1x1x32x32xf32>
    %143 = vector.shape_cast %142 : vector<1x1x32x32xf32> to vector<32x32xf32>
    %cst_177 = arith.constant dense<0.000000e+00> : vector<96x32xf32>
    %144 = tpu.matmul %119, %143, %cst_177 {dimension_numbers = #tpu.dot_dimension_numbers<[1], [0], [0], [1], [0, 0, 1, 1], [], []>} : vector<96x32xf32>, vector<32x32xf32>, vector<96x32xf32> -> vector<96x32xf32>
    %c2_178 = arith.constant 2 : index
    %c2_179 = arith.constant 2 : index
    %c0_180 = arith.constant 0 : index
    %c0_181 = arith.constant 0 : index
    %145 = vector.load %arg4[%c2_178, %c2_179, %c0_180, %c0_181] : memref<3x4x1x32xf32, #tpu.memory_space<vmem>>, vector<1x1x1x32xf32>
    %146 = vector.shape_cast %145 : vector<1x1x1x32xf32> to vector<1x32xf32>
    %147 = vector.broadcast %146 : vector<1x32xf32> to vector<96x32xf32>
    %148 = arith.addf %144, %147 : vector<96x32xf32>
    %149 = vector.shape_cast %148 : vector<96x32xf32> to vector<12x8x32xf32>
    %c2_182 = arith.constant 2 : index
    %c0_183 = arith.constant 0 : index
    %c0_184 = arith.constant 0 : index
    %c0_185 = arith.constant 0 : index
    %150 = vector.load %arg8[%c2_182, %c0_183, %c0_184, %c0_185] : memref<4x32x8x32xf32, #tpu.memory_space<vmem>>, vector<1x12x8x32xf32>
    %151 = vector.shape_cast %150 : vector<1x12x8x32xf32> to vector<12x8x32xf32>
    %152 = vector.shape_cast %149 : vector<12x8x32xf32> to vector<1x12x8x32xf32>
    tpu.vector_store %arg8[%c2_182, %c0_183, %c0_184, %c0_185], %152 {strides = array<i32>} : memref<4x32x8x32xf32, #tpu.memory_space<vmem>>, vector<1x12x8x32xf32>,
    %c2_186 = arith.constant 2 : index
    %c3_187 = arith.constant 3 : index
    %c0_188 = arith.constant 0 : index
    %c0_189 = arith.constant 0 : index
    %153 = vector.load %arg2[%c2_186, %c3_187, %c0_188, %c0_189] : memref<3x4x32x32xf32, #tpu.memory_space<vmem>>, vector<1x1x32x32xf32>
    %154 = vector.shape_cast %153 : vector<1x1x32x32xf32> to vector<32x32xf32>
    %cst_190 = arith.constant dense<0.000000e+00> : vector<96x32xf32>
    %155 = tpu.matmul %119, %154, %cst_190 {dimension_numbers = #tpu.dot_dimension_numbers<[1], [0], [0], [1], [0, 0, 1, 1], [], []>} : vector<96x32xf32>, vector<32x32xf32>, vector<96x32xf32> -> vector<96x32xf32>
    %c2_191 = arith.constant 2 : index
    %c3_192 = arith.constant 3 : index
    %c0_193 = arith.constant 0 : index
    %c0_194 = arith.constant 0 : index
    %156 = vector.load %arg4[%c2_191, %c3_192, %c0_193, %c0_194] : memref<3x4x1x32xf32, #tpu.memory_space<vmem>>, vector<1x1x1x32xf32>
    %157 = vector.shape_cast %156 : vector<1x1x1x32xf32> to vector<1x32xf32>
    %158 = vector.broadcast %157 : vector<1x32xf32> to vector<96x32xf32>
    %159 = arith.addf %155, %158 : vector<96x32xf32>
    %160 = vector.shape_cast %159 : vector<96x32xf32> to vector<12x8x32xf32>
    %c3_195 = arith.constant 3 : index
    %c0_196 = arith.constant 0 : index
    %c0_197 = arith.constant 0 : index
    %c0_198 = arith.constant 0 : index
    %161 = vector.load %arg8[%c3_195, %c0_196, %c0_197, %c0_198] : memref<4x32x8x32xf32, #tpu.memory_space<vmem>>, vector<1x12x8x32xf32>
    %162 = vector.shape_cast %161 : vector<1x12x8x32xf32> to vector<12x8x32xf32>
    %163 = vector.shape_cast %160 : vector<12x8x32xf32> to vector<1x12x8x32xf32>
    tpu.vector_store %arg8[%c3_195, %c0_196, %c0_197, %c0_198], %163 {strides = array<i32>} : memref<4x32x8x32xf32, #tpu.memory_space<vmem>>, vector<1x12x8x32xf32>,
    %c2_199 = arith.constant 2 : index
    %c0_200 = arith.constant 0 : index
    %c0_201 = arith.constant 0 : index
    %c0_202 = arith.constant 0 : index
    %164 = vector.load %arg3[%c2_199, %c0_200, %c0_201, %c0_202] : memref<3x4x32x32xf32, #tpu.memory_space<vmem>>, vector<1x1x32x32xf32>
    %165 = vector.shape_cast %164 : vector<1x1x32x32xf32> to vector<32x32xf32>
    %c2_203 = arith.constant 2 : index
    %c1_204 = arith.constant 1 : index
    %c0_205 = arith.constant 0 : index
    %c0_206 = arith.constant 0 : index
    %166 = vector.load %arg3[%c2_203, %c1_204, %c0_205, %c0_206] : memref<3x4x32x32xf32, #tpu.memory_space<vmem>>, vector<1x1x32x32xf32>
    %167 = vector.shape_cast %166 : vector<1x1x32x32xf32> to vector<32x32xf32>
    %c2_207 = arith.constant 2 : index
    %c2_208 = arith.constant 2 : index
    %c0_209 = arith.constant 0 : index
    %c0_210 = arith.constant 0 : index
    %168 = vector.load %arg3[%c2_207, %c2_208, %c0_209, %c0_210] : memref<3x4x32x32xf32, #tpu.memory_space<vmem>>, vector<1x1x32x32xf32>
    %169 = vector.shape_cast %168 : vector<1x1x32x32xf32> to vector<32x32xf32>
    %c2_211 = arith.constant 2 : index
    %c3_212 = arith.constant 3 : index
    %c0_213 = arith.constant 0 : index
    %c0_214 = arith.constant 0 : index
    %170 = vector.load %arg3[%c2_211, %c3_212, %c0_213, %c0_214] : memref<3x4x32x32xf32, #tpu.memory_space<vmem>>, vector<1x1x32x32xf32>
    %171 = vector.shape_cast %170 : vector<1x1x32x32xf32> to vector<32x32xf32>
    %cst_215 = arith.constant 0.000000e+00 : f32
    %172 = vector.broadcast %cst_215 : f32 to vector<8x32xf32>
    %c0_i32_216 = arith.constant 0 : i32
    %c12_i32 = arith.constant 12 : i32
    %173 = arith.addi %c0_i32_216, %c12_i32 : i32
    %c1_i32_217 = arith.constant 1 : i32
    %174:3 = scf.for %arg9 = %c0_i32_216 to %173 step %c1_i32_217 iter_args(%arg10 = %172, %arg11 = %172, %arg12 = %172) -> (vector<8x32xf32>, vector<8x32xf32>, vector<8x32xf32>)  : i32 {
      %c0_229 = arith.constant 0 : index
      %192 = arith.index_cast %arg9 : i32 to index
      %c0_230 = arith.constant 0 : index
      %c0_231 = arith.constant 0 : index
      %193 = vector.load %arg8[%c0_229, %192, %c0_230, %c0_231] : memref<4x32x8x32xf32, #tpu.memory_space<vmem>>, vector<1x1x8x32xf32>
      %194 = vector.shape_cast %193 : vector<1x1x8x32xf32> to vector<1x8x32xf32>
      %195 = vector.shape_cast %194 : vector<1x8x32xf32> to vector<8x32xf32>
      %cst_232 = arith.constant dense<0.000000e+00> : vector<8x32xf32>
      %196 = tpu.matmul %arg10, %165, %cst_232 {dimension_numbers = #tpu.dot_dimension_numbers<[1], [0], [0], [1], [0, 0, 1, 1], [], []>} : vector<8x32xf32>, vector<32x32xf32>, vector<8x32xf32> -> vector<8x32xf32>
      %197 = arith.addf %195, %196 : vector<8x32xf32>
      %198 = arith.negf %197 : vector<8x32xf32>
      %199 = math.exp %198 : vector<8x32xf32>
      %cst_233 = arith.constant 1.000000e+00 : f32
      %200 = vector.broadcast %cst_233 : f32 to vector<8x32xf32>
      %201 = arith.addf %200, %199 : vector<8x32xf32>
      %202 = arith.divf %200, %201 : vector<8x32xf32>
      %c1_234 = arith.constant 1 : index
      %203 = arith.index_cast %arg9 : i32 to index
      %c0_235 = arith.constant 0 : index
      %c0_236 = arith.constant 0 : index
      %204 = vector.load %arg8[%c1_234, %203, %c0_235, %c0_236] : memref<4x32x8x32xf32, #tpu.memory_space<vmem>>, vector<1x1x8x32xf32>
      %205 = vector.shape_cast %204 : vector<1x1x8x32xf32> to vector<1x8x32xf32>
      %206 = vector.shape_cast %205 : vector<1x8x32xf32> to vector<8x32xf32>
      %cst_237 = arith.constant dense<0.000000e+00> : vector<8x32xf32>
      %207 = tpu.matmul %arg10, %167, %cst_237 {dimension_numbers = #tpu.dot_dimension_numbers<[1], [0], [0], [1], [0, 0, 1, 1], [], []>} : vector<8x32xf32>, vector<32x32xf32>, vector<8x32xf32> -> vector<8x32xf32>
      %208 = arith.addf %206, %207 : vector<8x32xf32>
      %209 = arith.negf %208 : vector<8x32xf32>
      %210 = math.exp %209 : vector<8x32xf32>
      %cst_238 = arith.constant 1.000000e+00 : f32
      %211 = vector.broadcast %cst_238 : f32 to vector<8x32xf32>
      %212 = arith.addf %211, %210 : vector<8x32xf32>
      %213 = arith.divf %211, %212 : vector<8x32xf32>
      %c2_239 = arith.constant 2 : index
      %214 = arith.index_cast %arg9 : i32 to index
      %c0_240 = arith.constant 0 : index
      %c0_241 = arith.constant 0 : index
      %215 = vector.load %arg8[%c2_239, %214, %c0_240, %c0_241] : memref<4x32x8x32xf32, #tpu.memory_space<vmem>>, vector<1x1x8x32xf32>
      %216 = vector.shape_cast %215 : vector<1x1x8x32xf32> to vector<1x8x32xf32>
      %217 = vector.shape_cast %216 : vector<1x8x32xf32> to vector<8x32xf32>
      %cst_242 = arith.constant dense<0.000000e+00> : vector<8x32xf32>
      %218 = tpu.matmul %arg10, %169, %cst_242 {dimension_numbers = #tpu.dot_dimension_numbers<[1], [0], [0], [1], [0, 0, 1, 1], [], []>} : vector<8x32xf32>, vector<32x32xf32>, vector<8x32xf32> -> vector<8x32xf32>
      %219 = arith.addf %217, %218 : vector<8x32xf32>
      %220 = math.tanh %219 : vector<8x32xf32>
      %c3_243 = arith.constant 3 : index
      %221 = arith.index_cast %arg9 : i32 to index
      %c0_244 = arith.constant 0 : index
      %c0_245 = arith.constant 0 : index
      %222 = vector.load %arg8[%c3_243, %221, %c0_244, %c0_245] : memref<4x32x8x32xf32, #tpu.memory_space<vmem>>, vector<1x1x8x32xf32>
      %223 = vector.shape_cast %222 : vector<1x1x8x32xf32> to vector<1x8x32xf32>
      %224 = vector.shape_cast %223 : vector<1x8x32xf32> to vector<8x32xf32>
      %cst_246 = arith.constant dense<0.000000e+00> : vector<8x32xf32>
      %225 = tpu.matmul %arg10, %171, %cst_246 {dimension_numbers = #tpu.dot_dimension_numbers<[1], [0], [0], [1], [0, 0, 1, 1], [], []>} : vector<8x32xf32>, vector<32x32xf32>, vector<8x32xf32> -> vector<8x32xf32>
      %226 = arith.addf %224, %225 : vector<8x32xf32>
      %227 = arith.negf %226 : vector<8x32xf32>
      %228 = math.exp %227 : vector<8x32xf32>
      %cst_247 = arith.constant 1.000000e+00 : f32
      %229 = vector.broadcast %cst_247 : f32 to vector<8x32xf32>
      %230 = arith.addf %229, %228 : vector<8x32xf32>
      %231 = arith.divf %229, %230 : vector<8x32xf32>
      %232 = arith.mulf %213, %arg11 : vector<8x32xf32>
      %233 = arith.mulf %202, %220 : vector<8x32xf32>
      %234 = arith.addf %232, %233 : vector<8x32xf32>
      %235 = math.tanh %234 : vector<8x32xf32>
      %236 = arith.mulf %231, %235 : vector<8x32xf32>
      %237 = arith.addf %arg12, %236 : vector<8x32xf32>
      scf.yield %236, %234, %237 : vector<8x32xf32>, vector<8x32xf32>, vector<8x32xf32>
    }
    %c12_i32_218 = arith.constant 12 : i32
    %cst_219 = arith.constant 0.0833333358 : f32
    %175 = vector.broadcast %cst_219 : f32 to vector<8x32xf32>
    %176 = arith.mulf %174#2, %175 : vector<8x32xf32>
    %177 = arith.addf %58, %117 : vector<8x32xf32>
    %178 = arith.addf %177, %176 : vector<8x32xf32>
    %cst_220 = arith.constant 0.333333343 : f32
    %179 = vector.broadcast %cst_220 : f32 to vector<8x32xf32>
    %180 = arith.mulf %178, %179 : vector<8x32xf32>
    %c0_221 = arith.constant 0 : index
    %c0_222 = arith.constant 0 : index
    %181 = vector.load %arg5[%c0_221, %c0_222] : memref<32x1xf32, #tpu.memory_space<vmem>>, vector<32x1xf32>
    %cst_223 = arith.constant dense<0.000000e+00> : vector<8x1xf32>
    %182 = tpu.matmul %180, %181, %cst_223 {dimension_numbers = #tpu.dot_dimension_numbers<[1], [0], [0], [1], [0, 0, 1, 1], [], []>} : vector<8x32xf32>, vector<32x1xf32>, vector<8x1xf32> -> vector<8x1xf32>
    %c0_224 = arith.constant 0 : index
    %c0_225 = arith.constant 0 : index
    %183 = vector.load %arg6[%c0_224, %c0_225] : memref<1x1xf32, #tpu.memory_space<vmem>>, vector<1x1xf32>
    %184 = vector.broadcast %183 : vector<1x1xf32> to vector<8x1xf32>
    %185 = arith.addf %182, %184 : vector<8x1xf32>
    %186 = arith.negf %185 : vector<8x1xf32>
    %187 = math.exp %186 : vector<8x1xf32>
    %cst_226 = arith.constant 1.000000e+00 : f32
    %188 = vector.broadcast %cst_226 : f32 to vector<8x1xf32>
    %189 = arith.addf %188, %187 : vector<8x1xf32>
    %190 = arith.divf %188, %189 : vector<8x1xf32>
    %c0_227 = arith.constant 0 : index
    %c0_228 = arith.constant 0 : index
    %191 = vector.load %arg7[%c0_227, %c0_228] : memref<8x1xf32, #tpu.memory_space<vmem>>, vector<8x1xf32>
    tpu.vector_store %arg7[%c0_227, %c0_228], %190 {strides = array<i32>} : memref<8x1xf32, #tpu.memory_space<vmem>>, vector<8x1xf32>,
    return
  }
}

</mosaic_0001>

<bundles_post_ra>
// kernel: _lambda_.3
= control target key start
LH: loop header
LB: loop body
LE: loop exit
PB: predicated region body
PF: predicated region fallthrough
CT: control target
= control target key end

     0   :  { %vm68_vm0 = vcmask 261120   ;;  %s4829_s2 = inlined_call_operand.vmem [shape: f32[3,4,32,32], index: 2, kind: input, shape index: {}]   ;;  %s4830_s1 = inlined_call_operand.vmem [shape: f32[37,8,32], index: 1, kind: input, shape index: {}]   ;;  %s4831_s5 = inlined_call_operand.vmem [shape: f32[32,1], index: 5, kind: input, shape index: {}]   ;;  %s4832_s6 = inlined_call_operand.<no memory space> [shape: f32[1,1], index: 6, kind: input, shape index: {}]   ;;  %s4833_s7 = inlined_call_operand.vmem [shape: f32[8,1], index: 7, kind: output, shape index: {}]   ;;  %s4834_s0 = inlined_call_operand.vmem [shape: f32[32,8,32], index: 0, kind: input, shape index: {}]   ;;  %s4835_s4 = inlined_call_operand.vmem [shape: f32[3,4,1,32], index: 4, kind: input, shape index: {}]   ;;  %s4836_s3 = inlined_call_operand.vmem [shape: f32[3,4,32,32], index: 3, kind: input, shape index: {}]  }
   0x1   :  { %v2519_v0 = vld [vmem:[%s4829_s2 + $0x58] sm:$0xff]  ;;  %v2518_v2 = vld [vmem:[%s4829_s2 + $0x50] sm:$0xff]  ;;  %v12_v3 = vstv %s4832_s6  ;;  %v2517_v5 = vld [vmem:[%s4829_s2 + $0x48] sm:$0xff]  ;;  %s3812_s6 = smov 0  }
   0x2   :  { %v2556_v1 = vld [vmem:[%s4829_s2 + $0x78] sm:$0xff]  ;;  %488 = vmatpush.msra.mxu2 %v2519_v0  ;;  %v2555_v4 = vld [vmem:[%s4829_s2 + $0x70] sm:$0xff]  ;;  %13 = vst [vmem:[#allocation3] sm:$0x1] %v12_v3  ;;  %v2554_v6 = vld [vmem:[%s4829_s2 + $0x68] sm:$0xff] }
   0x3   :  { %644 = vmatpush.msra.mxu3 %v2556_v1  ;;  %v63_v7 = vld [vmem:[%s4829_s2 + $0x18] sm:$0xff]  ;;  %v62_v9 = vld [vmem:[%s4829_s2 + $0x10] sm:$0xff]  ;;  %v2516_v10 = vld [vmem:[%s4829_s2 + $0x40] sm:$0xff] }
   0x4   :  { %v2482_v8 = vld [vmem:[%s4829_s2 + $0x38] sm:$0xff]  ;;  %489 = vmatpush.msra.mxu2 %v2518_v2  ;;  %177 = vmatpush.msra.mxu0 %v63_v7  ;;  %v2553_v11 = vld [vmem:[%s4829_s2 + $0x60] sm:$0xff]  ;;  %v2481_v12 = vld [vmem:[%s4829_s2 + $0x30] sm:$0xff] }
   0x5   :  { %645 = vmatpush.msra.mxu3 %v2555_v4  ;;  %332 = vmatpush.msra.mxu1 %v2482_v8  ;;  %v28_v13 = vld [vmem:[%s4834_s0] sm:$0xff]  ;;  %v61_v14 = vld [vmem:[%s4829_s2 + $0x8] sm:$0xff]  ;;  %v30_v19 = vld [vmem:[%s4834_s0 + $0x10] sm:$0xff] }
   0x6   :  { %490 = vmatpush.msra.mxu2 %v2517_v5  ;;  %178 = vmatpush.msra.mxu0 %v62_v9  ;;  %v2480_v15 = vld [vmem:[%s4829_s2 + $0x28] sm:$0xff]  ;;  %v60_v16 = vld [vmem:[%s4829_s2] sm:$0xff]  ;;  %v31_v20 = vld [vmem:[%s4834_s0 + $0x18] sm:$0xff] }
   0x7   :  { %646 = vmatpush.msra.mxu3 %v2554_v6  ;;  %333 = vmatpush.msra.mxu1 %v2481_v12  ;;  %v2479_v17 = vld [vmem:[%s4829_s2 + $0x20] sm:$0xff]  ;;  %v29_v18 = vld [vmem:[%s4834_s0 + $0x8] sm:$0xff]  ;;  %v34_v23 = vld [vmem:[%s4834_s0 + $0x30] sm:$0xff] }
   0x8   :  { %491 = vmatpush.msra.mxu2 %v2516_v10  ;;  %179 = vmatpush.msra.mxu0 %v61_v14  ;;  %v32_v21 = vld [vmem:[%s4834_s0 + $0x20] sm:$0xff]  ;;  %v33_v22 = vld [vmem:[%s4834_s0 + $0x28] sm:$0xff]  ;;  %v35_v24 = vld [vmem:[%s4834_s0 + $0x38] sm:$0xff] }
   0x9   :  { %647 = vmatpush.msra.mxu3 %v2553_v11  ;;  %2521 = vmatmul.msk.f32.vlgmr.msra.gmra.mxu2 %vm68_vm0, %v28_v13  ;;  %v36_v25 = vld [vmem:[%s4834_s0 + $0x40] sm:$0xff]  ;;  %v37_v26 = vld [vmem:[%s4834_s0 + $0x48] sm:$0xff]  ;;  %v38_v27 = vld [vmem:[%s4834_s0 + $0x50] sm:$0xff] }
   0xa   :  { %2558 = vmatmul.msk.f32.vlgmr.msra.gmra.mxu3 %vm68_vm0, %v28_v13  ;;  %334 = vmatpush.msra.mxu1 %v2480_v15  ;;  %v39_v28 = vld [vmem:[%s4834_s0 + $0x58] sm:$0xff]  ;;  %v40_v29 = vld [vmem:[%s4834_s0 + $0x60] sm:$0xff]  ;;  %v41_v30 = vld [vmem:[%s4834_s0 + $0x68] sm:$0xff] }
   0xb   :  { %180 = vmatpush.msra.mxu0 %v60_v16  ;;  %v42_v31 = vld [vmem:[%s4834_s0 + $0x70] sm:$0xff]  ;;  %v43_v32 = vld [vmem:[%s4834_s0 + $0x78] sm:$0xff]  ;;  %v44_v33 = vld [vmem:[%s4834_s0 + $0x80] sm:$0xff] }
   0xc   :  { %335 = vmatpush.msra.mxu1 %v2479_v17  ;;  %2447 = vmatmul.msk.f32.vlgmr.msra.gmra.mxu0 %vm68_vm0, %v28_v13  ;;  %v3344_v34 = vld [vmem:[%s4835_s4] ss:$0 sm:$0xff]  ;;  %v3349_v35 = vld [vmem:[%s4835_s4 + $0x1] ss:$0 sm:$0xff]  ;;  %v3356_v36 = vld [vmem:[%s4835_s4 + $0x2] ss:$0 sm:$0xff] }
   0xd   :  { %2484 = vmatmul.msk.f32.vlgmr.msra.gmra.mxu1 %vm68_vm0, %v28_v13  ;;  %v3361_v37 = vld [vmem:[%s4835_s4 + $0x3] ss:$0 sm:$0xff]  ;;  %v45_v46 = vld [vmem:[%s4834_s0 + $0x88] sm:$0xff]  ;;  %v46_v55 = vld [vmem:[%s4834_s0 + $0x90] sm:$0xff] }
   0xe   :  { %v47_v0 = vld [vmem:[%s4834_s0 + $0x98] sm:$0xff]  ;;  %v48_v9 = vld [vmem:[%s4834_s0 + $0xa0] sm:$0xff] }
  0x11   :  { %2522 = vmatmul.msk.f32.gmra.mxu2 %vm68_vm0, %v29_v18 }
  0x12   :  { %2559 = vmatmul.msk.f32.gmra.mxu3 %vm68_vm0, %v29_v18 }
  0x14   :  { %2448 = vmatmul.msk.f32.gmra.mxu0 %vm68_vm0, %v29_v18 }
  0x15   :  { %2485 = vmatmul.msk.f32.gmra.mxu1 %vm68_vm0, %v29_v18  ;;  %v49_v18 = vld [vmem:[%s4834_s0 + $0xa8] sm:$0xff] }
  0x19   :  { %2523 = vmatmul.msk.f32.gmra.mxu2 %vm68_vm0, %v30_v19 }
  0x1a   :  { %2560 = vmatmul.msk.f32.gmra.mxu3 %vm68_vm0, %v30_v19 }
  0x1c   :  { %2449 = vmatmul.msk.f32.gmra.mxu0 %vm68_vm0, %v30_v19 }
  0x1d   :  { %2486 = vmatmul.msk.f32.gmra.mxu1 %vm68_vm0, %v30_v19 }
  0x21   :  { %2524 = vmatmul.msk.f32.gmra.mxu2 %vm68_vm0, %v31_v20 }
  0x22   :  { %2561 = vmatmul.msk.f32.gmra.mxu3 %vm68_vm0, %v31_v20 }
  0x24   :  { %2450 = vmatmul.msk.f32.gmra.mxu0 %vm68_vm0, %v31_v20 }
  0x25   :  { %2487 = vmatmul.msk.f32.gmra.mxu1 %vm68_vm0, %v31_v20 }
  0x29   :  { %2525 = vmatmul.msk.f32.gmra.mxu2 %vm68_vm0, %v32_v21 }
  0x2a   :  { %2562 = vmatmul.msk.f32.gmra.mxu3 %vm68_vm0, %v32_v21 }
  0x2c   :  { %2451 = vmatmul.msk.f32.gmra.mxu0 %vm68_vm0, %v32_v21 }
  0x2d   :  { %2488 = vmatmul.msk.f32.gmra.mxu1 %vm68_vm0, %v32_v21 }
  0x31   :  { %2526 = vmatmul.msk.f32.gmra.mxu2 %vm68_vm0, %v33_v22 }
  0x32   :  { %2563 = vmatmul.msk.f32.gmra.mxu3 %vm68_vm0, %v33_v22 }
  0x34   :  { %2452 = vmatmul.msk.f32.gmra.mxu0 %vm68_vm0, %v33_v22 }
  0x35   :  { %2489 = vmatmul.msk.f32.gmra.mxu1 %vm68_vm0, %v33_v22 }
  0x39   :  { %2527 = vmatmul.msk.f32.gmra.mxu2 %vm68_vm0, %v34_v23 }
  0x3a   :  { %2564 = vmatmul.msk.f32.gmra.mxu3 %vm68_vm0, %v34_v23 }
  0x3c   :  { %2453 = vmatmul.msk.f32.gmra.mxu0 %vm68_vm0, %v34_v23 }
  0x3d   :  { %2490 = vmatmul.msk.f32.gmra.mxu1 %vm68_vm0, %v34_v23 }
  0x41   :  { %2528 = vmatmul.msk.f32.gmra.mxu2 %vm68_vm0, %v35_v24 }
  0x42   :  { %2565 = vmatmul.msk.f32.gmra.mxu3 %vm68_vm0, %v35_v24 }
  0x44   :  { %2454 = vmatmul.msk.f32.gmra.mxu0 %vm68_vm0, %v35_v24 }
  0x45   :  { %2491 = vmatmul.msk.f32.gmra.mxu1 %vm68_vm0, %v35_v24 }
  0x49   :  { %2529 = vmatmul.msk.f32.gmra.mxu2 %vm68_vm0, %v36_v25 }
  0x4a   :  { %2566 = vmatmul.msk.f32.gmra.mxu3 %vm68_vm0, %v36_v25 }
  0x4c   :  { %2455 = vmatmul.msk.f32.gmra.mxu0 %vm68_vm0, %v36_v25 }
  0x4d   :  { %2492 = vmatmul.msk.f32.gmra.mxu1 %vm68_vm0, %v36_v25 }
  0x51   :  { %2530 = vmatmul.msk.f32.gmra.mxu2 %vm68_vm0, %v37_v26 }
  0x52   :  { %2567 = vmatmul.msk.f32.gmra.mxu3 %vm68_vm0, %v37_v26 }
  0x54   :  { %2456 = vmatmul.msk.f32.gmra.mxu0 %vm68_vm0, %v37_v26 }
  0x55   :  { %2493 = vmatmul.msk.f32.gmra.mxu1 %vm68_vm0, %v37_v26 }
  0x59   :  { %2531 = vmatmul.msk.f32.gmra.mxu2 %vm68_vm0, %v38_v27 }
  0x5a   :  { %2568 = vmatmul.msk.f32.gmra.mxu3 %vm68_vm0, %v38_v27 }
  0x5c   :  { %2457 = vmatmul.msk.f32.gmra.mxu0 %vm68_vm0, %v38_v27 }
  0x5d   :  { %2494 = vmatmul.msk.f32.gmra.mxu1 %vm68_vm0, %v38_v27  ;;  %v50_v27 = vld [vmem:[%s4834_s0 + $0xb0] sm:$0xff] }
  0x61   :  { %2532 = vmatmul.msk.f32.gmra.mxu2 %vm68_vm0, %v39_v28 }
  0x62   :  { %2569 = vmatmul.msk.f32.gmra.mxu3 %vm68_vm0, %v39_v28 }
  0x64   :  { %2458 = vmatmul.msk.f32.gmra.mxu0 %vm68_vm0, %v39_v28 }
  0x65   :  { %2495 = vmatmul.msk.f32.gmra.mxu1 %vm68_vm0, %v39_v28 }
  0x69   :  { %2533 = vmatmul.msk.f32.gmra.mxu2 %vm68_vm0, %v40_v29 }
  0x6a   :  { %2570 = vmatmul.msk.f32.gmra.mxu3 %vm68_vm0, %v40_v29 }
  0x6c   :  { %2459 = vmatmul.msk.f32.gmra.mxu0 %vm68_vm0, %v40_v29 }
  0x6d   :  { %2496 = vmatmul.msk.f32.gmra.mxu1 %vm68_vm0, %v40_v29 }
  0x71   :  { %2534 = vmatmul.msk.f32.gmra.mxu2 %vm68_vm0, %v41_v30 }
  0x72   :  { %2571 = vmatmul.msk.f32.gmra.mxu3 %vm68_vm0, %v41_v30 }
  0x74   :  { %2460 = vmatmul.msk.f32.gmra.mxu0 %vm68_vm0, %v41_v30 }
  0x75   :  { %2497 = vmatmul.msk.f32.gmra.mxu1 %vm68_vm0, %v41_v30 }
  0x79   :  { %2535 = vmatmul.msk.f32.gmra.mxu2 %vm68_vm0, %v42_v31 }
  0x7a   :  { %2572 = vmatmul.msk.f32.gmra.mxu3 %vm68_vm0, %v42_v31 }
  0x7c   :  { %2461 = vmatmul.msk.f32.gmra.mxu0 %vm68_vm0, %v42_v31 }
  0x7d   :  { %2498 = vmatmul.msk.f32.gmra.mxu1 %vm68_vm0, %v42_v31 }
  0x81   :  { %2536 = vmatmul.msk.f32.gmra.mxu2 %vm68_vm0, %v43_v32 }
  0x82   :  { %2573 = vmatmul.msk.f32.gmra.mxu3 %vm68_vm0, %v43_v32 }
  0x84   :  { %2462 = vmatmul.msk.f32.gmra.mxu0 %vm68_vm0, %v43_v32 }
  0x85   :  { %2499 = vmatmul.msk.f32.gmra.mxu1 %vm68_vm0, %v43_v32 }
  0x89   :  { %2537 = vmatmul.msk.f32.gmra.mxu2 %vm68_vm0, %v44_v33  ;;  %v182_v38 = vpop.f32.mrf.mxu0 }
  0x8a   :  { %2574 = vmatmul.msk.f32.gmra.mxu3 %vm68_vm0, %v44_v33  ;;  %v337_v39 = vpop.f32.mrf.mxu1  ;;  %v183_v40 = vadd.f32 %v3344_v34, %v182_v38 }
  0x8b   :  { %v338_v41 = vadd.f32 %v3349_v35, %v337_v39 }
  0x8c   :  { %v493_v42 = vpop.f32.mrf.mxu2  ;;  %278 = vst.msk [vmem:[#allocation2] sm:$0xff] %vm68_vm0, %v183_v40  ;;  %2463 = vmatmul.msk.f32.gmra.mxu0 %vm68_vm0, %v44_v33  ;;  %v51_v40 = vld [vmem:[%s4834_s0 + $0xb8] sm:$0xff] }
  0x8d   :  { %v649_v43 = vpop.f32.mrf.mxu3  ;;  %v494_v44 = vadd.f32 %v3356_v36, %v493_v42  ;;  %2500 = vmatmul.msk.f32.gmra.mxu1 %vm68_vm0, %v44_v33  ;;  %434 = vst.msk [vmem:[#allocation2 + $0x100] sm:$0xff] %vm68_vm0, %v338_v41 }
  0x8e   :  { %v650_v45 = vadd.f32 %v3361_v37, %v649_v43 }
  0x8f   :  { %590 = vst.msk [vmem:[#allocation2 + $0x200] sm:$0xff] %vm68_vm0, %v494_v44 }
  0x90   :  { %746 = vst.msk [vmem:[#allocation2 + $0x300] sm:$0xff] %vm68_vm0, %v650_v45 }
  0x91   :  { %2538 = vmatmul.msk.f32.gmra.mxu2 %vm68_vm0, %v45_v46  ;;  %v185_v47 = vpop.f32.mrf.mxu0 }
  0x92   :  { %2575 = vmatmul.msk.f32.gmra.mxu3 %vm68_vm0, %v45_v46  ;;  %v340_v48 = vpop.f32.mrf.mxu1  ;;  %v186_v49 = vadd.f32 %v3344_v34, %v185_v47 }
  0x93   :  { %v341_v50 = vadd.f32 %v3349_v35, %v340_v48 }
  0x94   :  { %v496_v51 = vpop.f32.mrf.mxu2  ;;  %279 = vst.msk [vmem:[#allocation2 + $0x8] sm:$0xff] %vm68_vm0, %v186_v49  ;;  %2464 = vmatmul.msk.f32.gmra.mxu0 %vm68_vm0, %v45_v46  ;;  %v52_v49 = vld [vmem:[%s4834_s0 + $0xc0] sm:$0xff] }
  0x95   :  { %v652_v52 = vpop.f32.mrf.mxu3  ;;  %v497_v53 = vadd.f32 %v3356_v36, %v496_v51  ;;  %2501 = vmatmul.msk.f32.gmra.mxu1 %vm68_vm0, %v45_v46  ;;  %435 = vst.msk [vmem:[#allocation2 + $0x108] sm:$0xff] %vm68_vm0, %v341_v50 }
  0x96   :  { %v653_v54 = vadd.f32 %v3361_v37, %v652_v52 }
  0x97   :  { %591 = vst.msk [vmem:[#allocation2 + $0x208] sm:$0xff] %vm68_vm0, %v497_v53 }
  0x98   :  { %747 = vst.msk [vmem:[#allocation2 + $0x308] sm:$0xff] %vm68_vm0, %v653_v54 }
  0x99   :  { %2539 = vmatmul.msk.f32.gmra.mxu2 %vm68_vm0, %v46_v55  ;;  %v188_v56 = vpop.f32.mrf.mxu0 }
  0x9a   :  { %2576 = vmatmul.msk.f32.gmra.mxu3 %vm68_vm0, %v46_v55  ;;  %v343_v57 = vpop.f32.mrf.mxu1  ;;  %v189_v58 = vadd.f32 %v3344_v34, %v188_v56 }
  0x9b   :  { %v344_v59 = vadd.f32 %v3349_v35, %v343_v57 }
  0x9c   :  { %v499_v60 = vpop.f32.mrf.mxu2  ;;  %280 = vst.msk [vmem:[#allocation2 + $0x10] sm:$0xff] %vm68_vm0, %v189_v58  ;;  %2465 = vmatmul.msk.f32.gmra.mxu0 %vm68_vm0, %v46_v55  ;;  %v53_v58 = vld [vmem:[%s4834_s0 + $0xc8] sm:$0xff] }
  0x9d   :  { %v655_v61 = vpop.f32.mrf.mxu3  ;;  %v500_v62 = vadd.f32 %v3356_v36, %v499_v60  ;;  %2502 = vmatmul.msk.f32.gmra.mxu1 %vm68_vm0, %v46_v55  ;;  %436 = vst.msk [vmem:[#allocation2 + $0x110] sm:$0xff] %vm68_vm0, %v344_v59 }
  0x9e   :  { %v656_v63 = vadd.f32 %v3361_v37, %v655_v61 }
  0x9f   :  { %592 = vst.msk [vmem:[#allocation2 + $0x210] sm:$0xff] %vm68_vm0, %v500_v62 }
  0xa0   :  { %748 = vst.msk [vmem:[#allocation2 + $0x310] sm:$0xff] %vm68_vm0, %v656_v63 }
  0xa1   :  { %2540 = vmatmul.msk.f32.gmra.mxu2 %vm68_vm0, %v47_v0  ;;  %v191_v1 = vpop.f32.mrf.mxu0 }
  0xa2   :  { %2577 = vmatmul.msk.f32.gmra.mxu3 %vm68_vm0, %v47_v0  ;;  %v346_v2 = vpop.f32.mrf.mxu1  ;;  %v192_v3 = vadd.f32 %v3344_v34, %v191_v1 }
  0xa3   :  { %v347_v4 = vadd.f32 %v3349_v35, %v346_v2 }
  0xa4   :  { %v502_v5 = vpop.f32.mrf.mxu2  ;;  %281 = vst.msk [vmem:[#allocation2 + $0x18] sm:$0xff] %vm68_vm0, %v192_v3  ;;  %2466 = vmatmul.msk.f32.gmra.mxu0 %vm68_vm0, %v47_v0  ;;  %v54_v3 = vld [vmem:[%s4834_s0 + $0xd0] sm:$0xff] }
  0xa5   :  { %v658_v6 = vpop.f32.mrf.mxu3  ;;  %v503_v7 = vadd.f32 %v3356_v36, %v502_v5  ;;  %2503 = vmatmul.msk.f32.gmra.mxu1 %vm68_vm0, %v47_v0  ;;  %437 = vst.msk [vmem:[#allocation2 + $0x118] sm:$0xff] %vm68_vm0, %v347_v4 }
  0xa6   :  { %v659_v8 = vadd.f32 %v3361_v37, %v658_v6 }
  0xa7   :  { %593 = vst.msk [vmem:[#allocation2 + $0x218] sm:$0xff] %vm68_vm0, %v503_v7 }
  0xa8   :  { %749 = vst.msk [vmem:[#allocation2 + $0x318] sm:$0xff] %vm68_vm0, %v659_v8 }
  0xa9   :  { %2541 = vmatmul.msk.f32.gmra.mxu2 %vm68_vm0, %v48_v9  ;;  %v194_v10 = vpop.f32.mrf.mxu0 }
  0xaa   :  { %2578 = vmatmul.msk.f32.gmra.mxu3 %vm68_vm0, %v48_v9  ;;  %v349_v11 = vpop.f32.mrf.mxu1  ;;  %v195_v12 = vadd.f32 %v3344_v34, %v194_v10 }
  0xab   :  { %v350_v13 = vadd.f32 %v3349_v35, %v349_v11 }
  0xac   :  { %v505_v14 = vpop.f32.mrf.mxu2  ;;  %282 = vst.msk [vmem:[#allocation2 + $0x20] sm:$0xff] %vm68_vm0, %v195_v12  ;;  %2467 = vmatmul.msk.f32.gmra.mxu0 %vm68_vm0, %v48_v9  ;;  %v55_v12 = vld [vmem:[%s4834_s0 + $0xd8] sm:$0xff] }
  0xad   :  { %v661_v15 = vpop.f32.mrf.mxu3  ;;  %v506_v16 = vadd.f32 %v3356_v36, %v505_v14  ;;  %2504 = vmatmul.msk.f32.gmra.mxu1 %vm68_vm0, %v48_v9  ;;  %438 = vst.msk [vmem:[#allocation2 + $0x120] sm:$0xff] %vm68_vm0, %v350_v13 }
  0xae   :  { %v662_v17 = vadd.f32 %v3361_v37, %v661_v15 }
  0xaf   :  { %594 = vst.msk [vmem:[#allocation2 + $0x220] sm:$0xff] %vm68_vm0, %v506_v16 }
  0xb0   :  { %750 = vst.msk [vmem:[#allocation2 + $0x320] sm:$0xff] %vm68_vm0, %v662_v17 }
  0xb1   :  { %2542 = vmatmul.msk.f32.gmra.mxu2 %vm68_vm0, %v49_v18  ;;  %v197_v19 = vpop.f32.mrf.mxu0 }
  0xb2   :  { %2579 = vmatmul.msk.f32.gmra.mxu3 %vm68_vm0, %v49_v18  ;;  %v352_v20 = vpop.f32.mrf.mxu1  ;;  %v198_v21 = vadd.f32 %v3344_v34, %v197_v19 }
  0xb3   :  { %v353_v22 = vadd.f32 %v3349_v35, %v352_v20 }
  0xb4   :  { %v508_v23 = vpop.f32.mrf.mxu2  ;;  %283 = vst.msk [vmem:[#allocation2 + $0x28] sm:$0xff] %vm68_vm0, %v198_v21  ;;  %2468 = vmatmul.msk.f32.gmra.mxu0 %vm68_vm0, %v49_v18  ;;  %v56_v21 = vld [vmem:[%s4834_s0 + $0xe0] sm:$0xff] }
  0xb5   :  { %v664_v24 = vpop.f32.mrf.mxu3  ;;  %v509_v25 = vadd.f32 %v3356_v36, %v508_v23  ;;  %2505 = vmatmul.msk.f32.gmra.mxu1 %vm68_vm0, %v49_v18  ;;  %439 = vst.msk [vmem:[#allocation2 + $0x128] sm:$0xff] %vm68_vm0, %v353_v22 }
  0xb6   :  { %v665_v26 = vadd.f32 %v3361_v37, %v664_v24 }
  0xb7   :  { %595 = vst.msk [vmem:[#allocation2 + $0x228] sm:$0xff] %vm68_vm0, %v509_v25 }
  0xb8   :  { %751 = vst.msk [vmem:[#allocation2 + $0x328] sm:$0xff] %vm68_vm0, %v665_v26 }
  0xb9   :  { %2543 = vmatmul.msk.f32.gmra.mxu2 %vm68_vm0, %v50_v27  ;;  %v200_v28 = vpop.f32.mrf.mxu0 }
  0xba   :  { %2580 = vmatmul.msk.f32.gmra.mxu3 %vm68_vm0, %v50_v27  ;;  %v355_v29 = vpop.f32.mrf.mxu1  ;;  %v201_v30 = vadd.f32 %v3344_v34, %v200_v28 }
  0xbb   :  { %v356_v31 = vadd.f32 %v3349_v35, %v355_v29 }
  0xbc   :  { %v511_v32 = vpop.f32.mrf.mxu2  ;;  %284 = vst.msk [vmem:[#allocation2 + $0x30] sm:$0xff] %vm68_vm0, %v201_v30  ;;  %2469 = vmatmul.msk.f32.gmra.mxu0 %vm68_vm0, %v50_v27  ;;  %v57_v30 = vld [vmem:[%s4834_s0 + $0xe8] sm:$0xff] }
  0xbd   :  { %v667_v33 = vpop.f32.mrf.mxu3  ;;  %v512_v38 = vadd.f32 %v3356_v36, %v511_v32  ;;  %2506 = vmatmul.msk.f32.gmra.mxu1 %vm68_vm0, %v50_v27  ;;  %440 = vst.msk [vmem:[#allocation2 + $0x130] sm:$0xff] %vm68_vm0, %v356_v31 }
  0xbe   :  { %v668_v39 = vadd.f32 %v3361_v37, %v667_v33 }
  0xbf   :  { %596 = vst.msk [vmem:[#allocation2 + $0x230] sm:$0xff] %vm68_vm0, %v512_v38 }
  0xc0   :  { %752 = vst.msk [vmem:[#allocation2 + $0x330] sm:$0xff] %vm68_vm0, %v668_v39 }
  0xc1   :  { %2544 = vmatmul.msk.f32.gmra.mxu2 %vm68_vm0, %v51_v40  ;;  %v203_v41 = vpop.f32.mrf.mxu0 }
  0xc2   :  { %2581 = vmatmul.msk.f32.gmra.mxu3 %vm68_vm0, %v51_v40  ;;  %v358_v42 = vpop.f32.mrf.mxu1  ;;  %v204_v43 = vadd.f32 %v3344_v34, %v203_v41 }
  0xc3   :  { %v359_v44 = vadd.f32 %v3349_v35, %v358_v42 }
  0xc4   :  { %v514_v45 = vpop.f32.mrf.mxu2  ;;  %285 = vst.msk [vmem:[#allocation2 + $0x38] sm:$0xff] %vm68_vm0, %v204_v43  ;;  %2470 = vmatmul.msk.f32.gmra.mxu0 %vm68_vm0, %v51_v40  ;;  %v58_v43 = vld [vmem:[%s4834_s0 + $0xf0] sm:$0xff] }
  0xc5   :  { %v670_v46 = vpop.f32.mrf.mxu3  ;;  %v515_v47 = vadd.f32 %v3356_v36, %v514_v45  ;;  %2507 = vmatmul.msk.f32.gmra.mxu1 %vm68_vm0, %v51_v40  ;;  %441 = vst.msk [vmem:[#allocation2 + $0x138] sm:$0xff] %vm68_vm0, %v359_v44 }
  0xc6   :  { %v671_v48 = vadd.f32 %v3361_v37, %v670_v46 }
  0xc7   :  { %597 = vst.msk [vmem:[#allocation2 + $0x238] sm:$0xff] %vm68_vm0, %v515_v47 }
  0xc8   :  { %753 = vst.msk [vmem:[#allocation2 + $0x338] sm:$0xff] %vm68_vm0, %v671_v48 }
  0xc9   :  { %2545 = vmatmul.msk.f32.gmra.mxu2 %vm68_vm0, %v52_v49  ;;  %v206_v50 = vpop.f32.mrf.mxu0 }
  0xca   :  { %2582 = vmatmul.msk.f32.gmra.mxu3 %vm68_vm0, %v52_v49  ;;  %v361_v51 = vpop.f32.mrf.mxu1  ;;  %v207_v52 = vadd.f32 %v3344_v34, %v206_v50 }
  0xcb   :  { %v362_v53 = vadd.f32 %v3349_v35, %v361_v51 }
  0xcc   :  { %v517_v54 = vpop.f32.mrf.mxu2  ;;  %286 = vst.msk [vmem:[#allocation2 + $0x40] sm:$0xff] %vm68_vm0, %v207_v52  ;;  %2471 = vmatmul.msk.f32.gmra.mxu0 %vm68_vm0, %v52_v49  ;;  %v59_v52 = vld [vmem:[%s4834_s0 + $0xf8] sm:$0xff] }
  0xcd   :  { %v673_v55 = vpop.f32.mrf.mxu3  ;;  %v518_v56 = vadd.f32 %v3356_v36, %v517_v54  ;;  %2508 = vmatmul.msk.f32.gmra.mxu1 %vm68_vm0, %v52_v49  ;;  %442 = vst.msk [vmem:[#allocation2 + $0x140] sm:$0xff] %vm68_vm0, %v362_v53 }
  0xce   :  { %v674_v57 = vadd.f32 %v3361_v37, %v673_v55 }
  0xcf   :  { %598 = vst.msk [vmem:[#allocation2 + $0x240] sm:$0xff] %vm68_vm0, %v518_v56 }
  0xd0   :  { %754 = vst.msk [vmem:[#allocation2 + $0x340] sm:$0xff] %vm68_vm0, %v674_v57 }
  0xd1   :  { %2546 = vmatmul.msk.f32.gmra.mxu2 %vm68_vm0, %v53_v58  ;;  %v209_v59 = vpop.f32.mrf.mxu0 }
  0xd2   :  { %2583 = vmatmul.msk.f32.gmra.mxu3 %vm68_vm0, %v53_v58  ;;  %v364_v60 = vpop.f32.mrf.mxu1  ;;  %v210_v61 = vadd.f32 %v3344_v34, %v209_v59 }
  0xd3   :  { %v365_v62 = vadd.f32 %v3349_v35, %v364_v60 }
  0xd4   :  { %v520_v63 = vpop.f32.mrf.mxu2  ;;  %287 = vst.msk [vmem:[#allocation2 + $0x48] sm:$0xff] %vm68_vm0, %v210_v61  ;;  %2472 = vmatmul.msk.f32.gmra.mxu0 %vm68_vm0, %v53_v58 }
  0xd5   :  { %v676_v0 = vpop.f32.mrf.mxu3  ;;  %v521_v1 = vadd.f32 %v3356_v36, %v520_v63  ;;  %2509 = vmatmul.msk.f32.gmra.mxu1 %vm68_vm0, %v53_v58  ;;  %443 = vst.msk [vmem:[#allocation2 + $0x148] sm:$0xff] %vm68_vm0, %v365_v62 }
  0xd6   :  { %v677_v2 = vadd.f32 %v3361_v37, %v676_v0 }
  0xd7   :  { %599 = vst.msk [vmem:[#allocation2 + $0x248] sm:$0xff] %vm68_vm0, %v521_v1 }
  0xd8   :  { %755 = vst.msk [vmem:[#allocation2 + $0x348] sm:$0xff] %vm68_vm0, %v677_v2 }
  0xd9   :  { %2547 = vmatmul.msk.f32.gmra.mxu2 %vm68_vm0, %v54_v3  ;;  %v212_v4 = vpop.f32.mrf.mxu0 }
  0xda   :  { %2584 = vmatmul.msk.f32.gmra.mxu3 %vm68_vm0, %v54_v3  ;;  %v367_v5 = vpop.f32.mrf.mxu1  ;;  %v213_v6 = vadd.f32 %v3344_v34, %v212_v4 }
  0xdb   :  { %v368_v7 = vadd.f32 %v3349_v35, %v367_v5 }
  0xdc   :  { %v523_v8 = vpop.f32.mrf.mxu2  ;;  %288 = vst.msk [vmem:[#allocation2 + $0x50] sm:$0xff] %vm68_vm0, %v213_v6  ;;  %2473 = vmatmul.msk.f32.gmra.mxu0 %vm68_vm0, %v54_v3 }
  0xdd   :  { %v679_v9 = vpop.f32.mrf.mxu3  ;;  %v524_v10 = vadd.f32 %v3356_v36, %v523_v8  ;;  %2510 = vmatmul.msk.f32.gmra.mxu1 %vm68_vm0, %v54_v3  ;;  %444 = vst.msk [vmem:[#allocation2 + $0x150] sm:$0xff] %vm68_vm0, %v368_v7 }
  0xde   :  { %v680_v11 = vadd.f32 %v3361_v37, %v679_v9 }
  0xdf   :  { %600 = vst.msk [vmem:[#allocation2 + $0x250] sm:$0xff] %vm68_vm0, %v524_v10 }
  0xe0   :  { %756 = vst.msk [vmem:[#allocation2 + $0x350] sm:$0xff] %vm68_vm0, %v680_v11 }
  0xe1   :  { %2548 = vmatmul.msk.f32.gmra.mxu2 %vm68_vm0, %v55_v12  ;;  %v215_v13 = vpop.f32.mrf.mxu0 }
  0xe2   :  { %2585 = vmatmul.msk.f32.gmra.mxu3 %vm68_vm0, %v55_v12  ;;  %v370_v14 = vpop.f32.mrf.mxu1  ;;  %v216_v15 = vadd.f32 %v3344_v34, %v215_v13 }
  0xe3   :  { %v371_v16 = vadd.f32 %v3349_v35, %v370_v14 }
  0xe4   :  { %v526_v17 = vpop.f32.mrf.mxu2  ;;  %289 = vst.msk [vmem:[#allocation2 + $0x58] sm:$0xff] %vm68_vm0, %v216_v15  ;;  %2474 = vmatmul.msk.f32.gmra.mxu0 %vm68_vm0, %v55_v12 }
  0xe5   :  { %v682_v18 = vpop.f32.mrf.mxu3  ;;  %v527_v19 = vadd.f32 %v3356_v36, %v526_v17  ;;  %2511 = vmatmul.msk.f32.gmra.mxu1 %vm68_vm0, %v55_v12  ;;  %445 = vst.msk [vmem:[#allocation2 + $0x158] sm:$0xff] %vm68_vm0, %v371_v16 }
  0xe6   :  { %v683_v20 = vadd.f32 %v3361_v37, %v682_v18 }
  0xe7   :  { %601 = vst.msk [vmem:[#allocation2 + $0x258] sm:$0xff] %vm68_vm0, %v527_v19 }
  0xe8   :  { %757 = vst.msk [vmem:[#allocation2 + $0x358] sm:$0xff] %vm68_vm0, %v683_v20 }
  0xe9   :  { %2549 = vmatmul.msk.f32.gmra.mxu2 %vm68_vm0, %v56_v21  ;;  %v218_v22 = vpop.f32.mrf.mxu0 }
  0xea   :  { %2586 = vmatmul.msk.f32.gmra.mxu3 %vm68_vm0, %v56_v21  ;;  %v373_v23 = vpop.f32.mrf.mxu1  ;;  %v219_v24 = vadd.f32 %v3344_v34, %v218_v22 }
  0xeb   :  { %v374_v25 = vadd.f32 %v3349_v35, %v373_v23 }
  0xec   :  { %v529_v26 = vpop.f32.mrf.mxu2  ;;  %290 = vst.msk [vmem:[#allocation2 + $0x60] sm:$0xff] %vm68_vm0, %v219_v24  ;;  %2475 = vmatmul.msk.f32.gmra.mxu0 %vm68_vm0, %v56_v21 }
  0xed   :  { %v685_v27 = vpop.f32.mrf.mxu3  ;;  %v530_v28 = vadd.f32 %v3356_v36, %v529_v26  ;;  %2512 = vmatmul.msk.f32.gmra.mxu1 %vm68_vm0, %v56_v21  ;;  %446 = vst.msk [vmem:[#allocation2 + $0x160] sm:$0xff] %vm68_vm0, %v374_v25 }
  0xee   :  { %v686_v29 = vadd.f32 %v3361_v37, %v685_v27 }
  0xef   :  { %602 = vst.msk [vmem:[#allocation2 + $0x260] sm:$0xff] %vm68_vm0, %v530_v28 }
  0xf0   :  { %758 = vst.msk [vmem:[#allocation2 + $0x360] sm:$0xff] %vm68_vm0, %v686_v29 }
  0xf1   :  { %2550 = vmatmul.msk.f32.gmra.mxu2 %vm68_vm0, %v57_v30  ;;  %v221_v31 = vpop.f32.mrf.mxu0 }
  0xf2   :  { %2587 = vmatmul.msk.f32.gmra.mxu3 %vm68_vm0, %v57_v30  ;;  %v376_v32 = vpop.f32.mrf.mxu1  ;;  %v222_v33 = vadd.f32 %v3344_v34, %v221_v31 }
  0xf3   :  { %v377_v38 = vadd.f32 %v3349_v35, %v376_v32 }
  0xf4   :  { %v532_v39 = vpop.f32.mrf.mxu2  ;;  %291 = vst.msk [vmem:[#allocation2 + $0x68] sm:$0xff] %vm68_vm0, %v222_v33  ;;  %2476 = vmatmul.msk.f32.gmra.mxu0 %vm68_vm0, %v57_v30 }
  0xf5   :  { %v688_v40 = vpop.f32.mrf.mxu3  ;;  %v533_v41 = vadd.f32 %v3356_v36, %v532_v39  ;;  %2513 = vmatmul.msk.f32.gmra.mxu1 %vm68_vm0, %v57_v30  ;;  %447 = vst.msk [vmem:[#allocation2 + $0x168] sm:$0xff] %vm68_vm0, %v377_v38 }
  0xf6   :  { %v689_v42 = vadd.f32 %v3361_v37, %v688_v40 }
  0xf7   :  { %603 = vst.msk [vmem:[#allocation2 + $0x268] sm:$0xff] %vm68_vm0, %v533_v41 }
  0xf8   :  { %759 = vst.msk [vmem:[#allocation2 + $0x368] sm:$0xff] %vm68_vm0, %v689_v42 }
  0xf9   :  { %2551 = vmatmul.msk.f32.gmra.mxu2 %vm68_vm0, %v58_v43  ;;  %v224_v44 = vpop.f32.mrf.mxu0 }
  0xfa   :  { %2588 = vmatmul.msk.f32.gmra.mxu3 %vm68_vm0, %v58_v43  ;;  %v379_v45 = vpop.f32.mrf.mxu1  ;;  %v225_v46 = vadd.f32 %v3344_v34, %v224_v44 }
  0xfb   :  { %v380_v47 = vadd.f32 %v3349_v35, %v379_v45 }
  0xfc   :  { %v535_v48 = vpop.f32.mrf.mxu2  ;;  %292 = vst.msk [vmem:[#allocation2 + $0x70] sm:$0xff] %vm68_vm0, %v225_v46  ;;  %2477 = vmatmul.msk.f32.gmra.mxu0 %vm68_vm0, %v58_v43 }
  0xfd   :  { %v691_v49 = vpop.f32.mrf.mxu3  ;;  %v536_v50 = vadd.f32 %v3356_v36, %v535_v48  ;;  %2514 = vmatmul.msk.f32.gmra.mxu1 %vm68_vm0, %v58_v43  ;;  %448 = vst.msk [vmem:[#allocation2 + $0x170] sm:$0xff] %vm68_vm0, %v380_v47 }
  0xfe   :  { %v692_v51 = vadd.f32 %v3361_v37, %v691_v49 }
  0xff   :  { %604 = vst.msk [vmem:[#allocation2 + $0x270] sm:$0xff] %vm68_vm0, %v536_v50 }
 0x100   :  { %760 = vst.msk [vmem:[#allocation2 + $0x370] sm:$0xff] %vm68_vm0, %v692_v51 }
 0x101   :  { %2552 = vmatmul.msk.f32.gmra.mxu2 %vm68_vm0, %v59_v52  ;;  %v227_v53 = vpop.f32.mrf.mxu0 }
 0x102   :  { %2589 = vmatmul.msk.f32.gmra.mxu3 %vm68_vm0, %v59_v52  ;;  %v382_v54 = vpop.f32.mrf.mxu1  ;;  %v228_v55 = vadd.f32 %v3344_v34, %v227_v53 }
 0x103   :  { %v383_v56 = vadd.f32 %v3349_v35, %v382_v54 }
 0x104   :  { %v538_v57 = vpop.f32.mrf.mxu2  ;;  %293 = vst.msk [vmem:[#allocation2 + $0x78] sm:$0xff] %vm68_vm0, %v228_v55  ;;  %2478 = vmatmul.msk.f32.gmra.mxu0 %vm68_vm0, %v59_v52 }
 0x105   :  { %v694_v58 = vpop.f32.mrf.mxu3  ;;  %v539_v59 = vadd.f32 %v3356_v36, %v538_v57  ;;  %2515 = vmatmul.msk.f32.gmra.mxu1 %vm68_vm0, %v59_v52  ;;  %449 = vst.msk [vmem:[#allocation2 + $0x178] sm:$0xff] %vm68_vm0, %v383_v56 }
 0x106   :  { %v695_v60 = vadd.f32 %v3361_v37, %v694_v58 }
 0x107   :  { %605 = vst.msk [vmem:[#allocation2 + $0x278] sm:$0xff] %vm68_vm0, %v539_v59 }
 0x108   :  { %761 = vst.msk [vmem:[#allocation2 + $0x378] sm:$0xff] %vm68_vm0, %v695_v60 }
 0x109   :  { %v230_v61 = vpop.f32.mrf.mxu0 }
 0x10a   :  { %v385_v62 = vpop.f32.mrf.mxu1  ;;  %v231_v63 = vadd.f32 %v3344_v34, %v230_v61 }
 0x10b   :  { %v386_v0 = vadd.f32 %v3349_v35, %v385_v62 }
 0x10c   :  { %v541_v1 = vpop.f32.mrf.mxu2  ;;  %294 = vst.msk [vmem:[#allocation2 + $0x80] sm:$0xff] %vm68_vm0, %v231_v63 }
 0x10d   :  { %v697_v2 = vpop.f32.mrf.mxu3  ;;  %v542_v3 = vadd.f32 %v3356_v36, %v541_v1  ;;  %450 = vst.msk [vmem:[#allocation2 + $0x180] sm:$0xff] %vm68_vm0, %v386_v0 }
 0x10e   :  { %v698_v4 = vadd.f32 %v3361_v37, %v697_v2 }
 0x10f   :  { %606 = vst.msk [vmem:[#allocation2 + $0x280] sm:$0xff] %vm68_vm0, %v542_v3 }
 0x110   :  { %762 = vst.msk [vmem:[#allocation2 + $0x380] sm:$0xff] %vm68_vm0, %v698_v4 }
 0x111   :  { %v233_v5 = vpop.f32.mrf.mxu0 }
 0x112   :  { %v388_v6 = vpop.f32.mrf.mxu1  ;;  %v234_v7 = vadd.f32 %v3344_v34, %v233_v5 }
 0x113   :  { %v389_v8 = vadd.f32 %v3349_v35, %v388_v6 }
 0x114   :  { %v544_v9 = vpop.f32.mrf.mxu2  ;;  %295 = vst.msk [vmem:[#allocation2 + $0x88] sm:$0xff] %vm68_vm0, %v234_v7 }
 0x115   :  { %v700_v10 = vpop.f32.mrf.mxu3  ;;  %v545_v11 = vadd.f32 %v3356_v36, %v544_v9  ;;  %451 = vst.msk [vmem:[#allocation2 + $0x188] sm:$0xff] %vm68_vm0, %v389_v8 }
 0x116   :  { %v701_v12 = vadd.f32 %v3361_v37, %v700_v10 }
 0x117   :  { %607 = vst.msk [vmem:[#allocation2 + $0x288] sm:$0xff] %vm68_vm0, %v545_v11 }
 0x118   :  { %763 = vst.msk [vmem:[#allocation2 + $0x388] sm:$0xff] %vm68_vm0, %v701_v12 }
 0x119   :  { %v236_v13 = vpop.f32.mrf.mxu0 }
 0x11a   :  { %v391_v14 = vpop.f32.mrf.mxu1  ;;  %v237_v15 = vadd.f32 %v3344_v34, %v236_v13 }
 0x11b   :  { %v392_v16 = vadd.f32 %v3349_v35, %v391_v14 }
 0x11c   :  { %v547_v17 = vpop.f32.mrf.mxu2  ;;  %296 = vst.msk [vmem:[#allocation2 + $0x90] sm:$0xff] %vm68_vm0, %v237_v15 }
 0x11d   :  { %v703_v18 = vpop.f32.mrf.mxu3  ;;  %v548_v19 = vadd.f32 %v3356_v36, %v547_v17  ;;  %452 = vst.msk [vmem:[#allocation2 + $0x190] sm:$0xff] %vm68_vm0, %v392_v16 }
 0x11e   :  { %v704_v20 = vadd.f32 %v3361_v37, %v703_v18 }
 0x11f   :  { %608 = vst.msk [vmem:[#allocation2 + $0x290] sm:$0xff] %vm68_vm0, %v548_v19 }
 0x120   :  { %764 = vst.msk [vmem:[#allocation2 + $0x390] sm:$0xff] %vm68_vm0, %v704_v20 }
 0x121   :  { %v239_v21 = vpop.f32.mrf.mxu0 }
 0x122   :  { %v394_v22 = vpop.f32.mrf.mxu1  ;;  %v240_v23 = vadd.f32 %v3344_v34, %v239_v21 }
 0x123   :  { %v395_v24 = vadd.f32 %v3349_v35, %v394_v22 }
 0x124   :  { %v550_v25 = vpop.f32.mrf.mxu2  ;;  %297 = vst.msk [vmem:[#allocation2 + $0x98] sm:$0xff] %vm68_vm0, %v240_v23 }
 0x125   :  { %v706_v26 = vpop.f32.mrf.mxu3  ;;  %v551_v27 = vadd.f32 %v3356_v36, %v550_v25  ;;  %453 = vst.msk [vmem:[#allocation2 + $0x198] sm:$0xff] %vm68_vm0, %v395_v24 }
 0x126   :  { %v707_v28 = vadd.f32 %v3361_v37, %v706_v26 }
 0x127   :  { %609 = vst.msk [vmem:[#allocation2 + $0x298] sm:$0xff] %vm68_vm0, %v551_v27 }
 0x128   :  { %765 = vst.msk [vmem:[#allocation2 + $0x398] sm:$0xff] %vm68_vm0, %v707_v28 }
 0x129   :  { %v242_v29 = vpop.f32.mrf.mxu0 }
 0x12a   :  { %v397_v30 = vpop.f32.mrf.mxu1  ;;  %v243_v31 = vadd.f32 %v3344_v34, %v242_v29 }
 0x12b   :  { %v398_v32 = vadd.f32 %v3349_v35, %v397_v30 }
 0x12c   :  { %v553_v33 = vpop.f32.mrf.mxu2  ;;  %298 = vst.msk [vmem:[#allocation2 + $0xa0] sm:$0xff] %vm68_vm0, %v243_v31 }
 0x12d   :  { %v709_v38 = vpop.f32.mrf.mxu3  ;;  %v554_v39 = vadd.f32 %v3356_v36, %v553_v33  ;;  %454 = vst.msk [vmem:[#allocation2 + $0x1a0] sm:$0xff] %vm68_vm0, %v398_v32  ;;  %v3697_v33 = vld [vmem:[%s4836_s3] sm:$0xff] }
 0x12e   :  { %v710_v40 = vadd.f32 %v3361_v37, %v709_v38  ;;  %v3702_v38 = vld [vmem:[%s4836_s3 + $0x8] sm:$0xff] }
 0x12f   :  { %610 = vst.msk [vmem:[#allocation2 + $0x2a0] sm:$0xff] %vm68_vm0, %v554_v39  ;;  %v3707_v39 = vld [vmem:[%s4836_s3 + $0x10] sm:$0xff] }
 0x130   :  { %766 = vst.msk [vmem:[#allocation2 + $0x3a0] sm:$0xff] %vm68_vm0, %v710_v40  ;;  %v3712_v40 = vld [vmem:[%s4836_s3 + $0x18] sm:$0xff] }
 0x131   :  { %v245_v41 = vpop.f32.mrf.mxu0 }
 0x132   :  { %v400_v42 = vpop.f32.mrf.mxu1  ;;  %v246_v43 = vadd.f32 %v3344_v34, %v245_v41  ;;  %v3717_v41 = vld [vmem:[%s4836_s3 + $0x20] sm:$0xff] }
 0x133   :  { %v401_v44 = vadd.f32 %v3349_v35, %v400_v42  ;;  %v3722_v42 = vld [vmem:[%s4836_s3 + $0x28] sm:$0xff] }
 0x134   :  { %v556_v45 = vpop.f32.mrf.mxu2  ;;  %299 = vst.msk [vmem:[#allocation2 + $0xa8] sm:$0xff] %vm68_vm0, %v246_v43 }
 0x135   :  { %v712_v46 = vpop.f32.mrf.mxu3  ;;  %v557_v47 = vadd.f32 %v3356_v36, %v556_v45  ;;  %455 = vst.msk [vmem:[#allocation2 + $0x1a8] sm:$0xff] %vm68_vm0, %v401_v44  ;;  %v3727_v45 = vld [vmem:[%s4836_s3 + $0x30] sm:$0xff] }
 0x136   :  { %v713_v48 = vadd.f32 %v3361_v37, %v712_v46  ;;  %v3732_v46 = vld [vmem:[%s4836_s3 + $0x38] sm:$0xff] }
 0x137   :  { %611 = vst.msk [vmem:[#allocation2 + $0x2a8] sm:$0xff] %vm68_vm0, %v557_v47  ;;  %v3737_v47 = vld [vmem:[%s4836_s3 + $0x40] sm:$0xff] }
 0x138   :  { %767 = vst.msk [vmem:[#allocation2 + $0x3a8] sm:$0xff] %vm68_vm0, %v713_v48 }
 0x139   :  { %v248_v49 = vpop.f32.mrf.mxu0 }
 0x13a   :  { %v403_v50 = vpop.f32.mrf.mxu1  ;;  %v249_v51 = vadd.f32 %v3344_v34, %v248_v49 }
 0x13b   :  { %v404_v52 = vadd.f32 %v3349_v35, %v403_v50  ;;  %v3744_v50 = vld [vmem:[%s4836_s3 + $0x48] sm:$0xff] }
 0x13c   :  { %v559_v53 = vpop.f32.mrf.mxu2  ;;  %300 = vst.msk [vmem:[#allocation2 + $0xb0] sm:$0xff] %vm68_vm0, %v249_v51  ;;  %v3749_v51 = vld [vmem:[%s4836_s3 + $0x50] sm:$0xff] }
 0x13d   :  { %v715_v54 = vpop.f32.mrf.mxu3  ;;  %v560_v55 = vadd.f32 %v3356_v36, %v559_v53  ;;  %456 = vst.msk [vmem:[#allocation2 + $0x1b0] sm:$0xff] %vm68_vm0, %v404_v52  ;;  %v3754_v52 = vld [vmem:[%s4836_s3 + $0x58] sm:$0xff] }
 0x13e   :  { %v716_v56 = vadd.f32 %v3361_v37, %v715_v54 }
 0x13f   :  { %612 = vst.msk [vmem:[#allocation2 + $0x2b0] sm:$0xff] %vm68_vm0, %v560_v55  ;;  %v3759_v55 = vld [vmem:[%s4836_s3 + $0x60] sm:$0xff] }
 0x140   :  { %768 = vst.msk [vmem:[#allocation2 + $0x3b0] sm:$0xff] %vm68_vm0, %v716_v56  ;;  %v3764_v56 = vld [vmem:[%s4836_s3 + $0x68] sm:$0xff] }
 0x141   :  { %v251_v57 = vpop.f32.mrf.mxu0 }
 0x142   :  { %v406_v58 = vpop.f32.mrf.mxu1  ;;  %v252_v59 = vadd.f32 %v3344_v34, %v251_v57  ;;  %v3769_v57 = vld [vmem:[%s4836_s3 + $0x70] sm:$0xff] }
 0x143   :  { %v407_v60 = vadd.f32 %v3349_v35, %v406_v58 }
 0x144   :  { %v562_v61 = vpop.f32.mrf.mxu2  ;;  %301 = vst.msk [vmem:[#allocation2 + $0xb8] sm:$0xff] %vm68_vm0, %v252_v59 }
 0x145   :  { %v718_v62 = vpop.f32.mrf.mxu3  ;;  %v563_v63 = vadd.f32 %v3356_v36, %v562_v61  ;;  %457 = vst.msk [vmem:[#allocation2 + $0x1b8] sm:$0xff] %vm68_vm0, %v407_v60  ;;  %v3777_v60 = vld [vmem:[%s4836_s3 + $0x78] sm:$0xff] }
 0x146   :  { %v719_v0 = vadd.f32 %v3361_v37, %v718_v62 }
 0x147   :  { %613 = vst.msk [vmem:[#allocation2 + $0x2b8] sm:$0xff] %vm68_vm0, %v563_v63 }
 0x148   :  { %769 = vst.msk [vmem:[#allocation2 + $0x3b8] sm:$0xff] %vm68_vm0, %v719_v0 }
 0x149   :  { %v254_v1 = vpop.f32.mrf.mxu0 }
 0x14a   :  { %v409_v2 = vpop.f32.mrf.mxu1  ;;  %v255_v3 = vadd.f32 %v3344_v34, %v254_v1 }
 0x14b   :  { %v410_v4 = vadd.f32 %v3349_v35, %v409_v2 }
 0x14c   :  { %v565_v5 = vpop.f32.mrf.mxu2  ;;  %302 = vst.msk [vmem:[#allocation2 + $0xc0] sm:$0xff] %vm68_vm0, %v255_v3 }
 0x14d   :  { %v721_v6 = vpop.f32.mrf.mxu3  ;;  %v566_v7 = vadd.f32 %v3356_v36, %v565_v5  ;;  %458 = vst.msk [vmem:[#allocation2 + $0x1c0] sm:$0xff] %vm68_vm0, %v410_v4 }
 0x14e   :  { %v722_v8 = vadd.f32 %v3361_v37, %v721_v6 }
 0x14f   :  { %614 = vst.msk [vmem:[#allocation2 + $0x2c0] sm:$0xff] %vm68_vm0, %v566_v7 }
 0x150   :  { %770 = vst.msk [vmem:[#allocation2 + $0x3c0] sm:$0xff] %vm68_vm0, %v722_v8 }
 0x151   :  { %v257_v9 = vpop.f32.mrf.mxu0 }
 0x152   :  { %v412_v10 = vpop.f32.mrf.mxu1  ;;  %v258_v11 = vadd.f32 %v3344_v34, %v257_v9 }
 0x153   :  { %v413_v12 = vadd.f32 %v3349_v35, %v412_v10 }
 0x154   :  { %v568_v13 = vpop.f32.mrf.mxu2  ;;  %303 = vst.msk [vmem:[#allocation2 + $0xc8] sm:$0xff] %vm68_vm0, %v258_v11 }
 0x155   :  { %v724_v14 = vpop.f32.mrf.mxu3  ;;  %v569_v15 = vadd.f32 %v3356_v36, %v568_v13  ;;  %459 = vst.msk [vmem:[#allocation2 + $0x1c8] sm:$0xff] %vm68_vm0, %v413_v12 }
 0x156   :  { %v725_v16 = vadd.f32 %v3361_v37, %v724_v14 }
 0x157   :  { %615 = vst.msk [vmem:[#allocation2 + $0x2c8] sm:$0xff] %vm68_vm0, %v569_v15 }
 0x158   :  { %771 = vst.msk [vmem:[#allocation2 + $0x3c8] sm:$0xff] %vm68_vm0, %v725_v16 }
 0x159   :  { %v260_v17 = vpop.f32.mrf.mxu0 }
 0x15a   :  { %v415_v18 = vpop.f32.mrf.mxu1  ;;  %v261_v19 = vadd.f32 %v3344_v34, %v260_v17 }
 0x15b   :  { %v416_v20 = vadd.f32 %v3349_v35, %v415_v18 }
 0x15c   :  { %v571_v21 = vpop.f32.mrf.mxu2  ;;  %304 = vst.msk [vmem:[#allocation2 + $0xd0] sm:$0xff] %vm68_vm0, %v261_v19 }
 0x15d   :  { %v727_v22 = vpop.f32.mrf.mxu3  ;;  %v572_v23 = vadd.f32 %v3356_v36, %v571_v21  ;;  %460 = vst.msk [vmem:[#allocation2 + $0x1d0] sm:$0xff] %vm68_vm0, %v416_v20  ;;  %v3806_v21 = vmov 0.0  }
 0x15e   :  { %v728_v24 = vadd.f32 %v3361_v37, %v727_v22  ;;  %v3808_v22 = vmov 0.0  }
 0x15f   :  { %616 = vst.msk [vmem:[#allocation2 + $0x2d0] sm:$0xff] %vm68_vm0, %v572_v23 }
 0x160   :  { %772 = vst.msk [vmem:[#allocation2 + $0x3d0] sm:$0xff] %vm68_vm0, %v728_v24 }
 0x161   :  { %v263_v25 = vpop.f32.mrf.mxu0 }
 0x162   :  { %v418_v26 = vpop.f32.mrf.mxu1  ;;  %v264_v27 = vadd.f32 %v3344_v34, %v263_v25 }
 0x163   :  { %v419_v28 = vadd.f32 %v3349_v35, %v418_v26 }
 0x164   :  { %v574_v29 = vpop.f32.mrf.mxu2  ;;  %305 = vst.msk [vmem:[#allocation2 + $0xd8] sm:$0xff] %vm68_vm0, %v264_v27 }
 0x165   :  { %v730_v30 = vpop.f32.mrf.mxu3  ;;  %v575_v31 = vadd.f32 %v3356_v36, %v574_v29  ;;  %461 = vst.msk [vmem:[#allocation2 + $0x1d8] sm:$0xff] %vm68_vm0, %v419_v28 }
 0x166   :  { %v731_v32 = vadd.f32 %v3361_v37, %v730_v30 }
 0x167   :  { %617 = vst.msk [vmem:[#allocation2 + $0x2d8] sm:$0xff] %vm68_vm0, %v575_v31 }
 0x168   :  { %773 = vst.msk [vmem:[#allocation2 + $0x3d8] sm:$0xff] %vm68_vm0, %v731_v32 }
 0x169   :  { %v266_v43 = vpop.f32.mrf.mxu0 }
 0x16a   :  { %v421_v44 = vpop.f32.mrf.mxu1  ;;  %v267_v48 = vadd.f32 %v3344_v34, %v266_v43 }
 0x16b   :  { %v422_v49 = vadd.f32 %v3349_v35, %v421_v44 }
 0x16c   :  { %v577_v53 = vpop.f32.mrf.mxu2  ;;  %306 = vst.msk [vmem:[#allocation2 + $0xe0] sm:$0xff] %vm68_vm0, %v267_v48 }
 0x16d   :  { %v733_v54 = vpop.f32.mrf.mxu3  ;;  %v578_v58 = vadd.f32 %v3356_v36, %v577_v53  ;;  %462 = vst.msk [vmem:[#allocation2 + $0x1e0] sm:$0xff] %vm68_vm0, %v422_v49 }
 0x16e   :  { %v734_v59 = vadd.f32 %v3361_v37, %v733_v54 }
 0x16f   :  { %618 = vst.msk [vmem:[#allocation2 + $0x2e0] sm:$0xff] %vm68_vm0, %v578_v58 }
 0x170   :  { %774 = vst.msk [vmem:[#allocation2 + $0x3e0] sm:$0xff] %vm68_vm0, %v734_v59 }
 0x171   :  { %v269_v61 = vpop.f32.mrf.mxu0 }
 0x172   :  { %v424_v62 = vpop.f32.mrf.mxu1  ;;  %v270_v63 = vadd.f32 %v3344_v34, %v269_v61 }
 0x173   :  { %v425_v0 = vadd.f32 %v3349_v35, %v424_v62 }
 0x174   :  { %v580_v1 = vpop.f32.mrf.mxu2  ;;  %307 = vst.msk [vmem:[#allocation2 + $0xe8] sm:$0xff] %vm68_vm0, %v270_v63 }
 0x175   :  { %v736_v2 = vpop.f32.mrf.mxu3  ;;  %v581_v3 = vadd.f32 %v3356_v36, %v580_v1  ;;  %463 = vst.msk [vmem:[#allocation2 + $0x1e8] sm:$0xff] %vm68_vm0, %v425_v0 }
 0x176   :  { %v737_v4 = vadd.f32 %v3361_v37, %v736_v2 }
 0x177   :  { %619 = vst.msk [vmem:[#allocation2 + $0x2e8] sm:$0xff] %vm68_vm0, %v581_v3 }
 0x178   :  { %775 = vst.msk [vmem:[#allocation2 + $0x3e8] sm:$0xff] %vm68_vm0, %v737_v4 }
 0x179   :  { %v272_v5 = vpop.f32.mrf.mxu0 }
 0x17a   :  { %v427_v6 = vpop.f32.mrf.mxu1  ;;  %v273_v7 = vadd.f32 %v3344_v34, %v272_v5 }
 0x17b   :  { %v428_v8 = vadd.f32 %v3349_v35, %v427_v6 }
 0x17c   :  { %v583_v9 = vpop.f32.mrf.mxu2  ;;  %308 = vst.msk [vmem:[#allocation2 + $0xf0] sm:$0xff] %vm68_vm0, %v273_v7 }
 0x17d   :  { %v739_v10 = vpop.f32.mrf.mxu3  ;;  %v584_v11 = vadd.f32 %v3356_v36, %v583_v9  ;;  %464 = vst.msk [vmem:[#allocation2 + $0x1f0] sm:$0xff] %vm68_vm0, %v428_v8 }
 0x17e   :  { %v740_v12 = vadd.f32 %v3361_v37, %v739_v10 }
 0x17f   :  { %620 = vst.msk [vmem:[#allocation2 + $0x2f0] sm:$0xff] %vm68_vm0, %v584_v11 }
 0x180   :  { %776 = vst.msk [vmem:[#allocation2 + $0x3f0] sm:$0xff] %vm68_vm0, %v740_v12 }
 0x181   :  { %v275_v13 = vpop.f32.mrf.mxu0 }
 0x182   :  { %v430_v14 = vpop.f32.mrf.mxu1  ;;  %v276_v15 = vadd.f32 %v3344_v34, %v275_v13  ;;  %v3810_v34 = vmov 0.0  }
 0x183   :  { %v431_v16 = vadd.f32 %v3349_v35, %v430_v14 }
 0x184   :  { %v586_v17 = vpop.f32.mrf.mxu2  ;;  %309 = vst.msk [vmem:[#allocation2 + $0xf8] sm:$0xff] %vm68_vm0, %v276_v15 }
 0x185   :  { %v742_v18 = vpop.f32.mrf.mxu3  ;;  %v587_v19 = vadd.f32 %v3356_v36, %v586_v17  ;;  %465 = vst.msk [vmem:[#allocation2 + $0x1f8] sm:$0xff] %vm68_vm0, %v431_v16 }
 0x186   :  { %v743_v20 = vadd.f32 %v3361_v37, %v742_v18 }
 0x187   :  { %621 = vst.msk [vmem:[#allocation2 + $0x2f8] sm:$0xff] %vm68_vm0, %v587_v19 }
 0x188   :  { %777 = vst.msk [vmem:[#allocation2 + $0x3f8] sm:$0xff] %vm68_vm0, %v743_v20 }
 0x189 LB: > { %824 = vmatpush.msra.mxu0 %v3712_v40  ;;  %867 = vmatpush.msra.mxu1 %v3732_v46  ;;  %s2602_s17 = sshll.u32 %s3101_s6, 3  ;;  %s802_s6 = sadd.s32 1, %s3101_s6   ;;  %s3101_s6 = sphi %s3812_s6, %s802_s6   ;;  %v3097_v34 = vphi %v3810_v34, %v967_v34   ;;  %v3093_v22 = vphi %v3808_v22, %v965_v22   ;;  %v3089_v21 = vphi %v3806_v21, %v4837_v21  }
 0x18a   : > { %935 = vmatpush.msra.mxu3 %v3777_v60  ;;  %910 = vmatpush.msra.mxu2 %v3754_v52  ;;  %s807_s18 = scalar_lea.vmem [#allocation2], %s2602_s17  ;;  %p799_p0 = scmp.ge.s32.totalorder %s802_s6, 32  }
 0x18b   : > { %825 = vmatpush.msra.mxu0 %v3707_v39  ;;  %868 = vmatpush.msra.mxu1 %v3727_v45  ;;  %v2619_v39 = vld [vmem:[%s4829_s2 + $0x98] sm:$0xff] (%p799_p0)  ;;  %v2706_v45 = vld [vmem:[%s4829_s2 + $0xe0] sm:$0xff] (%p799_p0)  ;;  %v2648_v46 = vld [vmem:[%s4829_s2 + $0xb0] sm:$0xff] (%p799_p0)  ;;  %s4387_s6 = smov (%p799_p0), 0  }
 0x18c   : > { %936 = vmatpush.msra.mxu3 %v3769_v57  ;;  %911 = vmatpush.msra.mxu2 %v3749_v51  ;;  %v2649_v40 = vld [vmem:[%s4829_s2 + $0xb8] sm:$0xff] (%p799_p0)  ;;  %v2647_v51 = vld [vmem:[%s4829_s2 + $0xa8] sm:$0xff] (%p799_p0)  ;;  %v2616_v52 = vld [vmem:[%s4829_s2 + $0x80] sm:$0xff] (%p799_p0) }
 0x18d   : > { %826 = vmatpush.msra.mxu0 %v3702_v38  ;;  %869 = vmatpush.msra.mxu1 %v3722_v42  ;;  %v2707_v38 = vld [vmem:[%s4829_s2 + $0xe8] sm:$0xff] (%p799_p0)  ;;  %v2676_v42 = vld [vmem:[%s4829_s2 + $0xc0] sm:$0xff] (%p799_p0)  ;;  %v972_v57 = vld [vmem:[%s4830_s1 + $0x10] sm:$0xff] (%p799_p0) }
 0x18e   : > { %937 = vmatpush.msra.mxu3 %v3764_v56  ;;  %912 = vmatpush.msra.mxu2 %v3744_v50  ;;  %v2617_v50 = vld [vmem:[%s4829_s2 + $0x88] sm:$0xff] (%p799_p0)  ;;  %v973_v60 = vld [vmem:[%s4830_s1 + $0x18] sm:$0xff] (%p799_p0) }
 0x18f   : > { %827 = vmatpush.msra.mxu0 %v3697_v33  ;;  %870 = vmatpush.msra.mxu1 %v3717_v41  ;;  %v808_v35 = vld [vmem:[%s807_s18] sm:$0xff]  ;;  %v2677_v33 = vld [vmem:[%s4829_s2 + $0xc8] sm:$0xff] (%p799_p0)  ;;  %v2618_v41 = vld [vmem:[%s4829_s2 + $0x90] sm:$0xff] (%p799_p0) }
 0x190   : > { %938 = vmatpush.msra.mxu3 %v3759_v55  ;;  %2603 = vmatmul.msk.f32.vlgmr.msra.gmra.mxu0 %vm68_vm0, %v3097_v34  ;;  %v2606_v36 = vld [vmem:[%s807_s18 + $0x100] sm:$0xff]  ;;  %v971_v56 = vld [vmem:[%s4830_s1 + $0x8] sm:$0xff] (%p799_p0) }
 0x191   : > { %2607 = vmatmul.msk.f32.vlgmr.msra.gmra.mxu1 %vm68_vm0, %v3097_v34  ;;  %2614 = vmatmul.msk.f32.vlgmr.msra.gmra.mxu3 %vm68_vm0, %v3097_v34  ;;  %v2613_v28 = vld [vmem:[%s807_s18 + $0x300] sm:$0xff] }
 0x192   : > { %913 = vmatpush.msra.mxu2 %v3737_v47  ;;  %v2610_v49 = vld [vmem:[%s807_s18 + $0x200] sm:$0xff]  ;;  %1092 = vmatpush.msra.mxu0 (%p799_p0), %v2619_v39 }
 0x193   : > { %2611 = vmatmul.msk.f32.vlgmr.msra.gmra.mxu2 %vm68_vm0, %v3097_v34  ;;  %1219 = vmatpush.msra.mxu1 (%p799_p0), %v2649_v40  ;;  %v970_v47 = vld [vmem:[%s4830_s1] sm:$0xff] (%p799_p0) }
 0x194   :  { %1093 = vmatpush.msra.mxu0 (%p799_p0), %v2618_v41  ;;  %v2646_v55 = vld [vmem:[%s4829_s2 + $0xa0] sm:$0xff] (%p799_p0) }
 0x195   :  { %1220 = vmatpush.msra.mxu1 (%p799_p0), %v2648_v46 }
 0x196   :  { %1094 = vmatpush.msra.mxu0 (%p799_p0), %v2617_v50 }
 0x197   :  { %1221 = vmatpush.msra.mxu1 (%p799_p0), %v2647_v51 }
 0x198   :  { %1095 = vmatpush.msra.mxu0 (%p799_p0), %v2616_v52 }
 0x199   :  { %1222 = vmatpush.msra.mxu1 (%p799_p0), %v2646_v55  ;;  %2621 = vmatmul.msk.f32.vlgmr.msra.gmra.mxu0 (%p799_p0), %vm68_vm0, %v970_v47 }
 0x19a   :  { %2651 = vmatmul.msk.f32.vlgmr.msra.gmra.mxu1 (%p799_p0), %vm68_vm0, %v970_v47 }
 0x1a1   :  { %2622 = vmatmul.msk.f32.gmra.mxu0 (%p799_p0), %vm68_vm0, %v971_v56 }
 0x1a2   :  { %2652 = vmatmul.msk.f32.gmra.mxu1 (%p799_p0), %vm68_vm0, %v971_v56 }
 0x1a9   :  { %2623 = vmatmul.msk.f32.gmra.mxu0 (%p799_p0), %vm68_vm0, %v972_v57 }
 0x1aa   :  { %2653 = vmatmul.msk.f32.gmra.mxu1 (%p799_p0), %vm68_vm0, %v972_v57 }
 0x1b1   :  { %2624 = vmatmul.msk.f32.gmra.mxu0 (%p799_p0), %vm68_vm0, %v973_v60 }
 0x1b2   :  { %2654 = vmatmul.msk.f32.gmra.mxu1 (%p799_p0), %vm68_vm0, %v973_v60 }
 0x20d   : > { %v829_v37 = vpop.f32.mrf.mxu0 }
 0x20e   : > { %v832_v23 = vadd.f32 %v829_v37, %v808_v35  ;;  %v872_v24 = vpop.f32.mrf.mxu1 }
 0x20f   : > { %v875_v25 = vadd.f32 %v2606_v36, %v872_v24 }
 0x210   : > { %v2604_v26 = vmul.f32 -1.442695, %v832_v23 }
 0x211   : > { %v2608_v27 = vmul.f32 -1.442695, %v875_v25 }
 0x212   : > { %2978 = vpow2.f32 %v2604_v26 }
 0x213   : > { %2980 = vpow2.f32 %v2608_v27 }
 0x214   : > { %v940_v29 = vpop.f32.mrf.mxu3 }
 0x215   : > { %v943_v30 = vadd.f32 %v2613_v28, %v940_v29 }
 0x216   : > { %v915_v53 = vpop.f32.mrf.mxu2 }
 0x217   : > { %v2615_v31 = vmul.f32 -1.442695, %v943_v30  ;;  %v918_v58 = vadd.f32 %v2610_v49, %v915_v53  ;;  %v2679_v30 = vld [vmem:[%s4829_s2 + $0xd8] sm:$0xff] (%p799_p0)  ;;  %v978_v53 = vld [vmem:[%s4830_s1 + $0x40] sm:$0xff] (%p799_p0) }
 0x218   : > { %v2979_v32 = vpop.eup %2978  ;;  %1346 = vmatpush.msra.mxu2 (%p799_p0), %v2679_v30  ;;  %v977_v49 = vld [vmem:[%s4830_s1 + $0x38] sm:$0xff] (%p799_p0) }
 0x219   : > { %v2981_v43 = vpop.eup %2980  ;;  %v836_v44 = vadd.f32 1.0, %v2979_v32  ;;  %2982 = vpow2.f32 %v2615_v31  ;;  %v2709_v31 = vld [vmem:[%s4829_s2 + $0xf8] sm:$0xff] (%p799_p0)  ;;  %v2678_v32 = vld [vmem:[%s4829_s2 + $0xd0] sm:$0xff] (%p799_p0) }
 0x21a   : > { %v879_v48 = vadd.f32 1.0, %v2981_v43  ;;  %1473 = vmatpush.msra.mxu3 (%p799_p0), %v2709_v31  ;;  %1347 = vmatpush.msra.mxu2 (%p799_p0), %v2678_v32  ;;  %v989_v30 = vld [vmem:[%s4830_s1 + $0x98] sm:$0xff] (%p799_p0) }
 0x21b   : > { %2984 = vrcp.f32 %v836_v44  ;;  %v848_v3 = vand.u32 2147483648, %v836_v44  ;;  %v846_v6 = vand.u32 2147483647, %v836_v44  ;;  %vm842_vm3 = vweird.f32 %v836_v44 }
 0x21c   : > { %2986 = vrcp.f32 %v879_v48  ;;  %v891_v4 = vand.u32 2147483648, %v879_v48  ;;  %v889_v8 = vand.u32 2147483647, %v879_v48  ;;  %vm885_vm4 = vweird.f32 %v879_v48  ;;  %1348 = vmatpush.msra.mxu2 (%p799_p0), %v2677_v33 }
 0x21d   : > { %v849_v13 = vor.u32 1.1754944e-38, %v848_v3  ;;  %vm847_vm7 = vcmp.eq.f32.partialorder %v846_v6, 8.507059e+37  ;;  %v4029_v3 = vld [vmem:[%s4835_s4 + $0x5] ss:$0 sm:$0xff] (%p799_p0)  ;;  %v1097_v6 = vpop.f32.mrf.mxu0 (%p799_p0) }
 0x21e   : > { %v892_v15 = vor.u32 1.1754944e-38, %v891_v4  ;;  %vm890_vm8 = vcmp.eq.f32.partialorder %v889_v8, 8.507059e+37  ;;  %1349 = vmatpush.msra.mxu2 (%p799_p0), %v2676_v42  ;;  %v4036_v4 = vld [vmem:[%s4835_s4 + $0x6] ss:$0 sm:$0xff] (%p799_p0) }
 0x21f   : > { %v2983_v54 = vpop.eup %2982  ;;  %2681 = vmatmul.msk.f32.vlgmr.msra.gmra.mxu2 (%p799_p0), %vm68_vm0, %v970_v47  ;;  %v990_v42 = vld [vmem:[%s4830_s1 + $0xa0] sm:$0xff] (%p799_p0) }
 0x220   : > { %v947_v59 = vadd.f32 1.0, %v2983_v54  ;;  %v979_v54 = vld [vmem:[%s4830_s1 + $0x48] sm:$0xff] (%p799_p0) }
 0x221   : > { %v2985_v61 = vpop.eup %2984 }
 0x222   : > { %v2987_v62 = vpop.eup %2986  ;;  %v838_v63 = vmul.f32 %v2985_v61, %v836_v44  ;;  %2988 = vrcp.f32 %v947_v59  ;;  %vm843_vm1 = vweird.f32 %v2985_v61  ;;  %v959_v23 = vand.u32 2147483648, %v947_v59  ;;  %v2708_v44 = vld [vmem:[%s4829_s2 + $0xf0] sm:$0xff] (%p799_p0) }
 0x223   : > { %v881_v0 = vmul.f32 %v2987_v62, %v879_v48  ;;  %2990 = vtanh.f32 %v918_v58  ;;  %vm886_vm2 = vweird.f32 %v2987_v62  ;;  %vm844_vm5 = vmor %vm842_vm3, %vm843_vm1  ;;  %vm953_vm10 = vweird.f32 %v947_v59  ;;  %1474 = vmatpush.msra.mxu3 (%p799_p0), %v2708_v44  ;;  %v976_v48 = vld [vmem:[%s4830_s1 + $0x30] sm:$0xff] (%p799_p0) }
 0x224   : > { %v839_v1 = vsub.f32 1.0, %v838_v63  ;;  %vm887_vm6 = vmor %vm885_vm4, %vm886_vm2  ;;  %v957_v24 = vand.u32 2147483647, %v947_v59  ;;  %v960_v26 = vor.u32 1.1754944e-38, %v959_v23  ;;  %v980_v58 = vld [vmem:[%s4830_s1 + $0x50] sm:$0xff] (%p799_p0) }
 0x225   : > { %v882_v2 = vsub.f32 1.0, %v881_v0  ;;  %1475 = vmatpush.msra.mxu3 (%p799_p0), %v2707_v38  ;;  %v984_v63 = vld [vmem:[%s4830_s1 + $0x70] sm:$0xff] (%p799_p0)  ;;  %v985_v0 = vld [vmem:[%s4830_s1 + $0x78] sm:$0xff] (%p799_p0) }
 0x226   : > { %v840_v5 = vmul.f32 %v2985_v61, %v839_v1  ;;  %vm958_vm12 = vcmp.eq.f32.partialorder %v957_v24, 8.507059e+37  ;;  %v986_v1 = vld [vmem:[%s4830_s1 + $0x80] sm:$0xff] (%p799_p0) }
 0x227   : > { %v883_v7 = vmul.f32 %v2987_v62, %v882_v2  ;;  %1476 = vmatpush.msra.mxu3 (%p799_p0), %v2706_v45  ;;  %2682 = vmatmul.msk.f32.gmra.mxu2 (%p799_p0), %vm68_vm0, %v971_v56  ;;  %v4024_v2 = vld [vmem:[%s4835_s4 + $0x4] ss:$0 sm:$0xff] (%p799_p0) }
 0x228   : > { %v2989_v9 = vpop.eup %2988  ;;  %v841_v10 = vadd.f32 %v2985_v61, %v840_v5  ;;  %2711 = vmatmul.msk.f32.vlgmr.msra.gmra.mxu3 (%p799_p0), %vm68_vm0, %v970_v47  ;;  %v4041_v5 = vld [vmem:[%s4835_s4 + $0x7] ss:$0 sm:$0xff] (%p799_p0)  ;;  %v1098_v8 = vadd.f32 (%p799_p0), %v4024_v2, %v1097_v6 }
 0x229   : > { %v2991_v11 = vpop.eup %2990  ;;  %v949_v12 = vmul.f32 %v2989_v9, %v947_v59  ;;  %v884_v14 = vadd.f32 %v2987_v62, %v883_v7  ;;  %vm954_vm9 = vweird.f32 %v2989_v9  ;;  %v981_v59 = vld [vmem:[%s4830_s1 + $0x58] sm:$0xff] (%p799_p0)  ;;  %v1224_v7 = vpop.f32.mrf.mxu1 (%p799_p0) }
 0x22a   : > { %v845_v16 = vsel %vm844_vm5, %v2985_v61, %v841_v10  ;;  %vm955_vm11 = vmor %vm953_vm10, %vm954_vm9  ;;  %v982_v61 = vld [vmem:[%s4830_s1 + $0x60] sm:$0xff] (%p799_p0)  ;;  %1172 = vst.msk [vmem:[#allocation2] sm:$0xff] (%p799_p0), %vm68_vm0, %v1098_v8 }
 0x22b   : > { %v950_v17 = vsub.f32 1.0, %v949_v12  ;;  %v850_v18 = vsel %vm847_vm7, %v849_v13, %v845_v16  ;;  %v888_v19 = vsel %vm887_vm6, %v2987_v62, %v884_v14  ;;  %v983_v62 = vld [vmem:[%s4830_s1 + $0x68] sm:$0xff] (%p799_p0) }
 0x22c   : > { %v893_v20 = vsel %vm890_vm8, %v892_v15, %v888_v19  ;;  %v964_v34 = vmul.f32 %v2991_v11, %v850_v18  ;;  %v987_v14 = vld [vmem:[%s4830_s1 + $0x88] sm:$0xff] (%p799_p0)  ;;  %v1100_v15 = vpop.f32.mrf.mxu0 (%p799_p0) }
 0x22d   : > { %v951_v35 = vmul.f32 %v2989_v9, %v950_v17  ;;  %v963_v36 = vmul.f32 %v3093_v22, %v893_v20  ;;  %v1101_v17 = vadd.f32 (%p799_p0), %v4024_v2, %v1100_v15 }
 0x22f   : > { %v965_v22 = vadd.f32 %v964_v34, %v963_v36   ;;  %v952_v37 = vadd.f32 %v2989_v9, %v951_v35  ;;  %2683 = vmatmul.msk.f32.gmra.mxu2 (%p799_p0), %vm68_vm0, %v972_v57  ;;  %1173 = vst.msk [vmem:[#allocation2 + $0x8] sm:$0xff] (%p799_p0), %vm68_vm0, %v1101_v17  ;;  %v988_v36 = vld [vmem:[%s4830_s1 + $0x90] sm:$0xff] (%p799_p0) }
 0x230   :  { %2712 = vmatmul.msk.f32.gmra.mxu3 (%p799_p0), %vm68_vm0, %v971_v56 }
 0x231   : > { %2992 = vtanh.f32 %v965_v22  ;;  %v956_v25 = vsel %vm955_vm11, %v2989_v9, %v952_v37  ;;  %v975_v22 = vld [vmem:[%s4830_s1 + $0x28] sm:$0xff] (%p799_p0)  ;;  %v1225_v9 = vadd.f32 (%p799_p0), %v4029_v3, %v1224_v7  ;;  %v1227_v16 = vpop.f32.mrf.mxu1 (%p799_p0) }
 0x232   : > { %v961_v28 = vsel %vm958_vm12, %v960_v26, %v956_v25  ;;  %v1228_v18 = vadd.f32 (%p799_p0), %v4029_v3, %v1227_v16 }
 0x233   :  { %1299 = vst.msk [vmem:[#allocation2 + $0x100] sm:$0xff] (%p799_p0), %vm68_vm0, %v1225_v9  ;;  %v993_v9 = vld [vmem:[%s4830_s1 + $0xb8] sm:$0xff] (%p799_p0) }
 0x234   :  { %1300 = vst.msk [vmem:[#allocation2 + $0x108] sm:$0xff] (%p799_p0), %vm68_vm0, %v1228_v18  ;;  %v1103_v37 = vpop.f32.mrf.mxu0 (%p799_p0)  ;;  %v994_v18 = vld [vmem:[%s4830_s1 + $0xc0] sm:$0xff] (%p799_p0) }
 0x235   :  { %v1104_v24 = vadd.f32 (%p799_p0), %v4024_v2, %v1103_v37 }
 0x237   : > { %v2993_v27 = vpop.eup %2992  ;;  %2684 = vmatmul.msk.f32.gmra.mxu2 (%p799_p0), %vm68_vm0, %v973_v60  ;;  %1174 = vst.msk [vmem:[#allocation2 + $0x10] sm:$0xff] (%p799_p0), %vm68_vm0, %v1104_v24 }
 0x238   : > { %v967_v34 = vmul.f32 %v2993_v27, %v961_v28   ;;  %801 = sbr.rel (!%p799_p0) target bundleno = 393 (0x189), region = 118  ;;  %2713 = vmatmul.msk.f32.gmra.mxu3 (%p799_p0), %vm68_vm0, %v972_v57  ;;  %v991_v57 = vld [vmem:[%s4830_s1 + $0xa8] sm:$0xff] (%p799_p0) }
 0x239   :  { %v1230_v23 = vpop.f32.mrf.mxu1 (%p799_p0) }
 0x23a   : > { %v968_v29 = vadd.f32 %v3089_v21, %v967_v34   ;;  %v1231_v25 = vadd.f32 (%p799_p0), %v4029_v3, %v1230_v23 }
 0x23c   : > { %v4837_v21 = vmov %v968_v29  ;;  %v3865_v43 = vmul.f32 (%p799_p0), 0.03125, %v968_v29  ;;  %1301 = vst.msk [vmem:[#allocation2 + $0x110] sm:$0xff] (%p799_p0), %vm68_vm0, %v1231_v25  ;;  %v1106_v31 = vpop.f32.mrf.mxu0 (%p799_p0) }
 0x23d   :  { %v974_v21 = vld [vmem:[%s4830_s1 + $0x20] sm:$0xff]  ;;  %v1107_v44 = vadd.f32 %v4024_v2, %v1106_v31 }
 0x23e   :  { %2625 = vmatmul.msk.f32.gmra.mxu0 %vm68_vm0, %v974_v21  ;;  %2655 = vmatmul.msk.f32.gmra.mxu1 %vm68_vm0, %v974_v21 }
 0x23f   :  { %2685 = vmatmul.msk.f32.gmra.mxu2 %vm68_vm0, %v974_v21  ;;  %1175 = vst.msk [vmem:[#allocation2 + $0x18] sm:$0xff] %vm68_vm0, %v1107_v44 }
 0x240   :  { %2714 = vmatmul.msk.f32.gmra.mxu3 %vm68_vm0, %v973_v60 }
 0x241   :  { %v1233_v32 = vpop.f32.mrf.mxu1 }
 0x242   :  { %v1234_v33 = vadd.f32 %v4029_v3, %v1233_v32 }
 0x244   :  { %1302 = vst.msk [vmem:[#allocation2 + $0x118] sm:$0xff] %vm68_vm0, %v1234_v33 }
 0x246   :  { %2626 = vmatmul.msk.f32.gmra.mxu0 %vm68_vm0, %v975_v22  ;;  %2656 = vmatmul.msk.f32.gmra.mxu1 %vm68_vm0, %v975_v22 }
 0x247   :  { %2686 = vmatmul.msk.f32.gmra.mxu2 %vm68_vm0, %v975_v22 }
 0x248   :  { %2715 = vmatmul.msk.f32.gmra.mxu3 %vm68_vm0, %v974_v21 }
 0x24e   :  { %2627 = vmatmul.msk.f32.gmra.mxu0 %vm68_vm0, %v976_v48  ;;  %2657 = vmatmul.msk.f32.gmra.mxu1 %vm68_vm0, %v976_v48 }
 0x24f   :  { %2687 = vmatmul.msk.f32.gmra.mxu2 %vm68_vm0, %v976_v48 }
 0x250   :  { %2716 = vmatmul.msk.f32.gmra.mxu3 %vm68_vm0, %v975_v22 }
 0x256   :  { %2628 = vmatmul.msk.f32.gmra.mxu0 %vm68_vm0, %v977_v49  ;;  %2658 = vmatmul.msk.f32.gmra.mxu1 %vm68_vm0, %v977_v49 }
 0x257   :  { %2688 = vmatmul.msk.f32.gmra.mxu2 %vm68_vm0, %v977_v49 }
 0x258   :  { %2717 = vmatmul.msk.f32.gmra.mxu3 %vm68_vm0, %v976_v48 }
 0x25e   :  { %2629 = vmatmul.msk.f32.gmra.mxu0 %vm68_vm0, %v978_v53  ;;  %2659 = vmatmul.msk.f32.gmra.mxu1 %vm68_vm0, %v978_v53 }
 0x25f   :  { %2689 = vmatmul.msk.f32.gmra.mxu2 %vm68_vm0, %v978_v53 }
 0x260   :  { %2718 = vmatmul.msk.f32.gmra.mxu3 %vm68_vm0, %v977_v49 }
 0x266   :  { %2630 = vmatmul.msk.f32.gmra.mxu0 %vm68_vm0, %v979_v54  ;;  %2660 = vmatmul.msk.f32.gmra.mxu1 %vm68_vm0, %v979_v54 }
 0x267   :  { %2690 = vmatmul.msk.f32.gmra.mxu2 %vm68_vm0, %v979_v54 }
 0x268   :  { %2719 = vmatmul.msk.f32.gmra.mxu3 %vm68_vm0, %v978_v53 }
 0x26e   :  { %2631 = vmatmul.msk.f32.gmra.mxu0 %vm68_vm0, %v980_v58  ;;  %2661 = vmatmul.msk.f32.gmra.mxu1 %vm68_vm0, %v980_v58 }
 0x26f   :  { %2691 = vmatmul.msk.f32.gmra.mxu2 %vm68_vm0, %v980_v58 }
 0x270   :  { %2720 = vmatmul.msk.f32.gmra.mxu3 %vm68_vm0, %v979_v54 }
 0x276   :  { %2632 = vmatmul.msk.f32.gmra.mxu0 %vm68_vm0, %v981_v59  ;;  %2662 = vmatmul.msk.f32.gmra.mxu1 %vm68_vm0, %v981_v59 }
 0x277   :  { %2692 = vmatmul.msk.f32.gmra.mxu2 %vm68_vm0, %v981_v59 }
 0x278   :  { %2721 = vmatmul.msk.f32.gmra.mxu3 %vm68_vm0, %v980_v58 }
 0x27e   :  { %2633 = vmatmul.msk.f32.gmra.mxu0 %vm68_vm0, %v982_v61  ;;  %2663 = vmatmul.msk.f32.gmra.mxu1 %vm68_vm0, %v982_v61 }
 0x27f   :  { %2693 = vmatmul.msk.f32.gmra.mxu2 %vm68_vm0, %v982_v61 }
 0x280   :  { %2722 = vmatmul.msk.f32.gmra.mxu3 %vm68_vm0, %v981_v59  ;;  %v992_v59 = vld [vmem:[%s4830_s1 + $0xb0] sm:$0xff] }
 0x286   :  { %2634 = vmatmul.msk.f32.gmra.mxu0 %vm68_vm0, %v983_v62  ;;  %2664 = vmatmul.msk.f32.gmra.mxu1 %vm68_vm0, %v983_v62 }
 0x287   :  { %2694 = vmatmul.msk.f32.gmra.mxu2 %vm68_vm0, %v983_v62 }
 0x288   :  { %2723 = vmatmul.msk.f32.gmra.mxu3 %vm68_vm0, %v982_v61 }
 0x28e   :  { %2635 = vmatmul.msk.f32.gmra.mxu0 %vm68_vm0, %v984_v63  ;;  %2665 = vmatmul.msk.f32.gmra.mxu1 %vm68_vm0, %v984_v63 }
 0x28f   :  { %2695 = vmatmul.msk.f32.gmra.mxu2 %vm68_vm0, %v984_v63 }
 0x290   :  { %2724 = vmatmul.msk.f32.gmra.mxu3 %vm68_vm0, %v983_v62 }
 0x296   :  { %2636 = vmatmul.msk.f32.gmra.mxu0 %vm68_vm0, %v985_v0  ;;  %2666 = vmatmul.msk.f32.gmra.mxu1 %vm68_vm0, %v985_v0 }
 0x297   :  { %2696 = vmatmul.msk.f32.gmra.mxu2 %vm68_vm0, %v985_v0 }
 0x298   :  { %2725 = vmatmul.msk.f32.gmra.mxu3 %vm68_vm0, %v984_v63 }
 0x29e   :  { %2637 = vmatmul.msk.f32.gmra.mxu0 %vm68_vm0, %v986_v1  ;;  %2667 = vmatmul.msk.f32.gmra.mxu1 %vm68_vm0, %v986_v1 }
 0x29f   :  { %2697 = vmatmul.msk.f32.gmra.mxu2 %vm68_vm0, %v986_v1 }
 0x2a0   :  { %2726 = vmatmul.msk.f32.gmra.mxu3 %vm68_vm0, %v985_v0 }
 0x2a2   :  { %v1351_v10 = vpop.f32.mrf.mxu2 }
 0x2a3   :  { %v1352_v12 = vadd.f32 %v4036_v4, %v1351_v10 }
 0x2a5   :  { %1426 = vst.msk [vmem:[#allocation2 + $0x200] sm:$0xff] %vm68_vm0, %v1352_v12 }
 0x2a6   :  { %2638 = vmatmul.msk.f32.gmra.mxu0 %vm68_vm0, %v987_v14  ;;  %2668 = vmatmul.msk.f32.gmra.mxu1 %vm68_vm0, %v987_v14 }
 0x2a7   :  { %2698 = vmatmul.msk.f32.gmra.mxu2 %vm68_vm0, %v987_v14 }
 0x2a8   :  { %2727 = vmatmul.msk.f32.gmra.mxu3 %vm68_vm0, %v986_v1 }
 0x2aa   :  { %v1354_v19 = vpop.f32.mrf.mxu2 }
 0x2ab   :  { %v1478_v11 = vpop.f32.mrf.mxu3  ;;  %v1355_v34 = vadd.f32 %v4036_v4, %v1354_v19 }
 0x2ac   :  { %v1479_v13 = vadd.f32 %v4041_v5, %v1478_v11 }
 0x2ad   :  { %1427 = vst.msk [vmem:[#allocation2 + $0x208] sm:$0xff] %vm68_vm0, %v1355_v34 }
 0x2ae   :  { %1553 = vst.msk [vmem:[#allocation2 + $0x300] sm:$0xff] %vm68_vm0, %v1479_v13  ;;  %2639 = vmatmul.msk.f32.gmra.mxu0 %vm68_vm0, %v988_v36  ;;  %2669 = vmatmul.msk.f32.gmra.mxu1 %vm68_vm0, %v988_v36 }
 0x2af   :  { %2699 = vmatmul.msk.f32.gmra.mxu2 %vm68_vm0, %v988_v36 }
 0x2b0   :  { %2728 = vmatmul.msk.f32.gmra.mxu3 %vm68_vm0, %v987_v14 }
 0x2b2   :  { %v1357_v26 = vpop.f32.mrf.mxu2 }
 0x2b3   :  { %v1481_v20 = vpop.f32.mrf.mxu3  ;;  %v1358_v28 = vadd.f32 %v4036_v4, %v1357_v26 }
 0x2b4   :  { %v1482_v35 = vadd.f32 %v4041_v5, %v1481_v20 }
 0x2b5   :  { %1428 = vst.msk [vmem:[#allocation2 + $0x210] sm:$0xff] %vm68_vm0, %v1358_v28 }
 0x2b6   :  { %1554 = vst.msk [vmem:[#allocation2 + $0x308] sm:$0xff] %vm68_vm0, %v1482_v35  ;;  %2640 = vmatmul.msk.f32.gmra.mxu0 %vm68_vm0, %v989_v30  ;;  %2670 = vmatmul.msk.f32.gmra.mxu1 %vm68_vm0, %v989_v30 }
 0x2b7   :  { %2700 = vmatmul.msk.f32.gmra.mxu2 %vm68_vm0, %v989_v30 }
 0x2b8   :  { %2729 = vmatmul.msk.f32.gmra.mxu3 %vm68_vm0, %v988_v36 }
 0x2ba   :  { %v1360_v38 = vpop.f32.mrf.mxu2 }
 0x2bb   :  { %v1484_v27 = vpop.f32.mrf.mxu3  ;;  %v1361_v40 = vadd.f32 %v4036_v4, %v1360_v38  ;;  %v1109_v45 = vpop.f32.mrf.mxu0 }
 0x2bc   :  { %v1485_v29 = vadd.f32 %v4041_v5, %v1484_v27  ;;  %v1236_v46 = vpop.f32.mrf.mxu1  ;;  %v1110_v47 = vadd.f32 %v4024_v2, %v1109_v45 }
 0x2bd   :  { %1429 = vst.msk [vmem:[#allocation2 + $0x218] sm:$0xff] %vm68_vm0, %v1361_v40  ;;  %v1237_v50 = vadd.f32 %v4029_v3, %v1236_v46 }
 0x2be   :  { %1555 = vst.msk [vmem:[#allocation2 + $0x310] sm:$0xff] %vm68_vm0, %v1485_v29  ;;  %2641 = vmatmul.msk.f32.gmra.mxu0 %vm68_vm0, %v990_v42  ;;  %2671 = vmatmul.msk.f32.gmra.mxu1 %vm68_vm0, %v990_v42 }
 0x2bf   :  { %2701 = vmatmul.msk.f32.gmra.mxu2 %vm68_vm0, %v990_v42  ;;  %1176 = vst.msk [vmem:[#allocation2 + $0x20] sm:$0xff] %vm68_vm0, %v1110_v47 }
 0x2c0   :  { %2730 = vmatmul.msk.f32.gmra.mxu3 %vm68_vm0, %v989_v30  ;;  %1303 = vst.msk [vmem:[#allocation2 + $0x120] sm:$0xff] %vm68_vm0, %v1237_v50 }
 0x2c2   :  { %v1363_v51 = vpop.f32.mrf.mxu2 }
 0x2c3   :  { %v1487_v39 = vpop.f32.mrf.mxu3  ;;  %v1364_v55 = vadd.f32 %v4036_v4, %v1363_v51  ;;  %v1112_v60 = vpop.f32.mrf.mxu0 }
 0x2c4   :  { %v1488_v41 = vadd.f32 %v4041_v5, %v1487_v39  ;;  %v1239_v21 = vpop.f32.mrf.mxu1  ;;  %v1113_v22 = vadd.f32 %v4024_v2, %v1112_v60 }
 0x2c5   :  { %1430 = vst.msk [vmem:[#allocation2 + $0x220] sm:$0xff] %vm68_vm0, %v1364_v55  ;;  %v1240_v48 = vadd.f32 %v4029_v3, %v1239_v21 }
 0x2c6   :  { %1556 = vst.msk [vmem:[#allocation2 + $0x318] sm:$0xff] %vm68_vm0, %v1488_v41  ;;  %2642 = vmatmul.msk.f32.gmra.mxu0 %vm68_vm0, %v991_v57  ;;  %2672 = vmatmul.msk.f32.gmra.mxu1 %vm68_vm0, %v991_v57 }
 0x2c7   :  { %2702 = vmatmul.msk.f32.gmra.mxu2 %vm68_vm0, %v991_v57  ;;  %1177 = vst.msk [vmem:[#allocation2 + $0x28] sm:$0xff] %vm68_vm0, %v1113_v22 }
 0x2c8   :  { %2731 = vmatmul.msk.f32.gmra.mxu3 %vm68_vm0, %v990_v42  ;;  %1304 = vst.msk [vmem:[#allocation2 + $0x128] sm:$0xff] %vm68_vm0, %v1240_v48 }
 0x2ca   :  { %v1366_v49 = vpop.f32.mrf.mxu2 }
 0x2cb   :  { %v1490_v52 = vpop.f32.mrf.mxu3  ;;  %v1367_v54 = vadd.f32 %v4036_v4, %v1366_v49  ;;  %v1115_v61 = vpop.f32.mrf.mxu0 }
 0x2cc   :  { %v1491_v56 = vadd.f32 %v4041_v5, %v1490_v52  ;;  %v1242_v62 = vpop.f32.mrf.mxu1  ;;  %v1116_v63 = vadd.f32 %v4024_v2, %v1115_v61 }
 0x2cd   :  { %1431 = vst.msk [vmem:[#allocation2 + $0x228] sm:$0xff] %vm68_vm0, %v1367_v54  ;;  %v1243_v0 = vadd.f32 %v4029_v3, %v1242_v62 }
 0x2ce   :  { %1557 = vst.msk [vmem:[#allocation2 + $0x320] sm:$0xff] %vm68_vm0, %v1491_v56  ;;  %2643 = vmatmul.msk.f32.gmra.mxu0 %vm68_vm0, %v992_v59  ;;  %2673 = vmatmul.msk.f32.gmra.mxu1 %vm68_vm0, %v992_v59 }
 0x2cf   :  { %2703 = vmatmul.msk.f32.gmra.mxu2 %vm68_vm0, %v992_v59  ;;  %1178 = vst.msk [vmem:[#allocation2 + $0x30] sm:$0xff] %vm68_vm0, %v1116_v63 }
 0x2d0   :  { %2732 = vmatmul.msk.f32.gmra.mxu3 %vm68_vm0, %v991_v57  ;;  %1305 = vst.msk [vmem:[#allocation2 + $0x130] sm:$0xff] %vm68_vm0, %v1243_v0 }
 0x2d2   :  { %v1369_v1 = vpop.f32.mrf.mxu2 }
 0x2d3   :  { %v1493_v53 = vpop.f32.mrf.mxu3  ;;  %v1370_v7 = vadd.f32 %v4036_v4, %v1369_v1  ;;  %v1118_v10 = vpop.f32.mrf.mxu0 }
 0x2d4   :  { %v1494_v58 = vadd.f32 %v4041_v5, %v1493_v53  ;;  %v1245_v11 = vpop.f32.mrf.mxu1  ;;  %v1119_v12 = vadd.f32 %v4024_v2, %v1118_v10 }
 0x2d5   :  { %1432 = vst.msk [vmem:[#allocation2 + $0x230] sm:$0xff] %vm68_vm0, %v1370_v7  ;;  %v1246_v13 = vadd.f32 %v4029_v3, %v1245_v11 }
 0x2d6   :  { %1558 = vst.msk [vmem:[#allocation2 + $0x328] sm:$0xff] %vm68_vm0, %v1494_v58  ;;  %2644 = vmatmul.msk.f32.gmra.mxu0 %vm68_vm0, %v993_v9  ;;  %2674 = vmatmul.msk.f32.gmra.mxu1 %vm68_vm0, %v993_v9 }
 0x2d7   :  { %2704 = vmatmul.msk.f32.gmra.mxu2 %vm68_vm0, %v993_v9  ;;  %1179 = vst.msk [vmem:[#allocation2 + $0x38] sm:$0xff] %vm68_vm0, %v1119_v12 }
 0x2d8   :  { %2733 = vmatmul.msk.f32.gmra.mxu3 %vm68_vm0, %v992_v59  ;;  %1306 = vst.msk [vmem:[#allocation2 + $0x138] sm:$0xff] %vm68_vm0, %v1246_v13 }
 0x2da   :  { %v1372_v14 = vpop.f32.mrf.mxu2 }
 0x2db   :  { %v1496_v6 = vpop.f32.mrf.mxu3  ;;  %v1373_v16 = vadd.f32 %v4036_v4, %v1372_v14  ;;  %v1121_v19 = vpop.f32.mrf.mxu0 }
 0x2dc   :  { %v1497_v8 = vadd.f32 %v4041_v5, %v1496_v6  ;;  %v1248_v20 = vpop.f32.mrf.mxu1  ;;  %v1122_v34 = vadd.f32 %v4024_v2, %v1121_v19 }
 0x2dd   :  { %1433 = vst.msk [vmem:[#allocation2 + $0x238] sm:$0xff] %vm68_vm0, %v1373_v16  ;;  %v1249_v35 = vadd.f32 %v4029_v3, %v1248_v20 }
 0x2de   :  { %1559 = vst.msk [vmem:[#allocation2 + $0x330] sm:$0xff] %vm68_vm0, %v1497_v8  ;;  %2645 = vmatmul.msk.f32.gmra.mxu0 %vm68_vm0, %v994_v18  ;;  %2675 = vmatmul.msk.f32.gmra.mxu1 %vm68_vm0, %v994_v18 }
 0x2df   :  { %2705 = vmatmul.msk.f32.gmra.mxu2 %vm68_vm0, %v994_v18  ;;  %1180 = vst.msk [vmem:[#allocation2 + $0x40] sm:$0xff] %vm68_vm0, %v1122_v34 }
 0x2e0   :  { %2734 = vmatmul.msk.f32.gmra.mxu3 %vm68_vm0, %v993_v9  ;;  %1307 = vst.msk [vmem:[#allocation2 + $0x140] sm:$0xff] %vm68_vm0, %v1249_v35 }
 0x2e2   :  { %v1375_v36 = vpop.f32.mrf.mxu2 }
 0x2e3   :  { %v1499_v15 = vpop.f32.mrf.mxu3  ;;  %v1376_v23 = vadd.f32 %v4036_v4, %v1375_v36  ;;  %v1124_v25 = vpop.f32.mrf.mxu0 }
 0x2e4   :  { %v1500_v17 = vadd.f32 %v4041_v5, %v1499_v15  ;;  %v1251_v26 = vpop.f32.mrf.mxu1  ;;  %v1125_v27 = vadd.f32 %v4024_v2, %v1124_v25 }
 0x2e5   :  { %1434 = vst.msk [vmem:[#allocation2 + $0x240] sm:$0xff] %vm68_vm0, %v1376_v23  ;;  %v1252_v28 = vadd.f32 %v4029_v3, %v1251_v26 }
 0x2e6   :  { %1560 = vst.msk [vmem:[#allocation2 + $0x338] sm:$0xff] %vm68_vm0, %v1500_v17 }
 0x2e7   :  { %1181 = vst.msk [vmem:[#allocation2 + $0x48] sm:$0xff] %vm68_vm0, %v1125_v27 }
 0x2e8   :  { %2735 = vmatmul.msk.f32.gmra.mxu3 %vm68_vm0, %v994_v18  ;;  %1308 = vst.msk [vmem:[#allocation2 + $0x148] sm:$0xff] %vm68_vm0, %v1252_v28 }
 0x2ea   :  { %v1378_v29 = vpop.f32.mrf.mxu2 }
 0x2eb   :  { %v1502_v37 = vpop.f32.mrf.mxu3  ;;  %v1379_v31 = vadd.f32 %v4036_v4, %v1378_v29  ;;  %v1127_v44 = vpop.f32.mrf.mxu0 }
 0x2ec   :  { %v1503_v24 = vadd.f32 %v4041_v5, %v1502_v37  ;;  %v1254_v33 = vpop.f32.mrf.mxu1  ;;  %v1128_v38 = vadd.f32 %v4024_v2, %v1127_v44 }
 0x2ed   :  { %1435 = vst.msk [vmem:[#allocation2 + $0x248] sm:$0xff] %vm68_vm0, %v1379_v31  ;;  %v1255_v39 = vadd.f32 %v4029_v3, %v1254_v33 }
 0x2ee   :  { %1561 = vst.msk [vmem:[#allocation2 + $0x340] sm:$0xff] %vm68_vm0, %v1503_v24 }
 0x2ef   :  { %1182 = vst.msk [vmem:[#allocation2 + $0x50] sm:$0xff] %vm68_vm0, %v1128_v38 }
 0x2f0   :  { %1309 = vst.msk [vmem:[#allocation2 + $0x150] sm:$0xff] %vm68_vm0, %v1255_v39 }
 0x2f2   :  { %v1381_v40 = vpop.f32.mrf.mxu2 }
 0x2f3   :  { %v1505_v30 = vpop.f32.mrf.mxu3  ;;  %v1382_v42 = vadd.f32 %v4036_v4, %v1381_v40  ;;  %v1130_v46 = vpop.f32.mrf.mxu0 }
 0x2f4   :  { %v1506_v32 = vadd.f32 %v4041_v5, %v1505_v30  ;;  %v1257_v47 = vpop.f32.mrf.mxu1  ;;  %v1131_v50 = vadd.f32 %v4024_v2, %v1130_v46 }
 0x2f5   :  { %1436 = vst.msk [vmem:[#allocation2 + $0x250] sm:$0xff] %vm68_vm0, %v1382_v42  ;;  %v1258_v51 = vadd.f32 %v4029_v3, %v1257_v47 }
 0x2f6   :  { %1562 = vst.msk [vmem:[#allocation2 + $0x348] sm:$0xff] %vm68_vm0, %v1506_v32 }
 0x2f7   :  { %1183 = vst.msk [vmem:[#allocation2 + $0x58] sm:$0xff] %vm68_vm0, %v1131_v50 }
 0x2f8   :  { %1310 = vst.msk [vmem:[#allocation2 + $0x158] sm:$0xff] %vm68_vm0, %v1258_v51 }
 0x2fa   :  { %v1384_v52 = vpop.f32.mrf.mxu2 }
 0x2fb   :  { %v1508_v41 = vpop.f32.mrf.mxu3  ;;  %v1385_v56 = vadd.f32 %v4036_v4, %v1384_v52  ;;  %v1133_v60 = vpop.f32.mrf.mxu0 }
 0x2fc   :  { %v1509_v45 = vadd.f32 %v4041_v5, %v1508_v41  ;;  %v1260_v21 = vpop.f32.mrf.mxu1  ;;  %v1134_v22 = vadd.f32 %v4024_v2, %v1133_v60 }
 0x2fd   :  { %1437 = vst.msk [vmem:[#allocation2 + $0x258] sm:$0xff] %vm68_vm0, %v1385_v56  ;;  %v1261_v48 = vadd.f32 %v4029_v3, %v1260_v21 }
 0x2fe   :  { %1563 = vst.msk [vmem:[#allocation2 + $0x350] sm:$0xff] %vm68_vm0, %v1509_v45 }
 0x2ff   :  { %1184 = vst.msk [vmem:[#allocation2 + $0x60] sm:$0xff] %vm68_vm0, %v1134_v22 }
 0x300   :  { %1311 = vst.msk [vmem:[#allocation2 + $0x160] sm:$0xff] %vm68_vm0, %v1261_v48 }
 0x302   :  { %v1387_v49 = vpop.f32.mrf.mxu2 }
 0x303   :  { %v1511_v55 = vpop.f32.mrf.mxu3  ;;  %v1388_v54 = vadd.f32 %v4036_v4, %v1387_v49  ;;  %v1136_v59 = vpop.f32.mrf.mxu0 }
 0x304   :  { %v1512_v57 = vadd.f32 %v4041_v5, %v1511_v55  ;;  %v1263_v61 = vpop.f32.mrf.mxu1  ;;  %v1137_v62 = vadd.f32 %v4024_v2, %v1136_v59 }
 0x305   :  { %1438 = vst.msk [vmem:[#allocation2 + $0x260] sm:$0xff] %vm68_vm0, %v1388_v54  ;;  %v1264_v63 = vadd.f32 %v4029_v3, %v1263_v61 }
 0x306   :  { %1564 = vst.msk [vmem:[#allocation2 + $0x358] sm:$0xff] %vm68_vm0, %v1512_v57 }
 0x307   :  { %1185 = vst.msk [vmem:[#allocation2 + $0x68] sm:$0xff] %vm68_vm0, %v1137_v62 }
 0x308   :  { %1312 = vst.msk [vmem:[#allocation2 + $0x168] sm:$0xff] %vm68_vm0, %v1264_v63 }
 0x30a   :  { %v1390_v0 = vpop.f32.mrf.mxu2 }
 0x30b   :  { %v1514_v53 = vpop.f32.mrf.mxu3  ;;  %v1391_v6 = vadd.f32 %v4036_v4, %v1390_v0  ;;  %v1139_v8 = vpop.f32.mrf.mxu0 }
 0x30c   :  { %v1515_v58 = vadd.f32 %v4041_v5, %v1514_v53  ;;  %v1266_v9 = vpop.f32.mrf.mxu1  ;;  %v1140_v10 = vadd.f32 %v4024_v2, %v1139_v8  ;;  %v4287_v8 = vld [vmem:[%s4836_s3 + $0x98] sm:$0xff] }
 0x30d   :  { %1439 = vst.msk [vmem:[#allocation2 + $0x268] sm:$0xff] %vm68_vm0, %v1391_v6  ;;  %v1267_v11 = vadd.f32 %v4029_v3, %v1266_v9  ;;  %v4277_v6 = vld [vmem:[%s4836_s3 + $0x88] sm:$0xff]  ;;  %v4292_v9 = vld [vmem:[%s4836_s3 + $0xa0] sm:$0xff] }
 0x30e   :  { %1565 = vst.msk [vmem:[#allocation2 + $0x360] sm:$0xff] %vm68_vm0, %v1515_v58 }
 0x30f   :  { %1186 = vst.msk [vmem:[#allocation2 + $0x70] sm:$0xff] %vm68_vm0, %v1140_v10  ;;  %v4297_v10 = vld [vmem:[%s4836_s3 + $0xa8] sm:$0xff] }
 0x310   :  { %1313 = vst.msk [vmem:[#allocation2 + $0x170] sm:$0xff] %vm68_vm0, %v1267_v11 }
 0x312   :  { %v1393_v12 = vpop.f32.mrf.mxu2 }
 0x313   :  { %v1517_v1 = vpop.f32.mrf.mxu3  ;;  %v1394_v14 = vadd.f32 %v4036_v4, %v1393_v12  ;;  %v1142_v16 = vpop.f32.mrf.mxu0 }
 0x314   :  { %v1518_v7 = vadd.f32 %v4041_v5, %v1517_v1  ;;  %v1269_v17 = vpop.f32.mrf.mxu1  ;;  %v1143_v18 = vadd.f32 %v4024_v2, %v1142_v16  ;;  %v4272_v1 = vld [vmem:[%s4836_s3 + $0x80] sm:$0xff] }
 0x315   :  { %1440 = vst.msk [vmem:[#allocation2 + $0x270] sm:$0xff] %vm68_vm0, %v1394_v14  ;;  %v1270_v19 = vadd.f32 %v4029_v3, %v1269_v17  ;;  %v4307_v14 = vld [vmem:[%s4836_s3 + $0xb8] sm:$0xff] }
 0x316   :  { %1566 = vst.msk [vmem:[#allocation2 + $0x368] sm:$0xff] %vm68_vm0, %v1518_v7  ;;  %v4282_v7 = vld [vmem:[%s4836_s3 + $0x90] sm:$0xff] }
 0x317   :  { %1187 = vst.msk [vmem:[#allocation2 + $0x78] sm:$0xff] %vm68_vm0, %v1143_v18  ;;  %v4319_v18 = vld [vmem:[%s4836_s3 + $0xc8] sm:$0xff] }
 0x318   :  { %1314 = vst.msk [vmem:[#allocation2 + $0x178] sm:$0xff] %vm68_vm0, %v1270_v19  ;;  %v4324_v19 = vld [vmem:[%s4836_s3 + $0xd0] sm:$0xff] }
 0x31a   :  { %v1396_v20 = vpop.f32.mrf.mxu2 }
 0x31b   :  { %v1520_v13 = vpop.f32.mrf.mxu3  ;;  %v1397_v35 = vadd.f32 %v4036_v4, %v1396_v20  ;;  %v1145_v37 = vpop.f32.mrf.mxu0  ;;  %v4329_v20 = vld [vmem:[%s4836_s3 + $0xd8] sm:$0xff] }
 0x31c   :  { %v1521_v15 = vadd.f32 %v4041_v5, %v1520_v13  ;;  %v1272_v23 = vpop.f32.mrf.mxu1  ;;  %v1146_v24 = vadd.f32 %v4024_v2, %v1145_v37  ;;  %v4302_v13 = vld [vmem:[%s4836_s3 + $0xb0] sm:$0xff]  ;;  %v4339_v37 = vld [vmem:[%s4836_s3 + $0xe8] sm:$0xff] }
 0x31d   :  { %1441 = vst.msk [vmem:[#allocation2 + $0x278] sm:$0xff] %vm68_vm0, %v1397_v35  ;;  %v1273_v25 = vadd.f32 %v4029_v3, %v1272_v23  ;;  %v4344_v23 = vld [vmem:[%s4836_s3 + $0xf0] sm:$0xff] }
 0x31e   :  { %1567 = vst.msk [vmem:[#allocation2 + $0x370] sm:$0xff] %vm68_vm0, %v1521_v15  ;;  %v4312_v15 = vld [vmem:[%s4836_s3 + $0xc0] sm:$0xff] }
 0x31f   :  { %1188 = vst.msk [vmem:[#allocation2 + $0x80] sm:$0xff] %vm68_vm0, %v1146_v24 }
 0x320   :  { %1315 = vst.msk [vmem:[#allocation2 + $0x180] sm:$0xff] %vm68_vm0, %v1273_v25 }
 0x322   :  { %v1399_v26 = vpop.f32.mrf.mxu2 }
 0x323   :  { %v1523_v34 = vpop.f32.mrf.mxu3  ;;  %v1400_v28 = vadd.f32 %v4036_v4, %v1399_v26  ;;  %v1148_v30 = vpop.f32.mrf.mxu0  ;;  %v4352_v26 = vld [vmem:[%s4836_s3 + $0xf8] sm:$0xff] }
 0x324   :  { %v1524_v36 = vadd.f32 %v4041_v5, %v1523_v34  ;;  %v1275_v31 = vpop.f32.mrf.mxu1  ;;  %v1149_v32 = vadd.f32 %v4024_v2, %v1148_v30 }
 0x325   :  { %1442 = vst.msk [vmem:[#allocation2 + $0x280] sm:$0xff] %vm68_vm0, %v1400_v28  ;;  %v1276_v44 = vadd.f32 %v4029_v3, %v1275_v31 }
 0x326   :  { %1568 = vst.msk [vmem:[#allocation2 + $0x378] sm:$0xff] %vm68_vm0, %v1524_v36  ;;  %v4334_v36 = vld [vmem:[%s4836_s3 + $0xe0] sm:$0xff] }
 0x327   :  { %1189 = vst.msk [vmem:[#allocation2 + $0x88] sm:$0xff] %vm68_vm0, %v1149_v32 }
 0x328   :  { %1316 = vst.msk [vmem:[#allocation2 + $0x188] sm:$0xff] %vm68_vm0, %v1276_v44 }
 0x32a   :  { %v1402_v33 = vpop.f32.mrf.mxu2 }
 0x32b   :  { %v1526_v27 = vpop.f32.mrf.mxu3  ;;  %v1403_v39 = vadd.f32 %v4036_v4, %v1402_v33  ;;  %v1151_v41 = vpop.f32.mrf.mxu0 }
 0x32c   :  { %v1527_v29 = vadd.f32 %v4041_v5, %v1526_v27  ;;  %v1278_v42 = vpop.f32.mrf.mxu1  ;;  %v1152_v45 = vadd.f32 %v4024_v2, %v1151_v41 }
 0x32d   :  { %1443 = vst.msk [vmem:[#allocation2 + $0x288] sm:$0xff] %vm68_vm0, %v1403_v39  ;;  %v1279_v46 = vadd.f32 %v4029_v3, %v1278_v42 }
 0x32e   :  { %1569 = vst.msk [vmem:[#allocation2 + $0x380] sm:$0xff] %vm68_vm0, %v1527_v29 }
 0x32f   :  { %1190 = vst.msk [vmem:[#allocation2 + $0x90] sm:$0xff] %vm68_vm0, %v1152_v45 }
 0x330   :  { %1317 = vst.msk [vmem:[#allocation2 + $0x190] sm:$0xff] %vm68_vm0, %v1279_v46 }
 0x332   :  { %v1405_v47 = vpop.f32.mrf.mxu2 }
 0x333   :  { %v1529_v38 = vpop.f32.mrf.mxu3  ;;  %v1406_v51 = vadd.f32 %v4036_v4, %v1405_v47  ;;  %v1154_v55 = vpop.f32.mrf.mxu0 }
 0x334   :  { %v1530_v40 = vadd.f32 %v4041_v5, %v1529_v38  ;;  %v1281_v56 = vpop.f32.mrf.mxu1  ;;  %v1155_v57 = vadd.f32 %v4024_v2, %v1154_v55 }
 0x335   :  { %1444 = vst.msk [vmem:[#allocation2 + $0x290] sm:$0xff] %vm68_vm0, %v1406_v51  ;;  %v1282_v60 = vadd.f32 %v4029_v3, %v1281_v56 }
 0x336   :  { %1570 = vst.msk [vmem:[#allocation2 + $0x388] sm:$0xff] %vm68_vm0, %v1530_v40 }
 0x337   :  { %1191 = vst.msk [vmem:[#allocation2 + $0x98] sm:$0xff] %vm68_vm0, %v1155_v57 }
 0x338   :  { %1318 = vst.msk [vmem:[#allocation2 + $0x198] sm:$0xff] %vm68_vm0, %v1282_v60 }
 0x33a   :  { %v1408_v21 = vpop.f32.mrf.mxu2 }
 0x33b   :  { %v1532_v50 = vpop.f32.mrf.mxu3  ;;  %v1409_v48 = vadd.f32 %v4036_v4, %v1408_v21  ;;  %v1157_v53 = vpop.f32.mrf.mxu0 }
 0x33c   :  { %v1533_v52 = vadd.f32 %v4041_v5, %v1532_v50  ;;  %v1284_v54 = vpop.f32.mrf.mxu1  ;;  %v1158_v58 = vadd.f32 %v4024_v2, %v1157_v53 }
 0x33d   :  { %1445 = vst.msk [vmem:[#allocation2 + $0x298] sm:$0xff] %vm68_vm0, %v1409_v48  ;;  %v1285_v59 = vadd.f32 %v4029_v3, %v1284_v54  ;;  %v4383_v48 = vmov 0.0  }
 0x33e   :  { %1571 = vst.msk [vmem:[#allocation2 + $0x390] sm:$0xff] %vm68_vm0, %v1533_v52 }
 0x33f   :  { %1192 = vst.msk [vmem:[#allocation2 + $0xa0] sm:$0xff] %vm68_vm0, %v1158_v58 }
 0x340   :  { %1319 = vst.msk [vmem:[#allocation2 + $0x1a0] sm:$0xff] %vm68_vm0, %v1285_v59 }
 0x342   :  { %v1411_v61 = vpop.f32.mrf.mxu2 }
 0x343   :  { %v1535_v22 = vpop.f32.mrf.mxu3  ;;  %v1412_v63 = vadd.f32 %v4036_v4, %v1411_v61  ;;  %v1160_v11 = vpop.f32.mrf.mxu0 }
 0x344   :  { %v1536_v49 = vadd.f32 %v4041_v5, %v1535_v22  ;;  %v1287_v12 = vpop.f32.mrf.mxu1  ;;  %v1161_v16 = vadd.f32 %v4024_v2, %v1160_v11  ;;  %v4381_v22 = vmov 0.0  }
 0x345   :  { %1446 = vst.msk [vmem:[#allocation2 + $0x2a0] sm:$0xff] %vm68_vm0, %v1412_v63  ;;  %v1288_v17 = vadd.f32 %v4029_v3, %v1287_v12 }
 0x346   :  { %1572 = vst.msk [vmem:[#allocation2 + $0x398] sm:$0xff] %vm68_vm0, %v1536_v49 }
 0x347   :  { %1193 = vst.msk [vmem:[#allocation2 + $0xa8] sm:$0xff] %vm68_vm0, %v1161_v16 }
 0x348   :  { %1320 = vst.msk [vmem:[#allocation2 + $0x1a8] sm:$0xff] %vm68_vm0, %v1288_v17 }
 0x34a   :  { %v1414_v34 = vpop.f32.mrf.mxu2 }
 0x34b   :  { %v1538_v62 = vpop.f32.mrf.mxu3  ;;  %v1415_v24 = vadd.f32 %v4036_v4, %v1414_v34  ;;  %v1163_v27 = vpop.f32.mrf.mxu0 }
 0x34c   :  { %v1539_v0 = vadd.f32 %v4041_v5, %v1538_v62  ;;  %v1290_v28 = vpop.f32.mrf.mxu1  ;;  %v1164_v29 = vadd.f32 %v4024_v2, %v1163_v27 }
 0x34d   :  { %1447 = vst.msk [vmem:[#allocation2 + $0x2a8] sm:$0xff] %vm68_vm0, %v1415_v24  ;;  %v1291_v30 = vadd.f32 %v4029_v3, %v1290_v28 }
 0x34e   :  { %1573 = vst.msk [vmem:[#allocation2 + $0x3a0] sm:$0xff] %vm68_vm0, %v1539_v0 }
 0x34f   :  { %1194 = vst.msk [vmem:[#allocation2 + $0xb0] sm:$0xff] %vm68_vm0, %v1164_v29 }
 0x350   :  { %1321 = vst.msk [vmem:[#allocation2 + $0x1b0] sm:$0xff] %vm68_vm0, %v1291_v30 }
 0x352   :  { %v1417_v31 = vpop.f32.mrf.mxu2 }
 0x353   :  { %v1541_v35 = vpop.f32.mrf.mxu3  ;;  %v1418_v44 = vadd.f32 %v4036_v4, %v1417_v31  ;;  %v1166_v38 = vpop.f32.mrf.mxu0 }
 0x354   :  { %v1542_v25 = vadd.f32 %v4041_v5, %v1541_v35  ;;  %v1293_v39 = vpop.f32.mrf.mxu1  ;;  %v1167_v40 = vadd.f32 %v4024_v2, %v1166_v38 }
 0x355   :  { %1448 = vst.msk [vmem:[#allocation2 + $0x2b0] sm:$0xff] %vm68_vm0, %v1418_v44  ;;  %v1294_v41 = vadd.f32 %v4029_v3, %v1293_v39 }
 0x356   :  { %1574 = vst.msk [vmem:[#allocation2 + $0x3a8] sm:$0xff] %vm68_vm0, %v1542_v25 }
 0x357   :  { %1195 = vst.msk [vmem:[#allocation2 + $0xb8] sm:$0xff] %vm68_vm0, %v1167_v40 }
 0x358   :  { %1322 = vst.msk [vmem:[#allocation2 + $0x1b8] sm:$0xff] %vm68_vm0, %v1294_v41 }
 0x35a   :  { %v1420_v42 = vpop.f32.mrf.mxu2 }
 0x35b   :  { %v1544_v32 = vpop.f32.mrf.mxu3  ;;  %v1421_v46 = vadd.f32 %v4036_v4, %v1420_v42  ;;  %v1169_v50 = vpop.f32.mrf.mxu0 }
 0x35c   :  { %v1545_v33 = vadd.f32 %v4041_v5, %v1544_v32  ;;  %v1296_v51 = vpop.f32.mrf.mxu1  ;;  %v1170_v52 = vadd.f32 %v4024_v2, %v1169_v50  ;;  %v4385_v2 = vmov 0.0  }
 0x35d   :  { %1449 = vst.msk [vmem:[#allocation2 + $0x2b8] sm:$0xff] %vm68_vm0, %v1421_v46  ;;  %v1297_v55 = vadd.f32 %v4029_v3, %v1296_v51 }
 0x35e   :  { %1575 = vst.msk [vmem:[#allocation2 + $0x3b0] sm:$0xff] %vm68_vm0, %v1545_v33 }
 0x35f   :  { %1196 = vst.msk [vmem:[#allocation2 + $0xc0] sm:$0xff] %vm68_vm0, %v1170_v52 }
 0x360   :  { %1323 = vst.msk [vmem:[#allocation2 + $0x1c0] sm:$0xff] %vm68_vm0, %v1297_v55 }
 0x362   :  { %v1423_v56 = vpop.f32.mrf.mxu2 }
 0x363   :  { %v1547_v45 = vpop.f32.mrf.mxu3  ;;  %v1424_v60 = vadd.f32 %v4036_v4, %v1423_v56 }
 0x364   :  { %v1548_v47 = vadd.f32 %v4041_v5, %v1547_v45 }
 0x365   :  { %1450 = vst.msk [vmem:[#allocation2 + $0x2c0] sm:$0xff] %vm68_vm0, %v1424_v60 }
 0x366   :  { %1576 = vst.msk [vmem:[#allocation2 + $0x3b8] sm:$0xff] %vm68_vm0, %v1548_v47 }
 0x36b   :  { %v1550_v57 = vpop.f32.mrf.mxu3 }
 0x36c   :  { %v1551_v21 = vadd.f32 %v4041_v5, %v1550_v57 }
 0x36e   :  { %1577 = vst.msk [vmem:[#allocation2 + $0x3c0] sm:$0xff] %vm68_vm0, %v1551_v21 }
 0x36f LB: > { %1625 = vmatpush.msra.mxu0 %v4287_v8  ;;  %1668 = vmatpush.msra.mxu1 %v4307_v14  ;;  %s2752_s17 = sshll.u32 %s3117_s6, 3  ;;  %s1603_s6 = sadd.s32 1, %s3117_s6   ;;  %s3117_s6 = sphi %s4387_s6, %s1603_s6   ;;  %v3113_v2 = vphi %v4385_v2, %v1768_v2   ;;  %v3109_v48 = vphi %v4383_v48, %v1766_v48   ;;  %v3105_v22 = vphi %v4381_v22, %v4838_v22  }
 0x370   : > { %1736 = vmatpush.msra.mxu3 %v4352_v26  ;;  %1711 = vmatpush.msra.mxu2 %v4329_v20  ;;  %s1608_s18 = scalar_lea.vmem [#allocation2], %s2752_s17  ;;  %p1600_p1 = scmp.ge.s32.totalorder %s1603_s6, 25  }
 0x371   : > { %1626 = vmatpush.msra.mxu0 %v4282_v7  ;;  %1669 = vmatpush.msra.mxu1 %v4302_v13  ;;  %v2781_v7 = vld [vmem:[%s4829_s2 + $0x118] sm:$0xff] (%p1600_p1)  ;;  %v2829_v13 = vld [vmem:[%s4829_s2 + $0x160] sm:$0xff] (%p1600_p1)  ;;  %v2797_v14 = vld [vmem:[%s4829_s2 + $0x130] sm:$0xff] (%p1600_p1) }
 0x372   : > { %1737 = vmatpush.msra.mxu3 %v4344_v23  ;;  %1712 = vmatpush.msra.mxu2 %v4324_v19  ;;  %v2798_v8 = vld [vmem:[%s4829_s2 + $0x138] sm:$0xff] (%p1600_p1)  ;;  %v2796_v19 = vld [vmem:[%s4829_s2 + $0x128] sm:$0xff] (%p1600_p1)  ;;  %v2778_v20 = vld [vmem:[%s4829_s2 + $0x100] sm:$0xff] (%p1600_p1) }
 0x373   : > { %1627 = vmatpush.msra.mxu0 %v4277_v6  ;;  %1670 = vmatpush.msra.mxu1 %v4297_v10  ;;  %v2830_v6 = vld [vmem:[%s4829_s2 + $0x168] sm:$0xff] (%p1600_p1)  ;;  %v2812_v10 = vld [vmem:[%s4829_s2 + $0x140] sm:$0xff] (%p1600_p1)  ;;  %v2768_v23 = vld [vmem:[%s4830_s1 + $0xd8] sm:$0xff] (%p1600_p1) }
 0x374   : > { %1738 = vmatpush.msra.mxu3 %v4339_v37  ;;  %1713 = vmatpush.msra.mxu2 %v4319_v18  ;;  %v2779_v18 = vld [vmem:[%s4829_s2 + $0x108] sm:$0xff] (%p1600_p1)  ;;  %v2767_v37 = vld [vmem:[%s4830_s1 + $0xd0] sm:$0xff] (%p1600_p1)  ;;  %v2769_v26 = vld [vmem:[%s4830_s1 + $0xe0] sm:$0xff] (%p1600_p1) }
 0x375   : > { %1628 = vmatpush.msra.mxu0 %v4272_v1  ;;  %1671 = vmatpush.msra.mxu1 %v4292_v9  ;;  %v1609_v3 = vld [vmem:[%s1608_s18] sm:$0xff]  ;;  %v2813_v1 = vld [vmem:[%s4829_s2 + $0x148] sm:$0xff] (%p1600_p1)  ;;  %v2780_v9 = vld [vmem:[%s4829_s2 + $0x110] sm:$0xff] (%p1600_p1) }
 0x376   : > { %1739 = vmatpush.msra.mxu3 %v4334_v36  ;;  %2753 = vmatmul.msk.f32.vlgmr.msra.gmra.mxu0 %vm68_vm0, %v3113_v2  ;;  %v2756_v4 = vld [vmem:[%s1608_s18 + $0x100] sm:$0xff] }
 0x377   : > { %2757 = vmatmul.msk.f32.vlgmr.msra.gmra.mxu1 %vm68_vm0, %v3113_v2  ;;  %2764 = vmatmul.msk.f32.vlgmr.msra.gmra.mxu3 %vm68_vm0, %v3113_v2  ;;  %v2763_v61 = vld [vmem:[%s1608_s18 + $0x300] sm:$0xff] }
 0x378   : > { %1714 = vmatpush.msra.mxu2 %v4312_v15  ;;  %v2760_v34 = vld [vmem:[%s1608_s18 + $0x200] sm:$0xff]  ;;  %1842 = vmatpush.msra.mxu0 (%p1600_p1), %v2781_v7  ;;  %v2766_v15 = vld [vmem:[%s4830_s1 + $0xc8] sm:$0xff] (%p1600_p1) }
 0x379   : > { %2761 = vmatmul.msk.f32.vlgmr.msra.gmra.mxu2 %vm68_vm0, %v3113_v2  ;;  %1917 = vmatpush.msra.mxu1 (%p1600_p1), %v2798_v8  ;;  %v2795_v36 = vld [vmem:[%s4829_s2 + $0x120] sm:$0xff] (%p1600_p1) }
 0x37a   :  { %1843 = vmatpush.msra.mxu0 (%p1600_p1), %v2780_v9 }
 0x37b   :  { %1918 = vmatpush.msra.mxu1 (%p1600_p1), %v2797_v14 }
 0x37c   :  { %1844 = vmatpush.msra.mxu0 (%p1600_p1), %v2779_v18 }
 0x37d   :  { %1919 = vmatpush.msra.mxu1 (%p1600_p1), %v2796_v19 }
 0x37e   :  { %1845 = vmatpush.msra.mxu0 (%p1600_p1), %v2778_v20 }
 0x37f   :  { %1920 = vmatpush.msra.mxu1 (%p1600_p1), %v2795_v36  ;;  %2783 = vmatmul.msk.f32.vlgmr.msra.gmra.mxu0 (%p1600_p1), %vm68_vm0, %v2766_v15 }
 0x380   :  { %2800 = vmatmul.msk.f32.vlgmr.msra.gmra.mxu1 (%p1600_p1), %vm68_vm0, %v2766_v15 }
 0x387   :  { %2784 = vmatmul.msk.f32.gmra.mxu0 (%p1600_p1), %vm68_vm0, %v2767_v37 }
 0x388   :  { %2801 = vmatmul.msk.f32.gmra.mxu1 (%p1600_p1), %vm68_vm0, %v2767_v37 }
 0x38f   :  { %2785 = vmatmul.msk.f32.gmra.mxu0 (%p1600_p1), %vm68_vm0, %v2768_v23 }
 0x390   :  { %2802 = vmatmul.msk.f32.gmra.mxu1 (%p1600_p1), %vm68_vm0, %v2768_v23 }
 0x397   :  { %2786 = vmatmul.msk.f32.gmra.mxu0 (%p1600_p1), %vm68_vm0, %v2769_v26 }
 0x398   :  { %2803 = vmatmul.msk.f32.gmra.mxu1 (%p1600_p1), %vm68_vm0, %v2769_v26 }
 0x3f3   : > { %v1630_v5 = vpop.f32.mrf.mxu0 }
 0x3f4   : > { %v1633_v49 = vadd.f32 %v1630_v5, %v1609_v3  ;;  %v1673_v53 = vpop.f32.mrf.mxu1 }
 0x3f5   : > { %v1676_v54 = vadd.f32 %v2756_v4, %v1673_v53 }
 0x3f6   : > { %v2754_v58 = vmul.f32 -1.442695, %v1633_v49 }
 0x3f7   : > { %v2758_v59 = vmul.f32 -1.442695, %v1676_v54 }
 0x3f8   : > { %2998 = vpow2.f32 %v2754_v58 }
 0x3f9   : > { %3000 = vpow2.f32 %v2758_v59 }
 0x3fa   : > { %v1741_v62 = vpop.f32.mrf.mxu3 }
 0x3fb   : > { %v1744_v63 = vadd.f32 %v2763_v61, %v1741_v62 }
 0x3fc   : > { %v1716_v35 = vpop.f32.mrf.mxu2 }
 0x3fd   : > { %v2765_v0 = vmul.f32 -1.442695, %v1744_v63  ;;  %v1719_v25 = vadd.f32 %v2760_v34, %v1716_v35  ;;  %v2772_v34 = vld [vmem:[%s4830_s1 + $0xf8] sm:$0xff] (%p1600_p1)  ;;  %v2773_v35 = vld [vmem:[%s4830_s1 + $0x100] sm:$0xff] (%p1600_p1) }
 0x3fe   : > { %v2999_v11 = vpop.eup %2998 }
 0x3ff   : > { %v3001_v12 = vpop.eup %3000  ;;  %v1637_v16 = vadd.f32 1.0, %v2999_v11  ;;  %3002 = vpow2.f32 %v2765_v0  ;;  %v2815_v0 = vld [vmem:[%s4829_s2 + $0x158] sm:$0xff] (%p1600_p1) }
 0x400   : > { %v1680_v17 = vadd.f32 1.0, %v3001_v12  ;;  %v2832_v11 = vld [vmem:[%s4829_s2 + $0x178] sm:$0xff] (%p1600_p1)  ;;  %v2814_v12 = vld [vmem:[%s4829_s2 + $0x150] sm:$0xff] (%p1600_p1)  ;;  %1992 = vmatpush.msra.mxu2 (%p1600_p1), %v2815_v0 }
 0x401   : > { %3004 = vrcp.f32 %v1637_v16  ;;  %v1649_v33 = vand.u32 2147483648, %v1637_v16  ;;  %v1647_v40 = vand.u32 2147483647, %v1637_v16  ;;  %vm1643_vm15 = vweird.f32 %v1637_v16  ;;  %2067 = vmatpush.msra.mxu3 (%p1600_p1), %v2832_v11 }
 0x402   : > { %3006 = vrcp.f32 %v1680_v17  ;;  %v1692_v38 = vand.u32 2147483648, %v1680_v17  ;;  %v1690_v42 = vand.u32 2147483647, %v1680_v17  ;;  %vm1686_vm1 = vweird.f32 %v1680_v17  ;;  %1993 = vmatpush.msra.mxu2 (%p1600_p1), %v2814_v12 }
 0x403   : > { %v1650_v51 = vor.u32 1.1754944e-38, %v1649_v33  ;;  %vm1648_vm4 = vcmp.eq.f32.partialorder %v1647_v40, 8.507059e+37  ;;  %v1922_v33 = vpop.f32.mrf.mxu1 (%p1600_p1) }
 0x404   : > { %v1693_v55 = vor.u32 1.1754944e-38, %v1692_v38  ;;  %vm1691_vm5 = vcmp.eq.f32.partialorder %v1690_v42, 8.507059e+37  ;;  %1994 = vmatpush.msra.mxu2 (%p1600_p1), %v2813_v1 }
 0x405   : > { %v3003_v24 = vpop.eup %3002 }
 0x406   : > { %v1748_v27 = vadd.f32 1.0, %v3003_v24  ;;  %1995 = vmatpush.msra.mxu2 (%p1600_p1), %v2812_v10  ;;  %v2774_v24 = vld [vmem:[%s4830_s1 + $0x108] sm:$0xff] (%p1600_p1) }
 0x407   : > { %v3005_v28 = vpop.eup %3004  ;;  %2817 = vmatmul.msk.f32.vlgmr.msra.gmra.mxu2 (%p1600_p1), %vm68_vm0, %v2766_v15 }
 0x408   : > { %v3007_v29 = vpop.eup %3006  ;;  %v1639_v30 = vmul.f32 %v3005_v28, %v1637_v16  ;;  %3008 = vrcp.f32 %v1748_v27  ;;  %vm1644_vm13 = vweird.f32 %v3005_v28  ;;  %v1760_v53 = vand.u32 2147483648, %v1748_v27 }
 0x409   : > { %v1682_v31 = vmul.f32 %v3007_v29, %v1680_v17  ;;  %3010 = vtanh.f32 %v1719_v25  ;;  %vm1687_vm14 = vweird.f32 %v3007_v29  ;;  %vm1645_vm2 = vmor %vm1643_vm15, %vm1644_vm13  ;;  %vm1754_vm7 = vweird.f32 %v1748_v27  ;;  %v2831_v17 = vld [vmem:[%s4829_s2 + $0x170] sm:$0xff] (%p1600_p1) }
 0x40a   : > { %v1640_v32 = vsub.f32 1.0, %v1639_v30  ;;  %vm1688_vm3 = vmor %vm1686_vm1, %vm1687_vm14  ;;  %v1758_v54 = vand.u32 2147483647, %v1748_v27  ;;  %v1761_v59 = vor.u32 1.1754944e-38, %v1760_v53  ;;  %2068 = vmatpush.msra.mxu3 (%p1600_p1), %v2831_v17  ;;  %v2775_v25 = vld [vmem:[%s4830_s1 + $0x110] sm:$0xff] (%p1600_p1) }
 0x40b   : > { %v1683_v44 = vsub.f32 1.0, %v1682_v31  ;;  %v4573_v30 = vld [vmem:[%s4835_s4 + $0x9] ss:$0 sm:$0xff] (%p1600_p1)  ;;  %v4578_v31 = vld [vmem:[%s4835_s4 + $0xa] ss:$0 sm:$0xff] (%p1600_p1) }
 0x40c   : > { %v1641_v39 = vmul.f32 %v3005_v28, %v1640_v32  ;;  %vm1759_vm9 = vcmp.eq.f32.partialorder %v1758_v54, 8.507059e+37  ;;  %2069 = vmatpush.msra.mxu3 (%p1600_p1), %v2830_v6  ;;  %v4583_v32 = vld [vmem:[%s4835_s4 + $0xb] ss:$0 sm:$0xff] (%p1600_p1) }
 0x40d   : > { %v1684_v41 = vmul.f32 %v3007_v29, %v1683_v44  ;;  %v1847_v44 = vpop.f32.mrf.mxu0 (%p1600_p1) }
 0x40e   : > { %v3009_v45 = vpop.eup %3008  ;;  %v1642_v46 = vadd.f32 %v3005_v28, %v1641_v39  ;;  %2070 = vmatpush.msra.mxu3 (%p1600_p1), %v2829_v13  ;;  %v1923_v39 = vadd.f32 (%p1600_p1), %v4573_v30, %v1922_v33 }
 0x40f   : > { %v3011_v47 = vpop.eup %3010  ;;  %v1750_v50 = vmul.f32 %v3009_v45, %v1748_v27  ;;  %v1685_v52 = vadd.f32 %v3007_v29, %v1684_v41  ;;  %vm1755_vm6 = vweird.f32 %v3009_v45  ;;  %2834 = vmatmul.msk.f32.vlgmr.msra.gmra.mxu3 (%p1600_p1), %vm68_vm0, %v2766_v15  ;;  %2818 = vmatmul.msk.f32.gmra.mxu2 (%p1600_p1), %vm68_vm0, %v2767_v37  ;;  %v2776_v27 = vld [vmem:[%s4830_s1 + $0x118] sm:$0xff] (%p1600_p1) }
 0x410   : > { %v1646_v56 = vsel %vm1645_vm2, %v3005_v28, %v1642_v46  ;;  %vm1756_vm8 = vmor %vm1754_vm7, %vm1755_vm6  ;;  %v2777_v28 = vld [vmem:[%s4830_s1 + $0x120] sm:$0xff] (%p1600_p1)  ;;  %1958 = vst.msk [vmem:[#allocation2 + $0x100] sm:$0xff] (%p1600_p1), %vm68_vm0, %v1923_v39 }
 0x411   : > { %v1751_v57 = vsub.f32 1.0, %v1750_v50  ;;  %v1651_v60 = vsel %vm1648_vm4, %v1650_v51, %v1646_v56  ;;  %v1689_v21 = vsel %vm1688_vm3, %v3007_v29, %v1685_v52  ;;  %v4568_v29 = vld [vmem:[%s4835_s4 + $0x8] ss:$0 sm:$0xff] (%p1600_p1) }
 0x412   : > { %v1694_v2 = vsel %vm1691_vm5, %v1693_v55, %v1689_v21  ;;  %v1765_v3 = vmul.f32 %v3011_v47, %v1651_v60  ;;  %v1848_v38 = vadd.f32 (%p1600_p1), %v4568_v29, %v1847_v44  ;;  %v1925_v47 = vpop.f32.mrf.mxu1 (%p1600_p1) }
 0x413   : > { %v1752_v4 = vmul.f32 %v3009_v45, %v1751_v57  ;;  %v1764_v5 = vmul.f32 %v3109_v48, %v1694_v2  ;;  %v1926_v51 = vadd.f32 (%p1600_p1), %v4573_v30, %v1925_v47  ;;  %v4667_v47 = vld [vmem:[%s4836_s3 + $0x118] sm:$0xff] (%p1600_p1) }
 0x414   :  { %1883 = vst.msk [vmem:[#allocation2] sm:$0xff] (%p1600_p1), %vm68_vm0, %v1848_v38 }
 0x415   : > { %v1766_v48 = vadd.f32 %v1765_v3, %v1764_v5   ;;  %v1753_v49 = vadd.f32 %v3009_v45, %v1752_v4  ;;  %v1850_v46 = vpop.f32.mrf.mxu0 (%p1600_p1)  ;;  %1959 = vst.msk [vmem:[#allocation2 + $0x108] sm:$0xff] (%p1600_p1), %vm68_vm0, %v1926_v51  ;;  %v4677_v51 = vld [vmem:[%s4836_s3 + $0x128] sm:$0xff] (%p1600_p1) }
 0x416   :  { %v1851_v50 = vadd.f32 (%p1600_p1), %v4568_v29, %v1850_v46  ;;  %v4662_v46 = vld [vmem:[%s4836_s3 + $0x110] sm:$0xff] (%p1600_p1) }
 0x417   : > { %3012 = vtanh.f32 %v1766_v48  ;;  %v1757_v58 = vsel %vm1756_vm8, %v3009_v45, %v1753_v49  ;;  %2835 = vmatmul.msk.f32.gmra.mxu3 (%p1600_p1), %vm68_vm0, %v2767_v37  ;;  %2819 = vmatmul.msk.f32.gmra.mxu2 (%p1600_p1), %vm68_vm0, %v2768_v23  ;;  %v2771_v48 = vld [vmem:[%s4830_s1 + $0xf0] sm:$0xff] (%p1600_p1) }
 0x418   : > { %v1762_v62 = vsel %vm1759_vm9, %v1761_v59, %v1757_v58  ;;  %1884 = vst.msk [vmem:[#allocation2 + $0x8] sm:$0xff] (%p1600_p1), %vm68_vm0, %v1851_v50  ;;  %v4672_v50 = vld [vmem:[%s4836_s3 + $0x120] sm:$0xff] (%p1600_p1) }
 0x41a   :  { %v1928_v21 = vpop.f32.mrf.mxu1 (%p1600_p1) }
 0x41b   :  { %v1929_v3 = vadd.f32 (%p1600_p1), %v4573_v30, %v1928_v21 }
 0x41d   : > { %v3013_v61 = vpop.eup %3012  ;;  %v1853_v60 = vpop.f32.mrf.mxu0 (%p1600_p1)  ;;  %1960 = vst.msk [vmem:[#allocation2 + $0x110] sm:$0xff] (%p1600_p1), %vm68_vm0, %v1929_v3  ;;  %v4699_v3 = vld [vmem:[%s4836_s3 + $0x148] sm:$0xff] (%p1600_p1) }
 0x41e   : > { %v1768_v2 = vmul.f32 %v3013_v61, %v1762_v62   ;;  %1602 = sbr.rel (!%p1600_p1) target bundleno = 879 (0x36f), region = 129 }
 0x41f   :  { %2836 = vmatmul.msk.f32.gmra.mxu3 (%p1600_p1), %vm68_vm0, %v2768_v23  ;;  %2820 = vmatmul.msk.f32.gmra.mxu2 (%p1600_p1), %vm68_vm0, %v2769_v26 }
 0x420   : > { %v1769_v63 = vadd.f32 %v3105_v22, %v1768_v2   ;;  %v1854_v2 = vadd.f32 (%p1600_p1), %v4568_v29, %v1853_v60  ;;  %v4692_v60 = vld [vmem:[%s4836_s3 + $0x140] sm:$0xff] (%p1600_p1) }
 0x422   : > { %v4838_v22 = vmov %v1769_v63  ;;  %v4440_v16 = vmul.f32 (%p1600_p1), 0.04, %v1769_v63  ;;  %1885 = vst.msk [vmem:[#allocation2 + $0x10] sm:$0xff] (%p1600_p1), %vm68_vm0, %v1854_v2  ;;  %v1931_v58 = vpop.f32.mrf.mxu1 (%p1600_p1) }
 0x423   :  { %v2770_v22 = vld [vmem:[%s4830_s1 + $0xe8] sm:$0xff]  ;;  %v1932_v61 = vadd.f32 %v4573_v30, %v1931_v58 }
 0x424   :  { %2787 = vmatmul.msk.f32.gmra.mxu0 %vm68_vm0, %v2770_v22  ;;  %2804 = vmatmul.msk.f32.gmra.mxu1 %vm68_vm0, %v2770_v22  ;;  %v4719_v58 = vld [vmem:[%s4836_s3 + $0x168] sm:$0xff] }
 0x425   :  { %v1856_v54 = vpop.f32.mrf.mxu0  ;;  %1961 = vst.msk [vmem:[#allocation2 + $0x118] sm:$0xff] %vm68_vm0, %v1932_v61 }
 0x426   :  { %v1857_v59 = vadd.f32 %v4568_v29, %v1856_v54  ;;  %v4714_v54 = vld [vmem:[%s4836_s3 + $0x160] sm:$0xff] }
 0x427   :  { %2837 = vmatmul.msk.f32.gmra.mxu3 %vm68_vm0, %v2769_v26  ;;  %2821 = vmatmul.msk.f32.gmra.mxu2 %vm68_vm0, %v2770_v22 }
 0x428   :  { %1886 = vst.msk [vmem:[#allocation2 + $0x18] sm:$0xff] %vm68_vm0, %v1857_v59  ;;  %v4724_v59 = vld [vmem:[%s4836_s3 + $0x170] sm:$0xff] }
 0x42c   :  { %2788 = vmatmul.msk.f32.gmra.mxu0 %vm68_vm0, %v2771_v48  ;;  %2805 = vmatmul.msk.f32.gmra.mxu1 %vm68_vm0, %v2771_v48 }
 0x42f   :  { %2838 = vmatmul.msk.f32.gmra.mxu3 %vm68_vm0, %v2770_v22  ;;  %2822 = vmatmul.msk.f32.gmra.mxu2 %vm68_vm0, %v2771_v48 }
 0x434   :  { %2789 = vmatmul.msk.f32.gmra.mxu0 %vm68_vm0, %v2772_v34  ;;  %2806 = vmatmul.msk.f32.gmra.mxu1 %vm68_vm0, %v2772_v34 }
 0x437   :  { %2839 = vmatmul.msk.f32.gmra.mxu3 %vm68_vm0, %v2771_v48  ;;  %2823 = vmatmul.msk.f32.gmra.mxu2 %vm68_vm0, %v2772_v34 }
 0x43c   :  { %2790 = vmatmul.msk.f32.gmra.mxu0 %vm68_vm0, %v2773_v35  ;;  %2807 = vmatmul.msk.f32.gmra.mxu1 %vm68_vm0, %v2773_v35 }
 0x43f   :  { %2840 = vmatmul.msk.f32.gmra.mxu3 %vm68_vm0, %v2772_v34  ;;  %2824 = vmatmul.msk.f32.gmra.mxu2 %vm68_vm0, %v2773_v35 }
 0x444   :  { %2791 = vmatmul.msk.f32.gmra.mxu0 %vm68_vm0, %v2774_v24  ;;  %2808 = vmatmul.msk.f32.gmra.mxu1 %vm68_vm0, %v2774_v24 }
 0x447   :  { %2841 = vmatmul.msk.f32.gmra.mxu3 %vm68_vm0, %v2773_v35  ;;  %2825 = vmatmul.msk.f32.gmra.mxu2 %vm68_vm0, %v2774_v24 }
 0x44c   :  { %2792 = vmatmul.msk.f32.gmra.mxu0 %vm68_vm0, %v2775_v25  ;;  %2809 = vmatmul.msk.f32.gmra.mxu1 %vm68_vm0, %v2775_v25 }
 0x44f   :  { %2842 = vmatmul.msk.f32.gmra.mxu3 %vm68_vm0, %v2774_v24  ;;  %2826 = vmatmul.msk.f32.gmra.mxu2 %vm68_vm0, %v2775_v25 }
 0x454   :  { %2793 = vmatmul.msk.f32.gmra.mxu0 %vm68_vm0, %v2776_v27  ;;  %2810 = vmatmul.msk.f32.gmra.mxu1 %vm68_vm0, %v2776_v27 }
 0x457   :  { %2843 = vmatmul.msk.f32.gmra.mxu3 %vm68_vm0, %v2775_v25  ;;  %2827 = vmatmul.msk.f32.gmra.mxu2 %vm68_vm0, %v2776_v27 }
 0x45c   :  { %2794 = vmatmul.msk.f32.gmra.mxu0 %vm68_vm0, %v2777_v28  ;;  %2811 = vmatmul.msk.f32.gmra.mxu1 %vm68_vm0, %v2777_v28 }
 0x45f   :  { %2844 = vmatmul.msk.f32.gmra.mxu3 %vm68_vm0, %v2776_v27  ;;  %2828 = vmatmul.msk.f32.gmra.mxu2 %vm68_vm0, %v2777_v28 }
 0x467   :  { %2845 = vmatmul.msk.f32.gmra.mxu3 %vm68_vm0, %v2777_v28 }
 0x48a   :  { %v1997_v40 = vpop.f32.mrf.mxu2 }
 0x48b   :  { %v1998_v42 = vadd.f32 %v4578_v31, %v1997_v40 }
 0x48d   :  { %2033 = vst.msk [vmem:[#allocation2 + $0x200] sm:$0xff] %vm68_vm0, %v1998_v42  ;;  %v4652_v42 = vld [vmem:[%s4836_s3 + $0x100] sm:$0xff] }
 0x492   :  { %v2072_v41 = vpop.f32.mrf.mxu3  ;;  %v2000_v52 = vpop.f32.mrf.mxu2 }
 0x493   :  { %v2073_v45 = vadd.f32 %v4583_v32, %v2072_v41  ;;  %v2001_v56 = vadd.f32 %v4578_v31, %v2000_v52 }
 0x495   :  { %2108 = vst.msk [vmem:[#allocation2 + $0x300] sm:$0xff] %vm68_vm0, %v2073_v45  ;;  %v4657_v45 = vld [vmem:[%s4836_s3 + $0x108] sm:$0xff] }
 0x496   :  { %2034 = vst.msk [vmem:[#allocation2 + $0x208] sm:$0xff] %vm68_vm0, %v2001_v56  ;;  %v4682_v56 = vld [vmem:[%s4836_s3 + $0x130] sm:$0xff] }
 0x49a   :  { %v2075_v55 = vpop.f32.mrf.mxu3  ;;  %v2003_v4 = vpop.f32.mrf.mxu2 }
 0x49b   :  { %v2076_v57 = vadd.f32 %v4583_v32, %v2075_v55  ;;  %v2004_v49 = vadd.f32 %v4578_v31, %v2003_v4  ;;  %v4704_v4 = vld [vmem:[%s4836_s3 + $0x150] sm:$0xff] }
 0x49d   :  { %2109 = vst.msk [vmem:[#allocation2 + $0x308] sm:$0xff] %vm68_vm0, %v2076_v57  ;;  %v4687_v57 = vld [vmem:[%s4836_s3 + $0x138] sm:$0xff] }
 0x49e   :  { %2035 = vst.msk [vmem:[#allocation2 + $0x210] sm:$0xff] %vm68_vm0, %v2004_v49 }
 0x4a1   :  { %v1859_v12 = vpop.f32.mrf.mxu0  ;;  %v1934_v17 = vpop.f32.mrf.mxu1 }
 0x4a2   :  { %v2078_v5 = vpop.f32.mrf.mxu3  ;;  %v2006_v62 = vpop.f32.mrf.mxu2  ;;  %v1860_v1 = vadd.f32 %v4568_v29, %v1859_v12  ;;  %v1935_v6 = vadd.f32 %v4573_v30, %v1934_v17 }
 0x4a3   :  { %v2079_v53 = vadd.f32 %v4583_v32, %v2078_v5  ;;  %v2007_v0 = vadd.f32 %v4578_v31, %v2006_v62  ;;  %v4709_v5 = vld [vmem:[%s4836_s3 + $0x158] sm:$0xff] }
 0x4a4   :  { %1887 = vst.msk [vmem:[#allocation2 + $0x20] sm:$0xff] %vm68_vm0, %v1860_v1 }
 0x4a5   :  { %2110 = vst.msk [vmem:[#allocation2 + $0x310] sm:$0xff] %vm68_vm0, %v2079_v53 }
 0x4a6   :  { %2036 = vst.msk [vmem:[#allocation2 + $0x218] sm:$0xff] %vm68_vm0, %v2007_v0 }
 0x4a7   :  { %1962 = vst.msk [vmem:[#allocation2 + $0x120] sm:$0xff] %vm68_vm0, %v1935_v6 }
 0x4a9   :  { %v1862_v13 = vpop.f32.mrf.mxu0  ;;  %v1937_v14 = vpop.f32.mrf.mxu1 }
 0x4aa   :  { %v2081_v63 = vpop.f32.mrf.mxu3  ;;  %v2009_v7 = vpop.f32.mrf.mxu2  ;;  %v1863_v15 = vadd.f32 %v4568_v29, %v1862_v13  ;;  %v1938_v18 = vadd.f32 %v4573_v30, %v1937_v14 }
 0x4ab   :  { %v2082_v11 = vadd.f32 %v4583_v32, %v2081_v63  ;;  %v2010_v9 = vadd.f32 %v4578_v31, %v2009_v7  ;;  %v4732_v63 = vld [vmem:[%s4836_s3 + $0x178] sm:$0xff]  ;;  %s4767_s3 = smov 0  }
 0x4ac   :  { %1888 = vst.msk [vmem:[#allocation2 + $0x28] sm:$0xff] %vm68_vm0, %v1863_v15 }
 0x4ad   :  { %2111 = vst.msk [vmem:[#allocation2 + $0x318] sm:$0xff] %vm68_vm0, %v2082_v11 }
 0x4ae   :  { %2037 = vst.msk [vmem:[#allocation2 + $0x220] sm:$0xff] %vm68_vm0, %v2010_v9 }
 0x4af   :  { %1963 = vst.msk [vmem:[#allocation2 + $0x128] sm:$0xff] %vm68_vm0, %v1938_v18 }
 0x4b1   :  { %v1865_v23 = vpop.f32.mrf.mxu0  ;;  %v1940_v26 = vpop.f32.mrf.mxu1 }
 0x4b2   :  { %v2084_v8 = vpop.f32.mrf.mxu3  ;;  %v2012_v19 = vpop.f32.mrf.mxu2  ;;  %v1866_v22 = vadd.f32 %v4568_v29, %v1865_v23  ;;  %v1941_v48 = vadd.f32 %v4573_v30, %v1940_v26 }
 0x4b3   :  { %v2085_v10 = vadd.f32 %v4583_v32, %v2084_v8  ;;  %v2013_v36 = vadd.f32 %v4578_v31, %v2012_v19 }
 0x4b4   :  { %1889 = vst.msk [vmem:[#allocation2 + $0x30] sm:$0xff] %vm68_vm0, %v1866_v22 }
 0x4b5   :  { %2112 = vst.msk [vmem:[#allocation2 + $0x320] sm:$0xff] %vm68_vm0, %v2085_v10 }
 0x4b6   :  { %2038 = vst.msk [vmem:[#allocation2 + $0x228] sm:$0xff] %vm68_vm0, %v2013_v36 }
 0x4b7   :  { %1964 = vst.msk [vmem:[#allocation2 + $0x130] sm:$0xff] %vm68_vm0, %v1941_v48 }
 0x4b9   :  { %v1868_v27 = vpop.f32.mrf.mxu0  ;;  %v1943_v28 = vpop.f32.mrf.mxu1 }
 0x4ba   :  { %v2087_v20 = vpop.f32.mrf.mxu3  ;;  %v2015_v34 = vpop.f32.mrf.mxu2  ;;  %v1869_v44 = vadd.f32 %v4568_v29, %v1868_v27  ;;  %v1944_v33 = vadd.f32 %v4573_v30, %v1943_v28 }
 0x4bb   :  { %v2088_v37 = vadd.f32 %v4583_v32, %v2087_v20  ;;  %v2016_v24 = vadd.f32 %v4578_v31, %v2015_v34 }
 0x4bc   :  { %1890 = vst.msk [vmem:[#allocation2 + $0x38] sm:$0xff] %vm68_vm0, %v1869_v44 }
 0x4bd   :  { %2113 = vst.msk [vmem:[#allocation2 + $0x328] sm:$0xff] %vm68_vm0, %v2088_v37 }
 0x4be   :  { %2039 = vst.msk [vmem:[#allocation2 + $0x230] sm:$0xff] %vm68_vm0, %v2016_v24  ;;  %v4761_v24 = vmov 0.0  }
 0x4bf   :  { %1965 = vst.msk [vmem:[#allocation2 + $0x138] sm:$0xff] %vm68_vm0, %v1944_v33 }
 0x4c1   :  { %v1871_v52 = vpop.f32.mrf.mxu0  ;;  %v1946_v55 = vpop.f32.mrf.mxu1 }
 0x4c2   :  { %v2090_v35 = vpop.f32.mrf.mxu3  ;;  %v2018_v38 = vpop.f32.mrf.mxu2  ;;  %v1872_v21 = vadd.f32 %v4568_v29, %v1871_v52  ;;  %v1947_v2 = vadd.f32 %v4573_v30, %v1946_v55 }
 0x4c3   :  { %v2091_v25 = vadd.f32 %v4583_v32, %v2090_v35  ;;  %v2019_v40 = vadd.f32 %v4578_v31, %v2018_v38 }
 0x4c4   :  { %1891 = vst.msk [vmem:[#allocation2 + $0x40] sm:$0xff] %vm68_vm0, %v1872_v21 }
 0x4c5   :  { %2114 = vst.msk [vmem:[#allocation2 + $0x330] sm:$0xff] %vm68_vm0, %v2091_v25  ;;  %v4763_v25 = vmov 0.0  }
 0x4c6   :  { %2040 = vst.msk [vmem:[#allocation2 + $0x238] sm:$0xff] %vm68_vm0, %v2019_v40 }
 0x4c7   :  { %1966 = vst.msk [vmem:[#allocation2 + $0x140] sm:$0xff] %vm68_vm0, %v1947_v2 }
 0x4c9   :  { %v1874_v0 = vpop.f32.mrf.mxu0  ;;  %v1949_v11 = vpop.f32.mrf.mxu1 }
 0x4ca   :  { %v2093_v39 = vpop.f32.mrf.mxu3  ;;  %v2021_v49 = vpop.f32.mrf.mxu2  ;;  %v1875_v12 = vadd.f32 %v4568_v29, %v1874_v0  ;;  %v1950_v17 = vadd.f32 %v4573_v30, %v1949_v11 }
 0x4cb   :  { %v2094_v41 = vadd.f32 %v4583_v32, %v2093_v39  ;;  %v2022_v61 = vadd.f32 %v4578_v31, %v2021_v49 }
 0x4cc   :  { %1892 = vst.msk [vmem:[#allocation2 + $0x48] sm:$0xff] %vm68_vm0, %v1875_v12 }
 0x4cd   :  { %2115 = vst.msk [vmem:[#allocation2 + $0x338] sm:$0xff] %vm68_vm0, %v2094_v41 }
 0x4ce   :  { %2041 = vst.msk [vmem:[#allocation2 + $0x240] sm:$0xff] %vm68_vm0, %v2022_v61 }
 0x4cf   :  { %1967 = vst.msk [vmem:[#allocation2 + $0x148] sm:$0xff] %vm68_vm0, %v1950_v17 }
 0x4d1   :  { %v1877_v9 = vpop.f32.mrf.mxu0  ;;  %v1952_v10 = vpop.f32.mrf.mxu1 }
 0x4d2   :  { %v2096_v53 = vpop.f32.mrf.mxu3  ;;  %v2024_v1 = vpop.f32.mrf.mxu2  ;;  %v1878_v13 = vadd.f32 %v4568_v29, %v1877_v9  ;;  %v1953_v14 = vadd.f32 %v4573_v30, %v1952_v10 }
 0x4d3   :  { %v2097_v62 = vadd.f32 %v4583_v32, %v2096_v53  ;;  %v2025_v7 = vadd.f32 %v4578_v31, %v2024_v1 }
 0x4d4   :  { %1893 = vst.msk [vmem:[#allocation2 + $0x50] sm:$0xff] %vm68_vm0, %v1878_v13 }
 0x4d5   :  { %2116 = vst.msk [vmem:[#allocation2 + $0x340] sm:$0xff] %vm68_vm0, %v2097_v62 }
 0x4d6   :  { %2042 = vst.msk [vmem:[#allocation2 + $0x248] sm:$0xff] %vm68_vm0, %v2025_v7 }
 0x4d7   :  { %1968 = vst.msk [vmem:[#allocation2 + $0x150] sm:$0xff] %vm68_vm0, %v1953_v14 }
 0x4d9   :  { %v1880_v36 = vpop.f32.mrf.mxu0  ;;  %v1955_v37 = vpop.f32.mrf.mxu1 }
 0x4da   :  { %v2099_v6 = vpop.f32.mrf.mxu3  ;;  %v2027_v15 = vpop.f32.mrf.mxu2  ;;  %v1881_v23 = vadd.f32 %v4568_v29, %v1880_v36  ;;  %v1956_v26 = vadd.f32 %v4573_v30, %v1955_v37  ;;  %v4765_v29 = vmov 0.0  }
 0x4db   :  { %v2100_v8 = vadd.f32 %v4583_v32, %v2099_v6  ;;  %v2028_v19 = vadd.f32 %v4578_v31, %v2027_v15 }
 0x4dc   :  { %1894 = vst.msk [vmem:[#allocation2 + $0x58] sm:$0xff] %vm68_vm0, %v1881_v23 }
 0x4dd   :  { %2117 = vst.msk [vmem:[#allocation2 + $0x348] sm:$0xff] %vm68_vm0, %v2100_v8 }
 0x4de   :  { %2043 = vst.msk [vmem:[#allocation2 + $0x250] sm:$0xff] %vm68_vm0, %v2028_v19 }
 0x4df   :  { %1969 = vst.msk [vmem:[#allocation2 + $0x158] sm:$0xff] %vm68_vm0, %v1956_v26 }
 0x4e2   :  { %v2102_v18 = vpop.f32.mrf.mxu3  ;;  %v2030_v22 = vpop.f32.mrf.mxu2 }
 0x4e3   :  { %v2103_v20 = vadd.f32 %v4583_v32, %v2102_v18  ;;  %v2031_v34 = vadd.f32 %v4578_v31, %v2030_v22 }
 0x4e5   :  { %2118 = vst.msk [vmem:[#allocation2 + $0x350] sm:$0xff] %vm68_vm0, %v2103_v20 }
 0x4e6   :  { %2044 = vst.msk [vmem:[#allocation2 + $0x258] sm:$0xff] %vm68_vm0, %v2031_v34 }
 0x4ea   :  { %v2105_v48 = vpop.f32.mrf.mxu3 }
 0x4eb   :  { %v2106_v35 = vadd.f32 %v4583_v32, %v2105_v48 }
 0x4ed   :  { %2119 = vst.msk [vmem:[#allocation2 + $0x358] sm:$0xff] %vm68_vm0, %v2106_v35 }
 0x4ee LB: > { %2167 = vmatpush.msra.mxu0 %v4667_v47  ;;  %2210 = vmatpush.msra.mxu1 %v4687_v57  ;;  %s2862_s10 = sshll.u32 %s3133_s3, 3  ;;  %s2145_s3 = sadd.s32 1, %s3133_s3   ;;  %s3133_s3 = sphi %s4767_s3, %s2145_s3   ;;  %v3129_v29 = vphi %v4765_v29, %v2310_v29   ;;  %v3125_v25 = vphi %v4763_v25, %v2308_v25   ;;  %v3121_v24 = vphi %v4761_v24, %v4839_v24  }
 0x4ef   : > { %2278 = vmatpush.msra.mxu3 %v4732_v63  ;;  %2253 = vmatpush.msra.mxu2 %v4709_v5  ;;  %s2150_s0 = scalar_lea.vmem [#allocation2], %s2862_s10  ;;  %p2142_p2 = scmp.ge.s32.totalorder %s2145_s3, 12  }
 0x4f0   : > { %2168 = vmatpush.msra.mxu0 %v4662_v46  ;;  %2211 = vmatpush.msra.mxu1 %v4682_v56  ;;  %v3034_v46 = vld [vmem:[#allocation3] ss:$0 sm:$0xff] (%p2142_p2) }
 0x4f1   : > { %2279 = vmatpush.msra.mxu3 %v4724_v59  ;;  %2254 = vmatpush.msra.mxu2 %v4704_v4 }
 0x4f2   : > { %2169 = vmatpush.msra.mxu0 %v4657_v45  ;;  %2212 = vmatpush.msra.mxu1 %v4677_v51 }
 0x4f3   : > { %2280 = vmatpush.msra.mxu3 %v4719_v58  ;;  %2255 = vmatpush.msra.mxu2 %v4699_v3 }
 0x4f4   : > { %2170 = vmatpush.msra.mxu0 %v4652_v42  ;;  %2213 = vmatpush.msra.mxu1 %v4672_v50  ;;  %v2151_v30 = vld [vmem:[%s2150_s0] sm:$0xff] }
 0x4f5   : > { %2281 = vmatpush.msra.mxu3 %v4714_v54  ;;  %2863 = vmatmul.msk.f32.vlgmr.msra.gmra.mxu0 %vm68_vm0, %v3129_v29  ;;  %v2866_v31 = vld [vmem:[%s2150_s0 + $0x100] sm:$0xff] }
 0x4f6   : > { %2867 = vmatmul.msk.f32.vlgmr.msra.gmra.mxu1 %vm68_vm0, %v3129_v29  ;;  %2874 = vmatmul.msk.f32.vlgmr.msra.gmra.mxu3 %vm68_vm0, %v3129_v29  ;;  %v2873_v39 = vld [vmem:[%s2150_s0 + $0x300] sm:$0xff] }
 0x4f7   : > { %2256 = vmatpush.msra.mxu2 %v4692_v60  ;;  %v2870_v53 = vld [vmem:[%s2150_s0 + $0x200] sm:$0xff] }
 0x4f8   : > { %2871 = vmatmul.msk.f32.vlgmr.msra.gmra.mxu2 %vm68_vm0, %v3129_v29  ;;  %v2316_v42 = vld [vmem:[%s4831_s5] sm:$0xff] (%p2142_p2) }
 0x572   : > { %v2172_v32 = vpop.f32.mrf.mxu0 }
 0x573   : > { %v2175_v27 = vadd.f32 %v2172_v32, %v2151_v30  ;;  %v2215_v28 = vpop.f32.mrf.mxu1 }
 0x574   : > { %v2218_v44 = vadd.f32 %v2866_v31, %v2215_v28 }
 0x575   : > { %v2864_v33 = vmul.f32 -1.442695, %v2175_v27 }
 0x576   : > { %v2868_v38 = vmul.f32 -1.442695, %v2218_v44 }
 0x577   : > { %3018 = vpow2.f32 %v2864_v33 }
 0x578   : > { %3020 = vpow2.f32 %v2868_v38 }
 0x579   : > { %v2283_v40 = vpop.f32.mrf.mxu3 }
 0x57a   : > { %v2286_v41 = vadd.f32 %v2873_v39, %v2283_v40 }
 0x57b   : > { %v2258_v61 = vpop.f32.mrf.mxu2 }
 0x57c   : > { %v2875_v52 = vmul.f32 -1.442695, %v2286_v41  ;;  %v2261_v0 = vadd.f32 %v2870_v53, %v2258_v61  ;;  %v2317_v53 = vld [vmem:[%s4831_s5 + $0x8] sm:$0xff] (%p2142_p2) }
 0x57d   : > { %v3019_v55 = vpop.eup %3018 }
 0x57e   : > { %v3021_v21 = vpop.eup %3020  ;;  %v2179_v2 = vadd.f32 1.0, %v3019_v55  ;;  %3022 = vpow2.f32 %v2875_v52  ;;  %v2319_v55 = vld [vmem:[%s4831_s5 + $0x18] sm:$0xff] (%p2142_p2) }
 0x57f   : > { %v2222_v49 = vadd.f32 1.0, %v3021_v21  ;;  %v2318_v21 = vld [vmem:[%s4831_s5 + $0x10] sm:$0xff] (%p2142_p2)  ;;  %2339 = vmatpush.msra.mxu0 (%p2142_p2), %v2319_v55 }
 0x580   : > { %3024 = vrcp.f32 %v2179_v2  ;;  %v2191_v9 = vand.u32 2147483648, %v2179_v2  ;;  %v2189_v14 = vand.u32 2147483647, %v2179_v2  ;;  %vm2185_vm12 = vweird.f32 %v2179_v2 }
 0x581   : > { %3026 = vrcp.f32 %v2222_v49  ;;  %v2234_v10 = vand.u32 2147483648, %v2222_v49  ;;  %v2232_v18 = vand.u32 2147483647, %v2222_v49  ;;  %vm2228_vm13 = vweird.f32 %v2222_v49  ;;  %2340 = vmatpush.msra.mxu0 (%p2142_p2), %v2318_v21 }
 0x582   : > { %v2192_v23 = vor.u32 1.1754944e-38, %v2191_v9  ;;  %vm2190_vm1 = vcmp.eq.f32.partialorder %v2189_v14, 8.507059e+37 }
 0x583   : > { %v2235_v22 = vor.u32 1.1754944e-38, %v2234_v10  ;;  %vm2233_vm2 = vcmp.eq.f32.partialorder %v2232_v18, 8.507059e+37  ;;  %2341 = vmatpush.msra.mxu0 (%p2142_p2), %v2317_v53 }
 0x584   : > { %v3023_v62 = vpop.eup %3022 }
 0x585   : > { %v2290_v11 = vadd.f32 1.0, %v3023_v62  ;;  %2342 = vmatpush.msra.mxu0 (%p2142_p2), %v2316_v42 }
 0x586   : > { %v3025_v12 = vpop.eup %3024 }
 0x587   : > { %v3027_v17 = vpop.eup %3026  ;;  %v2181_v1 = vmul.f32 %v3025_v12, %v2179_v2  ;;  %3028 = vrcp.f32 %v2290_v11  ;;  %vm2186_vm10 = vweird.f32 %v3025_v12  ;;  %v2302_v44 = vand.u32 2147483648, %v2290_v11 }
 0x588   : > { %v2224_v6 = vmul.f32 %v3027_v17, %v2222_v49  ;;  %3030 = vtanh.f32 %v2261_v0  ;;  %vm2229_vm11 = vweird.f32 %v3027_v17  ;;  %vm2187_vm14 = vmor %vm2185_vm12, %vm2186_vm10  ;;  %vm2296_vm4 = vweird.f32 %v2290_v11 }
 0x589   : > { %v2182_v7 = vsub.f32 1.0, %v2181_v1  ;;  %vm2230_vm15 = vmor %vm2228_vm13, %vm2229_vm11  ;;  %v2300_v33 = vand.u32 2147483647, %v2290_v11  ;;  %v2303_v39 = vor.u32 1.1754944e-38, %v2302_v44  ;;  %v2313_v49 = vadd.f32 (%p2142_p2), %v4440_v16, %v3865_v43 }
 0x58a   : > { %v2225_v8 = vsub.f32 1.0, %v2224_v6 }
 0x58b   : > { %v2183_v13 = vmul.f32 %v3025_v12, %v2182_v7  ;;  %vm2301_vm6 = vcmp.eq.f32.partialorder %v2300_v33, 8.507059e+37 }
 0x58c   : > { %v2226_v15 = vmul.f32 %v3027_v17, %v2225_v8 }
 0x58d   : > { %v3029_v19 = vpop.eup %3028  ;;  %v2184_v20 = vadd.f32 %v3025_v12, %v2183_v13 }
 0x58e   : > { %v3031_v36 = vpop.eup %3030  ;;  %v2292_v37 = vmul.f32 %v3029_v19, %v2290_v11  ;;  %v2227_v26 = vadd.f32 %v3027_v17, %v2226_v15  ;;  %vm2297_vm3 = vweird.f32 %v3029_v19 }
 0x58f   : > { %v2188_v48 = vsel %vm2187_vm14, %v3025_v12, %v2184_v20  ;;  %vm2298_vm5 = vmor %vm2296_vm4, %vm2297_vm3 }
 0x590   : > { %v2293_v34 = vsub.f32 1.0, %v2292_v37  ;;  %v2193_v35 = vsel %vm2190_vm1, %v2192_v23, %v2188_v48  ;;  %v2231_v29 = vsel %vm2230_vm15, %v3027_v17, %v2227_v26 }
 0x591   : > { %v2236_v30 = vsel %vm2233_vm2, %v2235_v22, %v2231_v29  ;;  %v2307_v31 = vmul.f32 %v3031_v36, %v2193_v35 }
 0x592   : > { %v2294_v32 = vmul.f32 %v3029_v19, %v2293_v34  ;;  %v2306_v27 = vmul.f32 %v3125_v25, %v2236_v30 }
 0x594   : > { %v2308_v25 = vadd.f32 %v2307_v31, %v2306_v27   ;;  %v2295_v28 = vadd.f32 %v3029_v19, %v2294_v32 }
 0x596   : > { %3032 = vtanh.f32 %v2308_v25  ;;  %v2299_v38 = vsel %vm2298_vm5, %v3029_v19, %v2295_v28 }
 0x597   : > { %v2304_v41 = vsel %vm2301_vm6, %v2303_v39, %v2299_v38 }
 0x59c   : > { %v3033_v40 = vpop.eup %3032 }
 0x59d   : > { %v2310_v29 = vmul.f32 %v3033_v40, %v2304_v41   ;;  %2144 = sbr.rel (!%p2142_p2) target bundleno = 1262 (0x4ee), region = 140 }
 0x59f   : > { %v2311_v52 = vadd.f32 %v3121_v24, %v2310_v29  }
 0x5a1   : > { %v4839_v24 = vmov %v2311_v52  ;;  %v2312_v2 = vmul.f32 (%p2142_p2), 0.083333336, %v2311_v52 }
 0x5a3   :  { %v2314_v61 = vadd.f32 %v2313_v49, %v2312_v2 }
 0x5a5   :  { %v2315_v45 = vmul.f32 0.33333334, %v2314_v61 }
 0x5a7   :  { %2876 = vmatmul.msk.f32.vlgmr.msra.gmra.mxu0 %vm68_vm0, %v2315_v45  ;;  %vm2366_vm0 = vcmask 7168  }
 0x624   :  { %v2344_v47 = vpop.f32.mrf.mxu0 }
 0x625   :  { %v2345_v50 = vadd.f32 %v3034_v46, %v2344_v47 }
 0x627   :  { %v2877_v43 = vmul.f32 -1.442695, %v2345_v50 }
 0x629   :  { %3035 = vpow2.f32 %v2877_v43 }
 0x62f   :  { %v3036_v16 = vpop.eup %3035 }
 0x630   :  { %v2350_v51 = vadd.f32 1.0, %v3036_v16 }
 0x632   :  { %3037 = vrcp.f32 %v2350_v51  ;;  %v2362_v3 = vand.u32 2147483648, %v2350_v51  ;;  %v2360_v5 = vand.u32 2147483647, %v2350_v51  ;;  %vm2356_vm8 = vweird.f32 %v2350_v51 }
 0x634   :  { %v2363_v58 = vor.u32 1.1754944e-38, %v2362_v3  ;;  %vm2361_vm10 = vcmp.eq.f32.partialorder %v2360_v5, 8.507059e+37 }
 0x638   :  { %v3038_v56 = vpop.eup %3037 }
 0x639   :  { %v2352_v57 = vmul.f32 %v3038_v56, %v2350_v51  ;;  %vm2357_vm7 = vweird.f32 %v3038_v56 }
 0x63a   :  { %vm2358_vm9 = vmor %vm2356_vm8, %vm2357_vm7 }
 0x63b   :  { %v2353_v60 = vsub.f32 1.0, %v2352_v57 }
 0x63d   :  { %v2354_v4 = vmul.f32 %v3038_v56, %v2353_v60 }
 0x63f   :  { %v2355_v54 = vadd.f32 %v3038_v56, %v2354_v4 }
 0x641   :  { %v2359_v59 = vsel %vm2358_vm9, %v3038_v56, %v2355_v54 }
 0x642   :  { %v2364_v63 = vsel %vm2361_vm10, %v2363_v58, %v2359_v59 }
 0x643   :  { %2367 = vst.msk [vmem:[%s4833_s7] sm:$0xff] %vm2366_vm0, %v2364_v63 }

// kernel: _lambda_.2
= control target key start
LH: loop header
LB: loop body
LE: loop exit
PB: predicated region body
PF: predicated region fallthrough
CT: control target
= control target key end

     0   :  { %s4555_s24 = smov 0   ;;  %s6038_s0 = inlined_call_operand.vmem [shape: f32[2,8,2,8,1], index: 0, kind: input, shape index: {}]   ;;  %s6039_s1 = inlined_call_operand.vmem [shape: f32[3,3,1,32], index: 1, kind: input, shape index: {}]   ;;  %s6040_s2 = inlined_call_operand.vmem [shape: f32[1,32], index: 2, kind: input, shape index: {}]   ;;  %s6041_s3 = inlined_call_operand.vmem [shape: f32[3,3,32,32], index: 3, kind: input, shape index: {}]   ;;  %s6042_s4 = inlined_call_operand.vmem [shape: f32[1,32], index: 4, kind: input, shape index: {}]   ;;  %s6043_s5 = inlined_call_operand.vmem [shape: f32[4,2,37,4], index: 5, kind: input, shape index: {}]   ;;  %s6044_s6 = inlined_call_operand.vmem [shape: f32[2,4,2,4,32], index: 6, kind: output, shape index: {0}]   ;;  %s6045_s7 = inlined_call_operand.vmem [shape: f32[2,37,32], index: 7, kind: output, shape index: {1}]  }
   0x1 LB: > { %s3952_s25 = sadd.s32 4294967295, %s4512_s24   ;;  %p3956_p0 = scmp.ge.s32.totalorder %s4512_s24, 1  ;;  %s4512_s24 = sphi %s4555_s24, %s18_s24  }
   0x2   : > { %p240_p1 = scmp.lt.s32.totalorder %s4512_s24, 3 }
   0x4   : > { %p241_p2 = pnand %p3956_p0, %p240_p1 }
   0x6   : > { %244 = sbr.rel (%p241_p2) target bundleno = 1191 (0x4a7), region = 44 }
   0xb   : > { %p277_p3 = scmp.lt.s32.totalorder %s3952_s25, 1  ;;  %v4514_v0 = vmov 0   ;;  %v4635_v61 = vld [vmem:[%s6039_s1] ss:$0 sm:$0xff]  ;;  %v4640_v62 = vld [vmem:[%s6039_s1 + $0x1] ss:$0 sm:$0xff] }
   0xc   : > { %4477 = vset.pattern.permute.xlu2 %v4514_v0  ;;  %4476 = vset.pattern.permute.xlu1 %v4514_v0  ;;  %v4645_v63 = vld [vmem:[%s6041_s3 + $0x38] sm:$0xff]  ;;  %vm1218_vm0 = vcmask 259072   ;;  %vm1242_vm1 = vcmask 261120   ;;  %vm1506_vm2 = vcmask 257024   ;;  %vm1804_vm3 = vcmask 1043456  }
   0xd   : > { %4475 = vset.pattern.permute.xlu0 %v4514_v0  ;;  %s6089_s25 = smov (!%p277_p3, %s3952_s25), 1  ;;  %v4650_v0 = vld [vmem:[%s6041_s3 + $0x18] sm:$0xff]  ;;  %1258 = vmatpush.msra.mxu0 %v4645_v63  ;;  %vm1788_vm4 = vcmask 31744   ;;  %vm3862_vm5 = vcmask 258048  }
   0xe   : > { %s4462_s26 = sshll.u32 %s6089_s25, 7  ;;  %1281 = vmatpush.msra.mxu1 %v4650_v0 }
   0xf   : > { %s4569_s29 = scalar_lea.vmem %s6038_s0, %s4462_s26  ;;  %s4465_s26 = smul.u32 40, %s6089_s25 }
  0x10   : > { %v3977_v1 = vld [vmem:[%s4569_s29 + $0x11] sm:$0x3f]  ;;  %v493_v2 = vld [vmem:[%s4569_s29 + $0x2] sm:$0x3f]  ;;  %v393_v22 = vld [vmem:[%s4569_s29 + $0x9] sm:$0x3f] }
  0x11   : > { %v292_v3 = vld [vmem:[%s4569_s29] sm:$0x3f]  ;;  %712 = vperm.xlu2 %4477, %v3977_v1   ;;  %509 = vperm.xlu1 %4476, %v493_v2   ;;  %v3964_v4 = vld [vmem:[%s4569_s29 + $0x10] sm:$0x3f]  ;;  %v293_v24 = vld [vmem:[%s4569_s29 + $0x8] sm:$0x3f]  ;;  %s291_s8 = scalar_lea.vmem %s6045_s7, %s4465_s26 }
  0x12   : > { %307 = vperm.xlu0 %4475, %v292_v3   ;;  %v294_v5 = vld [vmem:[%s4569_s29 + $0x10] sm:$0x3f]  ;;  %v392_v6 = vld [vmem:[%s4569_s29 + $0x1] sm:$0x3f]  ;;  %v494_v25 = vld [vmem:[%s4569_s29 + $0xa] sm:$0x3f] }
  0x13   : > { %v3990_v7 = vld [vmem:[%s4569_s29 + $0x12] sm:$0x3f]  ;;  %v296_v10 = vld [vmem:[%s4569_s29 + $0x20] sm:$0x3f]  ;;  %v3965_v28 = vld [vmem:[%s4569_s29 + $0x18] sm:$0x3f] }
  0x14   : > { %v495_v8 = vld [vmem:[%s4569_s29 + $0x12] sm:$0x3f]  ;;  %v396_v11 = vld [vmem:[%s4569_s29 + $0x21] sm:$0x3f]  ;;  %v295_v32 = vld [vmem:[%s4569_s29 + $0x18] sm:$0x3f] }
  0x15   : > { %v394_v9 = vld [vmem:[%s4569_s29 + $0x11] sm:$0x3f]  ;;  %v4003_v12 = vld [vmem:[%s4569_s29 + $0x20] sm:$0x3f]  ;;  %v3978_v33 = vld [vmem:[%s4569_s29 + $0x19] sm:$0x3f] }
  0x16   : > { %v4016_v13 = vld [vmem:[%s4569_s29 + $0x21] sm:$0x3f]  ;;  %v3968_v17 = vld [vmem:[%s4569_s29 + $0x30] sm:$0x3f]  ;;  %v3991_v34 = vld [vmem:[%s4569_s29 + $0x1a] sm:$0x3f] }
  0x17   : > { %v497_v14 = vld [vmem:[%s4569_s29 + $0x22] sm:$0x3f]  ;;  %v3981_v19 = vld [vmem:[%s4569_s29 + $0x31] sm:$0x3f]  ;;  %v297_v35 = vld [vmem:[%s4569_s29 + $0x28] sm:$0x3f] }
  0x18   : > { %v3966_v15 = vld [vmem:[%s4569_s29 + $0x20] sm:$0x3f]  ;;  %v4005_v20 = vld [vmem:[%s4569_s29 + $0x30] sm:$0x3f]  ;;  %v395_v36 = vld [vmem:[%s4569_s29 + $0x19] sm:$0x3f] }
  0x19   : > { %611 = vperm.xlu1 %4476, %v3964_v4   ;;  %317 = vperm.xlu2 %4477, %v294_v5   ;;  %v4029_v16 = vld [vmem:[%s4569_s29 + $0x22] sm:$0x3f]  ;;  %v3994_v23 = vld [vmem:[%s4569_s29 + $0x32] sm:$0x3f]  ;;  %v496_v38 = vld [vmem:[%s4569_s29 + $0x1a] sm:$0x3f] }
  0x1a   : > { %408 = vperm.xlu0 %4475, %v392_v6   ;;  %v3979_v18 = vld [vmem:[%s4569_s29 + $0x21] sm:$0x3f]  ;;  %v4018_v27 = vld [vmem:[%s4569_s29 + $0x31] sm:$0x3f]  ;;  %v4004_v39 = vld [vmem:[%s4569_s29 + $0x28] sm:$0x3f] }
  0x1b   : > { %v3992_v21 = vld [vmem:[%s4569_s29 + $0x22] sm:$0x3f]  ;;  %v4031_v30 = vld [vmem:[%s4569_s29 + $0x32] sm:$0x3f]  ;;  %v397_v40 = vld [vmem:[%s4569_s29 + $0x29] sm:$0x3f] }
  0x1c   : > { %v4007_v26 = vld [vmem:[%s4569_s29 + $0x40] sm:$0x3f]  ;;  %v3967_v42 = vld [vmem:[%s4569_s29 + $0x28] sm:$0x3f]  ;;  %v3969_v48 = vld [vmem:[%s4569_s29 + $0x38] sm:$0x3f] }
  0x1d   : > { %v4020_v29 = vld [vmem:[%s4569_s29 + $0x41] sm:$0x3f]  ;;  %v4017_v43 = vld [vmem:[%s4569_s29 + $0x29] sm:$0x3f]  ;;  %v3995_v53 = vld [vmem:[%s4569_s29 + $0x3a] sm:$0x3f] }
  0x1e   : > { %v4033_v31 = vld [vmem:[%s4569_s29 + $0x42] sm:$0x3f]  ;;  %v498_v44 = vld [vmem:[%s4569_s29 + $0x2a] sm:$0x3f]  ;;  %v3982_v54 = vld [vmem:[%s4569_s29 + $0x39] sm:$0x3f] }
  0x1f   : > { %v3980_v46 = vld [vmem:[%s4569_s29 + $0x29] sm:$0x3f]  ;;  %v4019_v59 = vld [vmem:[%s4569_s29 + $0x39] sm:$0x3f]  ;;  %v4664_v4 = vld [vmem:[%s6039_s1 + $0x2] ss:$0 sm:$0xff] }
  0x20   : > { %v4030_v47 = vld [vmem:[%s4569_s29 + $0x2a] sm:$0x3f]  ;;  %v4006_v60 = vld [vmem:[%s4569_s29 + $0x38] sm:$0x3f] }
  0x21   : > { %813 = vperm.xlu1 %4476, %v3990_v7   ;;  %519 = vperm.xlu2 %4477, %v495_v8   ;;  %v3993_v52 = vld [vmem:[%s4569_s29 + $0x2a] sm:$0x3f]  ;;  %v4655_v1 = vld [vmem:[%s6041_s3 + $0x58] sm:$0xff]  ;;  %v4673_v7 = vld [vmem:[%s6041_s3 + $0x30] sm:$0xff] }
  0x22   : > { %418 = vperm.xlu0 %4475, %v394_v9   ;;  %v4008_v58 = vld [vmem:[%s4569_s29 + $0x48] sm:$0x3f]  ;;  %1310 = vmatpush.msra.mxu2 %v4655_v1  ;;  %v4678_v8 = vld [vmem:[%s6041_s3 + $0x10] sm:$0xff] }
  0x23   : > { %v4683_v9 = vld [vmem:[%s6041_s3 + $0x50] sm:$0xff]  ;;  %1259 = vmatpush.msra.mxu0 %v4673_v7  ;;  %1282 = vmatpush.msra.mxu1 %v4678_v8 }
  0x24   : > { %1311 = vmatpush.msra.mxu2 %v4683_v9 }
  0x29   : > { %327 = vperm.xlu1 %4476, %v296_v10   ;;  %428 = vperm.xlu2 %4477, %v396_v11   ;;  %v4032_v11 = vld [vmem:[%s4569_s29 + $0x3a] sm:$0x3f] }
  0x2a   : > { %915 = vperm.xlu0 %4475, %v4003_v12   ;;  %v4034_v12 = vld [vmem:[%s4569_s29 + $0x4a] sm:$0x3f] }
  0x31   : > { %1016 = vperm.xlu1 %4476, %v4016_v13   ;;  %529 = vperm.xlu2 %4477, %v497_v14   ;;  %v4021_v13 = vld [vmem:[%s4569_s29 + $0x49] sm:$0x3f] }
  0x32   : > { %621 = vperm.xlu0 %4475, %v3966_v15   ;;  %v4695_v14 = vld [vmem:[%s6041_s3 + $0x28] sm:$0xff] }
  0x33   : > { %v4700_v15 = vld [vmem:[%s6041_s3 + $0x8] sm:$0xff]  ;;  %1260 = vmatpush.msra.mxu0 %v4695_v14 }
  0x34   : > { %1283 = vmatpush.msra.mxu1 %v4700_v15 }
  0x39   : > { %1117 = vperm.xlu1 %4476, %v4029_v16   ;;  %631 = vperm.xlu2 %4477, %v3968_v17   ;;  %v4705_v16 = vld [vmem:[%s6041_s3 + $0x48] sm:$0xff] }
  0x3a   : > { %722 = vperm.xlu0 %4475, %v3979_v18   ;;  %6061 = vst [vmem:[#allocation3_spill] sm:$0xff] %v4705_v16  ;;  %v4712_v18 = vld [vmem:[%s6041_s3 + $0x20] sm:$0xff]  ;;  %1312 = vmatpush.msra.mxu2 %v4705_v16 }
  0x3b   : > { %1261 = vmatpush.msra.mxu0 %v4712_v18 }
  0x41   : > { %732 = vperm.xlu1 %4476, %v3981_v19   ;;  %925 = vperm.xlu2 %4477, %v4005_v20   ;;  %v4717_v19 = vld [vmem:[%s6041_s3] sm:$0xff] }
  0x42   : > { %823 = vperm.xlu0 %4475, %v3992_v21   ;;  %v4722_v20 = vld [vmem:[%s6041_s3 + $0x40] sm:$0xff]  ;;  %1284 = vmatpush.msra.mxu1 %v4717_v19 }
  0x43   : > { %6062 = vst [vmem:[#allocation4_spill] sm:$0xff] %v4722_v20  ;;  %1313 = vmatpush.msra.mxu2 %v4722_v20 }
  0x49   : > { %413 = vperm.xlu1 %4476, %v393_v22   ;;  %833 = vperm.xlu2 %4477, %v3994_v23   ;;  %v4728_v22 = vld [vmem:[%s6039_s1 + $0x3] ss:$0 sm:$0xff] }
  0x4a   : > { %312 = vperm.xlu0 %4475, %v293_v24  }
  0x51   : > { %514 = vperm.xlu1 %4476, %v494_v25   ;;  %935 = vperm.xlu2 %4477, %v4007_v26  }
  0x52   : > { %1026 = vperm.xlu0 %4475, %v4018_v27   ;;  %v4741_v27 = vld [vmem:[%s6039_s1 + $0x4] ss:$0 sm:$0xff] }
  0x59   : > { %616 = vperm.xlu1 %4476, %v3965_v28   ;;  %1036 = vperm.xlu2 %4477, %v4020_v29   ;;  %v398_v29 = vld [vmem:[%s4569_s29 + $0x31] sm:$0x3f] }
  0x5a   : > { %1127 = vperm.xlu0 %4475, %v4031_v30   ;;  %v499_v30 = vld [vmem:[%s4569_s29 + $0x32] sm:$0x3f] }
  0x61   : > { %1137 = vperm.xlu1 %4476, %v4033_v31   ;;  %322 = vperm.xlu2 %4477, %v295_v32   ;;  %v298_v31 = vld [vmem:[%s4569_s29 + $0x30] sm:$0x3f]  ;;  %v4750_v32 = vld [vmem:[%s6039_s1 + $0x5] ss:$0 sm:$0xff] }
  0x62   : > { %717 = vperm.xlu0 %4475, %v3978_v33  }
  0x69   : > { %818 = vperm.xlu1 %4476, %v3991_v34   ;;  %332 = vperm.xlu2 %4477, %v297_v35   ;;  %v4757_v35 = vld [vmem:[%s6039_s1 + $0x6] ss:$0 sm:$0xff] }
  0x6a   : > { %423 = vperm.xlu0 %4475, %v395_v36  }
  0x6b   : > { %v4607_v37 = vpop.permute.xlu2 %712 }
  0x6c   : > { %v773_v34 = vmul.f32 %v4741_v27, %v4607_v37 }
  0x71   : > { %524 = vperm.xlu1 %4476, %v496_v38   ;;  %920 = vperm.xlu2 %4477, %v4004_v39  }
  0x72   : > { %433 = vperm.xlu0 %4475, %v397_v40  }
  0x73   : > { %v4612_v41 = vpop.permute.xlu2 %317 }
  0x79   : > { %626 = vperm.xlu1 %4476, %v3967_v42   ;;  %1021 = vperm.xlu2 %4477, %v4017_v43   ;;  %v4765_v42 = vld [vmem:[%s6039_s1 + $0x7] ss:$0 sm:$0xff] }
  0x7a   : > { %534 = vperm.xlu0 %4475, %v498_v44   ;;  %v3983_v44 = vld [vmem:[%s4569_s29 + $0x41] sm:$0x3f] }
  0x7b   : > { %v4617_v45 = vpop.permute.xlu2 %519 }
  0x81   : > { %727 = vperm.xlu1 %4476, %v3980_v46   ;;  %1122 = vperm.xlu2 %4477, %v4030_v47   ;;  %v3996_v46 = vld [vmem:[%s4569_s29 + $0x42] sm:$0x3f] }
  0x82   : > { %636 = vperm.xlu0 %4475, %v3969_v48   ;;  %v3970_v47 = vld [vmem:[%s4569_s29 + $0x40] sm:$0x3f] }
  0x83   : > { %v510_v49 = vpop.permute.xlu1 %509  ;;  %v4622_v50 = vpop.permute.xlu2 %428 }
  0x84   : > { %v308_v51 = vpop.permute.xlu0 %307  ;;  %v570_v21 = vmul.f32 %v4664_v4, %v510_v49 }
  0x85   : > { %v368_v10 = vmul.f32 %v4635_v61, %v308_v51  ;;  %v4777_v51 = vld [vmem:[%s6039_s1 + $0x8] ss:$0 sm:$0xff] }
  0x89   : > { %828 = vperm.xlu1 %4476, %v3993_v52   ;;  %838 = vperm.xlu2 %4477, %v3995_v53  }
  0x8a   : > { %737 = vperm.xlu0 %4475, %v3982_v54  }
  0x8b   : > { %v612_v55 = vpop.permute.xlu1 %611  ;;  %v4627_v56 = vpop.permute.xlu2 %529 }
  0x8c   : > { %v409_v57 = vpop.permute.xlu0 %408  ;;  %v672_v28 = vmul.f32 %v4728_v22, %v612_v55 }
  0x8d   : > { %v469_v5 = vmul.f32 %v4640_v62, %v409_v57  ;;  %v4784_v57 = vld [vmem:[%s6040_s2] ss:$0 sm:$0xff] }
  0x8f   : > { %v481_v17 = vadd.f32 %v469_v5, %v368_v10  ;;  %v4035_v5 = vld [vmem:[%s4569_s29 + $0x52] sm:$0x3f] }
  0x90   : > { %v4009_v10 = vld [vmem:[%s4569_s29 + $0x50] sm:$0x3f] }
  0x91   : > { %940 = vperm.xlu1 %4476, %v4008_v58   ;;  %1031 = vperm.xlu2 %4477, %v4019_v59   ;;  %v582_v25 = vadd.f32 %v570_v21, %v481_v17  ;;  %v4801_v17 = vld [vmem:[%s6041_s3 + $0x78] sm:$0xff] }
  0x92   : > { %930 = vperm.xlu0 %4475, %v4006_v60   ;;  %v4806_v21 = vld [vmem:[%s6041_s3 + $0x98] sm:$0xff]  ;;  %1341 = vmatpush.msrb.mxu1 %v4801_v17 }
  0x93   : > { %v814_v2 = vpop.permute.xlu1 %813  ;;  %v4657_v3 = vpop.permute.xlu2 %631  ;;  %v684_v33 = vadd.f32 %v672_v28, %v582_v25  ;;  %1371 = vmatpush.msrb.mxu0 %v4806_v21  ;;  %v4820_v28 = vld [vmem:[%s6041_s3 + $0x90] sm:$0xff] }
  0x94   : > { %v4667_v6 = vpop.permute.xlu0 %418  ;;  %v874_v40 = vmul.f32 %v4750_v32, %v814_v2  ;;  %v4022_v2 = vld [vmem:[%s4569_s29 + $0x51] sm:$0x3f] }
  0x95   : > { %v785_v39 = vadd.f32 %v773_v34, %v684_v33  ;;  %1372 = vmatpush.msrb.mxu0 %v4820_v28  ;;  %v4830_v33 = vld [vmem:[%s6041_s3 + $0x68] sm:$0xff] }
  0x96   : > { %v4835_v34 = vld [vmem:[%s6041_s3 + $0x88] sm:$0xff] }
  0x97   : > { %v886_v48 = vadd.f32 %v874_v40, %v785_v39  ;;  %1373 = vmatpush.msrb.mxu0 %v4835_v34 }
  0x99   : > { %1132 = vperm.xlu1 %4476, %v4032_v11   ;;  %1142 = vperm.xlu2 %4477, %v4034_v12  }
  0x9a   : > { %1041 = vperm.xlu0 %4475, %v4021_v13  }
  0x9b   : > { %v4731_v23 = vpop.permute.xlu1 %327  ;;  %v4733_v24 = vpop.permute.xlu2 %925 }
  0x9c   : > { %v916_v26 = vpop.permute.xlu0 %915 }
  0x9d   : > { %v976_v37 = vmul.f32 %v4757_v35, %v916_v26  ;;  %v4815_v26 = vld [vmem:[%s6041_s3 + $0x70] sm:$0xff] }
  0x9e   : > { %1342 = vmatpush.msrb.mxu1 %v4815_v26 }
  0x9f   : > { %v988_v52 = vadd.f32 %v976_v37, %v886_v48 }
  0xa0   : > { %1343 = vmatpush.msrb.mxu1 %v4830_v33 }
  0xa1   : > { %438 = vperm.xlu1 %4476, %v398_v29   ;;  %539 = vperm.xlu2 %4477, %v499_v30   ;;  %v399_v29 = vld [vmem:[%s4569_s29 + $0x39] sm:$0x3f] }
  0xa2   : > { %337 = vperm.xlu0 %4475, %v298_v31   ;;  %v500_v30 = vld [vmem:[%s4569_s29 + $0x3a] sm:$0x3f] }
  0xa3   : > { %v1017_v36 = vpop.permute.xlu1 %1016  ;;  %v4759_v38 = vpop.permute.xlu2 %833  ;;  %v299_v31 = vld [vmem:[%s4569_s29 + $0x38] sm:$0x3f] }
  0xa4   : > { %v4767_v43 = vpop.permute.xlu0 %621  ;;  %v1077_v49 = vmul.f32 %v4765_v42, %v1017_v36  ;;  %v471_v36 = vmul.f32 %v4640_v62, %v4667_v6  ;;  %v4852_v6 = vld [vmem:[%s6041_s3 + $0x80] sm:$0xff] }
  0xa5   : > { %1374 = vmatpush.msrb.mxu0 %v4852_v6 }
  0xa6   : > { %v1089_v55 = vadd.f32 %v1077_v49, %v988_v52  ;;  %v4865_v49 = vld [vmem:[%s6041_s3 + $0xd8] sm:$0xff]  ;;  %v473_v52 = vmul.f32 %v4640_v62, %v4622_v50 }
  0xa7   : > { %v4886_v50 = vld [vmem:[%s6041_s3 + $0x118] sm:$0xff]  ;;  %1432 = vmatpush.msrb.mxu2 %v4865_v49 }
  0xa8   : > { %6064 = vst [vmem:[#allocation6_spill] sm:$0xff] %v4886_v50 }
  0xa9   : > { %742 = vperm.xlu1 %4476, %v3983_v44   ;;  %843 = vperm.xlu2 %4477, %v3996_v46   ;;  %v372_v44 = vmul.f32 %v4635_v61, %v4731_v23  ;;  %v4847_v46 = vld [vmem:[%s6041_s3 + $0x60] sm:$0xff] }
  0xaa   : > { %641 = vperm.xlu0 %4475, %v3970_v47   ;;  %v370_v47 = vmul.f32 %v4635_v61, %v4612_v41  ;;  %1344 = vmatpush.msrb.mxu1 %v4847_v46  ;;  %v4876_v41 = vld [vmem:[%s6041_s3 + $0xf8] sm:$0xff] }
  0xab   : > { %v1118_v53 = vpop.permute.xlu1 %1117  ;;  %v4779_v54 = vpop.permute.xlu2 %935  ;;  %1462 = vmatpush.msra.mxu3 %v4876_v41 }
  0xac   : > { %v1178_v58 = vmul.f32 %v4777_v51, %v1118_v53  ;;  %v4787_v59 = vpop.permute.xlu0 %722 }
  0xae   : > { %v1190_v60 = vadd.f32 %v1178_v58, %v1089_v55  ;;  %v4881_v55 = vld [vmem:[%s6041_s3 + $0xb8] sm:$0xff]  ;;  %v483_v58 = vadd.f32 %v471_v36, %v370_v47  ;;  %v674_v36 = vmul.f32 %v4728_v22, %v4767_v43  ;;  %v4938_v43 = vld [vmem:[%s6041_s3 + $0xe8] sm:$0xff]  ;;  %v775_v47 = vmul.f32 %v4741_v27, %v4787_v59  ;;  %v4956_v59 = vld [vmem:[%s6041_s3 + $0xe0] sm:$0xff] }
  0xaf   : > { %6067 = vst [vmem:[#allocation9_spill] sm:$0xff] %v4938_v43 }
  0xb0   : > { %v1206_v11 = vadd.f32 %v4784_v57, %v1190_v60  ;;  %v4893_v60 = vld [vmem:[%s6041_s3 + $0xb0] sm:$0xff]  ;;  %6070 = vst [vmem:[#allocation12_spill] sm:$0xff] %v4956_v59 }
  0xb1   : > { %1046 = vperm.xlu1 %4476, %v4022_v2   ;;  %1147 = vperm.xlu2 %4477, %v4035_v5   ;;  %v4898_v2 = vld [vmem:[%s6041_s3 + $0xd0] sm:$0xff] }
  0xb2   : > { %1219 = vst.msk [vmem:[#allocation2] sm:$0x3f] %vm1218_vm0, %v1206_v11  ;;  %945 = vperm.xlu0 %4475, %v4009_v10   ;;  %v4903_v5 = vld [vmem:[%s6041_s3 + $0xf0] sm:$0xff]  ;;  %v485_v10 = vadd.f32 %v473_v52, %v372_v44  ;;  %v3984_v11 = vld [vmem:[%s4569_s29 + $0x49] sm:$0x3f]  ;;  %1433 = vmatpush.msrb.mxu2 %v4898_v2 }
  0xb3   : > { %v4794_v12 = vpop.permute.xlu1 %732  ;;  %v4796_v13 = vpop.permute.xlu2 %1036  ;;  %1463 = vmatpush.msra.mxu3 %v4903_v5 }
  0xb4   : > { %v4808_v25 = vpop.permute.xlu0 %823 }
  0xb5   : > { %1464 = vmatpush.msra.mxu3 %v4938_v43  ;;  %v4010_v43 = vld [vmem:[%s4569_s29 + $0x58] sm:$0x3f] }
  0xb7   : > { %1465 = vmatpush.msra.mxu3 %v4956_v59 }
  0xb9   : > { %443 = vperm.xlu1 %4476, %v399_v29   ;;  %544 = vperm.xlu2 %4477, %v500_v30   ;;  %v1236_v39 = vld [vmem:[#allocation2 + $0x1] sm:$0xf]  ;;  %v3997_v29 = vld [vmem:[%s4569_s29 + $0x4a] sm:$0x3f]  ;;  %v4912_v30 = vld [vmem:[%s6041_s3 + $0x110] sm:$0xff] }
  0xba   : > { %v1231_v40 = vld [vmem:[#allocation2] sm:$0xf]  ;;  %342 = vperm.xlu0 %4475, %v299_v31   ;;  %4046 = vmatmul.msk.f32.vlgmr.msra.gmra.mxu0 %vm1242_vm1, %v1236_v39  ;;  %6065 = vst [vmem:[#allocation7_spill] sm:$0xff] %v4912_v30  ;;  %v572_v31 = vmul.f32 %v4664_v4, %v4617_v45  ;;  %v3971_v39 = vld [vmem:[%s4569_s29 + $0x48] sm:$0x3f] }
  0xbb   : > { %v1289_v37 = vld [vmem:[#allocation2 + $0x2] sm:$0xf]  ;;  %4047 = vmatmul.msk.f32.vlgmr.msra.gmra.mxu1 %vm1242_vm1, %v1231_v40  ;;  %v4858_v23 = vpop.permute.xlu1 %413  ;;  %v4860_v48 = vpop.permute.xlu2 %322  ;;  %1492 = vmatpush.msra.mxu0 %v4886_v50  ;;  %v4924_v40 = vld [vmem:[%s6041_s3 + $0xa8] sm:$0xff]  ;;  %v4036_v50 = vld [vmem:[%s4569_s29 + $0x5a] sm:$0x3f] }
  0xbc   : > { %4052 = vmatmul.msk.f32.vlgmr.msra.gmra.mxu2 %vm1242_vm1, %v1289_v37  ;;  %6063 = vst [vmem:[#allocation5_spill] sm:$0xff] %v4860_v48  ;;  %v4869_v53 = vpop.permute.xlu0 %312  ;;  %1401 = vmatpush.msra.mxu1 %v4881_v55  ;;  %v574_v37 = vmul.f32 %v4664_v4, %v4627_v56  ;;  %v4933_v45 = vld [vmem:[%s6041_s3 + $0xc8] sm:$0xff]  ;;  %v584_v44 = vadd.f32 %v572_v31, %v483_v58  ;;  %v4951_v48 = vld [vmem:[%s6041_s3 + $0xc0] sm:$0xff] }
  0xbd   : > { %1493 = vmatpush.msra.mxu0 %v4912_v30  ;;  %6066 = vst [vmem:[#allocation8_spill] sm:$0xff] %v4933_v45  ;;  %v4945_v56 = vld [vmem:[%s6041_s3 + $0x108] sm:$0xff]  ;;  %v4961_v58 = vld [vmem:[%s6041_s3 + $0xa0] sm:$0xff]  ;;  %1434 = vmatpush.msrb.mxu2 %v4933_v45  ;;  %v4023_v30 = vld [vmem:[%s4569_s29 + $0x59] sm:$0x3f] }
  0xbe   : > { %1402 = vmatpush.msra.mxu1 %v4893_v60  ;;  %6068 = vst [vmem:[#allocation10_spill] sm:$0xff] %v4945_v56  ;;  %v586_v52 = vadd.f32 %v574_v37, %v485_v10  ;;  %v876_v10 = vmul.f32 %v4750_v32, %v4808_v25  ;;  %v777_v25 = vmul.f32 %v4741_v27, %v4794_v12 }
  0xbf   : > { %6069 = vst [vmem:[#allocation11_spill] sm:$0xff] %v4951_v48  ;;  %1494 = vmatpush.msra.mxu0 %v4945_v56  ;;  %1435 = vmatpush.msrb.mxu2 %v4951_v48 }
  0xc0   : > { %1403 = vmatpush.msra.mxu1 %v4924_v40  ;;  %1590 = vmatpush.msrb.mxu3 %v4655_v1 }
  0xc1   : > { %747 = vperm.xlu1 %4476, %v3984_v11   ;;  %848 = vperm.xlu2 %4477, %v3997_v29   ;;  %v686_v11 = vadd.f32 %v674_v36, %v584_v44  ;;  %v676_v36 = vmul.f32 %v4728_v22, %v4657_v3 }
  0xc2   : > { %646 = vperm.xlu0 %4475, %v3971_v39   ;;  %v4972_v39 = vld [vmem:[%s6041_s3 + $0x100] sm:$0xff]  ;;  %1404 = vmatpush.msra.mxu1 %v4961_v58 }
  0xc3   : > { %v515_v29 = vpop.permute.xlu1 %514  ;;  %v4965_v31 = vpop.permute.xlu2 %332  ;;  %6072 = vst [vmem:[#allocation14_spill] sm:$0xff] %v4972_v39  ;;  %v787_v44 = vadd.f32 %v775_v47, %v686_v11  ;;  %1495 = vmatpush.msra.mxu0 %v4972_v39  ;;  %1562 = vmatpush.msra.mxu2 %v4650_v0  ;;  %v978_v47 = vmul.f32 %v4757_v35, %v4733_v24 }
  0xc4   : > { %6071 = vst [vmem:[#allocation13_spill] sm:$0xff] %v4965_v31  ;;  %v1027_v37 = vpop.permute.xlu0 %1026  ;;  %v688_v31 = vadd.f32 %v676_v36, %v586_v52  ;;  %1591 = vmatpush.msrb.mxu3 %v4683_v9  ;;  %v878_v52 = vmul.f32 %v4750_v32, %v4759_v38  ;;  %v980_v38 = vmul.f32 %v4757_v35, %v4779_v54 }
  0xc5   : > { %v888_v3 = vadd.f32 %v876_v10, %v787_v44  ;;  %v1079_v11 = vmul.f32 %v4765_v42, %v1027_v37  ;;  %1563 = vmatpush.msra.mxu2 %v4678_v8  ;;  %v501_v37 = vld [vmem:[%s4569_s29 + $0x42] sm:$0x3f]  ;;  %v470_v54 = vmul.f32 %v4640_v62, %v4858_v23  ;;  %v3998_v23 = vld [vmem:[%s4569_s29 + $0x52] sm:$0x3f] }
  0xc6   : > { %v789_v12 = vadd.f32 %v777_v25, %v688_v31  ;;  %1592 = vmatpush.msrb.mxu3 %v4705_v16 }
  0xc7   : > { %v990_v10 = vadd.f32 %v978_v47, %v888_v3  ;;  %1564 = vmatpush.msra.mxu2 %v4700_v15  ;;  %v300_v3 = vld [vmem:[%s4569_s29 + $0x40] sm:$0x3f] }
  0xc8   : > { %v890_v25 = vadd.f32 %v878_v52, %v789_v12  ;;  %1593 = vmatpush.msrb.mxu3 %v4722_v20  ;;  %v369_v52 = vmul.f32 %v4635_v61, %v4869_v53  ;;  %v3972_v20 = vld [vmem:[%s4569_s29 + $0x50] sm:$0x3f] }
  0xc9   : > { %1051 = vperm.xlu1 %4476, %v4023_v30   ;;  %1152 = vperm.xlu2 %4477, %v4036_v50   ;;  %v1091_v30 = vadd.f32 %v1079_v11, %v990_v10  ;;  %v1081_v11 = vmul.f32 %v4765_v42, %v4796_v13 }
  0xca   : > { %950 = vperm.xlu0 %4475, %v4010_v43   ;;  %v400_v43 = vld [vmem:[%s4569_s29 + $0x41] sm:$0x3f]  ;;  %1565 = vmatpush.msra.mxu2 %v4717_v19  ;;  %v992_v47 = vadd.f32 %v980_v38, %v890_v25 }
  0xcb   : > { %v617_v31 = vpop.permute.xlu1 %616  ;;  %v921_v36 = vpop.permute.xlu2 %920 }
  0xcc   : > { %v1128_v24 = vpop.permute.xlu0 %1127  ;;  %v673_v13 = vmul.f32 %v4728_v22, %v617_v31 }
  0xcd   : > { %v1180_v50 = vmul.f32 %v4777_v51, %v1128_v24  ;;  %v1093_v24 = vadd.f32 %v1081_v11, %v992_v47 }
  0xcf   : > { %v1192_v44 = vadd.f32 %v1180_v50, %v1091_v30  ;;  %v571_v30 = vmul.f32 %v4664_v4, %v515_v29 }
  0xd1   : > { %v1208_v12 = vadd.f32 %v4784_v57, %v1192_v44  ;;  %448 = vperm.xlu1 %4476, %v400_v43   ;;  %549 = vperm.xlu2 %4477, %v501_v37   ;;  %v482_v43 = vadd.f32 %v470_v54, %v369_v52  ;;  %v3985_v44 = vld [vmem:[%s4569_s29 + $0x51] sm:$0x3f] }
  0xd2   : > { %347 = vperm.xlu0 %4475, %v300_v3  }
  0xd3   : > { %1221 = vst.msk [vmem:[#allocation2 + $0x10] sm:$0x3f] %vm1218_vm0, %v1208_v12  ;;  %v1138_v10 = vpop.permute.xlu1 %1137  ;;  %v1022_v25 = vpop.permute.xlu2 %1021  ;;  %v583_v16 = vadd.f32 %v571_v30, %v482_v43  ;;  %v4037_v30 = vld [vmem:[%s4569_s29 + $0x62] sm:$0x3f] }
  0xd4   : > { %v1182_v50 = vmul.f32 %v4777_v51, %v1138_v10  ;;  %v718_v38 = vpop.permute.xlu0 %717 }
  0xd5   : > { %v774_v3 = vmul.f32 %v4741_v27, %v718_v38  ;;  %v685_v47 = vadd.f32 %v673_v13, %v583_v16  ;;  %v977_v16 = vmul.f32 %v4757_v35, %v921_v36  ;;  %v1078_v38 = vmul.f32 %v4765_v42, %v1022_v25 }
  0xd6   : > { %v1194_v37 = vadd.f32 %v1182_v50, %v1093_v24  ;;  %v4024_v24 = vld [vmem:[%s4569_s29 + $0x61] sm:$0x3f] }
  0xd7   : > { %v786_v54 = vadd.f32 %v774_v3, %v685_v47  ;;  %v4011_v50 = vld [vmem:[%s4569_s29 + $0x60] sm:$0x3f] }
  0xd8   : > { %v1210_v53 = vadd.f32 %v4784_v57, %v1194_v37 }
  0xd9   : > { %752 = vperm.xlu1 %4476, %v3985_v44   ;;  %853 = vperm.xlu2 %4477, %v3998_v23  }
  0xda   : > { %1223 = vst.msk [vmem:[#allocation2 + $0x20] sm:$0x3f] %vm1218_vm0, %v1210_v53  ;;  %651 = vperm.xlu0 %4475, %v3972_v20   ;;  %v1320_v29 = vld [vmem:[#allocation2 + $0x10] sm:$0xf] }
  0xdb   : > { %v1350_v12 = vld [vmem:[#allocation2 + $0x11] sm:$0xf]  ;;  %4057 = vmatmul.msk.f32.vlgmr.msrb.gmra.mxu1 %vm1242_vm1, %v1320_v29  ;;  %v819_v31 = vpop.permute.xlu1 %818  ;;  %v1123_v11 = vpop.permute.xlu2 %1122 }
  0xdc   : > { %4062 = vmatmul.msk.f32.vlgmr.msrb.gmra.mxu0 %vm1242_vm1, %v1350_v12  ;;  %v875_v52 = vmul.f32 %v4750_v32, %v819_v31  ;;  %v5025_v10 = vpop.permute.xlu0 %423  ;;  %1539 = vmatpush.msrb.mxu1 %v4645_v63  ;;  %v1179_v23 = vmul.f32 %v4777_v51, %v1123_v11  ;;  %v1380_v53 = vld [vmem:[#allocation2 + $0x12] sm:$0xf]  ;;  %v401_v31 = vld [vmem:[%s4569_s29 + $0x49] sm:$0x3f] }
  0xdd   : > { %1620 = vmatpush.msrb.mxu0 %v4801_v17  ;;  %v502_v11 = vld [vmem:[%s4569_s29 + $0x4a] sm:$0x3f] }
  0xde   : > { %v887_v20 = vadd.f32 %v875_v52, %v786_v54  ;;  %1540 = vmatpush.msrb.mxu1 %v4673_v7  ;;  %v301_v54 = vld [vmem:[%s4569_s29 + $0x48] sm:$0x3f] }
  0xdf   : > { %1621 = vmatpush.msrb.mxu0 %v4815_v26 }
  0xe0   : > { %v989_v43 = vadd.f32 %v977_v16, %v887_v20  ;;  %1541 = vmatpush.msrb.mxu1 %v4695_v14 }
  0xe1   : > { %1622 = vmatpush.msrb.mxu0 %v4830_v33  ;;  %1056 = vperm.xlu1 %4476, %v4024_v24   ;;  %v1411_v13 = vld [vmem:[#allocation2 + $0x20] sm:$0xf]  ;;  %v3986_v24 = vld [vmem:[%s4569_s29 + $0x59] sm:$0x3f] }
  0xe2   : > { %1157 = vperm.xlu2 %4477, %v4037_v30   ;;  %v1441_v37 = vld [vmem:[#allocation2 + $0x21] sm:$0xf]  ;;  %v1090_v44 = vadd.f32 %v1078_v38, %v989_v43  ;;  %955 = vperm.xlu0 %4475, %v4011_v50   ;;  %v3999_v30 = vld [vmem:[%s4569_s29 + $0x5a] sm:$0x3f]  ;;  %v6073_v38 = vld [vmem:[#allocation9_spill] sm:$0xff] }
  0xe3   : > { %v1471_v36 = vld [vmem:[#allocation2 + $0x22] sm:$0xf]  ;;  %4072 = vmatmul.msk.f32.vlgmr.msrb.gmra.mxu2 %vm1242_vm1, %v1411_v13  ;;  %4067 = vmatmul.msk.f32.vlgmr.msra.gmra.mxu1 %vm1242_vm1, %v1380_v53  ;;  %v5042_v25 = vpop.permute.xlu1 %524  ;;  %v5044_v3 = vpop.permute.xlu2 %838  ;;  %v3973_v50 = vld [vmem:[%s4569_s29 + $0x58] sm:$0x3f] }
  0xe4   : > { %4077 = vmatmul.msk.f32.vlgmr.msra.gmra.mxu3 %vm1242_vm1, %v1441_v37  ;;  %v1191_v47 = vadd.f32 %v1179_v23, %v1090_v44  ;;  %4082 = vmatmul.msk.f32.vlgmr.msra.gmra.mxu0 %vm1242_vm1, %v1471_v36  ;;  %v434_v29 = vpop.permute.xlu0 %433  ;;  %v6074_v23 = vld [vmem:[#allocation6_spill] sm:$0xff] }
  0xe5   : > { %1542 = vmatpush.msrb.mxu1 %v4712_v18  ;;  %1678 = vmatpush.msrb.mxu2 %v4881_v55 }
  0xe6   : > { %v1207_v12 = vadd.f32 %v4784_v57, %v1191_v47  ;;  %1708 = vmatpush.msra.mxu3 %v4865_v49  ;;  %1623 = vmatpush.msrb.mxu0 %v4847_v46  ;;  %v6075_v47 = vld [vmem:[#allocation7_spill] sm:$0xff] }
  0xe7   : > { %1649 = vmatpush.msra.mxu1 %v4806_v21  ;;  %1679 = vmatpush.msrb.mxu2 %v4893_v60 }
  0xe8   : > { %1220 = vst.msk [vmem:[#allocation2 + $0x8] sm:$0x3f] %vm1218_vm0, %v1207_v12  ;;  %1709 = vmatpush.msra.mxu3 %v4898_v2  ;;  %1737 = vmatpush.msra.mxu0 %v4876_v41  ;;  %v4025_v12 = vld [vmem:[%s4569_s29 + $0x69] sm:$0x3f] }
  0xe9   : > { %1650 = vmatpush.msra.mxu1 %v4820_v28  ;;  %453 = vperm.xlu1 %4476, %v401_v31   ;;  %v4038_v31 = vld [vmem:[%s4569_s29 + $0x6a] sm:$0x3f] }
  0xea   : > { %554 = vperm.xlu2 %4477, %v502_v11   ;;  %352 = vperm.xlu0 %4475, %v301_v54   ;;  %v4012_v11 = vld [vmem:[%s4569_s29 + $0x68] sm:$0x3f]  ;;  %v472_v54 = vmul.f32 %v4640_v62, %v5025_v10 }
  0xeb   : > { %1651 = vmatpush.msra.mxu1 %v4835_v34  ;;  %v627_v52 = vpop.permute.xlu1 %626  ;;  %v5062_v16 = vpop.permute.xlu2 %1031  ;;  %1680 = vmatpush.msrb.mxu2 %v4924_v40 }
  0xec   : > { %1710 = vmatpush.msra.mxu3 %v4933_v45  ;;  %v535_v20 = vpop.permute.xlu0 %534  ;;  %1738 = vmatpush.msra.mxu0 %v4903_v5 }
  0xed   : > { %1652 = vmatpush.msra.mxu1 %v4852_v6  ;;  %1681 = vmatpush.msrb.mxu2 %v4961_v58 }
  0xee   : > { %1711 = vmatpush.msra.mxu3 %v4951_v48  ;;  %1739 = vmatpush.msra.mxu0 %v6073_v38 }
  0xef   : > { %v1519_v43 = vld [vmem:[#allocation2 + $0x9] sm:$0xf] }
  0xf0   : > { %v1514_v13 = vld [vmem:[#allocation2 + $0x8] sm:$0xf]  ;;  %4087 = vmatmul.msk.f32.vlgmr.msrb.gmra.mxu1 %vm1242_vm1, %v1519_v43  ;;  %1740 = vmatpush.msra.mxu0 %v4956_v59  ;;  %v6077_v59 = vld [vmem:[#allocation13_spill] sm:$0xff] }
  0xf1   : > { %v1570_v37 = vld [vmem:[#allocation2 + $0xa] sm:$0xf]  ;;  %4088 = vmatmul.msk.f32.vlgmr.msra.gmra.mxu2 %vm1242_vm1, %v1514_v13  ;;  %757 = vperm.xlu1 %4476, %v3986_v24   ;;  %v573_v13 = vmul.f32 %v4664_v4, %v5042_v25  ;;  %v373_v10 = vmul.f32 %v4635_v61, %v6077_v59 }
  0xf2   : > { %4093 = vmatmul.msk.f32.vlgmr.msrb.gmra.mxu3 %vm1242_vm1, %v1570_v37  ;;  %858 = vperm.xlu2 %4477, %v3999_v30  }
  0xf3   : > { %656 = vperm.xlu0 %4475, %v3973_v50   ;;  %v728_v36 = vpop.permute.xlu1 %727  ;;  %v5077_v44 = vpop.permute.xlu2 %1142  ;;  %1766 = vmatpush.msrb.mxu1 %v6074_v23  ;;  %v6076_v50 = vld [vmem:[#allocation5_spill] sm:$0xff] }
  0xf4   : > { %v637_v53 = vpop.permute.xlu0 %636  ;;  %v371_v43 = vmul.f32 %v4635_v61, %v6076_v50  ;;  %v302_v23 = vld [vmem:[%s4569_s29 + $0x50] sm:$0x3f]  ;;  %v776_v50 = vmul.f32 %v4741_v27, %v728_v36 }
  0xf5   : > { %1767 = vmatpush.msrb.mxu1 %v6075_v47  ;;  %v402_v47 = vld [vmem:[%s4569_s29 + $0x51] sm:$0x3f]  ;;  %v677_v25 = vmul.f32 %v4728_v22, %v637_v53 }
  0xf7   : > { %1768 = vmatpush.msrb.mxu1 %v4945_v56  ;;  %v484_v56 = vadd.f32 %v472_v54, %v371_v43 }
  0xf9   : > { %1061 = vperm.xlu1 %4476, %v4025_v12   ;;  %1769 = vmatpush.msrb.mxu1 %v4972_v39  ;;  %v474_v12 = vmul.f32 %v4640_v62, %v434_v29  ;;  %v675_v39 = vmul.f32 %v4728_v22, %v627_v52  ;;  %v585_v48 = vadd.f32 %v573_v13, %v484_v56 }
  0xfa   : > { %1162 = vperm.xlu2 %4477, %v4038_v31   ;;  %v575_v31 = vmul.f32 %v4664_v4, %v535_v20 }
  0xfb   : > { %960 = vperm.xlu0 %4475, %v4012_v11   ;;  %v829_v24 = vpop.permute.xlu1 %828  ;;  %v5089_v30 = vpop.permute.xlu2 %539  ;;  %v503_v11 = vld [vmem:[%s4569_s29 + $0x52] sm:$0x3f]  ;;  %v486_v38 = vadd.f32 %v474_v12, %v373_v10  ;;  %v687_v29 = vadd.f32 %v675_v39, %v585_v48  ;;  %v4000_v48 = vld [vmem:[%s4569_s29 + $0x62] sm:$0x3f] }
  0xfc   : > { %v738_v37 = vpop.permute.xlu0 %737  ;;  %v877_v52 = vmul.f32 %v4750_v32, %v829_v24  ;;  %v3974_v39 = vld [vmem:[%s4569_s29 + $0x60] sm:$0x3f]  ;;  %v1080_v24 = vmul.f32 %v4765_v42, %v5062_v16 }
  0xfd   : > { %v587_v59 = vadd.f32 %v575_v31, %v486_v38  ;;  %v778_v20 = vmul.f32 %v4741_v27, %v738_v37  ;;  %v788_v56 = vadd.f32 %v776_v50, %v687_v29  ;;  %v879_v38 = vmul.f32 %v4750_v32, %v5044_v3 }
  0xff   : > { %v689_v13 = vadd.f32 %v677_v25, %v587_v59  ;;  %v889_v53 = vadd.f32 %v877_v52, %v788_v56  ;;  %v4039_v56 = vld [vmem:[%s4569_s29 + $0x72] sm:$0x3f] }
 0x101   : > { %458 = vperm.xlu1 %4476, %v402_v47   ;;  %v3987_v47 = vld [vmem:[%s4569_s29 + $0x61] sm:$0x3f]  ;;  %v790_v10 = vadd.f32 %v778_v20, %v689_v13  ;;  %v4026_v20 = vld [vmem:[%s4569_s29 + $0x71] sm:$0x3f] }
 0x102   : > { %559 = vperm.xlu2 %4477, %v503_v11  }
 0x103   : > { %357 = vperm.xlu0 %4475, %v302_v23   ;;  %v941_v54 = vpop.permute.xlu1 %940  ;;  %v5107_v43 = vpop.permute.xlu2 %843  ;;  %v891_v37 = vadd.f32 %v879_v38, %v790_v10  ;;  %v504_v38 = vld [vmem:[%s4569_s29 + $0x5a] sm:$0x3f] }
 0x104   : > { %v931_v36 = vpop.permute.xlu0 %930  ;;  %v981_v23 = vmul.f32 %v4757_v35, %v941_v54  ;;  %v1183_v54 = vmul.f32 %v4777_v51, %v5077_v44 }
 0x105   : > { %v979_v12 = vmul.f32 %v4757_v35, %v931_v36  ;;  %v4013_v36 = vld [vmem:[%s4569_s29 + $0x70] sm:$0x3f] }
 0x106   : > { %v993_v52 = vadd.f32 %v981_v23, %v891_v37  ;;  %v303_v23 = vld [vmem:[%s4569_s29 + $0x58] sm:$0x3f] }
 0x107   : > { %v991_v45 = vadd.f32 %v979_v12, %v889_v53 }
 0x109   : > { %762 = vperm.xlu1 %4476, %v3987_v47   ;;  %v1092_v50 = vadd.f32 %v1080_v24, %v991_v45 }
 0x10a   : > { %863 = vperm.xlu2 %4477, %v4000_v48  }
 0x10b   : > { %661 = vperm.xlu0 %4475, %v3974_v39   ;;  %v1133_v31 = vpop.permute.xlu1 %1132  ;;  %v5118_v11 = vpop.permute.xlu2 %1147  ;;  %v403_v39 = vld [vmem:[%s4569_s29 + $0x59] sm:$0x3f] }
 0x10c   : > { %v1181_v25 = vmul.f32 %v4777_v51, %v1133_v31  ;;  %v1042_v29 = vpop.permute.xlu0 %1041 }
 0x10d   : > { %v1082_v3 = vmul.f32 %v4765_v42, %v1042_v29 }
 0x10e   : > { %v1193_v59 = vadd.f32 %v1181_v25, %v1092_v50  ;;  %v576_v25 = vmul.f32 %v4664_v4, %v5089_v30  ;;  %v3988_v30 = vld [vmem:[%s4569_s29 + $0x69] sm:$0x3f] }
 0x10f   : > { %v1094_v16 = vadd.f32 %v1082_v3, %v993_v52 }
 0x110   : > { %v1209_v13 = vadd.f32 %v4784_v57, %v1193_v59 }
 0x111   : > { %v1195_v45 = vadd.f32 %v1183_v54, %v1094_v16  ;;  %1066 = vperm.xlu1 %4476, %v4026_v20  }
 0x112   : > { %1222 = vst.msk [vmem:[#allocation2 + $0x18] sm:$0x3f] %vm1218_vm0, %v1209_v13  ;;  %1167 = vperm.xlu2 %4477, %v4039_v56   ;;  %v3975_v13 = vld [vmem:[%s4569_s29 + $0x68] sm:$0x3f] }
 0x113   : > { %965 = vperm.xlu0 %4475, %v4013_v36   ;;  %v1211_v12 = vadd.f32 %v4784_v57, %v1195_v45  ;;  %v439_v53 = vpop.permute.xlu1 %438  ;;  %v5130_v47 = vpop.permute.xlu2 %544  ;;  %v4001_v36 = vld [vmem:[%s4569_s29 + $0x6a] sm:$0x3f] }
 0x114   : > { %v338_v44 = vpop.permute.xlu0 %337  ;;  %v475_v10 = vmul.f32 %v4640_v62, %v439_v53  ;;  %v4027_v53 = vld [vmem:[%s4569_s29 + $0x79] sm:$0x3f] }
 0x115   : > { %1224 = vst.msk [vmem:[#allocation2 + $0x28] sm:$0x3f] %vm1218_vm0, %v1211_v12  ;;  %v374_v48 = vmul.f32 %v4635_v61, %v338_v44 }
 0x117   : > { %v487_v24 = vadd.f32 %v475_v10, %v374_v48  ;;  %v4040_v48 = vld [vmem:[%s4569_s29 + $0x7a] sm:$0x3f] }
 0x119   : > { %463 = vperm.xlu1 %4476, %v403_v39   ;;  %v1600_v37 = vld [vmem:[#allocation2 + $0x18] sm:$0xf]  ;;  %v588_v20 = vadd.f32 %v576_v25, %v487_v24  ;;  %v1975_v25 = vld [vmem:[#allocation2 + $0x20] sm:$0xf] }
 0x11a   : > { %v1629_v31 = vld [vmem:[#allocation2 + $0x19] sm:$0xf]  ;;  %564 = vperm.xlu2 %4477, %v504_v38   ;;  %4098 = vmatmul.msk.f32.vlgmr.msrb.gmra.mxu0 %vm1242_vm1, %v1600_v37  ;;  %v1890_v38 = vld [vmem:[#allocation2 + $0x10] sm:$0xf] }
 0x11b   : > { %v1658_v50 = vld [vmem:[#allocation2 + $0x1a] sm:$0xf]  ;;  %362 = vperm.xlu0 %4475, %v303_v23   ;;  %4103 = vmatmul.msk.f32.vlgmr.msra.gmra.mxu1 %vm1242_vm1, %v1629_v31  ;;  %v743_v29 = vpop.permute.xlu1 %742  ;;  %v5144_v59 = vpop.permute.xlu2 %848 }
 0x11c   : > { %4108 = vmatmul.msk.f32.vlgmr.msrb.gmra.mxu2 %vm1242_vm1, %v1658_v50  ;;  %v642_v52 = vpop.permute.xlu0 %641  ;;  %v1688_v3 = vld [vmem:[#allocation2 + $0x28] sm:$0xf]  ;;  %1915 = vmatpush.msrb.mxu0 %v4645_v63  ;;  %v779_v16 = vmul.f32 %v4741_v27, %v743_v29  ;;  %v4014_v39 = vld [vmem:[%s4569_s29 + $0x78] sm:$0x3f]  ;;  %s4463_s29 = sshll.u32 %s6089_s25, 5 }
 0x11d   : > { %v678_v54 = vmul.f32 %v4728_v22, %v642_v52  ;;  %4113 = vmatmul.msk.f32.vlgmr.msra.gmra.mxu3 %vm1242_vm1, %v1688_v3  ;;  %1938 = vmatpush.msra.mxu1 %v4650_v0  ;;  %v1717_v0 = vld [vmem:[#allocation2 + $0x29] sm:$0xf]  ;;  %v2033_v3 = vld [vmem:[#allocation2 + $0x22] sm:$0xf]  ;;  %s5389_s30 = scalar_lea.vmem %s6044_s6, %s4463_s29 }
 0x11e   : > { %1916 = vmatpush.msrb.mxu0 %v4673_v7  ;;  %v1746_v45 = vld [vmem:[#allocation2 + $0x2a] sm:$0xf]  ;;  %v880_v7 = vmul.f32 %v4750_v32, %v5107_v43 }
 0x11f   : > { %v690_v56 = vadd.f32 %v678_v54, %v588_v20  ;;  %1939 = vmatpush.msra.mxu1 %v4678_v8  ;;  %v6080_v52 = vld [vmem:[#allocation8_spill] sm:$0xff] }
 0x120   : > { %1917 = vmatpush.msrb.mxu0 %v4695_v14 }
 0x121   : > { %v791_v63 = vadd.f32 %v779_v16, %v690_v56  ;;  %767 = vperm.xlu1 %4476, %v3988_v30   ;;  %1940 = vmatpush.msra.mxu1 %v4700_v15  ;;  %v6083_v30 = vld [vmem:[#allocation6_spill] sm:$0xff]  ;;  %v6084_v16 = vld [vmem:[#allocation12_spill] sm:$0xff]  ;;  %v6085_v56 = vld [vmem:[#allocation7_spill] sm:$0xff] }
 0x122   : > { %868 = vperm.xlu2 %4477, %v4001_v36   ;;  %4118 = vmatmul.msk.f32.vlgmr.msra.gmra.mxu0 %vm1242_vm1, %v1717_v0 }
 0x123   : > { %666 = vperm.xlu0 %4475, %v3975_v13   ;;  %4123 = vmatmul.msk.f32.vlgmr.msrb.gmra.mxu1 %vm1242_vm1, %v1746_v45  ;;  %v1047_v8 = vpop.permute.xlu1 %1046  ;;  %v892_v15 = vadd.f32 %v880_v7, %v791_v63  ;;  %v5168_v44 = vpop.permute.xlu2 %1152  ;;  %v6086_v63 = vld [vmem:[#allocation10_spill] sm:$0xff] }
 0x124   : > { %v946_v14 = vpop.permute.xlu0 %945  ;;  %1918 = vmatpush.msrb.mxu0 %v4712_v18  ;;  %1941 = vmatpush.msra.mxu1 %v4717_v19  ;;  %v1083_v43 = vmul.f32 %v4765_v42, %v1047_v8  ;;  %v1184_v18 = vmul.f32 %v4777_v51, %v5118_v11  ;;  %v1185_v36 = vmul.f32 %v4777_v51, %v5168_v44  ;;  %v5232_v51 = vld [vmem:[%s6041_s3 + $0x50] sm:$0xff]  ;;  %v5244_v44 = vld [vmem:[%s6039_s1] ss:$0 sm:$0xff] }
 0x125   : > { %v982_v12 = vmul.f32 %v4757_v35, %v946_v14  ;;  %v6087_v14 = vld [vmem:[#allocation14_spill] sm:$0xff] }
 0x126   : > { %1966 = vmatpush.msra.mxu0 %v4655_v1  ;;  %1995 = vmatpush.msrb.mxu1 %v4801_v17  ;;  %v6078_v1 = vld [vmem:[#allocation3_spill] sm:$0xff]  ;;  %v1895_v17 = vld [vmem:[#allocation2 + $0x11] sm:$0xf] }
 0x127   : > { %v994_v10 = vadd.f32 %v982_v12, %v892_v15 }
 0x128   : > { %1967 = vmatpush.msra.mxu0 %v4683_v9  ;;  %1996 = vmatpush.msrb.mxu1 %v4815_v26  ;;  %v6079_v26 = vld [vmem:[#allocation4_spill] sm:$0xff] }
 0x129   : > { %v1095_v19 = vadd.f32 %v1083_v43, %v994_v10  ;;  %1071 = vperm.xlu1 %4476, %v4027_v53   ;;  %v5238_v53 = vld [vmem:[%s6039_s1 + $0x1] ss:$0 sm:$0xff] }
 0x12a   : > { %1968 = vmatpush.msra.mxu0 %v6078_v1  ;;  %1172 = vperm.xlu2 %4477, %v4040_v48  }
 0x12b   : > { %970 = vperm.xlu0 %4475, %v4014_v39   ;;  %v1196_v23 = vadd.f32 %v1184_v18, %v1095_v19  ;;  %4146 = vmatmul.msk.f32.vlgmr.msrb.gmra.mxu0 %vm1242_vm1, %v1895_v17  ;;  %v444_v24 = vpop.permute.xlu1 %443  ;;  %v5189_v50 = vpop.permute.xlu2 %549  ;;  %v5259_v39 = vld [vmem:[%s6041_s3 + $0x40] sm:$0xff] }
 0x12c   : > { %4147 = vmatmul.msk.f32.vlgmr.msra.gmra.mxu1 %vm1242_vm1, %v1890_v38  ;;  %v343_v9 = vpop.permute.xlu0 %342  ;;  %1969 = vmatpush.msra.mxu0 %v6079_v26  ;;  %v476_v37 = vmul.f32 %v4640_v62, %v444_v24  ;;  %v1946_v62 = vld [vmem:[#allocation2 + $0x12] sm:$0xf]  ;;  %v5264_v19 = vld [vmem:[%s6039_s1 + $0x2] ss:$0 sm:$0xff]  ;;  %v5273_v24 = vld [vmem:[%s6039_s1 + $0x3] ss:$0 sm:$0xff] }
 0x12d   : > { %1997 = vmatpush.msrb.mxu1 %v4830_v33  ;;  %v1212_v11 = vadd.f32 %v4784_v57, %v1196_v23  ;;  %v375_v31 = vmul.f32 %v4635_v61, %v343_v9  ;;  %v577_v61 = vmul.f32 %v4664_v4, %v5130_v47  ;;  %v578_v1 = vmul.f32 %v5264_v19, %v5189_v50 }
 0x12e   : > { %2024 = vmatpush.msrb.mxu0 %v4806_v21 }
 0x12f   : > { %1998 = vmatpush.msrb.mxu1 %v4847_v46  ;;  %1225 = vst.msk [vmem:[#allocation2 + $0x30] sm:$0x3f] %vm1218_vm0, %v1212_v11  ;;  %v488_v33 = vadd.f32 %v476_v37, %v375_v31  ;;  %v5280_v11 = vld [vmem:[%s6039_s1 + $0x4] ss:$0 sm:$0xff] }
 0x130   : > { %2025 = vmatpush.msrb.mxu0 %v4820_v28 }
 0x131   : > { %2053 = vmatpush.msra.mxu1 %v4881_v55  ;;  %v589_v28 = vadd.f32 %v577_v61, %v488_v33 }
 0x132   : > { %2026 = vmatpush.msrb.mxu0 %v4835_v34 }
 0x133   : > { %2054 = vmatpush.msra.mxu1 %v4893_v60  ;;  %4152 = vmatmul.msk.f32.vlgmr.msra.gmra.mxu0 %vm1242_vm1, %v1946_v62  ;;  %v748_v21 = vpop.permute.xlu1 %747  ;;  %v2274_v62 = vld [vmem:[#allocation2 + $0x1a] sm:$0xf] }
 0x134   : > { %4157 = vmatmul.msk.f32.vlgmr.msrb.gmra.mxu1 %vm1242_vm1, %v1975_v25  ;;  %v647_v46 = vpop.permute.xlu0 %646  ;;  %2027 = vmatpush.msrb.mxu0 %v4852_v6  ;;  %v780_v34 = vmul.f32 %v4741_v27, %v748_v21  ;;  %v2004_v6 = vld [vmem:[#allocation2 + $0x21] sm:$0xf] }
 0x135   : > { %2055 = vmatpush.msra.mxu1 %v4924_v40  ;;  %v679_v29 = vmul.f32 %v4728_v22, %v647_v46  ;;  %v881_v22 = vmul.f32 %v4750_v32, %v5144_v59 }
 0x136   : > { %2083 = vmatpush.msra.mxu0 %v4865_v49  ;;  %v854_v49 = vpop.permute.xlu2 %853  ;;  %v2063_v0 = vld [vmem:[#allocation2 + $0x30] sm:$0xf] }
 0x137   : > { %2056 = vmatpush.msra.mxu1 %v4961_v58  ;;  %v691_v4 = vadd.f32 %v679_v29, %v589_v28  ;;  %v2092_v45 = vld [vmem:[#allocation2 + $0x31] sm:$0xf]  ;;  %v1263_v28 = vpop.f32.mrf.mxu0  ;;  %v5303_v29 = vld [vmem:[%s6039_s1 + $0x7] ss:$0 sm:$0xff] }
 0x138   : > { %2084 = vmatpush.msra.mxu0 %v4898_v2  ;;  %v6082_v2 = vld [vmem:[#allocation11_spill] sm:$0xff]  ;;  %v2121_v18 = vld [vmem:[#allocation2 + $0x32] sm:$0xf]  ;;  %v1286_v50 = vpop.f32.mrf.mxu1 }
 0x139   : > { %2112 = vmatpush.msrb.mxu1 %v4876_v41  ;;  %v792_v47 = vadd.f32 %v780_v34, %v691_v4  ;;  %v6081_v41 = vld [vmem:[#allocation9_spill] sm:$0xff] }
 0x13a   : > { %2085 = vmatpush.msra.mxu0 %v6080_v52 }
 0x13b   : > { %2113 = vmatpush.msrb.mxu1 %v4903_v5  ;;  %4162 = vmatmul.msk.f32.vlgmr.msrb.gmra.mxu0 %vm1242_vm1, %v2004_v6  ;;  %v1052_v27 = vpop.permute.xlu1 %1051  ;;  %v893_v54 = vadd.f32 %v881_v22, %v792_v47  ;;  %v5310_v47 = vld [vmem:[%s6039_s1 + $0x8] ss:$0 sm:$0xff] }
 0x13c   : > { %4167 = vmatmul.msk.f32.vlgmr.msra.gmra.mxu1 %vm1242_vm1, %v2033_v3  ;;  %v951_v20 = vpop.permute.xlu0 %950  ;;  %2086 = vmatpush.msra.mxu0 %v6082_v2  ;;  %v1084_v32 = vmul.f32 %v4765_v42, %v1052_v27  ;;  %v2361_v27 = vld [vmem:[#allocation2 + $0x2a] sm:$0xf] }
 0x13d   : > { %2114 = vmatpush.msrb.mxu1 %v6081_v41  ;;  %v983_v5 = vmul.f32 %v4757_v35, %v951_v20  ;;  %v5224_v35 = vld [vmem:[%s6041_s3 + $0x58] sm:$0xff] }
 0x13e   : > { %2141 = vmatpush.msrb.mxu0 %v6083_v30  ;;  %v1158_v15 = vpop.permute.xlu2 %1157  ;;  %v5317_v20 = vld [vmem:[%s6041_s3 + $0x18] sm:$0xff] }
 0x13f   : > { %2115 = vmatpush.msrb.mxu1 %v6084_v16  ;;  %v995_v59 = vadd.f32 %v983_v5, %v893_v54  ;;  %v1186_v52 = vmul.f32 %v5310_v47, %v1158_v15  ;;  %v1315_v6 = vpop.f32.mrf.mxu2  ;;  %v5329_v16 = vld [vmem:[%s6040_s2] ss:$0 sm:$0xff] }
 0x140   : > { %2142 = vmatpush.msrb.mxu0 %v6085_v56 }
 0x141   : > { %v1096_v13 = vadd.f32 %v1084_v32, %v995_v59 }
 0x142   : > { %2143 = vmatpush.msrb.mxu0 %v6086_v63 }
 0x143   : > { %v1197_v7 = vadd.f32 %v1185_v36, %v1096_v13  ;;  %4172 = vmatmul.msk.f32.vlgmr.msra.gmra.mxu0 %vm1242_vm1, %v2063_v0  ;;  %v449_v42 = vpop.permute.xlu1 %448  ;;  %v5338_v13 = vld [vmem:[%s6041_s3 + $0x8] sm:$0xff] }
 0x144   : > { %4177 = vmatmul.msk.f32.vlgmr.msrb.gmra.mxu1 %vm1242_vm1, %v2092_v45  ;;  %v348_v8 = vpop.permute.xlu0 %347  ;;  %2144 = vmatpush.msrb.mxu0 %v6087_v14  ;;  %v477_v43 = vmul.f32 %v5238_v53, %v449_v42 }
 0x145   : > { %v1213_v12 = vadd.f32 %v4784_v57, %v1197_v7  ;;  %v376_v10 = vmul.f32 %v5244_v44, %v348_v8  ;;  %v5251_v57 = vld [vmem:[%s6041_s3 + $0x48] sm:$0xff]  ;;  %v5346_v7 = vld [vmem:[%s6041_s3] sm:$0xff] }
 0x146   : > { %2294 = vmatpush.msra.mxu0 %v5224_v35  ;;  %v555_v26 = vpop.permute.xlu2 %554 }
 0x147   : > { %1226 = vst.msk [vmem:[#allocation2 + $0x38] sm:$0x3f] %vm1218_vm0, %v1213_v12  ;;  %v489_v48 = vadd.f32 %v477_v43, %v376_v10  ;;  %v579_v15 = vmul.f32 %v5264_v19, %v555_v26 }
 0x148   : > { %2295 = vmatpush.msra.mxu0 %v5232_v51 }
 0x149   : > { %v590_v23 = vadd.f32 %v578_v1, %v489_v48 }
 0x14a   : > { %2296 = vmatpush.msra.mxu0 %v5251_v57 }
 0x14b   : > { %4182 = vmatmul.msk.f32.vlgmr.msrb.gmra.mxu0 %vm1242_vm1, %v2121_v18  ;;  %v753_v17 = vpop.permute.xlu1 %752  ;;  %v5359_v18 = vld [vmem:[%s6041_s3 + $0x70] sm:$0xff] }
 0x14c   : > { %v652_v38 = vpop.permute.xlu0 %651  ;;  %2297 = vmatpush.msra.mxu0 %v5259_v39  ;;  %v781_v37 = vmul.f32 %v5280_v11, %v753_v17 }
 0x14d   : > { %v680_v9 = vmul.f32 %v5273_v24, %v652_v38 }
 0x14e   : > { %2381 = vmatpush.msrb.mxu0 %v4881_v55  ;;  %v5288_v55 = vld [vmem:[%s6039_s1 + $0x5] ss:$0 sm:$0xff]  ;;  %v859_v3 = vpop.permute.xlu2 %858  ;;  %v2449_v8 = vld [vmem:[#allocation2 + $0x3a] sm:$0xf] }
 0x14f   : > { %v692_v31 = vadd.f32 %v680_v9, %v590_v23  ;;  %v882_v25 = vmul.f32 %v5288_v55, %v854_v49  ;;  %v1287_v49 = vadd.f32 %v1286_v50, %v1263_v28  ;;  %v5366_v9 = vld [vmem:[%s6041_s3 + $0x68] sm:$0xff]  ;;  %v883_v28 = vmul.f32 %v5288_v55, %v859_v3 }
 0x150   : > { %2382 = vmatpush.msrb.mxu0 %v4893_v60  ;;  %v5296_v60 = vld [vmem:[%s6039_s1 + $0x6] ss:$0 sm:$0xff] }
 0x151   : > { %v793_v33 = vadd.f32 %v781_v37, %v692_v31  ;;  %v1318_v54 = vadd.f32 %v1315_v6, %v1287_v49  ;;  %v5408_v49 = vld [vmem:[%s6041_s3 + $0xc8] sm:$0xff] }
 0x152   : > { %2383 = vmatpush.msrb.mxu0 %v4924_v40 }
 0x153   : > { %4205 = vmatmul.msk.f32.vlgmr.msra.gmra.mxu0 %vm1242_vm1, %v2274_v62  ;;  %v1057_v61 = vpop.permute.xlu1 %1056  ;;  %v894_v46 = vadd.f32 %v882_v25, %v793_v33  ;;  %v4488_v33 = vld [vmem:[%s6042_s4] ss:$0 sm:$0xff] }
 0x154   : > { %v956_v21 = vpop.permute.xlu0 %955  ;;  %2384 = vmatpush.msrb.mxu0 %v4961_v58  ;;  %v1085_v34 = vmul.f32 %v5303_v29, %v1057_v61  ;;  %v5378_v61 = vld [vmem:[%s6041_s3 + $0x60] sm:$0xff] }
 0x155   : > { %v984_v40 = vmul.f32 %v5296_v60, %v956_v21 }
 0x156   : > { %2469 = vmatpush.msra.mxu0 %v6083_v30  ;;  %v5324_v30 = vld [vmem:[%s6041_s3 + $0x10] sm:$0xff]  ;;  %v1163_v12 = vpop.permute.xlu2 %1162 }
 0x157   : > { %v996_v4 = vadd.f32 %v984_v40, %v894_v46  ;;  %v2546_v46 = vld [vmem:[#allocation2 + $0x20] sm:$0xf]  ;;  %v5383_v40 = vld [vmem:[%s6041_s3 + $0xd8] sm:$0xff] }
 0x158   : > { %2470 = vmatpush.msra.mxu0 %v6085_v56  ;;  %v1346_v58 = vpop.f32.mrf.mxu1 }
 0x159   : > { %v1097_v22 = vadd.f32 %v1085_v34, %v996_v4  ;;  %v1349_v36 = vadd.f32 %v1346_v58, %v1318_v54 }
 0x15a   : > { %2471 = vmatpush.msra.mxu0 %v6086_v63  ;;  %v1376_v63 = vpop.f32.mrf.mxu0 }
 0x15b   : > { %v1198_v41 = vadd.f32 %v1186_v52, %v1097_v22  ;;  %4220 = vmatmul.msk.f32.vlgmr.msrb.gmra.mxu0 %vm1242_vm1, %v2361_v27  ;;  %v454_v2 = vpop.permute.xlu1 %453  ;;  %v1379_v42 = vadd.f32 %v1376_v63, %v1349_v36  ;;  %v5398_v52 = vld [vmem:[%s6041_s3 + $0xd0] sm:$0xff] }
 0x15c   : > { %v353_v5 = vpop.permute.xlu0 %352  ;;  %2472 = vmatpush.msra.mxu0 %v6087_v14  ;;  %v478_v59 = vmul.f32 %v5238_v53, %v454_v2  ;;  %v5351_v14 = vld [vmem:[%s6041_s3 + $0x78] sm:$0xff]  ;;  %v1187_v2 = vmul.f32 %v5310_v47, %v1163_v12 }
 0x15d   : > { %v1214_v32 = vadd.f32 %v5329_v16, %v1198_v41  ;;  %v377_v56 = vmul.f32 %v5244_v44, %v353_v5  ;;  %v5417_v5 = vld [vmem:[%s6041_s3 + $0xc0] sm:$0xff] }
 0x15e   : > { %2594 = vmatpush.msrb.mxu0 %v5317_v20  ;;  %v560_v6 = vpop.permute.xlu2 %559 }
 0x15f   : > { %1227 = vst.msk [vmem:[#allocation2 + $0x40] sm:$0x3f] %vm1218_vm0, %v1214_v32  ;;  %v490_v0 = vadd.f32 %v478_v59, %v377_v56  ;;  %v2631_v32 = vld [vmem:[#allocation2 + $0x30] sm:$0xf] }
 0x160   : > { %2595 = vmatpush.msrb.mxu0 %v5324_v30  ;;  %v1406_v45 = vpop.f32.mrf.mxu1 }
 0x161   : > { %v1409_v10 = vadd.f32 %v1406_v45, %v1379_v42  ;;  %v591_v1 = vadd.f32 %v579_v15, %v490_v0 }
 0x162   : > { %2596 = vmatpush.msrb.mxu0 %v5338_v13  ;;  %v1497_v62 = vpop.f32.mrf.mxu0 }
 0x163   : > { %4235 = vmatmul.msk.f32.vlgmr.msra.gmra.mxu0 %vm1242_vm1, %v2449_v8  ;;  %v758_v43 = vpop.permute.xlu1 %757 }
 0x164   : > { %2597 = vmatpush.msrb.mxu0 %v5346_v7  ;;  %v782_v26 = vmul.f32 %v5280_v11, %v758_v43  ;;  %v580_v43 = vmul.f32 %v5264_v19, %v560_v6 }
 0x165   : > { %v657_v48 = vpop.permute.xlu0 %656 }
 0x166   : > { %v681_v17 = vmul.f32 %v5273_v24, %v657_v48  ;;  %v1437_v38 = vpop.f32.mrf.mxu2  ;;  %2651 = vmatpush.msra.mxu0 %v5351_v14  ;;  %v864_v42 = vpop.permute.xlu2 %863  ;;  %v2719_v15 = vld [vmem:[#allocation2 + $0x40] sm:$0xf] }
 0x167   : > { %v1440_v23 = vadd.f32 %v1437_v38, %v1409_v10  ;;  %v1467_v31 = vpop.f32.mrf.mxu3 }
 0x168   : > { %v693_v37 = vadd.f32 %v681_v17, %v591_v1  ;;  %2652 = vmatpush.msra.mxu0 %v5359_v18 }
 0x169   : > { %v1470_v50 = vadd.f32 %v1467_v31, %v1440_v23  ;;  %v884_v31 = vmul.f32 %v5288_v55, %v864_v42 }
 0x16a   : > { %v794_v25 = vadd.f32 %v782_v26, %v693_v37  ;;  %2653 = vmatpush.msra.mxu0 %v5366_v9 }
 0x16b   : > { %v1500_v21 = vadd.f32 %v1497_v62, %v1470_v50  ;;  %4253 = vmatmul.msk.f32.vlgmr.msrb.gmra.mxu0 %vm1242_vm1, %v2546_v46  ;;  %v1062_v34 = vpop.permute.xlu1 %1061 }
 0x16c   : > { %2654 = vmatpush.msra.mxu0 %v5378_v61  ;;  %v895_v3 = vadd.f32 %v883_v28, %v794_v25  ;;  %v1086_v27 = vmul.f32 %v5303_v29, %v1062_v34 }
 0x16d   : > { %v5392_v4 = vadd.f32 %v4488_v33, %v1500_v21  ;;  %v961_v58 = vpop.permute.xlu0 %960 }
 0x16e   : > { %v985_v22 = vmul.f32 %v5296_v60, %v961_v58  ;;  %2739 = vmatpush.msrb.mxu0 %v5383_v40  ;;  %v1168_v23 = vpop.permute.xlu2 %1167 }
 0x16f   : > { %1507 = vst.msk [vmem:[%s5389_s30] sm:$0xf] %vm1506_vm2, %v5392_v4  ;;  %v1188_v46 = vmul.f32 %v5310_v47, %v1168_v23 }
 0x170   : > { %v997_v41 = vadd.f32 %v985_v22, %v895_v3  ;;  %2740 = vmatpush.msrb.mxu0 %v5398_v52 }
 0x172   : > { %v1098_v54 = vadd.f32 %v1086_v27, %v997_v41  ;;  %2741 = vmatpush.msrb.mxu0 %v5408_v49 }
 0x173   : > { %4263 = vmatmul.msk.f32.vlgmr.msra.gmra.mxu0 %vm1242_vm1, %v2631_v32  ;;  %v459_v56 = vpop.permute.xlu1 %458 }
 0x174   : > { %v1199_v59 = vadd.f32 %v1187_v2, %v1098_v54  ;;  %2742 = vmatpush.msrb.mxu0 %v5417_v5  ;;  %v479_v0 = vmul.f32 %v5238_v53, %v459_v56  ;;  %v1544_v2 = vpop.f32.mrf.mxu1  ;;  %v1567_v54 = vpop.f32.mrf.mxu2 }
 0x175   : > { %v358_v63 = vpop.permute.xlu0 %357 }
 0x176   : > { %v1215_v36 = vadd.f32 %v5329_v16, %v1199_v59  ;;  %v378_v45 = vmul.f32 %v5244_v44, %v358_v63  ;;  %v565_v34 = vpop.permute.xlu2 %564 }
 0x177   : > { %v581_v56 = vmul.f32 %v5264_v19, %v565_v34 }
 0x178   : > { %1228 = vst.msk [vmem:[#allocation2 + $0x48] sm:$0x3f] %vm1218_vm0, %v1215_v36  ;;  %v491_v8 = vadd.f32 %v479_v0, %v378_v45  ;;  %v1568_v36 = vadd.f32 %v1567_v54, %v1544_v2  ;;  %v5477_v2 = vld [vmem:[%s6041_s3 + $0x28] sm:$0xff]  ;;  %v5484_v54 = vld [vmem:[%s6041_s3 + $0x20] sm:$0xff] }
 0x17a   : > { %v592_v48 = vadd.f32 %v580_v43, %v491_v8  ;;  %v1595_v8 = vpop.f32.mrf.mxu3 }
 0x17b   : > { %4278 = vmatmul.msk.f32.vlgmr.msrb.gmra.mxu0 %vm1242_vm1, %v2719_v15  ;;  %v763_v12 = vpop.permute.xlu1 %762  ;;  %v1598_v15 = vadd.f32 %v1595_v8, %v1568_v36 }
 0x17c   : > { %v783_v17 = vmul.f32 %v5280_v11, %v763_v12 }
 0x17d   : > { %v662_v10 = vpop.permute.xlu0 %661 }
 0x17e   : > { %v682_v1 = vmul.f32 %v5273_v24, %v662_v10  ;;  %v869_v63 = vpop.permute.xlu2 %868 }
 0x180   : > { %v694_v38 = vadd.f32 %v682_v1, %v592_v48  ;;  %v885_v1 = vmul.f32 %v5288_v55, %v869_v63 }
 0x182   : > { %v795_v26 = vadd.f32 %v783_v17, %v694_v38 }
 0x183   : > { %v1067_v37 = vpop.permute.xlu1 %1066 }
 0x184   : > { %v896_v33 = vadd.f32 %v884_v31, %v795_v26  ;;  %v1087_v25 = vmul.f32 %v5303_v29, %v1067_v37 }
 0x185   : > { %v966_v50 = vpop.permute.xlu0 %965 }
 0x186   : > { %v986_v62 = vmul.f32 %v5296_v60, %v966_v50  ;;  %v1173_v37 = vpop.permute.xlu2 %1172 }
 0x188   : > { %v998_v21 = vadd.f32 %v986_v62, %v896_v33 }
 0x18a   : > { %v1099_v28 = vadd.f32 %v1087_v25, %v998_v21  ;;  %v1189_v21 = vmul.f32 %v5310_v47, %v1173_v37  ;;  %v4125_v47 = vld [vmem:[%s6043_s5 + $0x28] sm:$0xff]  ;;  %v4185_v37 = vld [vmem:[%s6043_s5 + $0x58] sm:$0xff] }
 0x18b   : > { %v464_v58 = vpop.permute.xlu1 %463 }
 0x18c   : > { %v1200_v6 = vadd.f32 %v1188_v46, %v1099_v28  ;;  %v480_v27 = vmul.f32 %v5238_v53, %v464_v58 }
 0x18d   : > { %v363_v3 = vpop.permute.xlu0 %362 }
 0x18e   : > { %v1216_v22 = vadd.f32 %v5329_v16, %v1200_v6  ;;  %v379_v41 = vmul.f32 %v5244_v44, %v363_v3 }
 0x190   : > { %1229 = vst.msk [vmem:[#allocation2 + $0x50] sm:$0x3f] %vm1218_vm0, %v1216_v22  ;;  %v492_v32 = vadd.f32 %v480_v27, %v379_v41  ;;  %v4127_v22 = vld [vmem:[%s6043_s5 + $0x38] sm:$0xff]  ;;  %v5469_v41 = vld [vmem:[%s6041_s3 + $0x30] sm:$0xff] }
 0x192   : > { %v593_v45 = vadd.f32 %v581_v56, %v492_v32 }
 0x193   : > { %v768_v59 = vpop.permute.xlu1 %767 }
 0x194   : > { %v784_v53 = vmul.f32 %v5280_v11, %v768_v59  ;;  %v4128_v59 = vld [vmem:[%s6043_s5 + $0x40] sm:$0xff] }
 0x195   : > { %v667_v0 = vpop.permute.xlu0 %666 }
 0x196   : > { %v683_v42 = vmul.f32 %v5273_v24, %v667_v0 }
 0x197   : > { %v1625_v44 = vpop.f32.mrf.mxu0 }
 0x198   : > { %v695_v12 = vadd.f32 %v683_v42, %v593_v45  ;;  %v1654_v43 = vpop.f32.mrf.mxu1  ;;  %v1628_v48 = vadd.f32 %v1625_v44, %v1598_v15  ;;  %v4129_v45 = vld [vmem:[%s6043_s5 + $0x48] sm:$0x1f]  ;;  %v2223_v42 = vld [vmem:[#allocation2 + $0x19] sm:$0xf] }
 0x19a   : > { %v796_v10 = vadd.f32 %v784_v53, %v695_v12  ;;  %v1657_v19 = vadd.f32 %v1654_v43, %v1628_v48  ;;  %v1508_v53 = vld [vmem:[%s6043_s5] sm:$0xff]  ;;  %v2391_v48 = vld [vmem:[#allocation2 + $0x38] sm:$0xf] }
 0x19b   : > { %v1072_v17 = vpop.permute.xlu1 %1071 }
 0x19c   : > { %v897_v23 = vadd.f32 %v885_v1, %v796_v10  ;;  %v1088_v24 = vmul.f32 %v5303_v29, %v1072_v17  ;;  %v4184_v1 = vld [vmem:[%s6043_s5 + $0x50] sm:$0xff]  ;;  %v5531_v17 = vld [vmem:[%s6041_s3 + $0x98] sm:$0xff] }
 0x19d   : > { %v971_v38 = vpop.permute.xlu0 %970 }
 0x19e   : > { %v987_v26 = vmul.f32 %v5296_v60, %v971_v38  ;;  %v4489_v60 = vld [vmem:[%s6042_s4] ss:$0 sm:$0xff]  ;;  %v5536_v38 = vld [vmem:[%s6041_s3 + $0x90] sm:$0xff] }
 0x19f   : > { %v1683_v31 = vpop.f32.mrf.mxu2  ;;  %v1742_v62 = vpop.f32.mrf.mxu0 }
 0x1a0   : > { %v999_v50 = vadd.f32 %v987_v26, %v897_v23  ;;  %v1686_v33 = vadd.f32 %v1683_v31, %v1657_v19  ;;  %v1713_v11 = vpop.f32.mrf.mxu3  ;;  %v1771_v25 = vpop.f32.mrf.mxu1  ;;  %v5547_v19 = vld [vmem:[%s6041_s3 + $0x88] sm:$0xff]  ;;  %v1510_v23 = vld [vmem:[%s6043_s5 + $0x10] sm:$0xff]  ;;  %v5557_v26 = vld [vmem:[%s6041_s3 + $0x80] sm:$0xff] }
 0x1a1   : > { %v5571_v31 = vld [vmem:[%s6041_s3 + $0xf8] sm:$0xff] }
 0x1a2   : > { %v1100_v46 = vadd.f32 %v1088_v24, %v999_v50  ;;  %v1716_v55 = vadd.f32 %v1713_v11, %v1686_v33  ;;  %v1511_v24 = vld [vmem:[%s6043_s5 + $0x18] sm:$0xff]  ;;  %v5580_v50 = vld [vmem:[%s6041_s3 + $0xf0] sm:$0xff]  ;;  %v5586_v33 = vld [vmem:[%s6041_s3 + $0xe8] sm:$0xff] }
 0x1a3   : > { %v4186_v11 = vld [vmem:[%s6043_s5 + $0x60] sm:$0xff] }
 0x1a4   : > { %v1201_v28 = vadd.f32 %v1189_v21, %v1100_v46  ;;  %v1745_v34 = vadd.f32 %v1742_v62, %v1716_v55  ;;  %v5596_v62 = vld [vmem:[%s6041_s3 + $0xe0] sm:$0xff]  ;;  %v4187_v21 = vld [vmem:[%s6043_s5 + $0x68] sm:$0xff]  ;;  %v2218_v46 = vld [vmem:[#allocation2 + $0x18] sm:$0xf] }
 0x1a5   : > { %v4188_v55 = vld [vmem:[%s6043_s5 + $0x70] sm:$0x1f] }
 0x1a6   : > { %v1217_v58 = vadd.f32 %v5329_v16, %v1201_v28  ;;  %v1774_v6 = vadd.f32 %v1771_v25, %v1745_v34  ;;  %v5458_v16 = vld [vmem:[%s6041_s3 + $0x38] sm:$0xff]  ;;  %v1512_v25 = vld [vmem:[%s6043_s5 + $0x20] sm:$0x1f]  ;;  %v2332_v28 = vld [vmem:[#allocation2 + $0x29] sm:$0xf] }
 0x1a7   : > { %v2660_v34 = vld [vmem:[#allocation2 + $0x31] sm:$0xf] }
 0x1a8   : > { %1230 = vst.msk [vmem:[#allocation2 + $0x58] sm:$0x3f] %vm1218_vm0, %v1217_v58  ;;  %v1779_v29 = vadd.f32 %v4489_v60, %v1774_v6  ;;  %v1920_v3 = vpop.f32.mrf.mxu0  ;;  %v2420_v60 = vld [vmem:[#allocation2 + $0x39] sm:$0xf]  ;;  %v2748_v58 = vld [vmem:[#allocation2 + $0x41] sm:$0xf] }
 0x1a9   : > { %v1943_v27 = vpop.f32.mrf.mxu1  ;;  %v5637_v6 = vld [vmem:[%s6041_s3 + $0xb8] sm:$0xff] }
 0x1aa   : > { %4124 = vst.msk [vmem:[%s5389_s30 + $0x4] sm:$0xf] %vm1506_vm2, %v1779_v29  ;;  %4130 = vmatpush.msk.msra.mxu2 %vm1804_vm3, %v1779_v29  ;;  %4464 = vmatpush.msk.msrb.mxu3 %vm1804_vm3, %v1779_v29  ;;  %v1944_v36 = vadd.f32 %v1943_v27, %v1920_v3  ;;  %v2551_v29 = vld [vmem:[#allocation2 + $0x21] sm:$0xf]  ;;  %v5645_v3 = vld [vmem:[%s6041_s3 + $0xb0] sm:$0xff] }
 0x1ab   : > { %4131 = vmatmul.msk.f32.vlgmr.msra.gmra.mxu2 %vm1788_vm4, %v4125_v47  ;;  %4133 = vmatmul.msk.f32.vlgmr.msrb.gmra.mxu3 %vm1788_vm4, %v4127_v22  ;;  %v2879_v47 = vld [vmem:[#allocation2 + $0x29] sm:$0xf]  ;;  %v5660_v27 = vld [vmem:[%s6041_s3 + $0xa0] sm:$0xff] }
 0x1ac   : > { %4136 = vmatpush.msk.msra.mxu3 %vm1804_vm3, %v5392_v4  ;;  %2243 = vmatpush.msrb.mxu2 %v5458_v16  ;;  %v4126_v4 = vld [vmem:[%s6043_s5 + $0x30] sm:$0xff]  ;;  %v5652_v22 = vld [vmem:[%s6041_s3 + $0xa8] sm:$0xff] }
 0x1ae   : > { %2266 = vmatpush.msrb.mxu3 %v5317_v20  ;;  %2244 = vmatpush.msrb.mxu2 %v5469_v41 }
 0x1b0   : > { %2267 = vmatpush.msrb.mxu3 %v5324_v30  ;;  %v1971_v32 = vpop.f32.mrf.mxu0  ;;  %2245 = vmatpush.msrb.mxu2 %v5477_v2 }
 0x1b1   : > { %v2000_v56 = vpop.f32.mrf.mxu1  ;;  %v1974_v63 = vadd.f32 %v1971_v32, %v1944_v36  ;;  %v5667_v32 = vld [vmem:[%s6041_s3 + $0x118] sm:$0xff]  ;;  %v5682_v36 = vld [vmem:[%s6041_s3 + $0x108] sm:$0xff] }
 0x1b2   : > { %2268 = vmatpush.msrb.mxu3 %v5338_v13  ;;  %2246 = vmatpush.msrb.mxu2 %v5484_v54 }
 0x1b3   : > { %4132 = vmatmul.msk.f32.gmra.mxu2 %vm1788_vm4, %v4126_v4  ;;  %4134 = vmatmul.msk.f32.gmra.mxu3 %vm1788_vm4, %v4128_v59  ;;  %v2003_v8 = vadd.f32 %v2000_v56, %v1974_v63  ;;  %v2602_v4 = vld [vmem:[#allocation2 + $0x22] sm:$0xf]  ;;  %v5675_v59 = vld [vmem:[%s6041_s3 + $0x110] sm:$0xff]  ;;  %v2930_v56 = vld [vmem:[#allocation2 + $0x2a] sm:$0xf] }
 0x1b4   : > { %2323 = vmatpush.msra.mxu2 %v5351_v14  ;;  %2269 = vmatpush.msrb.mxu3 %v5346_v7  ;;  %v5690_v63 = vld [vmem:[%s6041_s3 + $0x100] sm:$0xff] }
 0x1b6   : > { %2324 = vmatpush.msra.mxu2 %v5359_v18 }
 0x1b8   : > { %v2029_v0 = vpop.f32.mrf.mxu0  ;;  %2325 = vmatpush.msra.mxu2 %v5366_v9 }
 0x1b9   : > { %v2058_v14 = vpop.f32.mrf.mxu1  ;;  %v2032_v18 = vadd.f32 %v2029_v0, %v2003_v8  ;;  %v2689_v0 = vld [vmem:[#allocation2 + $0x32] sm:$0xf]  ;;  %v3105_v8 = vld [vmem:[#allocation2 + $0x4a] sm:$0xf] }
 0x1ba   : > { %2326 = vmatpush.msra.mxu2 %v5378_v61  ;;  %v2303_v61 = vld [vmem:[#allocation2 + $0x28] sm:$0xf] }
 0x1bb   : > { %4135 = vmatmul.msk.f32.gmra.mxu3 %vm1788_vm4, %v4129_v45  ;;  %4199 = vmatmul.msk.f32.vlgmr.msrb.gmra.mxu2 %vm1242_vm1, %v2223_v42  ;;  %v2061_v9 = vadd.f32 %v2058_v14, %v2032_v18  ;;  %v3017_v45 = vld [vmem:[#allocation2 + $0x3a] sm:$0xf]  ;;  %v2777_v42 = vld [vmem:[#allocation2 + $0x42] sm:$0xf]  ;;  %v2874_v14 = vld [vmem:[#allocation2 + $0x28] sm:$0xf] }
 0x1bc   : > { %2411 = vmatpush.msrb.mxu2 %v5383_v40  ;;  %v3202_v18 = vld [vmem:[#allocation2 + $0x30] sm:$0xf] }
 0x1be   : > { %2412 = vmatpush.msrb.mxu2 %v5398_v52  ;;  %v4490_v52 = vld [vmem:[%s6042_s4] ss:$0 sm:$0xff] }
 0x1c0   : > { %v2088_v15 = vpop.f32.mrf.mxu0  ;;  %2413 = vmatpush.msrb.mxu2 %v5408_v49  ;;  %v1509_v49 = vld [vmem:[%s6043_s5 + $0x8] sm:$0xff] }
 0x1c1   : > { %v2091_v12 = vadd.f32 %v2088_v15, %v2061_v9  ;;  %v2117_v40 = vpop.f32.mrf.mxu1  ;;  %v2988_v15 = vld [vmem:[#allocation2 + $0x39] sm:$0xf] }
 0x1c2   : > { %2414 = vmatpush.msrb.mxu2 %v5417_v5 }
 0x1c3   : > { %4137 = vmatmul.msk.f32.vlgmr.msra.gmra.mxu3 %vm1788_vm4, %v1508_v53  ;;  %4210 = vmatmul.msk.f32.vlgmr.msra.gmra.mxu2 %vm1242_vm1, %v2303_v61  ;;  %v2120_v44 = vadd.f32 %v2117_v40, %v2091_v12  ;;  %v3316_v53 = vld [vmem:[#allocation2 + $0x41] sm:$0xf]  ;;  %v3076_v61 = vld [vmem:[#allocation2 + $0x49] sm:$0xf]  ;;  %v3404_v12 = vld [vmem:[#allocation2 + $0x51] sm:$0xf] }
 0x1c4   : > { %2352 = vmatpush.msra.mxu3 %v5531_v17 }
 0x1c6   : > { %2353 = vmatpush.msra.mxu3 %v5536_v38 }
 0x1c8   : > { %v2146_v43 = vpop.f32.mrf.mxu0  ;;  %2354 = vmatpush.msra.mxu3 %v5547_v19 }
 0x1c9   : > { %v2149_v10 = vadd.f32 %v2146_v43, %v2120_v44 }
 0x1ca   : > { %2355 = vmatpush.msra.mxu3 %v5557_v26 }
 0x1cb   : > { %v2154_v5 = vadd.f32 %v4490_v52, %v2149_v10  ;;  %4138 = vmatmul.msk.f32.gmra.mxu3 %vm1788_vm4, %v1509_v49  ;;  %4225 = vmatmul.msk.f32.vlgmr.msrb.gmra.mxu2 %vm1242_vm1, %v2391_v48  ;;  %v3345_v52 = vld [vmem:[#allocation2 + $0x42] sm:$0xf]  ;;  %v3673_v10 = vld [vmem:[#allocation2 + $0x4a] sm:$0xf] }
 0x1cd   : > { %4183 = vst.msk [vmem:[%s5389_s30 + $0x8] sm:$0xf] %vm1506_vm2, %v2154_v5  ;;  %4189 = vmatpush.msk.msra.mxu1 %vm1804_vm3, %v2154_v5 }
 0x1ce   : > { %4190 = vmatmul.msk.f32.vlgmr.msra.gmra.mxu1 %vm1788_vm4, %v4184_v1 }
 0x1cf   : > { %2680 = vmatpush.msrb.mxu1 %v5531_v17 }
 0x1d1   : > { %2681 = vmatpush.msrb.mxu1 %v5536_v38 }
 0x1d3   : > { %4139 = vmatmul.msk.f32.gmra.mxu3 %vm1788_vm4, %v1510_v23  ;;  %2682 = vmatpush.msrb.mxu1 %v5547_v19  ;;  %v3433_v23 = vld [vmem:[#allocation2 + $0x52] sm:$0xf] }
 0x1d5   : > { %2683 = vmatpush.msrb.mxu1 %v5557_v26 }
 0x1d6   : > { %4191 = vmatmul.msk.f32.gmra.mxu1 %vm1788_vm4, %v4185_v37 }
 0x1d7   : > { %2768 = vmatpush.msra.mxu1 %v5571_v31 }
 0x1d9   : > { %2769 = vmatpush.msra.mxu1 %v5580_v50 }
 0x1db   : > { %4140 = vmatmul.msk.f32.gmra.mxu3 %vm1788_vm4, %v1511_v24  ;;  %2770 = vmatpush.msra.mxu1 %v5586_v33 }
 0x1dd   : > { %2771 = vmatpush.msra.mxu1 %v5596_v62 }
 0x1de   : > { %4192 = vmatmul.msk.f32.gmra.mxu1 %vm1788_vm4, %v4186_v11 }
 0x1e3   : > { %4141 = vmatmul.msk.f32.gmra.mxu3 %vm1788_vm4, %v1512_v25 }
 0x1e6   : > { %4193 = vmatmul.msk.f32.gmra.mxu1 %vm1788_vm4, %v4187_v21 }
 0x1eb   : > { %4200 = vmatmul.msk.f32.vlgmr.msrb.gmra.mxu3 %vm1242_vm1, %v2218_v46  ;;  %v2299_v46 = vpop.f32.mrf.mxu0 }
 0x1ec   : > { %2440 = vmatpush.msrb.mxu3 %v5571_v31 }
 0x1ee   : > { %4194 = vmatmul.msk.f32.gmra.mxu1 %vm1788_vm4, %v4188_v55  ;;  %2441 = vmatpush.msrb.mxu3 %v5580_v50 }
 0x1f0   : > { %2442 = vmatpush.msrb.mxu3 %v5586_v33 }
 0x1f2   : > { %2443 = vmatpush.msrb.mxu3 %v5596_v62 }
 0x1f3   : > { %4215 = vmatmul.msk.f32.vlgmr.msra.gmra.mxu3 %vm1242_vm1, %v2332_v28 }
 0x1f4   : > { %2571 = vmatpush.msra.mxu3 %v5458_v16 }
 0x1f6   : > { %4268 = vmatmul.msk.f32.vlgmr.msrb.gmra.mxu1 %vm1242_vm1, %v2660_v34  ;;  %2572 = vmatpush.msra.mxu3 %v5469_v41  ;;  %v3732_v34 = vld [vmem:[#allocation2 + $0x59] sm:$0xf] }
 0x1f7   : > { %2899 = vmatpush.msrb.mxu1 %v5458_v16 }
 0x1f8   : > { %2573 = vmatpush.msra.mxu3 %v5477_v2 }
 0x1f9   : > { %2900 = vmatpush.msrb.mxu1 %v5469_v41 }
 0x1fa   : > { %2574 = vmatpush.msra.mxu3 %v5484_v54 }
 0x1fb   : > { %4230 = vmatmul.msk.f32.vlgmr.msrb.gmra.mxu3 %vm1242_vm1, %v2420_v60  ;;  %2901 = vmatpush.msrb.mxu1 %v5477_v2 }
 0x1fc   : > { %2622 = vmatpush.msrb.mxu3 %v5224_v35 }
 0x1fd   : > { %2902 = vmatpush.msrb.mxu1 %v5484_v54 }
 0x1fe   : > { %4283 = vmatmul.msk.f32.vlgmr.msra.gmra.mxu1 %vm1242_vm1, %v2748_v58  ;;  %2623 = vmatpush.msrb.mxu3 %v5232_v51 }
 0x1ff   : > { %2950 = vmatpush.msra.mxu1 %v5224_v35 }
 0x200   : > { %2624 = vmatpush.msrb.mxu3 %v5251_v57 }
 0x201   : > { %2951 = vmatpush.msra.mxu1 %v5232_v51 }
 0x202   : > { %2625 = vmatpush.msrb.mxu3 %v5259_v39 }
 0x203   : > { %4252 = vmatmul.msk.f32.vlgmr.msra.gmra.mxu3 %vm1242_vm1, %v2551_v29  ;;  %2952 = vmatpush.msra.mxu1 %v5251_v57 }
 0x204   : > { %2709 = vmatpush.msra.mxu3 %v5637_v6 }
 0x205   : > { %2953 = vmatpush.msra.mxu1 %v5259_v39 }
 0x206   : > { %4305 = vmatmul.msk.f32.vlgmr.msrb.gmra.mxu1 %vm1242_vm1, %v2879_v47  ;;  %2710 = vmatpush.msra.mxu3 %v5645_v3 }
 0x207   : > { %3037 = vmatpush.msrb.mxu1 %v5637_v6 }
 0x208   : > { %2711 = vmatpush.msra.mxu3 %v5652_v22 }
 0x209   : > { %3038 = vmatpush.msrb.mxu1 %v5645_v3 }
 0x20a   : > { %2712 = vmatpush.msra.mxu3 %v5660_v27 }
 0x20b   : > { %4258 = vmatmul.msk.f32.vlgmr.msrb.gmra.mxu3 %vm1242_vm1, %v2602_v4  ;;  %3039 = vmatpush.msrb.mxu1 %v5652_v22 }
 0x20c   : > { %2797 = vmatpush.msrb.mxu3 %v5667_v32 }
 0x20d   : > { %3040 = vmatpush.msrb.mxu1 %v5660_v27 }
 0x20e   : > { %4311 = vmatmul.msk.f32.vlgmr.msra.gmra.mxu1 %vm1242_vm1, %v2930_v56  ;;  %2798 = vmatpush.msrb.mxu3 %v5675_v59 }
 0x20f   : > { %3125 = vmatpush.msra.mxu1 %v5667_v32 }
 0x210   : > { %2799 = vmatpush.msrb.mxu3 %v5682_v36 }
 0x211   : > { %3126 = vmatpush.msra.mxu1 %v5675_v59 }
 0x212   : > { %2800 = vmatpush.msrb.mxu3 %v5690_v63 }
 0x213   : > { %4273 = vmatmul.msk.f32.vlgmr.msra.gmra.mxu3 %vm1242_vm1, %v2689_v0  ;;  %3127 = vmatpush.msra.mxu1 %v5682_v36 }
 0x214   : > { %2922 = vmatpush.msra.mxu3 %v5317_v20 }
 0x215   : > { %3128 = vmatpush.msra.mxu1 %v5690_v63 }
 0x216   : > { %4326 = vmatmul.msk.f32.vlgmr.msrb.gmra.mxu1 %vm1242_vm1, %v3017_v45  ;;  %2923 = vmatpush.msra.mxu3 %v5324_v30 }
 0x217   : > { %3250 = vmatpush.msrb.mxu1 %v5317_v20 }
 0x218   : > { %2924 = vmatpush.msra.mxu3 %v5338_v13 }
 0x219   : > { %3251 = vmatpush.msrb.mxu1 %v5324_v30 }
 0x21a   : > { %2925 = vmatpush.msra.mxu3 %v5346_v7 }
 0x21b   : > { %4288 = vmatmul.msk.f32.vlgmr.msrb.gmra.mxu3 %vm1242_vm1, %v2777_v42  ;;  %3252 = vmatpush.msrb.mxu1 %v5338_v13  ;;  %v4237_v42 = vld [vmem:[%s6043_s5 + $0x78] sm:$0xff] }
 0x21c   : > { %3008 = vmatpush.msrb.mxu3 %v5531_v17 }
 0x21d   : > { %3253 = vmatpush.msrb.mxu1 %v5346_v7 }
 0x21e   : > { %4341 = vmatmul.msk.f32.vlgmr.msra.gmra.mxu1 %vm1242_vm1, %v3105_v8  ;;  %3009 = vmatpush.msrb.mxu3 %v5536_v38 }
 0x21f   : > { %3336 = vmatpush.msra.mxu1 %v5531_v17 }
 0x220   : > { %3010 = vmatpush.msrb.mxu3 %v5547_v19 }
 0x221   : > { %3337 = vmatpush.msra.mxu1 %v5536_v38 }
 0x222   : > { %3011 = vmatpush.msrb.mxu3 %v5557_v26 }
 0x223   : > { %4306 = vmatmul.msk.f32.vlgmr.msra.gmra.mxu3 %vm1242_vm1, %v2874_v14  ;;  %3338 = vmatpush.msra.mxu1 %v5547_v19  ;;  %v5816_v14 = vld [vmem:[%s6041_s3 + $0x78] sm:$0xff] }
 0x224   : > { %3096 = vmatpush.msra.mxu3 %v5571_v31 }
 0x225   : > { %3339 = vmatpush.msra.mxu1 %v5557_v26 }
 0x226   : > { %4359 = vmatmul.msk.f32.vlgmr.msrb.gmra.mxu1 %vm1242_vm1, %v3202_v18  ;;  %3097 = vmatpush.msra.mxu3 %v5580_v50 }
 0x227   : > { %3424 = vmatpush.msrb.mxu1 %v5571_v31 }
 0x228   : > { %3098 = vmatpush.msra.mxu3 %v5586_v33 }
 0x229   : > { %3425 = vmatpush.msrb.mxu1 %v5580_v50 }
 0x22a   : > { %3099 = vmatpush.msra.mxu3 %v5596_v62 }
 0x22b   : > { %4321 = vmatmul.msk.f32.vlgmr.msrb.gmra.mxu3 %vm1242_vm1, %v2988_v15  ;;  %3426 = vmatpush.msrb.mxu1 %v5586_v33  ;;  %v5825_v15 = vld [vmem:[%s6041_s3 + $0x70] sm:$0xff] }
 0x22c   : > { %3227 = vmatpush.msrb.mxu3 %v5458_v16 }
 0x22d   : > { %3427 = vmatpush.msrb.mxu1 %v5596_v62 }
 0x22e   : > { %v5729_v9 = vpop.f32.mrf.mxu3  ;;  %4374 = vmatmul.msk.f32.vlgmr.msra.gmra.mxu1 %vm1242_vm1, %v3316_v53  ;;  %3228 = vmatpush.msrb.mxu3 %v5469_v41  ;;  %v5831_v53 = vld [vmem:[%s6041_s3 + $0x68] sm:$0xff] }
 0x22f   : > { %3555 = vmatpush.msra.mxu1 %v5458_v16  ;;  %v3207_v16 = vld [vmem:[#allocation2 + $0x31] sm:$0xf] }
 0x230   : > { %3229 = vmatpush.msrb.mxu3 %v5477_v2 }
 0x231   : > { %3556 = vmatpush.msra.mxu1 %v5469_v41  ;;  %v4413_v41 = vld [vmem:[%s6041_s3 + $0x40] sm:$0xff] }
 0x232   : > { %3230 = vmatpush.msrb.mxu3 %v5484_v54 }
 0x233   : > { %4336 = vmatmul.msk.f32.vlgmr.msra.gmra.mxu3 %vm1242_vm1, %v3076_v61  ;;  %3557 = vmatpush.msra.mxu1 %v5477_v2  ;;  %v3535_v2 = vld [vmem:[#allocation2 + $0x39] sm:$0xf]  ;;  %v4238_v61 = vld [vmem:[%s6043_s5 + $0x80] sm:$0xff] }
 0x234   : > { %3278 = vmatpush.msra.mxu3 %v5224_v35 }
 0x235   : > { %3558 = vmatpush.msra.mxu1 %v5484_v54 }
 0x236   : > { %v5741_v40 = vpop.f32.mrf.mxu3  ;;  %4389 = vmatmul.msk.f32.vlgmr.msrb.gmra.mxu1 %vm1242_vm1, %v3404_v12  ;;  %3279 = vmatpush.msra.mxu3 %v5232_v51 }
 0x237   : > { %3606 = vmatpush.msrb.mxu1 %v5224_v35 }
 0x238   : > { %3280 = vmatpush.msra.mxu3 %v5251_v57 }
 0x239   : > { %3607 = vmatpush.msrb.mxu1 %v5232_v51  ;;  %v3258_v51 = vld [vmem:[#allocation2 + $0x32] sm:$0xf] }
 0x23a   : > { %3281 = vmatpush.msra.mxu3 %v5259_v39  ;;  %v3586_v39 = vld [vmem:[#allocation2 + $0x3a] sm:$0xf] }
 0x23b   : > { %4358 = vmatmul.msk.f32.vlgmr.msrb.gmra.mxu3 %vm1242_vm1, %v3207_v16  ;;  %3608 = vmatpush.msrb.mxu1 %v5251_v57  ;;  %v1825_v57 = vpop.f32.mrf.mxu2 }
 0x23c   : > { %3365 = vmatpush.msrb.mxu3 %v5637_v6 }
 0x23d   : > { %3609 = vmatpush.msrb.mxu1 %v4413_v41  ;;  %v5848_v41 = vld [vmem:[%s6041_s3 + $0xd8] sm:$0xff] }
 0x23e   : > { %v5755_v35 = vpop.f32.mrf.mxu3  ;;  %4411 = vmatmul.msk.f32.vlgmr.msra.gmra.mxu1 %vm1242_vm1, %v3535_v2  ;;  %3366 = vmatpush.msrb.mxu3 %v5645_v3  ;;  %v5853_v2 = vld [vmem:[%s6041_s3 + $0xd0] sm:$0xff] }
 0x23f   : > { %3693 = vmatpush.msra.mxu1 %v5637_v6  ;;  %v2386_v6 = vpop.f32.mrf.mxu0 }
 0x240   : > { %3367 = vmatpush.msrb.mxu3 %v5652_v22 }
 0x241   : > { %3694 = vmatpush.msra.mxu1 %v5645_v3 }
 0x242   : > { %3368 = vmatpush.msrb.mxu3 %v5660_v27 }
 0x243   : > { %4364 = vmatmul.msk.f32.vlgmr.msra.gmra.mxu3 %vm1242_vm1, %v3258_v51  ;;  %3695 = vmatpush.msra.mxu1 %v5652_v22  ;;  %v1828_v48 = vpop.f32.mrf.mxu2  ;;  %v5859_v51 = vld [vmem:[%s6041_s3 + $0xc8] sm:$0xff] }
 0x244   : > { %3453 = vmatpush.msra.mxu3 %v5667_v32 }
 0x245   : > { %3696 = vmatpush.msra.mxu1 %v5660_v27 }
 0x246   : > { %v1875_v54 = vpop.f32.mrf.mxu3  ;;  %4417 = vmatmul.msk.f32.vlgmr.msrb.gmra.mxu1 %vm1242_vm1, %v3586_v39  ;;  %3454 = vmatpush.msra.mxu3 %v5675_v59 }
 0x247   : > { %v1876_v44 = vadd.f32 %v1875_v54, %v1825_v57  ;;  %3781 = vmatpush.msrb.mxu1 %v5667_v32  ;;  %v2474_v32 = vpop.f32.mrf.mxu0  ;;  %v4239_v54 = vld [vmem:[%s6043_s5 + $0x88] sm:$0xff] }
 0x248   : > { %3455 = vmatpush.msra.mxu3 %v5682_v36 }
 0x249   : > { %3782 = vmatpush.msrb.mxu1 %v5675_v59 }
 0x24a   : > { %3456 = vmatpush.msra.mxu3 %v5690_v63 }
 0x24b   : > { %4379 = vmatmul.msk.f32.vlgmr.msrb.gmra.mxu3 %vm1242_vm1, %v3345_v52  ;;  %v2198_v43 = vpop.f32.mrf.mxu1  ;;  %3783 = vmatpush.msrb.mxu1 %v5682_v36 }
 0x24c   : > { %v5775_v49 = vadd.f32 %v2198_v43, %v1876_v44  ;;  %3578 = vmatpush.msrb.mxu3 %v5317_v20  ;;  %v3761_v20 = vld [vmem:[#allocation2 + $0x5a] sm:$0xf]  ;;  %v5869_v44 = vld [vmem:[%s6041_s3 + $0xc0] sm:$0xff] }
 0x24d   : > { %3784 = vmatpush.msrb.mxu1 %v5690_v63  ;;  %v4491_v63 = vld [vmem:[%s6042_s4] ss:$0 sm:$0xff] }
 0x24e   : > { %v1878_v5 = vpop.f32.mrf.mxu3  ;;  %4432 = vmatmul.msk.f32.vlgmr.msra.gmra.mxu1 %vm1242_vm1, %v3673_v10  ;;  %3579 = vmatpush.msrb.mxu3 %v5324_v30 }
 0x24f   : > { %v1879_v1 = vadd.f32 %v1878_v5, %v1828_v48  ;;  %v2599_v8 = vpop.f32.mrf.mxu0 }
 0x250   : > { %3580 = vmatpush.msrb.mxu3 %v5338_v13  ;;  %v3530_v13 = vld [vmem:[#allocation2 + $0x38] sm:$0xf] }
 0x252   : > { %3581 = vmatpush.msrb.mxu3 %v5346_v7 }
 0x253   : > { %4394 = vmatmul.msk.f32.vlgmr.msra.gmra.mxu3 %vm1242_vm1, %v3433_v23  ;;  %v2201_v37 = vpop.f32.mrf.mxu1 }
 0x254   : > { %v5784_v24 = vadd.f32 %v2201_v37, %v1879_v1  ;;  %3664 = vmatpush.msra.mxu3 %v5531_v17  ;;  %v4240_v1 = vld [vmem:[%s6043_s5 + $0x90] sm:$0xff] }
 0x256   : > { %v1881_v11 = vpop.f32.mrf.mxu3  ;;  %4447 = vmatmul.msk.f32.vlgmr.msrb.gmra.mxu1 %vm1242_vm1, %v3761_v20  ;;  %3665 = vmatpush.msra.mxu3 %v5536_v38  ;;  %v3644_v38 = vld [vmem:[#allocation2 + $0x49] sm:$0xf]  ;;  %v4492_v20 = vld [vmem:[%s6042_s4] ss:$0 sm:$0xff] }
 0x257   : > { %v1882_v30 = vadd.f32 %v1881_v11, %v5729_v9  ;;  %v5837_v9 = vld [vmem:[%s6041_s3 + $0x60] sm:$0xff] }
 0x258   : > { %3666 = vmatpush.msra.mxu3 %v5547_v19 }
 0x25a   : > { %3667 = vmatpush.msra.mxu3 %v5557_v26 }
 0x25b   : > { %4412 = vmatmul.msk.f32.vlgmr.msrb.gmra.mxu3 %vm1242_vm1, %v3530_v13  ;;  %v2204_v7 = vpop.f32.mrf.mxu1 }
 0x25c   : > { %v5793_v25 = vadd.f32 %v2204_v7, %v1882_v30  ;;  %3752 = vmatpush.msrb.mxu3 %v5571_v31  ;;  %v2248_v31 = vpop.f32.mrf.mxu2  ;;  %v4290_v7 = vld [vmem:[%s6043_s5 + $0xa0] sm:$0xff] }
 0x25e   : > { %v1884_v17 = vpop.f32.mrf.mxu3  ;;  %3753 = vmatpush.msrb.mxu3 %v5580_v50 }
 0x25f   : > { %v1885_v21 = vadd.f32 %v1884_v17, %v5741_v40  ;;  %v2656_v40 = vpop.f32.mrf.mxu0  ;;  %v4241_v17 = vld [vmem:[%s6043_s5 + $0x98] sm:$0x1f] }
 0x260   : > { %3754 = vmatpush.msrb.mxu3 %v5586_v33 }
 0x262   : > { %3755 = vmatpush.msrb.mxu3 %v5596_v62 }
 0x263   : > { %4427 = vmatmul.msk.f32.vlgmr.msra.gmra.mxu3 %vm1242_vm1, %v3644_v38  ;;  %v2207_v19 = vpop.f32.mrf.mxu1  ;;  %v2959_v38 = vld [vmem:[#allocation2 + $0x38] sm:$0xf] }
 0x264   : > { %v5801_v26 = vadd.f32 %v2207_v19, %v1885_v21  ;;  %v2328_v29 = vpop.f32.mrf.mxu2  ;;  %v4291_v21 = vld [vmem:[%s6043_s5 + $0xa8] sm:$0xff]  ;;  %v4292_v19 = vld [vmem:[%s6043_s5 + $0xb0] sm:$0xff] }
 0x266   : > { %v1887_v55 = vpop.f32.mrf.mxu3 }
 0x267   : > { %v1888_v28 = vadd.f32 %v1887_v55, %v5755_v35  ;;  %v2744_v48 = vpop.f32.mrf.mxu0  ;;  %v4293_v55 = vld [vmem:[%s6043_s5 + $0xb8] sm:$0xff] }
 0x26b   : > { %4442 = vmatmul.msk.f32.vlgmr.msrb.gmra.mxu3 %vm1242_vm1, %v3732_v34  ;;  %v2210_v50 = vpop.f32.mrf.mxu1  ;;  %v3375_v34 = vld [vmem:[#allocation2 + $0x50] sm:$0xf] }
 0x26c   : > { %v5805_v60 = vadd.f32 %v2210_v50, %v1888_v28  ;;  %v2416_v4 = vpop.f32.mrf.mxu2  ;;  %v4294_v28 = vld [vmem:[%s6043_s5 + $0xc0] sm:$0x1f] }
 0x26e   : > { %v2271_v33 = vpop.f32.mrf.mxu3 }
 0x26f   : > { %v2272_v58 = vadd.f32 %v2271_v33, %v2248_v31  ;;  %v3287_v31 = vld [vmem:[#allocation2 + $0x40] sm:$0xf] }
 0x271   : > { %v2302_v62 = vadd.f32 %v2299_v46, %v2272_v58  ;;  %v3047_v46 = vld [vmem:[#allocation2 + $0x48] sm:$0xf] }
 0x273   : > { %v2331_v3 = vadd.f32 %v2328_v29, %v2302_v62  ;;  %v2685_v39 = vpop.f32.mrf.mxu1 }
 0x276   : > { %v2357_v47 = vpop.f32.mrf.mxu3 }
 0x277   : > { %v2360_v22 = vadd.f32 %v2357_v47, %v2331_v3 }
 0x279   : > { %v2389_v27 = vadd.f32 %v2386_v6, %v2360_v22 }
 0x27b   : > { %v2419_v59 = vadd.f32 %v2416_v4, %v2389_v27  ;;  %v2773_v23 = vpop.f32.mrf.mxu1 }
 0x27e   : > { %v2445_v56 = vpop.f32.mrf.mxu3 }
 0x27f   : > { %v2448_v36 = vadd.f32 %v2445_v56, %v2419_v59 }
 0x281   : > { %v2477_v0 = vadd.f32 %v2474_v32, %v2448_v36 }
 0x283   : > { %v2482_v45 = vadd.f32 %v4491_v63, %v2477_v0  ;;  %v2904_v62 = vpop.f32.mrf.mxu1 }
 0x285   : > { %4236 = vst.msk [vmem:[%s5389_s30 + $0xc] sm:$0xf] %vm1506_vm2, %v2482_v45  ;;  %4242 = vmatpush.msk.msra.mxu2 %vm1804_vm3, %v2482_v45 }
 0x286   : > { %4243 = vmatmul.msk.f32.vlgmr.msra.gmra.mxu2 %vm1788_vm4, %v4237_v42  ;;  %v2576_v18 = vpop.f32.mrf.mxu3 }
 0x287   : > { %2979 = vmatpush.msrb.mxu2 %v5816_v14  ;;  %v2600_v12 = vadd.f32 %v2599_v8, %v2576_v18 }
 0x289   : > { %2980 = vmatpush.msrb.mxu2 %v5825_v15 }
 0x28b   : > { %2981 = vmatpush.msrb.mxu2 %v5831_v53  ;;  %v2955_v22 = vpop.f32.mrf.mxu1 }
 0x28d   : > { %2982 = vmatpush.msrb.mxu2 %v5837_v9 }
 0x28e   : > { %4244 = vmatmul.msk.f32.gmra.mxu2 %vm1788_vm4, %v4238_v61  ;;  %v2627_v16 = vpop.f32.mrf.mxu3 }
 0x28f   : > { %v2630_v35 = vadd.f32 %v2627_v16, %v2600_v12  ;;  %3067 = vmatpush.msra.mxu2 %v5848_v41 }
 0x291   : > { %v2659_v57 = vadd.f32 %v2656_v40, %v2630_v35  ;;  %3068 = vmatpush.msra.mxu2 %v5853_v2 }
 0x293   : > { %3069 = vmatpush.msra.mxu2 %v5859_v51  ;;  %v2688_v52 = vadd.f32 %v2685_v39, %v2659_v57 }
 0x295   : > { %3070 = vmatpush.msra.mxu2 %v5869_v44 }
 0x296   : > { %4245 = vmatmul.msk.f32.gmra.mxu2 %vm1788_vm4, %v4239_v54  ;;  %v2714_v43 = vpop.f32.mrf.mxu3 }
 0x297   : > { %v2717_v10 = vadd.f32 %v2714_v43, %v2688_v52  ;;  %v4493_v43 = vld [vmem:[%s6042_s4] ss:$0 sm:$0xff] }
 0x299   : > { %v2747_v5 = vadd.f32 %v2744_v48, %v2717_v10 }
 0x29b   : > { %v2776_v37 = vadd.f32 %v2773_v23, %v2747_v5 }
 0x29e   : > { %4246 = vmatmul.msk.f32.gmra.mxu2 %vm1788_vm4, %v4240_v1  ;;  %v2802_v11 = vpop.f32.mrf.mxu3  ;;  %v4343_v1 = vld [vmem:[%s6043_s5 + $0xc8] sm:$0xff] }
 0x29f   : > { %v2805_v30 = vadd.f32 %v2802_v11, %v2776_v37 }
 0x2a1   : > { %v2810_v13 = vadd.f32 %v4492_v20, %v2805_v30 }
 0x2a3   : > { %4289 = vst.msk [vmem:[%s5389_s30 + $0x10] sm:$0xf] %vm1506_vm2, %v2810_v13  ;;  %4295 = vmatpush.msk.msra.mxu0 %vm1804_vm3, %v2810_v13  ;;  %v4344_v13 = vld [vmem:[%s6043_s5 + $0xd0] sm:$0xff] }
 0x2a4   : > { %4296 = vmatmul.msk.f32.vlgmr.msra.gmra.mxu0 %vm1788_vm4, %v4290_v7 }
 0x2a5   : > { %3307 = vmatpush.msrb.mxu0 %v5816_v14 }
 0x2a6   : > { %4247 = vmatmul.msk.f32.gmra.mxu2 %vm1788_vm4, %v4241_v17  ;;  %v2927_v29 = vpop.f32.mrf.mxu3 }
 0x2a7   : > { %3308 = vmatpush.msrb.mxu0 %v5825_v15  ;;  %v2928_v45 = vadd.f32 %v2927_v29, %v2904_v62  ;;  %v3703_v62 = vld [vmem:[#allocation2 + $0x58] sm:$0xf]  ;;  %v4400_v29 = vld [vmem:[%s6043_s5 + $0x110] sm:$0x1f] }
 0x2a9   : > { %3309 = vmatpush.msrb.mxu0 %v5831_v53  ;;  %v2958_v8 = vadd.f32 %v2955_v22, %v2928_v45 }
 0x2ab   : > { %3310 = vmatpush.msrb.mxu0 %v5837_v9 }
 0x2ac   : > { %4297 = vmatmul.msk.f32.gmra.mxu0 %vm1788_vm4, %v4291_v21 }
 0x2ad   : > { %3395 = vmatpush.msra.mxu0 %v5848_v41 }
 0x2ae   : > { %4316 = vmatmul.msk.f32.vlgmr.msrb.gmra.mxu2 %vm1242_vm1, %v2959_v38  ;;  %v3013_v56 = vpop.f32.mrf.mxu3 }
 0x2af   : > { %3396 = vmatpush.msra.mxu0 %v5853_v2 }
 0x2b1   : > { %3397 = vmatpush.msra.mxu0 %v5859_v51 }
 0x2b3   : > { %3398 = vmatpush.msra.mxu0 %v5869_v44 }
 0x2b4   : > { %4298 = vmatmul.msk.f32.gmra.mxu0 %vm1788_vm4, %v4292_v19 }
 0x2b6   : > { %4331 = vmatmul.msk.f32.vlgmr.msra.gmra.mxu2 %vm1242_vm1, %v3047_v46  ;;  %v3101_v42 = vpop.f32.mrf.mxu3 }
 0x2bc   : > { %4299 = vmatmul.msk.f32.gmra.mxu0 %vm1788_vm4, %v4293_v55 }
 0x2be   : > { %v3232_v16 = vpop.f32.mrf.mxu3 }
 0x2c4   : > { %4300 = vmatmul.msk.f32.gmra.mxu0 %vm1788_vm4, %v4294_v28 }
 0x2c6   : > { %v3283_v23 = vpop.f32.mrf.mxu3 }
 0x2cc   : > { %4369 = vmatmul.msk.f32.vlgmr.msrb.gmra.mxu0 %vm1242_vm1, %v3287_v31 }
 0x2ce   : > { %v3370_v38 = vpop.f32.mrf.mxu3 }
 0x2d4   : > { %4384 = vmatmul.msk.f32.vlgmr.msra.gmra.mxu0 %vm1242_vm1, %v3375_v34  ;;  %v4346_v34 = vld [vmem:[%s6043_s5 + $0xe0] sm:$0xff] }
 0x309   : > { %v2526_v50 = vpop.f32.mrf.mxu2 }
 0x30a   : > { %v2541_v33 = vadd.f32 %v2526_v50, %v5775_v49  ;;  %v4397_v50 = vld [vmem:[%s6043_s5 + $0xf8] sm:$0xff] }
 0x311   : > { %v2529_v58 = vpop.f32.mrf.mxu2 }
 0x312   : > { %v2542_v6 = vadd.f32 %v2529_v58, %v5784_v24  ;;  %v3042_v24 = vpop.f32.mrf.mxu1  ;;  %v3615_v58 = vld [vmem:[#allocation2 + $0x48] sm:$0xf] }
 0x319   : > { %v2532_v3 = vpop.f32.mrf.mxu2 }
 0x31a   : > { %v2543_v47 = vadd.f32 %v2532_v3, %v5793_v25 }
 0x321   : > { %v2535_v27 = vpop.f32.mrf.mxu2  ;;  %v2854_v32 = vpop.f32.mrf.mxu0 }
 0x322   : > { %v2544_v4 = vadd.f32 %v2535_v27, %v5801_v26  ;;  %v5923_v59 = vadd.f32 %v2854_v32, %v2541_v33  ;;  %v3130_v26 = vpop.f32.mrf.mxu1  ;;  %v4398_v33 = vld [vmem:[%s6043_s5 + $0x100] sm:$0xff] }
 0x329   : > { %v2538_v36 = vpop.f32.mrf.mxu2  ;;  %v2857_v63 = vpop.f32.mrf.mxu0 }
 0x32a   : > { %v2545_v49 = vadd.f32 %v2538_v36, %v5805_v60  ;;  %v5926_v0 = vadd.f32 %v2857_v63, %v2542_v6  ;;  %v3255_v48 = vpop.f32.mrf.mxu1  ;;  %v4399_v6 = vld [vmem:[%s6043_s5 + $0x108] sm:$0xff] }
 0x32b   : > { %v3256_v11 = vadd.f32 %v3255_v48, %v3232_v16  ;;  %v4451_v48 = vld [vmem:[%s6043_s5 + $0x128] sm:$0xff] }
 0x32d   : > { %v3286_v30 = vadd.f32 %v3283_v23, %v3256_v11 }
 0x331   : > { %v2860_v18 = vpop.f32.mrf.mxu0  ;;  %v2984_v25 = vpop.f32.mrf.mxu2 }
 0x332   : > { %v5928_v61 = vadd.f32 %v2860_v18, %v2543_v47  ;;  %v2987_v12 = vadd.f32 %v2984_v25, %v2958_v8  ;;  %v3341_v7 = vpop.f32.mrf.mxu1 }
 0x334   : > { %v3016_v40 = vadd.f32 %v3013_v56, %v2987_v12 }
 0x336   : > { %v3045_v35 = vadd.f32 %v3042_v24, %v3016_v40 }
 0x339   : > { %v2863_v57 = vpop.f32.mrf.mxu0  ;;  %v3072_v39 = vpop.f32.mrf.mxu2 }
 0x33a   : > { %v5930_v54 = vadd.f32 %v2863_v57, %v2544_v4  ;;  %v3075_v60 = vadd.f32 %v3072_v39, %v3045_v35  ;;  %v4495_v39 = vld [vmem:[%s6042_s4] ss:$0 sm:$0xff] }
 0x33c   : > { %v3104_v52 = vadd.f32 %v3101_v42, %v3075_v60 }
 0x33e   : > { %v3133_v10 = vadd.f32 %v3130_v26, %v3104_v52 }
 0x340   : > { %v3138_v5 = vadd.f32 %v4493_v43, %v3133_v10  ;;  %v4449_v43 = vld [vmem:[%s6043_s5 + $0x118] sm:$0xff]  ;;  %v4450_v10 = vld [vmem:[%s6043_s5 + $0x120] sm:$0xff] }
 0x341   : > { %v2866_v37 = vpop.f32.mrf.mxu0 }
 0x342   : > { %4342 = vst.msk [vmem:[%s5389_s30 + $0x14] sm:$0xf] %vm1506_vm2, %v3138_v5  ;;  %v5940_v20 = vadd.f32 %v2866_v37, %v2545_v49  ;;  %4348 = vmatpush.msk.msrb.mxu2 %vm1804_vm3, %v3138_v5  ;;  %v4452_v5 = vld [vmem:[%s6043_s5 + $0x130] sm:$0xff] }
 0x343   : > { %4349 = vmatmul.msk.f32.vlgmr.msrb.gmra.mxu2 %vm1788_vm4, %v4343_v1  ;;  %v4453_v1 = vld [vmem:[%s6043_s5 + $0x138] sm:$0x1f] }
 0x344   : > { %3635 = vmatpush.msra.mxu2 %v5816_v14 }
 0x346   : > { %3636 = vmatpush.msra.mxu2 %v5825_v15  ;;  %v4345_v15 = vld [vmem:[%s6043_s5 + $0xd8] sm:$0xff] }
 0x348   : > { %3637 = vmatpush.msra.mxu2 %v5831_v53 }
 0x349   : > { %v3312_v17 = vpop.f32.mrf.mxu0 }
 0x34a   : > { %v3315_v21 = vadd.f32 %v3312_v17, %v3286_v30  ;;  %3638 = vmatpush.msra.mxu2 %v5837_v9  ;;  %v3429_v9 = vpop.f32.mrf.mxu1 }
 0x34b   : > { %4350 = vmatmul.msk.f32.gmra.mxu2 %vm1788_vm4, %v4344_v13 }
 0x34c   : > { %v3344_v19 = vadd.f32 %v3341_v7, %v3315_v21  ;;  %3723 = vmatpush.msrb.mxu2 %v5848_v41  ;;  %v4494_v41 = vld [vmem:[%s6042_s4] ss:$0 sm:$0xff] }
 0x34e   : > { %3724 = vmatpush.msrb.mxu2 %v5853_v2  ;;  %v3373_v14 = vadd.f32 %v3370_v38, %v3344_v19  ;;  %v3458_v2 = vpop.f32.mrf.mxu3 }
 0x350   : > { %3725 = vmatpush.msrb.mxu2 %v5859_v51  ;;  %v4396_v51 = vld [vmem:[%s6043_s5 + $0xf0] sm:$0xff] }
 0x351   : > { %v3400_v53 = vpop.f32.mrf.mxu0 }
 0x352   : > { %v3403_v46 = vadd.f32 %v3400_v53, %v3373_v14  ;;  %3726 = vmatpush.msrb.mxu2 %v5869_v44  ;;  %v4347_v44 = vld [vmem:[%s6043_s5 + $0xe8] sm:$0x1f]  ;;  %v3560_v56 = vpop.f32.mrf.mxu1 }
 0x353   : > { %4351 = vmatmul.msk.f32.gmra.mxu2 %vm1788_vm4, %v4345_v15 }
 0x354   : > { %v3432_v55 = vadd.f32 %v3429_v9, %v3403_v46 }
 0x356   : > { %v3461_v28 = vadd.f32 %v3458_v2, %v3432_v55  ;;  %v3583_v49 = vpop.f32.mrf.mxu3 }
 0x357   : > { %v3584_v8 = vadd.f32 %v3583_v49, %v3560_v56 }
 0x358   : > { %v3466_v31 = vadd.f32 %v4494_v41, %v3461_v28 }
 0x35a   : > { %4395 = vst.msk [vmem:[%s5389_s30 + $0x18] sm:$0xf] %vm1506_vm2, %v3466_v31  ;;  %4401 = vmatpush.msk.msrb.mxu0 %vm1804_vm3, %v3466_v31  ;;  %v3611_v24 = vpop.f32.mrf.mxu1 }
 0x35b   : > { %4352 = vmatmul.msk.f32.gmra.mxu2 %vm1788_vm4, %v4346_v34  ;;  %4402 = vmatmul.msk.f32.vlgmr.msrb.gmra.mxu0 %vm1788_vm4, %v4396_v51  ;;  %v3614_v18 = vadd.f32 %v3611_v24, %v3584_v8 }
 0x35e   : > { %v3669_v25 = vpop.f32.mrf.mxu3 }
 0x362   : > { %v3698_v40 = vpop.f32.mrf.mxu1 }
 0x363   : > { %4353 = vmatmul.msk.f32.gmra.mxu2 %vm1788_vm4, %v4347_v44  ;;  %4403 = vmatmul.msk.f32.gmra.mxu0 %vm1788_vm4, %v4397_v50 }
 0x366   : > { %v3757_v35 = vpop.f32.mrf.mxu3 }
 0x36b   : > { %4404 = vmatmul.msk.f32.gmra.mxu0 %vm1788_vm4, %v4398_v33  ;;  %4422 = vmatmul.msk.f32.vlgmr.msra.gmra.mxu2 %vm1242_vm1, %v3615_v58 }
 0x373   : > { %4405 = vmatmul.msk.f32.gmra.mxu0 %vm1788_vm4, %v4399_v6  ;;  %4437 = vmatmul.msk.f32.vlgmr.msrb.gmra.mxu2 %vm1242_vm1, %v3703_v62 }
 0x37b   : > { %4406 = vmatmul.msk.f32.gmra.mxu0 %vm1788_vm4, %v4400_v29 }
 0x3c6   : > { %v3182_v3 = vpop.f32.mrf.mxu2 }
 0x3c7   : > { %v3197_v47 = vadd.f32 %v3182_v3, %v5923_v59 }
 0x3ce   : > { %v3185_v22 = vpop.f32.mrf.mxu2 }
 0x3cf   : > { %v3198_v27 = vadd.f32 %v3185_v22, %v5926_v0 }
 0x3d6   : > { %v3188_v32 = vpop.f32.mrf.mxu2 }
 0x3d7   : > { %v3199_v4 = vadd.f32 %v3188_v32, %v5928_v61 }
 0x3d8   : > { %v3510_v23 = vpop.f32.mrf.mxu0 }
 0x3de   : > { %v3191_v36 = vpop.f32.mrf.mxu2 }
 0x3df   : > { %v3200_v63 = vadd.f32 %v3191_v36, %v5930_v54  ;;  %v3786_v54 = vpop.f32.mrf.mxu1 }
 0x3e0   : > { %v3513_v37 = vpop.f32.mrf.mxu0 }
 0x3e1   : > { %v3526_v13 = vadd.f32 %v3513_v37, %v3198_v27 }
 0x3e6   : > { %v3194_v45 = vpop.f32.mrf.mxu2 }
 0x3e7   : > { %v3201_v42 = vadd.f32 %v3194_v45, %v5940_v20  ;;  %v3525_v20 = vadd.f32 %v3510_v23, %v3197_v47 }
 0x3e8   : > { %v3516_v7 = vpop.f32.mrf.mxu0 }
 0x3e9   : > { %v3527_v38 = vadd.f32 %v3516_v7, %v3199_v4 }
 0x3ee   : > { %v3640_v59 = vpop.f32.mrf.mxu2 }
 0x3ef   : > { %v3643_v12 = vadd.f32 %v3640_v59, %v3614_v18 }
 0x3f0   : > { %v3519_v15 = vpop.f32.mrf.mxu0 }
 0x3f1   : > { %v3672_v0 = vadd.f32 %v3669_v25, %v3643_v12  ;;  %v3528_v53 = vadd.f32 %v3519_v15, %v3200_v63 }
 0x3f3   : > { %v3701_v26 = vadd.f32 %v3698_v40, %v3672_v0 }
 0x3f6   : > { %v3728_v16 = vpop.f32.mrf.mxu2 }
 0x3f7   : > { %v3731_v61 = vadd.f32 %v3728_v16, %v3701_v26 }
 0x3f8   : > { %v3522_v55 = vpop.f32.mrf.mxu0 }
 0x3f9   : > { %v3760_v57 = vadd.f32 %v3757_v35, %v3731_v61  ;;  %v3529_v41 = vadd.f32 %v3522_v55, %v3201_v42 }
 0x3fb   : > { %v3789_v60 = vadd.f32 %v3786_v54, %v3760_v57 }
 0x3fd   : > { %v3794_v52 = vadd.f32 %v4495_v39, %v3789_v60 }
 0x3ff   : > { %4448 = vst.msk [vmem:[%s5389_s30 + $0x1c] sm:$0xf] %vm1506_vm2, %v3794_v52  ;;  %4454 = vmatpush.msk.msra.mxu2 %vm1804_vm3, %v3794_v52 }
 0x400   : > { %4455 = vmatmul.msk.f32.vlgmr.msra.gmra.mxu2 %vm1788_vm4, %v4449_v43 }
 0x408   : > { %4456 = vmatmul.msk.f32.gmra.mxu2 %vm1788_vm4, %v4450_v10 }
 0x410   : > { %4457 = vmatmul.msk.f32.gmra.mxu2 %vm1788_vm4, %v4451_v48 }
 0x418   : > { %4458 = vmatmul.msk.f32.gmra.mxu2 %vm1788_vm4, %v4452_v5 }
 0x420   : > { %4459 = vmatmul.msk.f32.gmra.mxu2 %vm1788_vm4, %v4453_v1 }
 0x483   : > { %v3838_v11 = vpop.f32.mrf.mxu2 }
 0x484   : > { %v3853_v30 = vadd.f32 %v3838_v11, %v3525_v20 }
 0x486   : > { %3858 = vst.msk [vmem:[%s291_s8] sm:$0xff] %vm1242_vm1, %v3853_v30 }
 0x48b   : > { %v3841_v17 = vpop.f32.mrf.mxu2 }
 0x48c   : > { %v3854_v21 = vadd.f32 %v3841_v17, %v3526_v13 }
 0x48e   : > { %3859 = vst.msk [vmem:[%s291_s8 + $0x8] sm:$0xff] %vm1242_vm1, %v3854_v21 }
 0x493   : > { %v3844_v19 = vpop.f32.mrf.mxu2 }
 0x494   : > { %v3855_v14 = vadd.f32 %v3844_v19, %v3527_v38 }
 0x496   : > { %3860 = vst.msk [vmem:[%s291_s8 + $0x10] sm:$0xff] %vm1242_vm1, %v3855_v14 }
 0x49b   : > { %v3847_v46 = vpop.f32.mrf.mxu2 }
 0x49c   : > { %v3856_v9 = vadd.f32 %v3847_v46, %v3528_v53 }
 0x49e   : > { %3861 = vst.msk [vmem:[%s291_s8 + $0x18] sm:$0xff] %vm1242_vm1, %v3856_v9 }
 0x4a3   : > { %v3850_v2 = vpop.f32.mrf.mxu2 }
 0x4a4   : > { %v3857_v28 = vadd.f32 %v3850_v2, %v3529_v41 }
 0x4a6   : > { %3863 = vst.msk [vmem:[%s291_s8 + $0x20] sm:$0x1f] %vm3862_vm5, %v3857_v28 }
 0x4a7 PF: > { %s18_s24 = sadd.s32 1, %s4512_s24  }
 0x4a8   : > { %p15_p4 = scmp.ge.s32.totalorder %s18_s24, 4  }
 0x4aa   :  { %17 = sbr.rel (!%p15_p4) target bundleno = 1 (0x1), region = 129 }

</bundles_post_ra>
